<compile_context>
chip_gen: v5e
topology: v5e:2x2
jax: 0.10.0
libtpu: 0.0.40
codegen_flags: <defaults>
</compile_context>

<pallas_src>
import functools

import jax
import jax.numpy as jnp
from jax.experimental import pallas as pl
from jax.experimental.pallas import tpu as pltpu


def _round_up(x, m):
    return -(-x // m) * m


_VMEM_LIMIT = 32 * 1024 * 1024


# ---------------------------------------------------------------------------
# Kernel 1: conv1 (8x8 stride 4) as a 2x2 stride-1 conv over the space-to-depth
# input, computed with 4 shifted contiguous-slice matmuls per row chunk.
#   x_ref: (1, 448, 16*C) bf16   pitch-21 rows (oh*21+ow), rows >= 441 are zero slack
#   w_ref: (2, 2, 16*C, 32) bf16, b_ref: (1, 32) f32
#   o_ref: (1, 420, 32) bf16     pitch-21 rows; column ow==20 is garbage
# ---------------------------------------------------------------------------
def _conv1_kernel(x_ref, w_ref, b_ref, o_ref):
    for ci in range(3):                       # 3 chunks of 140 rows -> bounded vreg use
        base = 140 * ci
        acc = jnp.zeros((140, 32), jnp.float32)
        for bi in range(2):
            for bj in range(2):
                xs = x_ref[0, pl.ds(base + 21 * bi + bj, 140), :]
                acc = acc + jnp.dot(xs, w_ref[bi, bj],
                                    preferred_element_type=jnp.float32)
        acc = jnp.maximum(acc + b_ref[...], 0.0)
        o_ref[0, pl.ds(base, 140), :] = acc.astype(o_ref.dtype)


def conv1_pallas(x_s2d, w1s, b1):
    B, R, Cs = x_s2d.shape                    # (B, 448, 16*C)
    return pl.pallas_call(
        _conv1_kernel,
        out_shape=jax.ShapeDtypeStruct((B, 420, 32), jnp.bfloat16),
        grid=(B,),
        in_specs=[
            pl.BlockSpec((1, R, Cs), lambda b: (b, 0, 0)),
            pl.BlockSpec(w1s.shape, lambda b: (0, 0, 0, 0)),   # resident weights
            pl.BlockSpec((1, 32), lambda b: (0, 0)),
        ],
        out_specs=pl.BlockSpec((1, 420, 32), lambda b: (b, 0, 0)),
        compiler_params=pltpu.CompilerParams(
            dimension_semantics=("parallel",),
            vmem_limit_bytes=_VMEM_LIMIT),
    )(x_s2d, w1s, b1)


# ---------------------------------------------------------------------------
# Kernel 2: conv2 (4x4 stride 2, as 2x2 stride-1 over s2d input) fused with
# conv3 (3x3 stride 1); the 9x9x64 intermediate stays in VMEM scratch.
#   x_ref : (1, 112, 128) bf16  pitch-10 rows, rows >= 100 zero slack
#   o_ref : (1, 49, 64) bf16    (h, w, c)-ordered valid 7x7 conv3 output
# ---------------------------------------------------------------------------
def _conv23_kernel(x_ref, w2_ref, b2_ref, w3_ref, b3_ref, o_ref, a2_ref, a3_ref):
    # conv2: pitch-10 output rows [0, 96); valid rows are oh2*10+ow2, oh2,ow2 < 9.
    acc2 = jnp.zeros((96, 64), jnp.float32)
    for bi in range(2):
        for bj in range(2):
            acc2 = acc2 + jnp.dot(x_ref[0, pl.ds(10 * bi + bj, 96), :], w2_ref[bi, bj],
                                  preferred_element_type=jnp.float32)
    a2_ref[...] = jnp.maximum(acc2 + b2_ref[...], 0.0).astype(a2_ref.dtype)

    # conv3: pitch-10 output rows [0, 72); valid rows are oh3*10+ow3, oh3,ow3 < 7.
    acc3 = jnp.zeros((72, 64), jnp.float32)
    for di in range(3):
        for dj in range(3):
            acc3 = acc3 + jnp.dot(a2_ref[pl.ds(10 * di + dj, 72), :], w3_ref[di, dj],
                                  preferred_element_type=jnp.float32)
    a3_ref[...] = jnp.maximum(acc3 + b3_ref[...], 0.0).astype(a3_ref.dtype)

    # Gather the valid 7x7 window out of the pitch-10 layout.
    for i in range(7):
        o_ref[0, pl.ds(7 * i, 7), :] = a3_ref[pl.ds(10 * i, 7), :]


def conv23_pallas(x_s2d, w2s, b2, w3s, b3):
    B = x_s2d.shape[0]
    return pl.pallas_call(
        _conv23_kernel,
        out_shape=jax.ShapeDtypeStruct((B, 49, 64), jnp.bfloat16),
        grid=(B,),
        in_specs=[
            pl.BlockSpec((1, 112, 128), lambda b: (b, 0, 0)),
            pl.BlockSpec((2, 2, 128, 64), lambda b: (0, 0, 0, 0)),
            pl.BlockSpec((1, 64), lambda b: (0, 0)),
            pl.BlockSpec((3, 3, 64, 64), lambda b: (0, 0, 0, 0)),
            pl.BlockSpec((1, 64), lambda b: (0, 0)),
        ],
        out_specs=pl.BlockSpec((1, 49, 64), lambda b: (b, 0, 0)),
        scratch_shapes=[
            pltpu.VMEM((96, 64), jnp.bfloat16),   # conv2 output (pitch layout)
            pltpu.VMEM((72, 64), jnp.bfloat16),   # conv3 output (pitch layout)
        ],
        compiler_params=pltpu.CompilerParams(
            dimension_semantics=("parallel",),
            vmem_limit_bytes=_VMEM_LIMIT),
    )(x_s2d, w2s, b2, w3s, b3)


# ---------------------------------------------------------------------------
# Kernel 3: fused FC head  out = relu(x @ w4 + b4) @ w5 + b5, row-tiled over batch.
# Weights are resident bf16; the (tm, 512) intermediate never leaves VMEM.
# (On v7x, pipeline_mode=pl.Buffered(1) on the constant-index weight specs would
#  single-buffer the resident w4 for extra VMEM headroom.)
# ---------------------------------------------------------------------------
def _head_kernel(x_ref, w4_ref, b4_ref, w5_ref, b5_ref, o_ref):
    h = jnp.dot(x_ref[...], w4_ref[...], preferred_element_type=jnp.float32)
    h = jnp.maximum(h + b4_ref[...], 0.0).astype(jnp.bfloat16)
    o = jnp.dot(h, w5_ref[...], preferred_element_type=jnp.float32) + b5_ref[...]
    o_ref[...] = o


def head_pallas(x, w4, b4, w5, b5, *, tm=256):
    M, K = x.shape
    H = w4.shape[1]
    Np = w5.shape[1]                          # already lane-padded (multiple of 128)
    Mp = _round_up(M, 8)
    tm = Mp if Mp <= tm else tm
    Mp = _round_up(Mp, tm)
    if Mp != M:
        x = jnp.pad(x, ((0, Mp - M), (0, 0)))
    return pl.pallas_call(
        _head_kernel,
        out_shape=jax.ShapeDtypeStruct((Mp, Np), jnp.float32),
        grid=(Mp // tm,),
        in_specs=[
            pl.BlockSpec((tm, K), lambda i: (i, 0)),
            pl.BlockSpec((K, H), lambda i: (0, 0)),     # resident w4 (bf16, 3.2 MB)
            pl.BlockSpec((1, H), lambda i: (0, 0)),
            pl.BlockSpec((H, Np), lambda i: (0, 0)),
            pl.BlockSpec((1, Np), lambda i: (0, 0)),
        ],
        out_specs=pl.BlockSpec((tm, Np), lambda i: (i, 0)),
        compiler_params=pltpu.CompilerParams(
            dimension_semantics=("parallel",),
            vmem_limit_bytes=_VMEM_LIMIT),
    )(x, w4, b4, w5, b5)


# ---------------------------------------------------------------------------
# Parameters: torch-layout init + one-time (outside jit) repack for the kernels.
# ---------------------------------------------------------------------------
def init_dqn_params(key, in_channels=4, num_actions=5):
    def uni(k, shape, fan_in):
        bound = 1.0 / jnp.sqrt(jnp.float32(fan_in))
        return jax.random.uniform(k, shape, jnp.float32, -bound, bound)

    ks = jax.random.split(key, 10)
    return {
        "w1": uni(ks[0], (32, in_channels, 8, 8), in_channels * 64),
        "b1": uni(ks[1], (32,), in_channels * 64),
        "w2": uni(ks[2], (64, 32, 4, 4), 32 * 16),
        "b2": uni(ks[3], (64,), 32 * 16),
        "w3": uni(ks[4], (64, 64, 3, 3), 64 * 9),
        "b3": uni(ks[5], (64,), 64 * 9),
        "w4": uni(ks[6], (7 * 7 * 64, 512), 7 * 7 * 64),   # rows in torch (C, H, W) order
        "b4": uni(ks[7], (512,), 7 * 7 * 64),
        "w5": uni(ks[8], (512, num_actions), 512),
        "b5": uni(ks[9], (num_actions,), 512),
    }


def prepare_params(p, dtype=jnp.bfloat16):
    """One-time repack of torch-layout DQN weights (call once, outside jit)."""
    C = p["w1"].shape[1]
    n_act = p["w5"].shape[1]

    # conv1 (8x8 s4) -> 2x2 s1 over space-to-depth channels ordered (ph, pw, c).
    w1 = p["w1"].transpose(2, 3, 1, 0).reshape(2, 4, 2, 4, C, 32)
    w1s = w1.transpose(0, 2, 1, 3, 4, 5).reshape(2, 2, 16 * C, 32)

    # conv2 (4x4 s2) -> 2x2 s1 over space-to-depth channels ordered (ph, pw, c).
    w2 = p["w2"].transpose(2, 3, 1, 0).reshape(2, 2, 2, 2, 32, 64)
    w2s = w2.transpose(0, 2, 1, 3, 4, 5).reshape(2, 2, 128, 64)

    # conv3 (3x3 s1): (kh, kw, cin, cout).
    w3s = p["w3"].transpose(2, 3, 1, 0)

    # fc4: permute rows from torch (C, H, W) flatten order to the kernels' (H, W, C).
    w4p = p["w4"].reshape(64, 7, 7, 512).transpose(1, 2, 0, 3).reshape(3136, 512)

    # fc5: lane-pad the action dim to 128 once, so head stores are lane-dense.
    n_pad = _round_up(n_act, 128)
    w5p = jnp.pad(p["w5"], ((0, 0), (0, n_pad - n_act)))
    b5p = jnp.pad(p["b5"], ((0, n_pad - n_act),))

    return {
        "w1s": w1s.astype(dtype), "b1": p["b1"].reshape(1, -1).astype(jnp.float32),
        "w2s": w2s.astype(dtype), "b2": p["b2"].reshape(1, -1).astype(jnp.float32),
        "w3s": w3s.astype(dtype), "b3": p["b3"].reshape(1, -1).astype(jnp.float32),
        "w4": w4p.astype(dtype),  "b4": p["b4"].reshape(1, -1).astype(jnp.float32),
        "w5": w5p.astype(dtype),  "b5": b5p.reshape(1, -1).astype(jnp.float32),
    }


# ---------------------------------------------------------------------------
# Forward passes
# ---------------------------------------------------------------------------
def dqn_forward_pallas(x, pp, *, num_actions=5):
    """x: (B, C, 84, 84) f32 NCHW (torch convention); pp from prepare_params()."""
    B, C = x.shape[0], x.shape[1]
    xb = x.astype(jnp.bfloat16)

    # Space-to-depth (factor 4): conv1 becomes 2x2 stride-1 over 16*C channels.
    t = xb.transpose(0, 2, 3, 1).reshape(B, 21, 4, 21, 4, C)
    t = t.transpose(0, 1, 3, 2, 4, 5).reshape(B, 441, 16 * C)
    x1 = jnp.pad(t, ((0, 0), (0, 7), (0, 0)))                # pitch-21 rows + zero slack
    a1 = conv1_pallas(x1, pp["w1s"], pp["b1"])               # (B, 420, 32)

    # Drop the garbage pitch column, space-to-depth (factor 2) for conv2.
    a1 = a1.reshape(B, 20, 21, 32)[:, :, :20, :]
    t = a1.reshape(B, 10, 2, 10, 2, 32).transpose(0, 1, 3, 2, 4, 5).reshape(B, 100, 128)
    x2 = jnp.pad(t, ((0, 0), (0, 12), (0, 0)))               # pitch-10 rows + zero slack
    a3 = conv23_pallas(x2, pp["w2s"], pp["b2"], pp["w3s"], pp["b3"])   # (B, 49, 64)

    # (h, w, c)-ordered flatten; w4 rows were pre-permuted to match (no per-call gather).
    xf = a3.reshape(B, 49 * 64)
    out = head_pallas(xf, pp["w4"], pp["b4"], pp["w5"], pp["b5"])
    return out[:B, :num_actions]


def dqn_forward_ref(x, p):
    """Pure-JAX reference (XLA conv, HIGHEST precision) for correctness only."""
    def conv(x, w, b, s):
        y = jax.lax.conv_general_dilated(
            x, w, (s, s), "VALID",
            dimension_numbers=("NCHW", "OIHW", "NCHW"),
            precision=jax.lax.Precision.HIGHEST)
        return jnp.maximum(y + b.reshape(1, -1, 1, 1), 0.0)

    B = x.shape[0]
    x = conv(x, p["w1"], p["b1"], 4)
    x = conv(x, p["w2"], p["b2"], 2)
    x = conv(x, p["w3"], p["b3"], 1)
    x = x.reshape(B, -1)
    x = jnp.maximum(
        jnp.dot(x, p["w4"], precision=jax.lax.Precision.HIGHEST) + p["b4"], 0.0)
    return jnp.dot(x, p["w5"], precision=jax.lax.Precision.HIGHEST) + p["b5"]


if __name__ == "__main__":
    key = jax.random.PRNGKey(0)
    k_x, k_p = jax.random.split(key)

    # DQN's fc4 hard-codes 7*7*64, which implies 84x84 Atari frames; batch=2.
    x = jax.random.normal(k_x, (2, 4, 84, 84), jnp.float32)
    params = init_dqn_params(k_p, in_channels=4, num_actions=5)
    prepped = prepare_params(params)          # one-time repack + bf16 cast, outside jit

    fwd = jax.jit(dqn_forward_pallas, static_argnames=("num_actions",))
    out = jax.block_until_ready(fwd(x, prepped))

    ref = jax.block_until_ready(jax.jit(dqn_forward_ref)(x, params))
    assert out.shape == (2, 5), out.shape
    # bf16 MXU inputs with f32 accumulate vs f32/HIGHEST reference.
    assert jnp.allclose(out, ref, rtol=2e-2, atol=2e-2), (out, ref)

    print("KERNEL_OK")
</pallas_src>

<mosaic_0001>
module attributes {stable_mosaic.version = 11 : i64} {
  func.func @_conv1_kernel(%arg0: i32, %arg1: memref<1x448x64xbf16, #tpu.memory_space<vmem>>, %arg2: memref<2x2x64x32xbf16, #tpu.memory_space<vmem>>, %arg3: memref<1x32xf32, #tpu.memory_space<vmem>>, %arg4: memref<1x420x32xbf16, #tpu.memory_space<vmem>>) attributes {dimension_semantics = [#tpu.dimension_semantics<parallel>], iteration_bounds = array<i64: 2>, scalar_prefetch = 0 : i64, scratch_operands = 0 : i64, tpu.core_type = #tpu.core_type<tc>, window_params = [{transform_indices = @transform_0, window_bounds = array<i64: 1, 448, 64>}, {pipeline_mode = #tpu.pipeline_mode<synchronous>, transform_indices = @transform_1, window_bounds = array<i64: 2, 2, 64, 32>}, {pipeline_mode = #tpu.pipeline_mode<synchronous>, transform_indices = @transform_2, window_bounds = array<i64: 1, 32>}, {transform_indices = @transform_3, window_bounds = array<i64: 1, 420, 32>}]} {
    %cst = arith.constant 0.000000e+00 : f32
    %0 = vector.broadcast %cst : f32 to vector<140x32xf32>
    %c0 = arith.constant 0 : index
    %c0_0 = arith.constant 0 : index
    %c0_1 = arith.constant 0 : index
    %1 = vector.load %arg1[%c0, %c0_0, %c0_1] : memref<1x448x64xbf16, #tpu.memory_space<vmem>>, vector<1x140x64xbf16>
    %2 = vector.shape_cast %1 : vector<1x140x64xbf16> to vector<140x64xbf16>
    %c0_2 = arith.constant 0 : index
    %c0_3 = arith.constant 0 : index
    %c0_4 = arith.constant 0 : index
    %c0_5 = arith.constant 0 : index
    %3 = vector.load %arg2[%c0_2, %c0_3, %c0_4, %c0_5] : memref<2x2x64x32xbf16, #tpu.memory_space<vmem>>, vector<1x1x64x32xbf16>
    %4 = vector.shape_cast %3 : vector<1x1x64x32xbf16> to vector<64x32xbf16>
    %cst_6 = arith.constant dense<0.000000e+00> : vector<140x32xf32>
    %5 = tpu.matmul %2, %4, %cst_6 {dimension_numbers = #tpu.dot_dimension_numbers<[1], [0], [0], [1], [0, 0, 1, 1], [], []>} : vector<140x64xbf16>, vector<64x32xbf16>, vector<140x32xf32> -> vector<140x32xf32>
    %6 = arith.addf %0, %5 : vector<140x32xf32>
    %c0_7 = arith.constant 0 : index
    %c1 = arith.constant 1 : index
    %c0_8 = arith.constant 0 : index
    %7 = vector.load %arg1[%c0_7, %c1, %c0_8] : memref<1x448x64xbf16, #tpu.memory_space<vmem>>, vector<1x140x64xbf16>
    %8 = vector.shape_cast %7 : vector<1x140x64xbf16> to vector<140x64xbf16>
    %c0_9 = arith.constant 0 : index
    %c1_10 = arith.constant 1 : index
    %c0_11 = arith.constant 0 : index
    %c0_12 = arith.constant 0 : index
    %9 = vector.load %arg2[%c0_9, %c1_10, %c0_11, %c0_12] : memref<2x2x64x32xbf16, #tpu.memory_space<vmem>>, vector<1x1x64x32xbf16>
    %10 = vector.shape_cast %9 : vector<1x1x64x32xbf16> to vector<64x32xbf16>
    %cst_13 = arith.constant dense<0.000000e+00> : vector<140x32xf32>
    %11 = tpu.matmul %8, %10, %cst_13 {dimension_numbers = #tpu.dot_dimension_numbers<[1], [0], [0], [1], [0, 0, 1, 1], [], []>} : vector<140x64xbf16>, vector<64x32xbf16>, vector<140x32xf32> -> vector<140x32xf32>
    %12 = arith.addf %6, %11 : vector<140x32xf32>
    %c0_14 = arith.constant 0 : index
    %c21 = arith.constant 21 : index
    %c0_15 = arith.constant 0 : index
    %13 = vector.load %arg1[%c0_14, %c21, %c0_15] : memref<1x448x64xbf16, #tpu.memory_space<vmem>>, vector<1x140x64xbf16>
    %14 = vector.shape_cast %13 : vector<1x140x64xbf16> to vector<140x64xbf16>
    %c1_16 = arith.constant 1 : index
    %c0_17 = arith.constant 0 : index
    %c0_18 = arith.constant 0 : index
    %c0_19 = arith.constant 0 : index
    %15 = vector.load %arg2[%c1_16, %c0_17, %c0_18, %c0_19] : memref<2x2x64x32xbf16, #tpu.memory_space<vmem>>, vector<1x1x64x32xbf16>
    %16 = vector.shape_cast %15 : vector<1x1x64x32xbf16> to vector<64x32xbf16>
    %cst_20 = arith.constant dense<0.000000e+00> : vector<140x32xf32>
    %17 = tpu.matmul %14, %16, %cst_20 {dimension_numbers = #tpu.dot_dimension_numbers<[1], [0], [0], [1], [0, 0, 1, 1], [], []>} : vector<140x64xbf16>, vector<64x32xbf16>, vector<140x32xf32> -> vector<140x32xf32>
    %18 = arith.addf %12, %17 : vector<140x32xf32>
    %c0_21 = arith.constant 0 : index
    %c22 = arith.constant 22 : index
    %c0_22 = arith.constant 0 : index
    %19 = vector.load %arg1[%c0_21, %c22, %c0_22] : memref<1x448x64xbf16, #tpu.memory_space<vmem>>, vector<1x140x64xbf16>
    %20 = vector.shape_cast %19 : vector<1x140x64xbf16> to vector<140x64xbf16>
    %c1_23 = arith.constant 1 : index
    %c1_24 = arith.constant 1 : index
    %c0_25 = arith.constant 0 : index
    %c0_26 = arith.constant 0 : index
    %21 = vector.load %arg2[%c1_23, %c1_24, %c0_25, %c0_26] : memref<2x2x64x32xbf16, #tpu.memory_space<vmem>>, vector<1x1x64x32xbf16>
    %22 = vector.shape_cast %21 : vector<1x1x64x32xbf16> to vector<64x32xbf16>
    %cst_27 = arith.constant dense<0.000000e+00> : vector<140x32xf32>
    %23 = tpu.matmul %20, %22, %cst_27 {dimension_numbers = #tpu.dot_dimension_numbers<[1], [0], [0], [1], [0, 0, 1, 1], [], []>} : vector<140x64xbf16>, vector<64x32xbf16>, vector<140x32xf32> -> vector<140x32xf32>
    %24 = arith.addf %18, %23 : vector<140x32xf32>
    %c0_28 = arith.constant 0 : index
    %c0_29 = arith.constant 0 : index
    %25 = vector.load %arg3[%c0_28, %c0_29] : memref<1x32xf32, #tpu.memory_space<vmem>>, vector<1x32xf32>
    %26 = vector.broadcast %25 : vector<1x32xf32> to vector<140x32xf32>
    %27 = arith.addf %24, %26 : vector<140x32xf32>
    %cst_30 = arith.constant 0.000000e+00 : f32
    %28 = vector.broadcast %cst_30 : f32 to vector<140x32xf32>
    %29 = arith.maximumf %27, %28 : vector<140x32xf32>
    %30 = arith.truncf %29 : vector<140x32xf32> to vector<140x32xbf16>
    %c0_31 = arith.constant 0 : index
    %c0_32 = arith.constant 0 : index
    %c0_33 = arith.constant 0 : index
    %31 = vector.load %arg4[%c0_31, %c0_32, %c0_33] : memref<1x420x32xbf16, #tpu.memory_space<vmem>>, vector<1x140x32xbf16>
    %32 = vector.shape_cast %31 : vector<1x140x32xbf16> to vector<140x32xbf16>
    %33 = vector.shape_cast %30 : vector<140x32xbf16> to vector<1x140x32xbf16>
    tpu.vector_store %arg4[%c0_31, %c0_32, %c0_33], %33 {strides = array<i32>} : memref<1x420x32xbf16, #tpu.memory_space<vmem>>, vector<1x140x32xbf16>,
    %cst_34 = arith.constant 0.000000e+00 : f32
    %34 = vector.broadcast %cst_34 : f32 to vector<140x32xf32>
    %c0_35 = arith.constant 0 : index
    %c140 = arith.constant 140 : index
    %c0_36 = arith.constant 0 : index
    %35 = vector.load %arg1[%c0_35, %c140, %c0_36] : memref<1x448x64xbf16, #tpu.memory_space<vmem>>, vector<1x140x64xbf16>
    %36 = vector.shape_cast %35 : vector<1x140x64xbf16> to vector<140x64xbf16>
    %c0_37 = arith.constant 0 : index
    %c0_38 = arith.constant 0 : index
    %c0_39 = arith.constant 0 : index
    %c0_40 = arith.constant 0 : index
    %37 = vector.load %arg2[%c0_37, %c0_38, %c0_39, %c0_40] : memref<2x2x64x32xbf16, #tpu.memory_space<vmem>>, vector<1x1x64x32xbf16>
    %38 = vector.shape_cast %37 : vector<1x1x64x32xbf16> to vector<64x32xbf16>
    %cst_41 = arith.constant dense<0.000000e+00> : vector<140x32xf32>
    %39 = tpu.matmul %36, %38, %cst_41 {dimension_numbers = #tpu.dot_dimension_numbers<[1], [0], [0], [1], [0, 0, 1, 1], [], []>} : vector<140x64xbf16>, vector<64x32xbf16>, vector<140x32xf32> -> vector<140x32xf32>
    %40 = arith.addf %34, %39 : vector<140x32xf32>
    %c0_42 = arith.constant 0 : index
    %c141 = arith.constant 141 : index
    %c0_43 = arith.constant 0 : index
    %41 = vector.load %arg1[%c0_42, %c141, %c0_43] : memref<1x448x64xbf16, #tpu.memory_space<vmem>>, vector<1x140x64xbf16>
    %42 = vector.shape_cast %41 : vector<1x140x64xbf16> to vector<140x64xbf16>
    %c0_44 = arith.constant 0 : index
    %c1_45 = arith.constant 1 : index
    %c0_46 = arith.constant 0 : index
    %c0_47 = arith.constant 0 : index
    %43 = vector.load %arg2[%c0_44, %c1_45, %c0_46, %c0_47] : memref<2x2x64x32xbf16, #tpu.memory_space<vmem>>, vector<1x1x64x32xbf16>
    %44 = vector.shape_cast %43 : vector<1x1x64x32xbf16> to vector<64x32xbf16>
    %cst_48 = arith.constant dense<0.000000e+00> : vector<140x32xf32>
    %45 = tpu.matmul %42, %44, %cst_48 {dimension_numbers = #tpu.dot_dimension_numbers<[1], [0], [0], [1], [0, 0, 1, 1], [], []>} : vector<140x64xbf16>, vector<64x32xbf16>, vector<140x32xf32> -> vector<140x32xf32>
    %46 = arith.addf %40, %45 : vector<140x32xf32>
    %c0_49 = arith.constant 0 : index
    %c161 = arith.constant 161 : index
    %c0_50 = arith.constant 0 : index
    %47 = vector.load %arg1[%c0_49, %c161, %c0_50] : memref<1x448x64xbf16, #tpu.memory_space<vmem>>, vector<1x140x64xbf16>
    %48 = vector.shape_cast %47 : vector<1x140x64xbf16> to vector<140x64xbf16>
    %c1_51 = arith.constant 1 : index
    %c0_52 = arith.constant 0 : index
    %c0_53 = arith.constant 0 : index
    %c0_54 = arith.constant 0 : index
    %49 = vector.load %arg2[%c1_51, %c0_52, %c0_53, %c0_54] : memref<2x2x64x32xbf16, #tpu.memory_space<vmem>>, vector<1x1x64x32xbf16>
    %50 = vector.shape_cast %49 : vector<1x1x64x32xbf16> to vector<64x32xbf16>
    %cst_55 = arith.constant dense<0.000000e+00> : vector<140x32xf32>
    %51 = tpu.matmul %48, %50, %cst_55 {dimension_numbers = #tpu.dot_dimension_numbers<[1], [0], [0], [1], [0, 0, 1, 1], [], []>} : vector<140x64xbf16>, vector<64x32xbf16>, vector<140x32xf32> -> vector<140x32xf32>
    %52 = arith.addf %46, %51 : vector<140x32xf32>
    %c0_56 = arith.constant 0 : index
    %c162 = arith.constant 162 : index
    %c0_57 = arith.constant 0 : index
    %53 = vector.load %arg1[%c0_56, %c162, %c0_57] : memref<1x448x64xbf16, #tpu.memory_space<vmem>>, vector<1x140x64xbf16>
    %54 = vector.shape_cast %53 : vector<1x140x64xbf16> to vector<140x64xbf16>
    %c1_58 = arith.constant 1 : index
    %c1_59 = arith.constant 1 : index
    %c0_60 = arith.constant 0 : index
    %c0_61 = arith.constant 0 : index
    %55 = vector.load %arg2[%c1_58, %c1_59, %c0_60, %c0_61] : memref<2x2x64x32xbf16, #tpu.memory_space<vmem>>, vector<1x1x64x32xbf16>
    %56 = vector.shape_cast %55 : vector<1x1x64x32xbf16> to vector<64x32xbf16>
    %cst_62 = arith.constant dense<0.000000e+00> : vector<140x32xf32>
    %57 = tpu.matmul %54, %56, %cst_62 {dimension_numbers = #tpu.dot_dimension_numbers<[1], [0], [0], [1], [0, 0, 1, 1], [], []>} : vector<140x64xbf16>, vector<64x32xbf16>, vector<140x32xf32> -> vector<140x32xf32>
    %58 = arith.addf %52, %57 : vector<140x32xf32>
    %c0_63 = arith.constant 0 : index
    %c0_64 = arith.constant 0 : index
    %59 = vector.load %arg3[%c0_63, %c0_64] : memref<1x32xf32, #tpu.memory_space<vmem>>, vector<1x32xf32>
    %60 = vector.broadcast %59 : vector<1x32xf32> to vector<140x32xf32>
    %61 = arith.addf %58, %60 : vector<140x32xf32>
    %cst_65 = arith.constant 0.000000e+00 : f32
    %62 = vector.broadcast %cst_65 : f32 to vector<140x32xf32>
    %63 = arith.maximumf %61, %62 : vector<140x32xf32>
    %64 = arith.truncf %63 : vector<140x32xf32> to vector<140x32xbf16>
    %c0_66 = arith.constant 0 : index
    %c140_67 = arith.constant 140 : index
    %c0_68 = arith.constant 0 : index
    %65 = vector.load %arg4[%c0_66, %c140_67, %c0_68] : memref<1x420x32xbf16, #tpu.memory_space<vmem>>, vector<1x140x32xbf16>
    %66 = vector.shape_cast %65 : vector<1x140x32xbf16> to vector<140x32xbf16>
    %67 = vector.shape_cast %64 : vector<140x32xbf16> to vector<1x140x32xbf16>
    tpu.vector_store %arg4[%c0_66, %c140_67, %c0_68], %67 {strides = array<i32>} : memref<1x420x32xbf16, #tpu.memory_space<vmem>>, vector<1x140x32xbf16>,
    %cst_69 = arith.constant 0.000000e+00 : f32
    %68 = vector.broadcast %cst_69 : f32 to vector<140x32xf32>
    %c0_70 = arith.constant 0 : index
    %c280 = arith.constant 280 : index
    %c0_71 = arith.constant 0 : index
    %69 = vector.load %arg1[%c0_70, %c280, %c0_71] : memref<1x448x64xbf16, #tpu.memory_space<vmem>>, vector<1x140x64xbf16>
    %70 = vector.shape_cast %69 : vector<1x140x64xbf16> to vector<140x64xbf16>
    %c0_72 = arith.constant 0 : index
    %c0_73 = arith.constant 0 : index
    %c0_74 = arith.constant 0 : index
    %c0_75 = arith.constant 0 : index
    %71 = vector.load %arg2[%c0_72, %c0_73, %c0_74, %c0_75] : memref<2x2x64x32xbf16, #tpu.memory_space<vmem>>, vector<1x1x64x32xbf16>
    %72 = vector.shape_cast %71 : vector<1x1x64x32xbf16> to vector<64x32xbf16>
    %cst_76 = arith.constant dense<0.000000e+00> : vector<140x32xf32>
    %73 = tpu.matmul %70, %72, %cst_76 {dimension_numbers = #tpu.dot_dimension_numbers<[1], [0], [0], [1], [0, 0, 1, 1], [], []>} : vector<140x64xbf16>, vector<64x32xbf16>, vector<140x32xf32> -> vector<140x32xf32>
    %74 = arith.addf %68, %73 : vector<140x32xf32>
    %c0_77 = arith.constant 0 : index
    %c281 = arith.constant 281 : index
    %c0_78 = arith.constant 0 : index
    %75 = vector.load %arg1[%c0_77, %c281, %c0_78] : memref<1x448x64xbf16, #tpu.memory_space<vmem>>, vector<1x140x64xbf16>
    %76 = vector.shape_cast %75 : vector<1x140x64xbf16> to vector<140x64xbf16>
    %c0_79 = arith.constant 0 : index
    %c1_80 = arith.constant 1 : index
    %c0_81 = arith.constant 0 : index
    %c0_82 = arith.constant 0 : index
    %77 = vector.load %arg2[%c0_79, %c1_80, %c0_81, %c0_82] : memref<2x2x64x32xbf16, #tpu.memory_space<vmem>>, vector<1x1x64x32xbf16>
    %78 = vector.shape_cast %77 : vector<1x1x64x32xbf16> to vector<64x32xbf16>
    %cst_83 = arith.constant dense<0.000000e+00> : vector<140x32xf32>
    %79 = tpu.matmul %76, %78, %cst_83 {dimension_numbers = #tpu.dot_dimension_numbers<[1], [0], [0], [1], [0, 0, 1, 1], [], []>} : vector<140x64xbf16>, vector<64x32xbf16>, vector<140x32xf32> -> vector<140x32xf32>
    %80 = arith.addf %74, %79 : vector<140x32xf32>
    %c0_84 = arith.constant 0 : index
    %c301 = arith.constant 301 : index
    %c0_85 = arith.constant 0 : index
    %81 = vector.load %arg1[%c0_84, %c301, %c0_85] : memref<1x448x64xbf16, #tpu.memory_space<vmem>>, vector<1x140x64xbf16>
    %82 = vector.shape_cast %81 : vector<1x140x64xbf16> to vector<140x64xbf16>
    %c1_86 = arith.constant 1 : index
    %c0_87 = arith.constant 0 : index
    %c0_88 = arith.constant 0 : index
    %c0_89 = arith.constant 0 : index
    %83 = vector.load %arg2[%c1_86, %c0_87, %c0_88, %c0_89] : memref<2x2x64x32xbf16, #tpu.memory_space<vmem>>, vector<1x1x64x32xbf16>
    %84 = vector.shape_cast %83 : vector<1x1x64x32xbf16> to vector<64x32xbf16>
    %cst_90 = arith.constant dense<0.000000e+00> : vector<140x32xf32>
    %85 = tpu.matmul %82, %84, %cst_90 {dimension_numbers = #tpu.dot_dimension_numbers<[1], [0], [0], [1], [0, 0, 1, 1], [], []>} : vector<140x64xbf16>, vector<64x32xbf16>, vector<140x32xf32> -> vector<140x32xf32>
    %86 = arith.addf %80, %85 : vector<140x32xf32>
    %c0_91 = arith.constant 0 : index
    %c302 = arith.constant 302 : index
    %c0_92 = arith.constant 0 : index
    %87 = vector.load %arg1[%c0_91, %c302, %c0_92] : memref<1x448x64xbf16, #tpu.memory_space<vmem>>, vector<1x140x64xbf16>
    %88 = vector.shape_cast %87 : vector<1x140x64xbf16> to vector<140x64xbf16>
    %c1_93 = arith.constant 1 : index
    %c1_94 = arith.constant 1 : index
    %c0_95 = arith.constant 0 : index
    %c0_96 = arith.constant 0 : index
    %89 = vector.load %arg2[%c1_93, %c1_94, %c0_95, %c0_96] : memref<2x2x64x32xbf16, #tpu.memory_space<vmem>>, vector<1x1x64x32xbf16>
    %90 = vector.shape_cast %89 : vector<1x1x64x32xbf16> to vector<64x32xbf16>
    %cst_97 = arith.constant dense<0.000000e+00> : vector<140x32xf32>
    %91 = tpu.matmul %88, %90, %cst_97 {dimension_numbers = #tpu.dot_dimension_numbers<[1], [0], [0], [1], [0, 0, 1, 1], [], []>} : vector<140x64xbf16>, vector<64x32xbf16>, vector<140x32xf32> -> vector<140x32xf32>
    %92 = arith.addf %86, %91 : vector<140x32xf32>
    %c0_98 = arith.constant 0 : index
    %c0_99 = arith.constant 0 : index
    %93 = vector.load %arg3[%c0_98, %c0_99] : memref<1x32xf32, #tpu.memory_space<vmem>>, vector<1x32xf32>
    %94 = vector.broadcast %93 : vector<1x32xf32> to vector<140x32xf32>
    %95 = arith.addf %92, %94 : vector<140x32xf32>
    %cst_100 = arith.constant 0.000000e+00 : f32
    %96 = vector.broadcast %cst_100 : f32 to vector<140x32xf32>
    %97 = arith.maximumf %95, %96 : vector<140x32xf32>
    %98 = arith.truncf %97 : vector<140x32xf32> to vector<140x32xbf16>
    %c0_101 = arith.constant 0 : index
    %c280_102 = arith.constant 280 : index
    %c0_103 = arith.constant 0 : index
    %99 = vector.load %arg4[%c0_101, %c280_102, %c0_103] : memref<1x420x32xbf16, #tpu.memory_space<vmem>>, vector<1x140x32xbf16>
    %100 = vector.shape_cast %99 : vector<1x140x32xbf16> to vector<140x32xbf16>
    %101 = vector.shape_cast %98 : vector<140x32xbf16> to vector<1x140x32xbf16>
    tpu.vector_store %arg4[%c0_101, %c280_102, %c0_103], %101 {strides = array<i32>} : memref<1x420x32xbf16, #tpu.memory_space<vmem>>, vector<1x140x32xbf16>,
    return
  }
  func.func @transform_0(%arg0: i32) -> (i32, i32, i32) {
    %c0_i32 = arith.constant 0 : i32
    %c0_i32_0 = arith.constant 0 : i32
    %c0_i32_1 = arith.constant 0 : i32
    return %arg0, %c0_i32, %c0_i32_0 : i32, i32, i32
  }
  func.func @transform_1(%arg0: i32) -> (i32, i32, i32, i32) {
    %c0_i32 = arith.constant 0 : i32
    %c0_i32_0 = arith.constant 0 : i32
    %c0_i32_1 = arith.constant 0 : i32
    %c0_i32_2 = arith.constant 0 : i32
    %c0_i32_3 = arith.constant 0 : i32
    return %c0_i32, %c0_i32_0, %c0_i32_1, %c0_i32_2 : i32, i32, i32, i32
  }
  func.func @transform_2(%arg0: i32) -> (i32, i32) {
    %c0_i32 = arith.constant 0 : i32
    %c0_i32_0 = arith.constant 0 : i32
    %c0_i32_1 = arith.constant 0 : i32
    return %c0_i32, %c0_i32_0 : i32, i32
  }
  func.func @transform_3(%arg0: i32) -> (i32, i32, i32) {
    %c0_i32 = arith.constant 0 : i32
    %c0_i32_0 = arith.constant 0 : i32
    %c0_i32_1 = arith.constant 0 : i32
    return %arg0, %c0_i32, %c0_i32_0 : i32, i32, i32
  }
}

module attributes {stable_mosaic.version = 11 : i64} {
  func.func @_conv23_kernel(%arg0: i32, %arg1: memref<1x112x128xbf16, #tpu.memory_space<vmem>>, %arg2: memref<2x2x128x64xbf16, #tpu.memory_space<vmem>>, %arg3: memref<1x64xf32, #tpu.memory_space<vmem>>, %arg4: memref<3x3x64x64xbf16, #tpu.memory_space<vmem>>, %arg5: memref<1x64xf32, #tpu.memory_space<vmem>>, %arg6: memref<1x49x64xbf16, #tpu.memory_space<vmem>>, %arg7: memref<96x64xbf16, #tpu.memory_space<vmem>>, %arg8: memref<72x64xbf16, #tpu.memory_space<vmem>>) attributes {dimension_semantics = [#tpu.dimension_semantics<parallel>], iteration_bounds = array<i64: 2>, scalar_prefetch = 0 : i64, scratch_operands = 2 : i64, tpu.core_type = #tpu.core_type<tc>, window_params = [{transform_indices = @transform_0, window_bounds = array<i64: 1, 112, 128>}, {pipeline_mode = #tpu.pipeline_mode<synchronous>, transform_indices = @transform_1, window_bounds = array<i64: 2, 2, 128, 64>}, {pipeline_mode = #tpu.pipeline_mode<synchronous>, transform_indices = @transform_2, window_bounds = array<i64: 1, 64>}, {pipeline_mode = #tpu.pipeline_mode<synchronous>, transform_indices = @transform_3, window_bounds = array<i64: 3, 3, 64, 64>}, {pipeline_mode = #tpu.pipeline_mode<synchronous>, transform_indices = @transform_4, window_bounds = array<i64: 1, 64>}, {transform_indices = @transform_5, window_bounds = array<i64: 1, 49, 64>}]} {
    %cst = arith.constant 0.000000e+00 : f32
    %0 = vector.broadcast %cst : f32 to vector<96x64xf32>
    %c0 = arith.constant 0 : index
    %c0_0 = arith.constant 0 : index
    %c0_1 = arith.constant 0 : index
    %1 = vector.load %arg1[%c0, %c0_0, %c0_1] : memref<1x112x128xbf16, #tpu.memory_space<vmem>>, vector<1x96x128xbf16>
    %2 = vector.shape_cast %1 : vector<1x96x128xbf16> to vector<96x128xbf16>
    %c0_2 = arith.constant 0 : index
    %c0_3 = arith.constant 0 : index
    %c0_4 = arith.constant 0 : index
    %c0_5 = arith.constant 0 : index
    %3 = vector.load %arg2[%c0_2, %c0_3, %c0_4, %c0_5] : memref<2x2x128x64xbf16, #tpu.memory_space<vmem>>, vector<1x1x128x64xbf16>
    %4 = vector.shape_cast %3 : vector<1x1x128x64xbf16> to vector<128x64xbf16>
    %cst_6 = arith.constant dense<0.000000e+00> : vector<96x64xf32>
    %5 = tpu.matmul %2, %4, %cst_6 {dimension_numbers = #tpu.dot_dimension_numbers<[1], [0], [0], [1], [0, 0, 1, 1], [], []>} : vector<96x128xbf16>, vector<128x64xbf16>, vector<96x64xf32> -> vector<96x64xf32>
    %6 = arith.addf %0, %5 : vector<96x64xf32>
    %c0_7 = arith.constant 0 : index
    %c1 = arith.constant 1 : index
    %c0_8 = arith.constant 0 : index
    %7 = vector.load %arg1[%c0_7, %c1, %c0_8] : memref<1x112x128xbf16, #tpu.memory_space<vmem>>, vector<1x96x128xbf16>
    %8 = vector.shape_cast %7 : vector<1x96x128xbf16> to vector<96x128xbf16>
    %c0_9 = arith.constant 0 : index
    %c1_10 = arith.constant 1 : index
    %c0_11 = arith.constant 0 : index
    %c0_12 = arith.constant 0 : index
    %9 = vector.load %arg2[%c0_9, %c1_10, %c0_11, %c0_12] : memref<2x2x128x64xbf16, #tpu.memory_space<vmem>>, vector<1x1x128x64xbf16>
    %10 = vector.shape_cast %9 : vector<1x1x128x64xbf16> to vector<128x64xbf16>
    %cst_13 = arith.constant dense<0.000000e+00> : vector<96x64xf32>
    %11 = tpu.matmul %8, %10, %cst_13 {dimension_numbers = #tpu.dot_dimension_numbers<[1], [0], [0], [1], [0, 0, 1, 1], [], []>} : vector<96x128xbf16>, vector<128x64xbf16>, vector<96x64xf32> -> vector<96x64xf32>
    %12 = arith.addf %6, %11 : vector<96x64xf32>
    %c0_14 = arith.constant 0 : index
    %c10 = arith.constant 10 : index
    %c0_15 = arith.constant 0 : index
    %13 = vector.load %arg1[%c0_14, %c10, %c0_15] : memref<1x112x128xbf16, #tpu.memory_space<vmem>>, vector<1x96x128xbf16>
    %14 = vector.shape_cast %13 : vector<1x96x128xbf16> to vector<96x128xbf16>
    %c1_16 = arith.constant 1 : index
    %c0_17 = arith.constant 0 : index
    %c0_18 = arith.constant 0 : index
    %c0_19 = arith.constant 0 : index
    %15 = vector.load %arg2[%c1_16, %c0_17, %c0_18, %c0_19] : memref<2x2x128x64xbf16, #tpu.memory_space<vmem>>, vector<1x1x128x64xbf16>
    %16 = vector.shape_cast %15 : vector<1x1x128x64xbf16> to vector<128x64xbf16>
    %cst_20 = arith.constant dense<0.000000e+00> : vector<96x64xf32>
    %17 = tpu.matmul %14, %16, %cst_20 {dimension_numbers = #tpu.dot_dimension_numbers<[1], [0], [0], [1], [0, 0, 1, 1], [], []>} : vector<96x128xbf16>, vector<128x64xbf16>, vector<96x64xf32> -> vector<96x64xf32>
    %18 = arith.addf %12, %17 : vector<96x64xf32>
    %c0_21 = arith.constant 0 : index
    %c11 = arith.constant 11 : index
    %c0_22 = arith.constant 0 : index
    %19 = vector.load %arg1[%c0_21, %c11, %c0_22] : memref<1x112x128xbf16, #tpu.memory_space<vmem>>, vector<1x96x128xbf16>
    %20 = vector.shape_cast %19 : vector<1x96x128xbf16> to vector<96x128xbf16>
    %c1_23 = arith.constant 1 : index
    %c1_24 = arith.constant 1 : index
    %c0_25 = arith.constant 0 : index
    %c0_26 = arith.constant 0 : index
    %21 = vector.load %arg2[%c1_23, %c1_24, %c0_25, %c0_26] : memref<2x2x128x64xbf16, #tpu.memory_space<vmem>>, vector<1x1x128x64xbf16>
    %22 = vector.shape_cast %21 : vector<1x1x128x64xbf16> to vector<128x64xbf16>
    %cst_27 = arith.constant dense<0.000000e+00> : vector<96x64xf32>
    %23 = tpu.matmul %20, %22, %cst_27 {dimension_numbers = #tpu.dot_dimension_numbers<[1], [0], [0], [1], [0, 0, 1, 1], [], []>} : vector<96x128xbf16>, vector<128x64xbf16>, vector<96x64xf32> -> vector<96x64xf32>
    %24 = arith.addf %18, %23 : vector<96x64xf32>
    %c0_28 = arith.constant 0 : index
    %c0_29 = arith.constant 0 : index
    %25 = vector.load %arg3[%c0_28, %c0_29] : memref<1x64xf32, #tpu.memory_space<vmem>>, vector<1x64xf32>
    %26 = vector.broadcast %25 : vector<1x64xf32> to vector<96x64xf32>
    %27 = arith.addf %24, %26 : vector<96x64xf32>
    %cst_30 = arith.constant 0.000000e+00 : f32
    %28 = vector.broadcast %cst_30 : f32 to vector<96x64xf32>
    %29 = arith.maximumf %27, %28 : vector<96x64xf32>
    %30 = arith.truncf %29 : vector<96x64xf32> to vector<96x64xbf16>
    %c0_31 = arith.constant 0 : index
    %c0_32 = arith.constant 0 : index
    %31 = vector.load %arg7[%c0_31, %c0_32] : memref<96x64xbf16, #tpu.memory_space<vmem>>, vector<96x64xbf16>
    tpu.vector_store %arg7[%c0_31, %c0_32], %30 {strides = array<i32>} : memref<96x64xbf16, #tpu.memory_space<vmem>>, vector<96x64xbf16>,
    %cst_33 = arith.constant 0.000000e+00 : f32
    %32 = vector.broadcast %cst_33 : f32 to vector<72x64xf32>
    %c0_34 = arith.constant 0 : index
    %c0_35 = arith.constant 0 : index
    %33 = vector.load %arg7[%c0_34, %c0_35] : memref<96x64xbf16, #tpu.memory_space<vmem>>, vector<72x64xbf16>
    %c0_36 = arith.constant 0 : index
    %c0_37 = arith.constant 0 : index
    %c0_38 = arith.constant 0 : index
    %c0_39 = arith.constant 0 : index
    %34 = vector.load %arg4[%c0_36, %c0_37, %c0_38, %c0_39] : memref<3x3x64x64xbf16, #tpu.memory_space<vmem>>, vector<1x1x64x64xbf16>
    %35 = vector.shape_cast %34 : vector<1x1x64x64xbf16> to vector<64x64xbf16>
    %cst_40 = arith.constant dense<0.000000e+00> : vector<72x64xf32>
    %36 = tpu.matmul %33, %35, %cst_40 {dimension_numbers = #tpu.dot_dimension_numbers<[1], [0], [0], [1], [0, 0, 1, 1], [], []>} : vector<72x64xbf16>, vector<64x64xbf16>, vector<72x64xf32> -> vector<72x64xf32>
    %37 = arith.addf %32, %36 : vector<72x64xf32>
    %c1_41 = arith.constant 1 : index
    %c0_42 = arith.constant 0 : index
    %38 = vector.load %arg7[%c1_41, %c0_42] : memref<96x64xbf16, #tpu.memory_space<vmem>>, vector<72x64xbf16>
    %c0_43 = arith.constant 0 : index
    %c1_44 = arith.constant 1 : index
    %c0_45 = arith.constant 0 : index
    %c0_46 = arith.constant 0 : index
    %39 = vector.load %arg4[%c0_43, %c1_44, %c0_45, %c0_46] : memref<3x3x64x64xbf16, #tpu.memory_space<vmem>>, vector<1x1x64x64xbf16>
    %40 = vector.shape_cast %39 : vector<1x1x64x64xbf16> to vector<64x64xbf16>
    %cst_47 = arith.constant dense<0.000000e+00> : vector<72x64xf32>
    %41 = tpu.matmul %38, %40, %cst_47 {dimension_numbers = #tpu.dot_dimension_numbers<[1], [0], [0], [1], [0, 0, 1, 1], [], []>} : vector<72x64xbf16>, vector<64x64xbf16>, vector<72x64xf32> -> vector<72x64xf32>
    %42 = arith.addf %37, %41 : vector<72x64xf32>
    %c2 = arith.constant 2 : index
    %c0_48 = arith.constant 0 : index
    %43 = vector.load %arg7[%c2, %c0_48] : memref<96x64xbf16, #tpu.memory_space<vmem>>, vector<72x64xbf16>
    %c0_49 = arith.constant 0 : index
    %c2_50 = arith.constant 2 : index
    %c0_51 = arith.constant 0 : index
    %c0_52 = arith.constant 0 : index
    %44 = vector.load %arg4[%c0_49, %c2_50, %c0_51, %c0_52] : memref<3x3x64x64xbf16, #tpu.memory_space<vmem>>, vector<1x1x64x64xbf16>
    %45 = vector.shape_cast %44 : vector<1x1x64x64xbf16> to vector<64x64xbf16>
    %cst_53 = arith.constant dense<0.000000e+00> : vector<72x64xf32>
    %46 = tpu.matmul %43, %45, %cst_53 {dimension_numbers = #tpu.dot_dimension_numbers<[1], [0], [0], [1], [0, 0, 1, 1], [], []>} : vector<72x64xbf16>, vector<64x64xbf16>, vector<72x64xf32> -> vector<72x64xf32>
    %47 = arith.addf %42, %46 : vector<72x64xf32>
    %c10_54 = arith.constant 10 : index
    %c0_55 = arith.constant 0 : index
    %48 = vector.load %arg7[%c10_54, %c0_55] : memref<96x64xbf16, #tpu.memory_space<vmem>>, vector<72x64xbf16>
    %c1_56 = arith.constant 1 : index
    %c0_57 = arith.constant 0 : index
    %c0_58 = arith.constant 0 : index
    %c0_59 = arith.constant 0 : index
    %49 = vector.load %arg4[%c1_56, %c0_57, %c0_58, %c0_59] : memref<3x3x64x64xbf16, #tpu.memory_space<vmem>>, vector<1x1x64x64xbf16>
    %50 = vector.shape_cast %49 : vector<1x1x64x64xbf16> to vector<64x64xbf16>
    %cst_60 = arith.constant dense<0.000000e+00> : vector<72x64xf32>
    %51 = tpu.matmul %48, %50, %cst_60 {dimension_numbers = #tpu.dot_dimension_numbers<[1], [0], [0], [1], [0, 0, 1, 1], [], []>} : vector<72x64xbf16>, vector<64x64xbf16>, vector<72x64xf32> -> vector<72x64xf32>
    %52 = arith.addf %47, %51 : vector<72x64xf32>
    %c11_61 = arith.constant 11 : index
    %c0_62 = arith.constant 0 : index
    %53 = vector.load %arg7[%c11_61, %c0_62] : memref<96x64xbf16, #tpu.memory_space<vmem>>, vector<72x64xbf16>
    %c1_63 = arith.constant 1 : index
    %c1_64 = arith.constant 1 : index
    %c0_65 = arith.constant 0 : index
    %c0_66 = arith.constant 0 : index
    %54 = vector.load %arg4[%c1_63, %c1_64, %c0_65, %c0_66] : memref<3x3x64x64xbf16, #tpu.memory_space<vmem>>, vector<1x1x64x64xbf16>
    %55 = vector.shape_cast %54 : vector<1x1x64x64xbf16> to vector<64x64xbf16>
    %cst_67 = arith.constant dense<0.000000e+00> : vector<72x64xf32>
    %56 = tpu.matmul %53, %55, %cst_67 {dimension_numbers = #tpu.dot_dimension_numbers<[1], [0], [0], [1], [0, 0, 1, 1], [], []>} : vector<72x64xbf16>, vector<64x64xbf16>, vector<72x64xf32> -> vector<72x64xf32>
    %57 = arith.addf %52, %56 : vector<72x64xf32>
    %c12 = arith.constant 12 : index
    %c0_68 = arith.constant 0 : index
    %58 = vector.load %arg7[%c12, %c0_68] : memref<96x64xbf16, #tpu.memory_space<vmem>>, vector<72x64xbf16>
    %c1_69 = arith.constant 1 : index
    %c2_70 = arith.constant 2 : index
    %c0_71 = arith.constant 0 : index
    %c0_72 = arith.constant 0 : index
    %59 = vector.load %arg4[%c1_69, %c2_70, %c0_71, %c0_72] : memref<3x3x64x64xbf16, #tpu.memory_space<vmem>>, vector<1x1x64x64xbf16>
    %60 = vector.shape_cast %59 : vector<1x1x64x64xbf16> to vector<64x64xbf16>
    %cst_73 = arith.constant dense<0.000000e+00> : vector<72x64xf32>
    %61 = tpu.matmul %58, %60, %cst_73 {dimension_numbers = #tpu.dot_dimension_numbers<[1], [0], [0], [1], [0, 0, 1, 1], [], []>} : vector<72x64xbf16>, vector<64x64xbf16>, vector<72x64xf32> -> vector<72x64xf32>
    %62 = arith.addf %57, %61 : vector<72x64xf32>
    %c20 = arith.constant 20 : index
    %c0_74 = arith.constant 0 : index
    %63 = vector.load %arg7[%c20, %c0_74] : memref<96x64xbf16, #tpu.memory_space<vmem>>, vector<72x64xbf16>
    %c2_75 = arith.constant 2 : index
    %c0_76 = arith.constant 0 : index
    %c0_77 = arith.constant 0 : index
    %c0_78 = arith.constant 0 : index
    %64 = vector.load %arg4[%c2_75, %c0_76, %c0_77, %c0_78] : memref<3x3x64x64xbf16, #tpu.memory_space<vmem>>, vector<1x1x64x64xbf16>
    %65 = vector.shape_cast %64 : vector<1x1x64x64xbf16> to vector<64x64xbf16>
    %cst_79 = arith.constant dense<0.000000e+00> : vector<72x64xf32>
    %66 = tpu.matmul %63, %65, %cst_79 {dimension_numbers = #tpu.dot_dimension_numbers<[1], [0], [0], [1], [0, 0, 1, 1], [], []>} : vector<72x64xbf16>, vector<64x64xbf16>, vector<72x64xf32> -> vector<72x64xf32>
    %67 = arith.addf %62, %66 : vector<72x64xf32>
    %c21 = arith.constant 21 : index
    %c0_80 = arith.constant 0 : index
    %68 = vector.load %arg7[%c21, %c0_80] : memref<96x64xbf16, #tpu.memory_space<vmem>>, vector<72x64xbf16>
    %c2_81 = arith.constant 2 : index
    %c1_82 = arith.constant 1 : index
    %c0_83 = arith.constant 0 : index
    %c0_84 = arith.constant 0 : index
    %69 = vector.load %arg4[%c2_81, %c1_82, %c0_83, %c0_84] : memref<3x3x64x64xbf16, #tpu.memory_space<vmem>>, vector<1x1x64x64xbf16>
    %70 = vector.shape_cast %69 : vector<1x1x64x64xbf16> to vector<64x64xbf16>
    %cst_85 = arith.constant dense<0.000000e+00> : vector<72x64xf32>
    %71 = tpu.matmul %68, %70, %cst_85 {dimension_numbers = #tpu.dot_dimension_numbers<[1], [0], [0], [1], [0, 0, 1, 1], [], []>} : vector<72x64xbf16>, vector<64x64xbf16>, vector<72x64xf32> -> vector<72x64xf32>
    %72 = arith.addf %67, %71 : vector<72x64xf32>
    %c22 = arith.constant 22 : index
    %c0_86 = arith.constant 0 : index
    %73 = vector.load %arg7[%c22, %c0_86] : memref<96x64xbf16, #tpu.memory_space<vmem>>, vector<72x64xbf16>
    %c2_87 = arith.constant 2 : index
    %c2_88 = arith.constant 2 : index
    %c0_89 = arith.constant 0 : index
    %c0_90 = arith.constant 0 : index
    %74 = vector.load %arg4[%c2_87, %c2_88, %c0_89, %c0_90] : memref<3x3x64x64xbf16, #tpu.memory_space<vmem>>, vector<1x1x64x64xbf16>
    %75 = vector.shape_cast %74 : vector<1x1x64x64xbf16> to vector<64x64xbf16>
    %cst_91 = arith.constant dense<0.000000e+00> : vector<72x64xf32>
    %76 = tpu.matmul %73, %75, %cst_91 {dimension_numbers = #tpu.dot_dimension_numbers<[1], [0], [0], [1], [0, 0, 1, 1], [], []>} : vector<72x64xbf16>, vector<64x64xbf16>, vector<72x64xf32> -> vector<72x64xf32>
    %77 = arith.addf %72, %76 : vector<72x64xf32>
    %c0_92 = arith.constant 0 : index
    %c0_93 = arith.constant 0 : index
    %78 = vector.load %arg5[%c0_92, %c0_93] : memref<1x64xf32, #tpu.memory_space<vmem>>, vector<1x64xf32>
    %79 = vector.broadcast %78 : vector<1x64xf32> to vector<72x64xf32>
    %80 = arith.addf %77, %79 : vector<72x64xf32>
    %cst_94 = arith.constant 0.000000e+00 : f32
    %81 = vector.broadcast %cst_94 : f32 to vector<72x64xf32>
    %82 = arith.maximumf %80, %81 : vector<72x64xf32>
    %83 = arith.truncf %82 : vector<72x64xf32> to vector<72x64xbf16>
    %c0_95 = arith.constant 0 : index
    %c0_96 = arith.constant 0 : index
    %84 = vector.load %arg8[%c0_95, %c0_96] : memref<72x64xbf16, #tpu.memory_space<vmem>>, vector<72x64xbf16>
    tpu.vector_store %arg8[%c0_95, %c0_96], %83 {strides = array<i32>} : memref<72x64xbf16, #tpu.memory_space<vmem>>, vector<72x64xbf16>,
    %c0_97 = arith.constant 0 : index
    %c0_98 = arith.constant 0 : index
    %85 = vector.load %arg8[%c0_97, %c0_98] : memref<72x64xbf16, #tpu.memory_space<vmem>>, vector<7x64xbf16>
    %c0_99 = arith.constant 0 : index
    %c0_100 = arith.constant 0 : index
    %c0_101 = arith.constant 0 : index
    %86 = vector.load %arg6[%c0_99, %c0_100, %c0_101] : memref<1x49x64xbf16, #tpu.memory_space<vmem>>, vector<1x7x64xbf16>
    %87 = vector.shape_cast %86 : vector<1x7x64xbf16> to vector<7x64xbf16>
    %88 = vector.shape_cast %85 : vector<7x64xbf16> to vector<1x7x64xbf16>
    tpu.vector_store %arg6[%c0_99, %c0_100, %c0_101], %88 {strides = array<i32>} : memref<1x49x64xbf16, #tpu.memory_space<vmem>>, vector<1x7x64xbf16>,
    %c10_102 = arith.constant 10 : index
    %c0_103 = arith.constant 0 : index
    %89 = vector.load %arg8[%c10_102, %c0_103] : memref<72x64xbf16, #tpu.memory_space<vmem>>, vector<7x64xbf16>
    %c0_104 = arith.constant 0 : index
    %c7 = arith.constant 7 : index
    %c0_105 = arith.constant 0 : index
    %90 = vector.load %arg6[%c0_104, %c7, %c0_105] : memref<1x49x64xbf16, #tpu.memory_space<vmem>>, vector<1x7x64xbf16>
    %91 = vector.shape_cast %90 : vector<1x7x64xbf16> to vector<7x64xbf16>
    %92 = vector.shape_cast %89 : vector<7x64xbf16> to vector<1x7x64xbf16>
    tpu.vector_store %arg6[%c0_104, %c7, %c0_105], %92 {strides = array<i32>} : memref<1x49x64xbf16, #tpu.memory_space<vmem>>, vector<1x7x64xbf16>,
    %c20_106 = arith.constant 20 : index
    %c0_107 = arith.constant 0 : index
    %93 = vector.load %arg8[%c20_106, %c0_107] : memref<72x64xbf16, #tpu.memory_space<vmem>>, vector<7x64xbf16>
    %c0_108 = arith.constant 0 : index
    %c14 = arith.constant 14 : index
    %c0_109 = arith.constant 0 : index
    %94 = vector.load %arg6[%c0_108, %c14, %c0_109] : memref<1x49x64xbf16, #tpu.memory_space<vmem>>, vector<1x7x64xbf16>
    %95 = vector.shape_cast %94 : vector<1x7x64xbf16> to vector<7x64xbf16>
    %96 = vector.shape_cast %93 : vector<7x64xbf16> to vector<1x7x64xbf16>
    tpu.vector_store %arg6[%c0_108, %c14, %c0_109], %96 {strides = array<i32>} : memref<1x49x64xbf16, #tpu.memory_space<vmem>>, vector<1x7x64xbf16>,
    %c30 = arith.constant 30 : index
    %c0_110 = arith.constant 0 : index
    %97 = vector.load %arg8[%c30, %c0_110] : memref<72x64xbf16, #tpu.memory_space<vmem>>, vector<7x64xbf16>
    %c0_111 = arith.constant 0 : index
    %c21_112 = arith.constant 21 : index
    %c0_113 = arith.constant 0 : index
    %98 = vector.load %arg6[%c0_111, %c21_112, %c0_113] : memref<1x49x64xbf16, #tpu.memory_space<vmem>>, vector<1x7x64xbf16>
    %99 = vector.shape_cast %98 : vector<1x7x64xbf16> to vector<7x64xbf16>
    %100 = vector.shape_cast %97 : vector<7x64xbf16> to vector<1x7x64xbf16>
    tpu.vector_store %arg6[%c0_111, %c21_112, %c0_113], %100 {strides = array<i32>} : memref<1x49x64xbf16, #tpu.memory_space<vmem>>, vector<1x7x64xbf16>,
    %c40 = arith.constant 40 : index
    %c0_114 = arith.constant 0 : index
    %101 = vector.load %arg8[%c40, %c0_114] : memref<72x64xbf16, #tpu.memory_space<vmem>>, vector<7x64xbf16>
    %c0_115 = arith.constant 0 : index
    %c28 = arith.constant 28 : index
    %c0_116 = arith.constant 0 : index
    %102 = vector.load %arg6[%c0_115, %c28, %c0_116] : memref<1x49x64xbf16, #tpu.memory_space<vmem>>, vector<1x7x64xbf16>
    %103 = vector.shape_cast %102 : vector<1x7x64xbf16> to vector<7x64xbf16>
    %104 = vector.shape_cast %101 : vector<7x64xbf16> to vector<1x7x64xbf16>
    tpu.vector_store %arg6[%c0_115, %c28, %c0_116], %104 {strides = array<i32>} : memref<1x49x64xbf16, #tpu.memory_space<vmem>>, vector<1x7x64xbf16>,
    %c50 = arith.constant 50 : index
    %c0_117 = arith.constant 0 : index
    %105 = vector.load %arg8[%c50, %c0_117] : memref<72x64xbf16, #tpu.memory_space<vmem>>, vector<7x64xbf16>
    %c0_118 = arith.constant 0 : index
    %c35 = arith.constant 35 : index
    %c0_119 = arith.constant 0 : index
    %106 = vector.load %arg6[%c0_118, %c35, %c0_119] : memref<1x49x64xbf16, #tpu.memory_space<vmem>>, vector<1x7x64xbf16>
    %107 = vector.shape_cast %106 : vector<1x7x64xbf16> to vector<7x64xbf16>
    %108 = vector.shape_cast %105 : vector<7x64xbf16> to vector<1x7x64xbf16>
    tpu.vector_store %arg6[%c0_118, %c35, %c0_119], %108 {strides = array<i32>} : memref<1x49x64xbf16, #tpu.memory_space<vmem>>, vector<1x7x64xbf16>,
    %c60 = arith.constant 60 : index
    %c0_120 = arith.constant 0 : index
    %109 = vector.load %arg8[%c60, %c0_120] : memref<72x64xbf16, #tpu.memory_space<vmem>>, vector<7x64xbf16>
    %c0_121 = arith.constant 0 : index
    %c42 = arith.constant 42 : index
    %c0_122 = arith.constant 0 : index
    %110 = vector.load %arg6[%c0_121, %c42, %c0_122] : memref<1x49x64xbf16, #tpu.memory_space<vmem>>, vector<1x7x64xbf16>
    %111 = vector.shape_cast %110 : vector<1x7x64xbf16> to vector<7x64xbf16>
    %112 = vector.shape_cast %109 : vector<7x64xbf16> to vector<1x7x64xbf16>
    tpu.vector_store %arg6[%c0_121, %c42, %c0_122], %112 {strides = array<i32>} : memref<1x49x64xbf16, #tpu.memory_space<vmem>>, vector<1x7x64xbf16>,
    return
  }
  func.func @transform_0(%arg0: i32) -> (i32, i32, i32) {
    %c0_i32 = arith.constant 0 : i32
    %c0_i32_0 = arith.constant 0 : i32
    %c0_i32_1 = arith.constant 0 : i32
    return %arg0, %c0_i32, %c0_i32_0 : i32, i32, i32
  }
  func.func @transform_1(%arg0: i32) -> (i32, i32, i32, i32) {
    %c0_i32 = arith.constant 0 : i32
    %c0_i32_0 = arith.constant 0 : i32
    %c0_i32_1 = arith.constant 0 : i32
    %c0_i32_2 = arith.constant 0 : i32
    %c0_i32_3 = arith.constant 0 : i32
    return %c0_i32, %c0_i32_0, %c0_i32_1, %c0_i32_2 : i32, i32, i32, i32
  }
  func.func @transform_2(%arg0: i32) -> (i32, i32) {
    %c0_i32 = arith.constant 0 : i32
    %c0_i32_0 = arith.constant 0 : i32
    %c0_i32_1 = arith.constant 0 : i32
    return %c0_i32, %c0_i32_0 : i32, i32
  }
  func.func @transform_3(%arg0: i32) -> (i32, i32, i32, i32) {
    %c0_i32 = arith.constant 0 : i32
    %c0_i32_0 = arith.constant 0 : i32
    %c0_i32_1 = arith.constant 0 : i32
    %c0_i32_2 = arith.constant 0 : i32
    %c0_i32_3 = arith.constant 0 : i32
    return %c0_i32, %c0_i32_0, %c0_i32_1, %c0_i32_2 : i32, i32, i32, i32
  }
  func.func @transform_4(%arg0: i32) -> (i32, i32) {
    %c0_i32 = arith.constant 0 : i32
    %c0_i32_0 = arith.constant 0 : i32
    %c0_i32_1 = arith.constant 0 : i32
    return %c0_i32, %c0_i32_0 : i32, i32
  }
  func.func @transform_5(%arg0: i32) -> (i32, i32, i32) {
    %c0_i32 = arith.constant 0 : i32
    %c0_i32_0 = arith.constant 0 : i32
    %c0_i32_1 = arith.constant 0 : i32
    return %arg0, %c0_i32, %c0_i32_0 : i32, i32, i32
  }
}

module attributes {stable_mosaic.version = 11 : i64} {
  func.func @_head_kernel(%arg0: i32, %arg1: memref<8x3136xbf16, #tpu.memory_space<vmem>>, %arg2: memref<3136x512xbf16, #tpu.memory_space<vmem>>, %arg3: memref<1x512xf32, #tpu.memory_space<vmem>>, %arg4: memref<512x128xbf16, #tpu.memory_space<vmem>>, %arg5: memref<1x128xf32, #tpu.memory_space<vmem>>, %arg6: memref<8x128xf32, #tpu.memory_space<vmem>>) attributes {dimension_semantics = [#tpu.dimension_semantics<parallel>], iteration_bounds = array<i64: 1>, scalar_prefetch = 0 : i64, scratch_operands = 0 : i64, tpu.core_type = #tpu.core_type<tc>, window_params = [{transform_indices = @transform_0, window_bounds = array<i64: 8, 3136>}, {pipeline_mode = #tpu.pipeline_mode<synchronous>, transform_indices = @transform_1, window_bounds = array<i64: 3136, 512>}, {pipeline_mode = #tpu.pipeline_mode<synchronous>, transform_indices = @transform_2, window_bounds = array<i64: 1, 512>}, {pipeline_mode = #tpu.pipeline_mode<synchronous>, transform_indices = @transform_3, window_bounds = array<i64: 512, 128>}, {pipeline_mode = #tpu.pipeline_mode<synchronous>, transform_indices = @transform_4, window_bounds = array<i64: 1, 128>}, {transform_indices = @transform_5, window_bounds = array<i64: 8, 128>}]} {
    %c0 = arith.constant 0 : index
    %c0_0 = arith.constant 0 : index
    %0 = vector.load %arg1[%c0, %c0_0] : memref<8x3136xbf16, #tpu.memory_space<vmem>>, vector<8x3136xbf16>
    %c0_1 = arith.constant 0 : index
    %c0_2 = arith.constant 0 : index
    %1 = vector.load %arg2[%c0_1, %c0_2] : memref<3136x512xbf16, #tpu.memory_space<vmem>>, vector<3136x512xbf16>
    %cst = arith.constant dense<0.000000e+00> : vector<8x512xf32>
    %2 = tpu.matmul %0, %1, %cst {dimension_numbers = #tpu.dot_dimension_numbers<[1], [0], [0], [1], [0, 0, 1, 1], [], []>} : vector<8x3136xbf16>, vector<3136x512xbf16>, vector<8x512xf32> -> vector<8x512xf32>
    %c0_3 = arith.constant 0 : index
    %c0_4 = arith.constant 0 : index
    %3 = vector.load %arg3[%c0_3, %c0_4] : memref<1x512xf32, #tpu.memory_space<vmem>>, vector<1x512xf32>
    %4 = vector.broadcast %3 : vector<1x512xf32> to vector<8x512xf32>
    %5 = arith.addf %2, %4 : vector<8x512xf32>
    %cst_5 = arith.constant 0.000000e+00 : f32
    %6 = vector.broadcast %cst_5 : f32 to vector<8x512xf32>
    %7 = arith.maximumf %5, %6 : vector<8x512xf32>
    %8 = arith.truncf %7 : vector<8x512xf32> to vector<8x512xbf16>
    %c0_6 = arith.constant 0 : index
    %c0_7 = arith.constant 0 : index
    %9 = vector.load %arg4[%c0_6, %c0_7] : memref<512x128xbf16, #tpu.memory_space<vmem>>, vector<512x128xbf16>
    %cst_8 = arith.constant dense<0.000000e+00> : vector<8x128xf32>
    %10 = tpu.matmul %8, %9, %cst_8 {dimension_numbers = #tpu.dot_dimension_numbers<[1], [0], [0], [1], [0, 0, 1, 1], [], []>} : vector<8x512xbf16>, vector<512x128xbf16>, vector<8x128xf32> -> vector<8x128xf32>
    %c0_9 = arith.constant 0 : index
    %c0_10 = arith.constant 0 : index
    %11 = vector.load %arg5[%c0_9, %c0_10] : memref<1x128xf32, #tpu.memory_space<vmem>>, vector<1x128xf32>
    %12 = vector.broadcast %11 : vector<1x128xf32> to vector<8x128xf32>
    %13 = arith.addf %10, %12 : vector<8x128xf32>
    %c0_11 = arith.constant 0 : index
    %c0_12 = arith.constant 0 : index
    %14 = vector.load %arg6[%c0_11, %c0_12] : memref<8x128xf32, #tpu.memory_space<vmem>>, vector<8x128xf32>
    tpu.vector_store %arg6[%c0_11, %c0_12], %13 {strides = array<i32>} : memref<8x128xf32, #tpu.memory_space<vmem>>, vector<8x128xf32>,
    return
  }
  func.func @transform_0(%arg0: i32) -> (i32, i32) {
    %c0_i32 = arith.constant 0 : i32
    %c0_i32_0 = arith.constant 0 : i32
    return %arg0, %c0_i32 : i32, i32
  }
  func.func @transform_1(%arg0: i32) -> (i32, i32) {
    %c0_i32 = arith.constant 0 : i32
    %c0_i32_0 = arith.constant 0 : i32
    %c0_i32_1 = arith.constant 0 : i32
    return %c0_i32, %c0_i32_0 : i32, i32
  }
  func.func @transform_2(%arg0: i32) -> (i32, i32) {
    %c0_i32 = arith.constant 0 : i32
    %c0_i32_0 = arith.constant 0 : i32
    %c0_i32_1 = arith.constant 0 : i32
    return %c0_i32, %c0_i32_0 : i32, i32
  }
  func.func @transform_3(%arg0: i32) -> (i32, i32) {
    %c0_i32 = arith.constant 0 : i32
    %c0_i32_0 = arith.constant 0 : i32
    %c0_i32_1 = arith.constant 0 : i32
    return %c0_i32, %c0_i32_0 : i32, i32
  }
  func.func @transform_4(%arg0: i32) -> (i32, i32) {
    %c0_i32 = arith.constant 0 : i32
    %c0_i32_0 = arith.constant 0 : i32
    %c0_i32_1 = arith.constant 0 : i32
    return %c0_i32, %c0_i32_0 : i32, i32
  }
  func.func @transform_5(%arg0: i32) -> (i32, i32) {
    %c0_i32 = arith.constant 0 : i32
    %c0_i32_0 = arith.constant 0 : i32
    return %arg0, %c0_i32 : i32, i32
  }
}

</mosaic_0001>

<bundles_post_ra>
// kernel: dqn_forward_pallas.3
= control target key start
LH: loop header
LB: loop body
LE: loop exit
PB: predicated region body
PF: predicated region fallthrough
CT: control target
= control target key end

     0   :  { %s3679_s12 = smov 0   ;;  %s4553_s0 = inlined_call_operand.vmem [shape: bf16[2,448,64], index: 0, kind: input, shape index: {}]   ;;  %s4554_s1 = inlined_call_operand.vmem [shape: bf16[2,2,64,32], index: 1, kind: input, shape index: {}]   ;;  %s4555_s2 = inlined_call_operand.vmem [shape: f32[1,32], index: 2, kind: input, shape index: {}]   ;;  %s4556_s3 = inlined_call_operand.vmem [shape: bf16[2,420,32], index: 3, kind: output, shape index: {}]  }
   0x1 LB: > { %s2956_s13 = sadd.s32 4294967295, %s3657_s12   ;;  %p2960_p0 = scmp.ge.s32.totalorder %s3657_s12, 1  ;;  %s3657_s12 = sphi %s3679_s12, %s13_s12  }
   0x2   : > { %p137_p1 = scmp.lt.s32.totalorder %s3657_s12, 3 }
   0x4   : > { %p138_p2 = pnand %p2960_p0, %p137_p1 }
   0x5   : > { %p161_p3 = scmp.lt.s32.totalorder (!%p138_p2), %s2956_s13, 1 }
   0x6   : > { %141 = sbr.rel (%p138_p2) target bundleno = 597 (0x255), region = 32 }
   0xb   : > { %v3548_v0 = vld [vmem:[%s4554_s1 + $0x38] sm:$0xff]  ;;  %v3547_v4 = vld [vmem:[%s4554_s1 + $0x30] sm:$0xff]  ;;  %s4560_s13 = smov (!%p161_p3, %s2956_s13), 1  ;;  %v3546_v8 = vld [vmem:[%s4554_s1 + $0x28] sm:$0xff]  ;;  %vm253_vm0 = vsmask.f32 7424 }
   0xc   : > { %v3544_v1 = vld [vmem:[%s4554_s1 + $0x18] sm:$0xff]  ;;  %381 = vmatpush.bf16.msra.mxu0 %v3548_v0  ;;  %v3543_v5 = vld [vmem:[%s4554_s1 + $0x10] sm:$0xff]  ;;  %s3638_s30 = smul.u32 224, %s4560_s13  ;;  %v3542_v9 = vld [vmem:[%s4554_s1 + $0x8] sm:$0xff]  ;;  %vm829_vm1 = vcmask 1044480   ;;  %vm349_vm2 = vcmask 523264  }
   0xd   : > { %v3564_v2 = vld [vmem:[%s4554_s1 + $0x78] sm:$0xff]  ;;  %481 = vmatpush.bf16.msra.mxu1 %v3544_v1  ;;  %v3563_v6 = vld [vmem:[%s4554_s1 + $0x70] sm:$0xff]  ;;  %v3562_v10 = vld [vmem:[%s4554_s1 + $0x68] sm:$0xff]  ;;  %vm607_vm3 = vsmask.f32 5376  ;;  %vm1323_vm4 = vcmask 1045504  }
   0xe   : > { %v3560_v3 = vld [vmem:[%s4554_s1 + $0x58] sm:$0xff]  ;;  %904 = vmatpush.bf16.msra.mxu3 %v3564_v2  ;;  %v3559_v7 = vld [vmem:[%s4554_s1 + $0x50] sm:$0xff]  ;;  %v3558_v11 = vld [vmem:[%s4554_s1 + $0x48] sm:$0xff]  ;;  %s3729_s16 = scalar_lea.vmem %s4553_s0, %s3638_s30  ;;  %s3639_s19 = smul.u32 212, %s4560_s13  ;;  %vm1723_vm5 = vcmask 1046528   ;;  %vm1030_vm6 = vcmask 257024  }
   0xf   : > { %748 = vmatpush.bf16.msra.mxu2 %v3560_v3  ;;  %v3533_v12 = vld [vmem:[%s3729_s16] sm:$0xff]  ;;  %v3733_v13 = vld [vmem:[%s3729_s16 + $0x8] sm:$0xff]  ;;  %v3737_v15 = vld [vmem:[%s3729_s16 + $0x10] sm:$0xff]  ;;  %vm1048_vm7 = vcmask 254976   ;;  %vm2013_vm8 = vcmask 257026   ;;  %vm1940_vm9 = vcmask 1041408  }
  0x10   : > { %382 = vmatpush.bf16.msra.mxu0 %v3547_v4  ;;  %v532_v14 = vld [vmem:[%s3729_s16 + $0xc] sm:$0xf]  ;;  %v816_v17 = vld [vmem:[%s3729_s16 + $0x8] sm:$0x8]  ;;  %v3545_v19 = vld [vmem:[%s4554_s1 + $0x20] sm:$0xff]  ;;  %v255_v20 = vshrl.u32 %v3533_v12, 16  ;;  %s3930_s21 = scalar_lea.vmem %s4556_s3, %s3639_s19 }
  0x11   : > { %482 = vmatpush.bf16.msra.mxu1 %v3543_v5  ;;  %v579_v16 = vunpack.c.l.b16 %v532_v14  ;;  %v531_v18 = vld [vmem:[%s3729_s16 + $0x8] sm:$0xc]  ;;  %v257_v21 = vshll.u32 %v3533_v12, 16  ;;  %v262_v22 = vshll.u32 %v3733_v13, 16  ;;  %v827_v23 = vunpack.c.l.b16 %v816_v17  ;;  %v3541_v24 = vld [vmem:[%s4554_s1] sm:$0xff]  ;;  %v3593_v37 = vld [vmem:[%s4554_s1 + $0x58] sm:$0xff] }
  0x12   : > { %905 = vmatpush.bf16.msra.mxu3 %v3563_v6  ;;  %v3561_v25 = vld [vmem:[%s4554_s1 + $0x60] sm:$0xff]  ;;  %v578_v26 = vunpack.c.l.b16 %v531_v18  ;;  %v617_v27 = vshrl.u32 %v3737_v15, 16  ;;  %v620_v28 = vshll.u32 %v3737_v15, 16  ;;  %v831_v33 = vrot.slane %v3737_v15, 3  ;;  %v3597_v38 = vld [vmem:[%s4554_s1 + $0x78] sm:$0xff]  ;;  %v3535_v51 = vld [vmem:[%s3729_s16 + $0x10] sm:$0xff] }
  0x13   : > { %749 = vmatpush.bf16.msra.mxu2 %v3559_v7  ;;  %v3557_v29 = vld [vmem:[%s4554_s1 + $0x40] sm:$0xff]  ;;  %v259_v30 = vrot.slane %v257_v21, 1  ;;  %v264_v31 = vrot.slane %v262_v22, 1  ;;  %v828_v32 = vpack.c.b16 %v579_v16, %v827_v23  ;;  %v3581_v43 = vld [vmem:[%s4554_s1 + $0x38] sm:$0xff]  ;;  %v3592_v54 = vld [vmem:[%s4554_s1 + $0x50] sm:$0xff]  ;;  %v266_v57 = vshrl.u32 %v3733_v13, 16 }
  0x14   : > { %383 = vmatpush.bf16.msra.mxu0 %v3546_v8  ;;  %v597_v34 = vpack.c.b16 %v579_v16, %v578_v26  ;;  %v619_v35 = vrot.slane %v617_v27, 2  ;;  %v622_v36 = vrot.slane %v620_v28, 3  ;;  %v3577_v46 = vld [vmem:[%s4554_s1 + $0x18] sm:$0xff]  ;;  %v3596_v55 = vld [vmem:[%s4554_s1 + $0x70] sm:$0xff]  ;;  %v270_v58 = vshll.u32 %v3535_v51, 16  ;;  %v3551_v8 = vld [vmem:[%s3729_s16 + $0x20] sm:$0xff] }
  0x15   : > { %483 = vmatpush.bf16.msra.mxu1 %v3542_v9  ;;  %v260_v39 = vor.u32 %v259_v30, %v255_v20  ;;  %v830_v40 = vrot.slane %v828_v32, 3  ;;  %v3550_v52 = vld [vmem:[%s3729_s16 + $0x18] sm:$0xff]  ;;  %v3580_v56 = vld [vmem:[%s4554_s1 + $0x30] sm:$0xff]  ;;  %v268_v62 = vor.u32 %v266_v57, %v264_v31  ;;  %v274_v9 = vshrl.u32 %v3535_v51, 16  ;;  %v3537_v22 = vld [vmem:[%s3729_s16 + $0x20] sm:$0xff] }
  0x16   : > { %906 = vmatpush.bf16.msra.mxu3 %v3562_v10  ;;  %v609_v41 = vshrl.u32 %v597_v34, 16  ;;  %v612_v42 = vshll.u32 %v597_v34, 16  ;;  %v623_v49 = vor.u32 %v622_v36, %v619_v35  ;;  %v626_v59 = vshrl.u32 %v3550_v52, 16  ;;  %v3576_v61 = vld [vmem:[%s4554_s1 + $0x10] sm:$0xff]  ;;  %v3536_v7 = vld [vmem:[%s3729_s16 + $0x18] sm:$0xff]  ;;  %v3552_v23 = vld [vmem:[%s3729_s16 + $0x28] sm:$0xff] }
  0x17   : > { %750 = vmatpush.bf16.msra.mxu2 %v3558_v11  ;;  %v265_v44 = vsel %vm253_vm0, %v260_v39, %v264_v31  ;;  %v832_v45 = vsel %vm829_vm1, %v830_v40, %v831_v33  ;;  %v629_v60 = vshll.u32 %v3550_v52, 16  ;;  %v272_v63 = vrot.slane %v270_v58, 1  ;;  %v3579_v26 = vld [vmem:[%s4554_s1 + $0x28] sm:$0xff]  ;;  %v3554_v57 = vld [vmem:[%s3729_s16 + $0x38] sm:$0xff]  ;;  %v3590_v58 = vld [vmem:[%s4554_s1 + $0x40] sm:$0xff] }
  0x18   : > { %384 = vmatpush.bf16.msra.mxu0 %v3545_v19  ;;  %v611_v47 = vrot.slane %v609_v41, 2  ;;  %v614_v48 = vrot.slane %v612_v42, 3  ;;  %v628_v0 = vrot.slane %v626_v59, 2  ;;  %v833_v2 = vrot.slane %v3550_v52, 3  ;;  %v3575_v31 = vld [vmem:[%s4554_s1 + $0x8] sm:$0xff]  ;;  %v3553_v42 = vld [vmem:[%s3729_s16 + $0x30] sm:$0xff] }
  0x19   : > { %484 = vmatpush.bf16.msra.mxu1 %v3541_v24  ;;  %v631_v1 = vrot.slane %v629_v60, 3  ;;  %v273_v3 = vsel %vm253_vm0, %v268_v62, %v272_v63  ;;  %v278_v10 = vshll.u32 %v3536_v7, 16  ;;  %v635_v11 = vshrl.u32 %v3551_v8, 16  ;;  %v3591_v24 = vld [vmem:[%s4554_s1 + $0x48] sm:$0xff]  ;;  %v3594_v59 = vld [vmem:[%s4554_s1 + $0x60] sm:$0xff] }
  0x1a   : > { %907 = vmatpush.bf16.msra.mxu3 %v3561_v25  ;;  %v615_v50 = vor.u32 %v614_v48, %v611_v47  ;;  %v834_v5 = vsel %vm829_vm1, %v831_v33, %v833_v2  ;;  %v276_v14 = vor.u32 %v274_v9, %v272_v63  ;;  %v835_v18 = vrot.slane %v3551_v8, 3  ;;  %v3595_v25 = vld [vmem:[%s4554_s1 + $0x68] sm:$0xff]  ;;  %v3540_v9 = vld [vmem:[%s3729_s16 + $0x38] sm:$0xff] }
  0x1b   : > { %751 = vmatpush.bf16.msra.mxu2 %v3557_v29  ;;  %3019 = vmatmul.msk.bf16.vlgmr.msra.gmra.mxu0 %vm349_vm2, %v265_v44  ;;  %v632_v4 = vor.u32 %v631_v1, %v628_v0  ;;  %v280_v15 = vrot.slane %v278_v10, 1  ;;  %v637_v16 = vrot.slane %v635_v11, 2  ;;  %v282_v27 = vshrl.u32 %v3536_v7, 16  ;;  %v3538_v41 = vld [vmem:[%s3729_s16 + $0x28] sm:$0xff]  ;;  %v3555_v10 = vld [vmem:[%s3729_s16 + $0x40] sm:$0xff] }
  0x1c   : > { %3044 = vmatmul.msk.bf16.vlgmr.msra.gmra.mxu1 %vm349_vm2, %v3533_v12  ;;  %1273 = vmatpush.bf16.msrb.mxu0 %v3581_v43  ;;  %v624_v53 = vsel %vm607_vm3, %v615_v50, %v623_v49  ;;  %v638_v12 = vshll.u32 %v3551_v8, 16  ;;  %v836_v20 = vsel %vm829_vm1, %v833_v2, %v835_v18  ;;  %v286_v28 = vshll.u32 %v3537_v22, 16  ;;  %v3578_v11 = vld [vmem:[%s4554_s1 + $0x20] sm:$0xff] }
  0x1d   : > { %3142 = vmatmul.msk.bf16.vlgmr.msra.gmra.mxu3 %vm349_vm2, %v832_v45  ;;  %1396 = vmatpush.bf16.msrb.mxu1 %v3577_v46  ;;  %v633_v6 = vsel %vm607_vm3, %v623_v49, %v632_v4  ;;  %v644_v29 = vshrl.u32 %v3552_v23, 16  ;;  %v647_v30 = vshll.u32 %v3552_v23, 16  ;;  %v284_v32 = vor.u32 %v282_v27, %v280_v15 }
  0x1e   : > { %1796 = vmatpush.bf16.msrb.mxu3 %v3597_v38  ;;  %3109 = vmatmul.msk.bf16.vlgmr.msra.gmra.mxu2 %vm349_vm2, %v624_v53  ;;  %v640_v17 = vrot.slane %v638_v12, 3  ;;  %v288_v33 = vrot.slane %v286_v28, 1  ;;  %v837_v36 = vrot.slane %v3552_v23, 3  ;;  %v290_v43 = vshrl.u32 %v3537_v22, 16  ;;  %v3574_v12 = vld [vmem:[%s4554_s1] sm:$0xff] }
  0x1f   : > { %1643 = vmatpush.bf16.msrb.mxu2 %v3593_v37  ;;  %v646_v34 = vrot.slane %v644_v29, 2  ;;  %v649_v35 = vrot.slane %v647_v30, 3  ;;  %v294_v44 = vshll.u32 %v3538_v41, 16  ;;  %v653_v45 = vshrl.u32 %v3553_v42, 16  ;;  %v198_v23 = vld [vmem:[%s3729_s16 + $0x44] sm:$0x7] }
  0x20   : > { %1274 = vmatpush.bf16.msrb.mxu0 %v3580_v56  ;;  %v641_v19 = vor.u32 %v640_v17, %v637_v16  ;;  %v289_v37 = vsel %vm253_vm0, %v284_v32, %v288_v33  ;;  %v838_v39 = vsel %vm829_vm1, %v835_v18, %v837_v36  ;;  %v656_v46 = vshll.u32 %v3553_v42, 16  ;;  %v3539_v56 = vld [vmem:[%s3729_s16 + $0x30] sm:$0xff] }
  0x21   : > { %1397 = vmatpush.bf16.msrb.mxu1 %v3576_v61  ;;  %v650_v38 = vor.u32 %v649_v35, %v646_v34  ;;  %v292_v47 = vor.u32 %v290_v43, %v288_v33  ;;  %v296_v48 = vrot.slane %v294_v44, 1  ;;  %v655_v49 = vrot.slane %v653_v45, 2  ;;  %v549_v44 = vld [vmem:[%s3729_s16 + $0x50] sm:$0x1] }
  0x22   : > { %1797 = vmatpush.bf16.msrb.mxu3 %v3596_v55  ;;  %v642_v21 = vsel %vm607_vm3, %v632_v4, %v641_v19  ;;  %v658_v50 = vrot.slane %v656_v46, 3  ;;  %v298_v60 = vshrl.u32 %v3538_v41, 16  ;;  %v302_v61 = vshll.u32 %v3539_v56, 16 }
  0x23   : > { %1644 = vmatpush.bf16.msrb.mxu2 %v3592_v54  ;;  %v651_v40 = vsel %vm607_vm3, %v641_v19, %v650_v38  ;;  %v297_v52 = vsel %vm253_vm0, %v292_v47, %v296_v48  ;;  %v662_v62 = vshrl.u32 %v3554_v57, 16  ;;  %v665_v63 = vshll.u32 %v3554_v57, 16  ;;  %v189_v47 = vld [vmem:[%s3729_s16 + $0x44] sm:$0x3] }
  0x24   : > { %1275 = vmatpush.bf16.msrb.mxu0 %v3579_v26  ;;  %v659_v53 = vor.u32 %v658_v50, %v655_v49  ;;  %v300_v0 = vor.u32 %v298_v60, %v296_v48  ;;  %v304_v1 = vrot.slane %v302_v61, 1  ;;  %v841_v4 = vrot.slane %v3554_v57, 3  ;;  %v3889_v60 = vld [vmem:[%s3729_s16 + $0x4c] sm:$0xff] }
  0x25   : > { %1398 = vmatpush.bf16.msrb.mxu1 %v3575_v31  ;;  %v664_v2 = vrot.slane %v662_v62, 2  ;;  %v671_v16 = vshrl.u32 %v3555_v10, 16  ;;  %v674_v17 = vshll.u32 %v3555_v10, 16  ;;  %v243_v27 = vunpack.c.l.b16 %v198_v23  ;;  %v3556_v31 = vld [vmem:[%s3729_s16 + $0x48] sm:$0xff] }
  0x26   : > { %1798 = vmatpush.bf16.msrb.mxu3 %v3595_v25  ;;  %v660_v55 = vsel %vm607_vm3, %v650_v38, %v659_v53  ;;  %v314_v32 = vshrl.u32 %v3540_v9, 16  ;;  %v680_v34 = vshrl.u32 %v3556_v31, 16  ;;  %v683_v35 = vshll.u32 %v3556_v31, 16 }
  0x27   : > { %1645 = vmatpush.bf16.msrb.mxu2 %v3591_v24  ;;  %v673_v19 = vrot.slane %v671_v16, 2  ;;  %v596_v46 = vunpack.c.l.b16 %v549_v44  ;;  %v432_v50 = vunpack.c.l.b16 %v189_v47  ;;  %vm1941_vm10 = vcmask 1045508  }
  0x28   : > { %1276 = vmatpush.bf16.msrb.mxu0 %v3578_v11  ;;  %v682_v38 = vrot.slane %v680_v34, 2  ;;  %v3636_v11 = vld [vmem:[%s3729_s16 + $0x50] sm:$0xe]  ;;  %vm4255_vm11 = vmor %vm1940_vm9, %vm1941_vm10 }
  0x29   : > { %1399 = vmatpush.bf16.msrb.mxu1 %v3574_v12  ;;  %v606_v48 = vpack.c.b16 %v596_v46, %v596_v46 }
  0x2a   : > { %1799 = vmatpush.bf16.msrb.mxu3 %v3594_v59 }
  0x2b   : > { %3020 = vmatmul.msk.bf16.gmra.mxu0 %vm349_vm2, %v273_v3  ;;  %1646 = vmatpush.bf16.msrb.mxu2 %v3590_v58  ;;  %v667_v3 = vrot.slane %v665_v63, 3 }
  0x2c   : > { %3045 = vmatmul.msk.bf16.gmra.mxu1 %vm349_vm2, %v3733_v13  ;;  %v281_v13 = vsel %vm253_vm0, %v276_v14, %v280_v15  ;;  %v306_v14 = vshrl.u32 %v3539_v56, 16  ;;  %v310_v15 = vshll.u32 %v3540_v9, 16 }
  0x2d   : > { %3143 = vmatmul.msk.bf16.gmra.mxu3 %vm349_vm2, %v834_v5  ;;  %v305_v5 = vsel %vm253_vm0, %v300_v0, %v304_v1 }
  0x2e   : > { %3110 = vmatmul.msk.bf16.gmra.mxu2 %vm349_vm2, %v633_v6  ;;  %v668_v6 = vor.u32 %v667_v3, %v664_v2  ;;  %v308_v18 = vor.u32 %v306_v14, %v304_v1  ;;  %v1142_v3 = vshrl.u32 %v3889_v60, 16 }
  0x30   : > { %v669_v8 = vsel %vm607_vm3, %v659_v53, %v668_v6  ;;  %v689_v53 = vshll.u32 %v606_v48, 16  ;;  %v1144_v16 = vrot.slane %v1142_v3, 2 }
  0x32   : > { %v691_v63 = vrot.slane %v689_v53, 3 }
  0x3b   : > { %3021 = vmatmul.msk.bf16.gmra.mxu0 %vm349_vm2, %v281_v13  ;;  %v312_v13 = vrot.slane %v310_v15, 1 }
  0x3c   : > { %3046 = vmatmul.msk.bf16.gmra.mxu1 %vm349_vm2, %v3535_v51  ;;  %v839_v51 = vrot.slane %v3553_v42, 3 }
  0x3d   : > { %3144 = vmatmul.msk.bf16.gmra.mxu3 %vm349_vm2, %v836_v20  ;;  %v676_v20 = vrot.slane %v674_v17, 3  ;;  %v313_v24 = vsel %vm253_vm0, %v308_v18, %v312_v13 }
  0x3e   : > { %3111 = vmatmul.msk.bf16.gmra.mxu2 %vm349_vm2, %v642_v21  ;;  %v840_v54 = vsel %vm829_vm1, %v837_v36, %v839_v51  ;;  %v843_v21 = vrot.slane %v3555_v10, 3  ;;  %v316_v36 = vor.u32 %v314_v32, %v312_v13  ;;  %v3635_v10 = vld [vmem:[%s3729_s16 + $0x50] sm:$0xf0] }
  0x3f   : > { %v677_v25 = vor.u32 %v676_v20, %v673_v19  ;;  %v3909_v19 = vld [vmem:[%s3729_s16 + $0x58] sm:$0xff] }
  0x40   : > { %v844_v28 = vsel %vm829_vm1, %v841_v4, %v843_v21  ;;  %v1725_v34 = vrot.slane %v3909_v19, 1 }
  0x41   : > { %v678_v29 = vsel %vm607_vm3, %v668_v6, %v677_v25  ;;  %v3634_v6 = vld [vmem:[%s3729_s16 + $0x50] sm:$0xff]  }
  0x42   : > { %v1520_v20 = vshll.u32 %v3634_v6, 16 }
  0x4b   : > { %3022 = vmatmul.msk.bf16.gmra.mxu0 %vm349_vm2, %v289_v37 }
  0x4c   : > { %3047 = vmatmul.msk.bf16.gmra.mxu1 %vm349_vm2, %v3536_v7  ;;  %v842_v7 = vsel %vm829_vm1, %v839_v51, %v841_v4  ;;  %v3161_v51 = vld [vmem:[%s3729_s16 + $0x44] sm:$0xc]  ;;  %v1145_v4 = vshll.u32 %v3889_v60, 16 }
  0x4d   : > { %3145 = vmatmul.msk.bf16.gmra.mxu3 %vm349_vm2, %v838_v39  ;;  %v685_v39 = vrot.slane %v683_v35, 3 }
  0x4e   : > { %3112 = vmatmul.msk.bf16.gmra.mxu2 %vm349_vm2, %v651_v40  ;;  %v845_v40 = vrot.slane %v3556_v31, 3  ;;  %v1147_v17 = vrot.slane %v1145_v4, 3  ;;  %v1525_v31 = vshll.u32 %v3909_v19, 16  ;;  %v1529_v4 = vshrl.u32 %v3909_v19, 16 }
  0x4f   : > { %v686_v42 = vor.u32 %v685_v39, %v682_v38 }
  0x50   : > { %v846_v43 = vsel %vm829_vm1, %v843_v21, %v845_v40  ;;  %v3637_v21 = vor.u32 %v3636_v11, %v3635_v10 }
  0x51   : > { %v687_v45 = vsel %vm607_vm3, %v677_v25, %v686_v42 }
  0x5b   : > { %3023 = vmatmul.msk.bf16.gmra.mxu0 %vm349_vm2, %v297_v52  ;;  %v3565_v52 = vld [vmem:[%s3729_s16 + $0x44] sm:$0xf0] }
  0x5c   : > { %3048 = vmatmul.msk.bf16.gmra.mxu1 %vm349_vm2, %v3537_v22  ;;  %v188_v22 = vld [vmem:[%s3729_s16 + $0x40] sm:$0xf]  ;;  %v3162_v57 = vor.u32 %v3565_v52, %v3161_v51 }
  0x5d   : > { %3146 = vmatmul.msk.bf16.gmra.mxu3 %vm349_vm2, %v840_v54  ;;  %v242_v26 = vunpack.c.l.b16 %v188_v22  ;;  %v847_v54 = vrot.slane %v606_v48, 3 }
  0x5e   : > { %3113 = vmatmul.msk.bf16.gmra.mxu2 %vm349_vm2, %v660_v55  ;;  %v3625_v55 = vld [vmem:[%s4554_s1 + $0x58] sm:$0xff]  ;;  %v1134_v1 = vshrl.u32 %v3162_v57, 16  ;;  %v1137_v2 = vshll.u32 %v3162_v57, 16 }
  0x5f   : > { %v252_v30 = vpack.c.b16 %v243_v27, %v242_v26  ;;  %v433_v59 = vpack.c.b16 %v432_v50, %v242_v26  ;;  %2603 = vmatpush.bf16.msra.mxu2 %v3625_v55  ;;  %v848_v0 = vsel %vm829_vm1, %v845_v40, %v847_v54  ;;  %v1148_v26 = vor.u32 %v1147_v17, %v1144_v16  ;;  %v3960_v17 = vld [vmem:[%s3729_s16 + $0x5c] sm:$0xff] }
  0x60   : > { %v1139_v15 = vrot.slane %v1137_v2, 3  ;;  %v1324_v27 = vrot.slane %v3162_v57, 2 }
  0x61   : > { %v318_v33 = vshll.u32 %v252_v30, 16  ;;  %v322_v49 = vshrl.u32 %v252_v30, 16  ;;  %v1522_v30 = vrot.slane %v1520_v20, 1 }
  0x63   : > { %v320_v37 = vrot.slane %v318_v33, 1  ;;  %v1724_v33 = vrot.slane %v3637_v21, 1 }
  0x65   : > { %v324_v58 = vor.u32 %v322_v49, %v320_v37  ;;  %v1726_v46 = vsel %vm1723_vm5, %v1724_v33, %v1725_v34 }
  0x6b   : > { %3024 = vmatmul.msk.bf16.gmra.mxu0 %vm349_vm2, %v305_v5  ;;  %v692_v5 = vsel %vm607_vm3, %v686_v42, %v691_v63  ;;  %v1527_v42 = vrot.slane %v1525_v31, 1  ;;  %v3608_v31 = vld [vmem:[%s4554_s1 + $0x10] sm:$0xff] }
  0x6c   : > { %3049 = vmatmul.msk.bf16.gmra.mxu1 %vm349_vm2, %v3538_v41  ;;  %v321_v41 = vsel %vm253_vm0, %v316_v36, %v320_v37 }
  0x6d   : > { %3147 = vmatmul.msk.bf16.gmra.mxu3 %vm349_vm2, %v842_v7  ;;  %v3613_v7 = vld [vmem:[%s4554_s1 + $0x38] sm:$0xff] }
  0x6e   : > { %3114 = vmatmul.msk.bf16.gmra.mxu2 %vm349_vm2, %v669_v8  ;;  %v3609_v8 = vld [vmem:[%s4554_s1 + $0x18] sm:$0xff]  ;;  %2238 = vmatpush.bf16.msra.mxu0 %v3613_v7 }
  0x6f   : > { %2338 = vmatpush.bf16.msra.mxu1 %v3609_v8 }
  0x73   : > { %2339 = vmatpush.bf16.msra.mxu1 %v3608_v31 }
  0x7b   : > { %3025 = vmatmul.msk.bf16.gmra.mxu0 %vm349_vm2, %v313_v24  ;;  %v3914_v24 = vld [vmem:[%s4555_s2] ss:$0 sm:$0xff] }
  0x7c   : > { %3050 = vmatmul.msk.bf16.gmra.mxu1 %vm349_vm2, %v3539_v56  ;;  %v3629_v56 = vld [vmem:[%s4554_s1 + $0x78] sm:$0xff] }
  0x7d   : > { %3148 = vmatmul.msk.bf16.gmra.mxu3 %vm349_vm2, %v844_v28  ;;  %v1325_v28 = vrot.slane %v3889_v60, 2 }
  0x7e   : > { %3115 = vmatmul.msk.bf16.gmra.mxu2 %vm349_vm2, %v678_v29  ;;  %2757 = vmatpush.bf16.msra.mxu3 %v3629_v56  ;;  %v1518_v29 = vshrl.u32 %v3634_v6, 16 }
  0x7f   : > { %v1326_v40 = vsel %vm1323_vm4, %v1324_v27, %v1325_v28 }
  0x8b   : > { %3026 = vmatmul.msk.bf16.gmra.mxu0 %vm349_vm2, %v321_v41  ;;  %v1523_v41 = vor.u32 %v1522_v30, %v1518_v29  ;;  %v3628_v29 = vld [vmem:[%s4554_s1 + $0x70] sm:$0xff] }
  0x8c   : > { %3051 = vmatmul.msk.bf16.gmra.mxu1 %vm349_vm2, %v3540_v9  ;;  %v1136_v9 = vrot.slane %v1134_v1, 2  ;;  %v3612_v30 = vld [vmem:[%s4554_s1 + $0x30] sm:$0xff]  ;;  %2758 = vmatpush.bf16.msra.mxu3 %v3628_v29 }
  0x8d   : > { %3149 = vmatmul.msk.bf16.gmra.mxu3 %vm349_vm2, %v846_v43  ;;  %v3924_v43 = vld [vmem:[%s3729_s16 + $0x54] sm:$0xff]  ;;  %v1528_v50 = vsel %vm253_vm0, %v1523_v41, %v1527_v42  ;;  %2239 = vmatpush.bf16.msra.mxu0 %v3612_v30 }
  0x8e   : > { %3116 = vmatmul.msk.bf16.gmra.mxu2 %vm349_vm2, %v687_v45  ;;  %v1140_v25 = vor.u32 %v1139_v15, %v1136_v9  ;;  %v1151_v51 = vshrl.u32 %v3924_v43, 16  ;;  %v1154_v52 = vshll.u32 %v3924_v43, 16  ;;  %v1327_v3 = vrot.slane %v3924_v43, 2 }
  0x8f   : > { %v1531_v15 = vor.u32 %v1529_v4, %v1527_v42 }
  0x90   : > { %v1149_v39 = vsel %vm607_vm3, %v1140_v25, %v1148_v26  ;;  %v1156_v60 = vrot.slane %v1154_v52, 3  ;;  %v1160_v25 = vshrl.u32 %v3960_v17, 16 }
  0x98   : > { %v386_v61 = vpop.f32.mrf.mxu0 }
  0x99   : > { %v486_v62 = vpop.f32.mrf.mxu1 }
  0x9a   : > { %v487_v12 = vadd.f32 %v486_v62, %v386_v61  ;;  %v3943_v61 = vld [vmem:[%s3729_s16 + $0x60] sm:$0xff] }
  0x9b   : > { %3027 = vmatmul.msk.bf16.gmra.mxu0 %vm349_vm2, %v324_v58  ;;  %v1727_v7 = vrot.slane %v3943_v61, 1 }
  0x9c   : > { %3052 = vmatmul.msk.bf16.gmra.mxu1 %vm349_vm2, %v433_v59  ;;  %v1153_v59 = vrot.slane %v1151_v51, 2 }
  0x9d   : > { %3150 = vmatmul.msk.bf16.gmra.mxu3 %vm349_vm2, %v848_v0  ;;  %v1728_v19 = vsel %vm1723_vm5, %v1725_v34, %v1727_v7 }
  0x9e   : > { %3117 = vmatmul.msk.bf16.gmra.mxu2 %vm349_vm2, %v692_v5  ;;  %v3945_v2 = vor.u32 %v1156_v60, %v1153_v59  ;;  %v1533_v5 = vshll.u32 %v3943_v61, 16  ;;  %v4003_v59 = vld [vmem:[%s3729_s16 + $0x64] sm:$0xff] }
  0xa0   : > { %v909_v14 = vpop.f32.mrf.mxu3  ;;  %v388_v18 = vpop.f32.mrf.mxu0  ;;  %v1535_v16 = vrot.slane %v1533_v5, 1 }
  0xa1   : > { %v488_v13 = vpop.f32.mrf.mxu1  ;;  %v753_v22 = vpop.f32.mrf.mxu2 }
  0xa2   : > { %v798_v23 = vadd.f32 %v753_v22, %v487_v12  ;;  %v489_v45 = vadd.f32 %v488_v13, %v388_v18  ;;  %v1158_v12 = vsel %vm607_vm3, %v1148_v26, %v3945_v2  ;;  %v1163_v26 = vshll.u32 %v3960_v17, 16 }
  0xa4   : > { %v954_v32 = vadd.f32 %v909_v14, %v798_v23  ;;  %v1328_v14 = vsel %vm1323_vm4, %v1325_v28, %v1327_v3  ;;  %v1536_v23 = vsel %vm253_vm0, %v1531_v15, %v1535_v16  ;;  %v3624_v28 = vld [vmem:[%s4554_s1 + $0x50] sm:$0xff] }
  0xa5   : > { %2604 = vmatpush.bf16.msra.mxu2 %v3624_v28 }
  0xa6   : > { %v976_v35 = vadd.f32 %v3914_v24, %v954_v32 }
  0xa8   : > { %v911_v36 = vpop.f32.mrf.mxu3  ;;  %v391_v37 = vpop.f32.mrf.mxu0  ;;  %v994_v44 = vmax.f32 %v976_v35, 0.0 }
  0xa9   : > { %v491_v38 = vpop.f32.mrf.mxu1  ;;  %v755_v47 = vpop.f32.mrf.mxu2 }
  0xaa   : > { %v1012_v48 = vpack.c.bf16 %v994_v44, %v994_v44  ;;  %v799_v49 = vadd.f32 %v755_v47, %v489_v45  ;;  %v492_v55 = vadd.f32 %v491_v38, %v391_v37  ;;  %v1162_v37 = vrot.slane %v1160_v25, 2 }
  0xab   : > { %3211 = vmatmul.msk.bf16.vlgmr.msrb.gmra.mxu0 %vm349_vm2, %v1149_v39  ;;  %v1165_v38 = vrot.slane %v1163_v26, 3  ;;  %v3988_v39 = vld [vmem:[%s3729_s16 + $0x68] sm:$0xff]  ;;  %v1537_v47 = vshrl.u32 %v3943_v61, 16 }
  0xac   : > { %3236 = vmatmul.msk.bf16.vlgmr.msrb.gmra.mxu1 %vm349_vm2, %v1326_v40  ;;  %1031 = vst.msk [vmem:[%s3930_s21] sm:$0xf] %vm1030_vm6, %v1012_v48  ;;  %v955_v53 = vadd.f32 %v911_v36, %v799_v49  ;;  %v1541_v48 = vshll.u32 %v3988_v39, 16 }
  0xad   : > { %3334 = vmatmul.msk.bf16.vlgmr.msrb.gmra.mxu3 %vm349_vm2, %v1726_v46  ;;  %v1166_v45 = vor.u32 %v1165_v38, %v1162_v37  ;;  %v1329_v46 = vrot.slane %v3960_v17, 2 }
  0xae   : > { %v977_v54 = vadd.f32 %v3914_v24, %v955_v53  ;;  %3301 = vmatmul.msk.bf16.vlgmr.msrb.gmra.mxu2 %vm349_vm2, %v1528_v50  ;;  %v1729_v50 = vrot.slane %v3988_v39, 1 }
  0xb0   : > { %v914_v56 = vpop.f32.mrf.mxu3  ;;  %v393_v57 = vpop.f32.mrf.mxu0  ;;  %v995_v62 = vmax.f32 %v977_v54, 0.0 }
  0xb1   : > { %v493_v58 = vpop.f32.mrf.mxu1  ;;  %v758_v63 = vpop.f32.mrf.mxu2 }
  0xb2   : > { %v1013_v0 = vpack.c.bf16 %v995_v62, %v995_v62  ;;  %v800_v1 = vadd.f32 %v758_v63, %v492_v55  ;;  %v494_v13 = vadd.f32 %v493_v58, %v393_v57  ;;  %v1167_v55 = vsel %vm607_vm3, %v3945_v2, %v1166_v45 }
  0xb3   : > { %v1539_v57 = vor.u32 %v1537_v47, %v1535_v16  ;;  %v1543_v58 = vrot.slane %v1541_v48, 1  ;;  %v1730_v63 = vsel %vm1723_vm5, %v1727_v7, %v1729_v50  ;;  %v1169_v2 = vshrl.u32 %v4003_v59, 16 }
  0xb4   : > { %1032 = vst.msk [vmem:[%s3930_s21 + $0x4] sm:$0xf] %vm1030_vm6, %v1013_v0  ;;  %v956_v6 = vadd.f32 %v914_v56, %v800_v1  ;;  %v1330_v56 = vsel %vm1323_vm4, %v1327_v3, %v1329_v46  ;;  %v1172_v3 = vshll.u32 %v4003_v59, 16 }
  0xb5   : > { %v1544_v43 = vsel %vm253_vm0, %v1539_v57, %v1543_v58 }
  0xb6   : > { %v978_v8 = vadd.f32 %v3914_v24, %v956_v6 }
  0xb8   : > { %v916_v9 = vpop.f32.mrf.mxu3  ;;  %v396_v10 = vpop.f32.mrf.mxu0  ;;  %v996_v18 = vmax.f32 %v978_v8, 0.0 }
  0xb9   : > { %v496_v11 = vpop.f32.mrf.mxu1  ;;  %v760_v20 = vpop.f32.mrf.mxu2 }
  0xba   : > { %v1014_v21 = vpack.c.bf16 %v996_v18, %v996_v18  ;;  %v801_v22 = vadd.f32 %v760_v20, %v494_v13  ;;  %v497_v33 = vadd.f32 %v496_v11, %v396_v10  ;;  %v1171_v10 = vrot.slane %v1169_v2, 2 }
  0xbb   : > { %3212 = vmatmul.msk.bf16.gmra.mxu0 %vm349_vm2, %v1158_v12  ;;  %v1174_v11 = vrot.slane %v1172_v3, 3  ;;  %v4019_v12 = vld [vmem:[%s3729_s16 + $0x70] sm:$0xff]  ;;  %v1331_v13 = vrot.slane %v4003_v59, 2 }
  0xbc   : > { %3237 = vmatmul.msk.bf16.gmra.mxu1 %vm349_vm2, %v1328_v14  ;;  %1033 = vst.msk [vmem:[%s3930_s21 + $0x8] sm:$0xf] %vm1030_vm6, %v1014_v21  ;;  %v957_v27 = vadd.f32 %v916_v9, %v801_v22  ;;  %v1549_v20 = vshll.u32 %v4019_v12, 16  ;;  %v1731_v22 = vrot.slane %v4019_v12, 1 }
  0xbd   : > { %3335 = vmatmul.msk.bf16.gmra.mxu3 %vm349_vm2, %v1728_v19  ;;  %v4021_v18 = vor.u32 %v1174_v11, %v1171_v10  ;;  %v1545_v19 = vshrl.u32 %v3988_v39, 16  ;;  %v1332_v29 = vsel %vm1323_vm4, %v1329_v46, %v1331_v13  ;;  %v4079_v10 = vld [vmem:[%s3729_s16 + $0x74] sm:$0xff] }
  0xbe   : > { %v979_v32 = vadd.f32 %v3914_v24, %v957_v27  ;;  %3302 = vmatmul.msk.bf16.gmra.mxu2 %vm349_vm2, %v1536_v23  ;;  %v1551_v31 = vrot.slane %v1549_v20, 1 }
  0xbf   : > { %v1176_v28 = vsel %vm607_vm3, %v1166_v45, %v4021_v18  ;;  %v1547_v30 = vor.u32 %v1545_v19, %v1543_v58  ;;  %v3627_v45 = vld [vmem:[%s4554_s1 + $0x68] sm:$0xff] }
  0xc0   : > { %v919_v34 = vpop.f32.mrf.mxu3  ;;  %v398_v35 = vpop.f32.mrf.mxu0  ;;  %v997_v40 = vmax.f32 %v979_v32, 0.0  ;;  %v4036_v32 = vld [vmem:[%s3729_s16 + $0x6c] sm:$0xff]  ;;  %2759 = vmatpush.bf16.msra.mxu3 %v3627_v45 }
  0xc1   : > { %v498_v36 = vpop.f32.mrf.mxu1  ;;  %v763_v41 = vpop.f32.mrf.mxu2  ;;  %v1552_v39 = vsel %vm253_vm0, %v1547_v30, %v1551_v31 }
  0xc2   : > { %v1015_v42 = vpack.c.bf16 %v997_v40, %v997_v40  ;;  %v802_v44 = vadd.f32 %v763_v41, %v497_v33  ;;  %v499_v62 = vadd.f32 %v498_v36, %v398_v35  ;;  %v1732_v35 = vsel %vm1723_vm5, %v1729_v50, %v1731_v22 }
  0xc3   : > { %v1178_v40 = vshrl.u32 %v4036_v32, 16  ;;  %v1181_v41 = vshll.u32 %v4036_v32, 16 }
  0xc4   : > { %1034 = vst.msk [vmem:[%s3930_s21 + $0xc] sm:$0xf] %vm1030_vm6, %v1015_v42  ;;  %v958_v49 = vadd.f32 %v919_v34, %v802_v44  ;;  %v3623_v44 = vld [vmem:[%s4554_s1 + $0x48] sm:$0xff] }
  0xc5   : > { %2605 = vmatpush.bf16.msra.mxu2 %v3623_v44 }
  0xc6   : > { %v980_v51 = vadd.f32 %v3914_v24, %v958_v49 }
  0xc8   : > { %v921_v52 = vpop.f32.mrf.mxu3  ;;  %v401_v53 = vpop.f32.mrf.mxu0  ;;  %v998_v60 = vmax.f32 %v980_v51, 0.0  ;;  %v1180_v51 = vrot.slane %v1178_v40, 2 }
  0xc9   : > { %v501_v54 = vpop.f32.mrf.mxu1  ;;  %v765_v0 = vpop.f32.mrf.mxu2 }
  0xca   : > { %v1016_v1 = vpack.c.bf16 %v998_v60, %v998_v60  ;;  %v803_v4 = vadd.f32 %v765_v0, %v499_v62  ;;  %v502_v6 = vadd.f32 %v501_v54, %v401_v53  ;;  %v4058_v53 = vld [vmem:[%s3729_s16 + $0x78] sm:$0xff]  ;;  %v1333_v60 = vrot.slane %v4036_v32, 2 }
  0xcb   : > { %3213 = vmatmul.msk.bf16.gmra.mxu0 %vm349_vm2, %v1167_v55  ;;  %v1553_v62 = vshrl.u32 %v4019_v12, 16 }
  0xcc   : > { %3238 = vmatmul.msk.bf16.gmra.mxu1 %vm349_vm2, %v1330_v56  ;;  %1035 = vst.msk [vmem:[%s3930_s21 + $0x10] sm:$0xf] %vm1030_vm6, %v1016_v1  ;;  %v959_v61 = vadd.f32 %v921_v52, %v803_v4  ;;  %v1183_v52 = vrot.slane %v1181_v41, 3  ;;  %v1733_v1 = vrot.slane %v4058_v53, 1  ;;  %v3611_v4 = vld [vmem:[%s4554_s1 + $0x28] sm:$0xff] }
  0xcd   : > { %3336 = vmatmul.msk.bf16.gmra.mxu3 %vm349_vm2, %v1730_v63  ;;  %v1557_v63 = vshll.u32 %v4058_v53, 16  ;;  %2240 = vmatpush.bf16.msra.mxu0 %v3611_v4 }
  0xce   : > { %v981_v5 = vadd.f32 %v3914_v24, %v959_v61  ;;  %3303 = vmatmul.msk.bf16.gmra.mxu2 %vm349_vm2, %v1544_v43  ;;  %v1184_v58 = vor.u32 %v1183_v52, %v1180_v51  ;;  %v3607_v43 = vld [vmem:[%s4554_s1 + $0x8] sm:$0xff] }
  0xcf   : > { %2340 = vmatpush.bf16.msra.mxu1 %v3607_v43 }
  0xd0   : > { %v924_v7 = vpop.f32.mrf.mxu3  ;;  %v403_v8 = vpop.f32.mrf.mxu0  ;;  %v999_v14 = vmax.f32 %v981_v5, 0.0 }
  0xd1   : > { %v503_v9 = vpop.f32.mrf.mxu1  ;;  %v768_v15 = vpop.f32.mrf.mxu2 }
  0xd2   : > { %v1017_v16 = vpack.c.bf16 %v999_v14, %v999_v14  ;;  %v804_v17 = vadd.f32 %v768_v15, %v502_v6  ;;  %v504_v34 = vadd.f32 %v503_v9, %v403_v8  ;;  %v1185_v6 = vsel %vm607_vm3, %v4021_v18, %v1184_v58 }
  0xd3   : > { %v1555_v8 = vor.u32 %v1553_v62, %v1551_v31  ;;  %v1559_v9 = vrot.slane %v1557_v63, 1  ;;  %v1734_v15 = vsel %vm1723_vm5, %v1731_v22, %v1733_v1  ;;  %v1187_v18 = vshrl.u32 %v4079_v10, 16 }
  0xd4   : > { %1036 = vst.msk [vmem:[%s3930_s21 + $0x14] sm:$0xf] %vm1030_vm6, %v1017_v16  ;;  %v960_v21 = vadd.f32 %v924_v7, %v804_v17  ;;  %v1334_v7 = vsel %vm1323_vm4, %v1331_v13, %v1333_v60  ;;  %v1190_v13 = vshll.u32 %v4079_v10, 16 }
  0xd5   : > { %v1560_v59 = vsel %vm253_vm0, %v1555_v8, %v1559_v9 }
  0xd6   : > { %v982_v23 = vadd.f32 %v3914_v24, %v960_v21 }
  0xd8   : > { %v926_v25 = vpop.f32.mrf.mxu3  ;;  %v406_v26 = vpop.f32.mrf.mxu0  ;;  %v1000_v33 = vmax.f32 %v982_v23, 0.0 }
  0xd9   : > { %v506_v27 = vpop.f32.mrf.mxu1  ;;  %v770_v36 = vpop.f32.mrf.mxu2 }
  0xda   : > { %v1018_v37 = vpack.c.bf16 %v1000_v33, %v1000_v33  ;;  %v805_v38 = vadd.f32 %v770_v36, %v504_v34  ;;  %v507_v47 = vadd.f32 %v506_v27, %v406_v26  ;;  %v1189_v26 = vrot.slane %v1187_v18, 2 }
  0xdb   : > { %3214 = vmatmul.msk.bf16.gmra.mxu0 %vm349_vm2, %v1176_v28  ;;  %v1192_v27 = vrot.slane %v1190_v13, 3  ;;  %v4095_v28 = vld [vmem:[%s3729_s16 + $0x80] sm:$0xff]  ;;  %v1335_v34 = vrot.slane %v4079_v10, 2 }
  0xdc   : > { %3239 = vmatmul.msk.bf16.gmra.mxu1 %vm349_vm2, %v1332_v29  ;;  %1037 = vst.msk [vmem:[%s3930_s21 + $0x18] sm:$0xf] %vm1030_vm6, %v1018_v37  ;;  %v961_v42 = vadd.f32 %v926_v25, %v805_v38  ;;  %v1565_v36 = vshll.u32 %v4095_v28, 16  ;;  %v1735_v38 = vrot.slane %v4095_v28, 1  ;;  %v4147_v13 = vld [vmem:[%s3729_s16 + $0x84] sm:$0xff] }
  0xdd   : > { %3337 = vmatmul.msk.bf16.gmra.mxu3 %vm349_vm2, %v1732_v35  ;;  %v1193_v33 = vor.u32 %v1192_v27, %v1189_v26  ;;  %v1561_v35 = vshrl.u32 %v4058_v53, 16  ;;  %v1336_v45 = vsel %vm1323_vm4, %v1333_v60, %v1335_v34 }
  0xde   : > { %v983_v46 = vadd.f32 %v3914_v24, %v961_v42  ;;  %3304 = vmatmul.msk.bf16.gmra.mxu2 %vm349_vm2, %v1552_v39  ;;  %v1736_v51 = vsel %vm1723_vm5, %v1733_v1, %v1735_v38 }
  0xdf   : > { %v1194_v44 = vsel %vm607_vm3, %v1184_v58, %v1193_v33 }
  0xe0   : > { %v929_v48 = vpop.f32.mrf.mxu3  ;;  %v408_v49 = vpop.f32.mrf.mxu0  ;;  %v1001_v54 = vmax.f32 %v983_v46, 0.0  ;;  %v1563_v46 = vor.u32 %v1561_v35, %v1559_v9  ;;  %v1569_v9 = vshrl.u32 %v4095_v28, 16 }
  0xe1   : > { %v508_v50 = vpop.f32.mrf.mxu1  ;;  %v773_v55 = vpop.f32.mrf.mxu2 }
  0xe2   : > { %v1019_v56 = vpack.c.bf16 %v1001_v54, %v1001_v54  ;;  %v806_v57 = vadd.f32 %v773_v55, %v507_v47  ;;  %v509_v14 = vadd.f32 %v508_v50, %v408_v49  ;;  %v1567_v47 = vrot.slane %v1565_v36, 1  ;;  %v3283_v36 = vld [vmem:[%s3729_s16 + $0x90] sm:$0xf] }
  0xe4   : > { %1038 = vst.msk [vmem:[%s3930_s21 + $0x1c] sm:$0xf] %vm1030_vm6, %v1019_v56  ;;  %v962_v0 = vadd.f32 %v929_v48, %v806_v57  ;;  %v4107_v48 = vld [vmem:[%s3729_s16 + $0x7c] sm:$0xff]  ;;  %v1568_v55 = vsel %vm253_vm0, %v1563_v46, %v1567_v47 }
  0xe5   : > { %v1196_v56 = vshrl.u32 %v4107_v48, 16  ;;  %v1199_v57 = vshll.u32 %v4107_v48, 16  ;;  %v1337_v8 = vrot.slane %v4107_v48, 2 }
  0xe6   : > { %v984_v2 = vadd.f32 %v3914_v24, %v962_v0 }
  0xe7   : > { %v1198_v4 = vrot.slane %v1196_v56, 2  ;;  %v1201_v43 = vrot.slane %v1199_v57, 3 }
  0xe8   : > { %v931_v3 = vpop.f32.mrf.mxu3  ;;  %v411_v61 = vpop.f32.mrf.mxu0  ;;  %v1002_v11 = vmax.f32 %v984_v2, 0.0  ;;  %v4123_v2 = vld [vmem:[%s3729_s16 + $0x88] sm:$0xff] }
  0xe9   : > { %v511_v5 = vpop.f32.mrf.mxu1  ;;  %v775_v16 = vpop.f32.mrf.mxu2  ;;  %v1573_v10 = vshll.u32 %v4123_v2, 16 }
  0xea   : > { %v1020_v17 = vpack.c.bf16 %v1002_v11, %v1002_v11  ;;  %v807_v19 = vadd.f32 %v775_v16, %v509_v14  ;;  %v512_v21 = vadd.f32 %v511_v5, %v411_v61  ;;  %v1737_v14 = vrot.slane %v4123_v2, 1  ;;  %v3626_v16 = vld [vmem:[%s4554_s1 + $0x60] sm:$0xff] }
  0xeb   : > { %3215 = vmatmul.msk.bf16.gmra.mxu0 %vm349_vm2, %v1185_v6  ;;  %2760 = vmatpush.bf16.msra.mxu3 %v3626_v16 }
  0xec   : > { %3240 = vmatmul.msk.bf16.gmra.mxu1 %vm349_vm2, %v1334_v7  ;;  %1039 = vst.msk [vmem:[%s3930_s21 + $0x20] sm:$0xf] %vm1030_vm6, %v1020_v17  ;;  %v963_v12 = vadd.f32 %v931_v3, %v807_v19  ;;  %v4125_v7 = vor.u32 %v1201_v43, %v1198_v4  ;;  %v3610_v17 = vld [vmem:[%s4554_s1 + $0x20] sm:$0xff] }
  0xed   : > { %3338 = vmatmul.msk.bf16.gmra.mxu3 %vm349_vm2, %v1734_v15  ;;  %v3622_v15 = vld [vmem:[%s4554_s1 + $0x40] sm:$0xff]  ;;  %2241 = vmatpush.bf16.msra.mxu0 %v3610_v17 }
  0xee   : > { %v985_v20 = vadd.f32 %v3914_v24, %v963_v12  ;;  %3305 = vmatmul.msk.bf16.gmra.mxu2 %vm349_vm2, %v1560_v59  ;;  %v3606_v19 = vld [vmem:[%s4554_s1] sm:$0xff] }
  0xef   : > { %2606 = vmatpush.bf16.msra.mxu2 %v3622_v15  ;;  %2341 = vmatpush.bf16.msra.mxu1 %v3606_v19 }
  0xf0   : > { %v934_v22 = vpop.f32.mrf.mxu3  ;;  %v413_v23 = vpop.f32.mrf.mxu0  ;;  %v1003_v29 = vmax.f32 %v985_v20, 0.0 }
  0xf1   : > { %v513_v25 = vpop.f32.mrf.mxu1  ;;  %v778_v30 = vpop.f32.mrf.mxu2 }
  0xf2   : > { %v1021_v31 = vpack.c.bf16 %v1003_v29, %v1003_v29  ;;  %v808_v32 = vadd.f32 %v778_v30, %v512_v21  ;;  %v514_v50 = vadd.f32 %v513_v25, %v413_v23  ;;  %v1203_v21 = vsel %vm607_vm3, %v1193_v33, %v4125_v7 }
  0xf3   : > { %v1571_v23 = vor.u32 %v1569_v9, %v1567_v47  ;;  %v1575_v25 = vrot.slane %v1573_v10, 1  ;;  %v1738_v29 = vsel %vm1723_vm5, %v1735_v38, %v1737_v14  ;;  %v1205_v33 = vshrl.u32 %v4147_v13, 16 }
  0xf4   : > { %1040 = vst.msk [vmem:[%s3930_s21 + $0x24] sm:$0xf] %vm1030_vm6, %v1021_v31  ;;  %v964_v37 = vadd.f32 %v934_v22, %v808_v32  ;;  %v1338_v22 = vsel %vm1323_vm4, %v1335_v34, %v1337_v8  ;;  %v1208_v34 = vshll.u32 %v4147_v13, 16 }
  0xf5   : > { %v1576_v35 = vsel %vm253_vm0, %v1571_v23, %v1575_v25  ;;  %v2389_v23 = vld [vmem:[%s3729_s16 + $0x98] sm:$0xf] }
  0xf6   : > { %v986_v39 = vadd.f32 %v3914_v24, %v964_v37  ;;  %v3589_v37 = vld [vmem:[%s3729_s16 + $0x90] sm:$0x70] }
  0xf7   : > { %v4171_v46 = vor.u32 %v3589_v37, %v3283_v36 }
  0xf8   : > { %v936_v40 = vpop.f32.mrf.mxu3  ;;  %v416_v41 = vpop.f32.mrf.mxu0  ;;  %v1004_v49 = vmax.f32 %v986_v39, 0.0 }
  0xf9   : > { %v516_v42 = vpop.f32.mrf.mxu1  ;;  %v780_v52 = vpop.f32.mrf.mxu2  ;;  %v1739_v57 = vrot.slane %v4171_v46, 1 }
  0xfa   : > { %v1022_v53 = vpack.c.bf16 %v1004_v49, %v1004_v49  ;;  %v809_v54 = vadd.f32 %v780_v52, %v514_v50  ;;  %v517_v62 = vadd.f32 %v516_v42, %v416_v41  ;;  %v1207_v41 = vrot.slane %v1205_v33, 2 }
  0xfb   : > { %3216 = vmatmul.msk.bf16.gmra.mxu0 %vm349_vm2, %v1194_v44  ;;  %v1210_v42 = vrot.slane %v1208_v34, 3  ;;  %v1740_v9 = vsel %vm1723_vm5, %v1737_v14, %v1739_v57  ;;  %v2435_v34 = vunpack.c.l.b16 %v2389_v23 }
  0xfc   : > { %3241 = vmatmul.msk.bf16.gmra.mxu1 %vm349_vm2, %v1336_v45  ;;  %1041 = vst.msk [vmem:[%s3930_s21 + $0x28] sm:$0xf] %vm1030_vm6, %v1022_v53  ;;  %v965_v58 = vadd.f32 %v936_v40, %v809_v54  ;;  %v1339_v53 = vrot.slane %v4147_v13, 2  ;;  %v1577_v54 = vshrl.u32 %v4123_v2, 16 }
  0xfd   : > { %3339 = vmatmul.msk.bf16.gmra.mxu3 %vm349_vm2, %v1736_v51  ;;  %v1211_v52 = vor.u32 %v1210_v42, %v1207_v41  ;;  %v4211_v42 = vld [vmem:[%s3729_s16 + $0x94] sm:$0xff] }
  0xfe   : > { %v987_v60 = vadd.f32 %v3914_v24, %v965_v58  ;;  %3306 = vmatmul.msk.bf16.gmra.mxu2 %vm349_vm2, %v1568_v55  ;;  %v1581_v55 = vshll.u32 %v4171_v46, 16  ;;  %v1076_v58 = vld [vmem:[%s3729_s16 + $0x8c] sm:$0x1]  ;;  %v1340_v4 = vsel %vm1323_vm4, %v1337_v8, %v1339_v53  ;;  %v1579_v43 = vor.u32 %v1577_v54, %v1575_v25  ;;  %v2388_v25 = vld [vmem:[%s3729_s16 + $0x94] sm:$0xc] }
 0x100   : > { %v939_v63 = vpop.f32.mrf.mxu3  ;;  %v418_v0 = vpop.f32.mrf.mxu0  ;;  %v1005_v3 = vmax.f32 %v987_v60, 0.0 }
 0x101   : > { %v518_v1 = vpop.f32.mrf.mxu1  ;;  %v783_v61 = vpop.f32.mrf.mxu2 }
 0x102   : > { %v1023_v5 = vpack.c.bf16 %v1005_v3, %v1005_v3  ;;  %v810_v6 = vadd.f32 %v783_v61, %v517_v62  ;;  %v519_v27 = vadd.f32 %v518_v1, %v418_v0  ;;  %v1583_v3 = vrot.slane %v1581_v55, 1 }
 0x103   : > { %v1122_v61 = vunpack.c.l.b16 %v1076_v58  ;;  %v2120_v55 = vshll.u32 %v4211_v42, 16 }
 0x104   : > { %1042 = vst.msk [vmem:[%s3930_s21 + $0x2c] sm:$0xf] %vm1030_vm6, %v1023_v5  ;;  %v966_v11 = vadd.f32 %v939_v63, %v810_v6  ;;  %v1212_v63 = vsel %vm607_vm3, %v4125_v7, %v1211_v52  ;;  %v1584_v48 = vsel %vm253_vm0, %v1579_v43, %v1583_v3 }
 0x105   : > { %v1132_v7 = vpack.c.b16 %v1122_v61, %v1122_v61 }
 0x106   : > { %v988_v59 = vadd.f32 %v3914_v24, %v966_v11 }
 0x108   : > { %v941_v18 = vpop.f32.mrf.mxu3  ;;  %v421_v12 = vpop.f32.mrf.mxu0  ;;  %v1006_v26 = vmax.f32 %v988_v59, 0.0  ;;  %v1214_v59 = vshll.u32 %v1132_v7, 16 }
 0x109   : > { %v521_v20 = vpop.f32.mrf.mxu1  ;;  %v785_v30 = vpop.f32.mrf.mxu2 }
 0x10a   : > { %v1024_v31 = vpack.c.bf16 %v1006_v26, %v1006_v26  ;;  %v811_v32 = vadd.f32 %v785_v30, %v519_v27  ;;  %v522_v39 = vadd.f32 %v521_v20, %v421_v12  ;;  %v4204_v30 = vld [vmem:[%s3729_s16 + $0x8c] sm:$0xff] }
 0x10b   : > { %3217 = vmatmul.msk.bf16.gmra.mxu0 %vm349_vm2, %v1203_v21  ;;  %v1216_v21 = vrot.slane %v1214_v59, 3 }
 0x10c   : > { %3242 = vmatmul.msk.bf16.gmra.mxu1 %vm349_vm2, %v1338_v22  ;;  %1043 = vst.msk [vmem:[%s3930_s21 + $0x30] sm:$0xf] %vm1030_vm6, %v1024_v31  ;;  %v967_v28 = vadd.f32 %v941_v18, %v811_v32 }
 0x10d   : > { %3340 = vmatmul.msk.bf16.gmra.mxu3 %vm349_vm2, %v1738_v29  ;;  %v1585_v29 = vshrl.u32 %v4171_v46, 16  ;;  %v1217_v33 = vsel %vm607_vm3, %v1211_v52, %v1216_v21 }
 0x10e   : > { %v989_v38 = vadd.f32 %v3914_v24, %v967_v28  ;;  %3307 = vmatmul.msk.bf16.gmra.mxu2 %vm349_vm2, %v1576_v35  ;;  %v2434_v35 = vunpack.c.l.b16 %v2388_v25  ;;  %v4243_v25 = vld [vmem:[%s3729_s16 + $0x9c] sm:$0xff] }
 0x10f   : > { %v1587_v41 = vor.u32 %v1585_v29, %v1583_v3  ;;  %v4229_v3 = vld [vmem:[%s4555_s2] ss:$0 sm:$0xff] }
 0x110   : > { %v944_v40 = vpop.f32.mrf.mxu3  ;;  %v423_v44 = vpop.f32.mrf.mxu0  ;;  %v1007_v47 = vmax.f32 %v989_v38, 0.0  ;;  %v2671_v38 = vld [vmem:[%s3729_s16 + $0x94] sm:$0x8]  ;;  %v2453_v46 = vpack.c.b16 %v2435_v34, %v2434_v35  ;;  %v2124_v35 = vshrl.u32 %v4211_v42, 16 }
 0x111   : > { %v523_v45 = vpop.f32.mrf.mxu1  ;;  %v788_v49 = vpop.f32.mrf.mxu2 }
 0x112   : > { %v1025_v50 = vpack.c.bf16 %v1007_v47, %v1007_v47  ;;  %v812_v51 = vadd.f32 %v788_v49, %v522_v39  ;;  %v524_v6 = vadd.f32 %v523_v45, %v423_v44  ;;  %v2115_v44 = vshll.u32 %v4204_v30, 16  ;;  %v4216_v45 = vld [vmem:[%s3729_s16 + $0x9c] sm:$0xff] }
 0x113   : > { %v2681_v49 = vunpack.c.l.b16 %v2671_v38  ;;  %v2464_v58 = vshrl.u32 %v2453_v46, 16  ;;  %v2684_v7 = vrot.slane %v4216_v45, 3 }
 0x114   : > { %1044 = vst.msk [vmem:[%s3930_s21 + $0x34] sm:$0xf] %vm1030_vm6, %v1025_v50  ;;  %v968_v56 = vadd.f32 %v944_v40, %v812_v51  ;;  %v2113_v50 = vshrl.u32 %v4204_v30, 16  ;;  %v2117_v54 = vrot.slane %v2115_v44, 1 }
 0x116   : > { %v990_v60 = vadd.f32 %v3914_v24, %v968_v56  ;;  %v2118_v61 = vor.u32 %v2117_v54, %v2113_v50 }
 0x118   : > { %v946_v62 = vpop.f32.mrf.mxu3  ;;  %v426_v0 = vpop.f32.mrf.mxu0  ;;  %v1008_v5 = vmax.f32 %v990_v60, 0.0  ;;  %v2467_v60 = vshll.u32 %v2453_v46, 16 }
 0x119   : > { %v526_v1 = vpop.f32.mrf.mxu1  ;;  %v790_v10 = vpop.f32.mrf.mxu2 }
 0x11a   : > { %v1026_v11 = vpack.c.bf16 %v1008_v5, %v1008_v5  ;;  %v813_v15 = vadd.f32 %v790_v10, %v524_v6  ;;  %v527_v14 = vadd.f32 %v526_v1, %v426_v0  ;;  %v2682_v1 = vpack.c.b16 %v2435_v34, %v2681_v49 }
 0x11b   : > { %3218 = vmatmul.msk.bf16.gmra.mxu0 %vm349_vm2, %v1212_v63  ;;  %v2475_v63 = vshll.u32 %v4216_v45, 16  ;;  %v2122_v5 = vrot.slane %v2120_v55, 1  ;;  %v2466_v6 = vrot.slane %v2464_v58, 2 }
 0x11c   : > { %3243 = vmatmul.msk.bf16.gmra.mxu1 %vm349_vm2, %v1340_v4  ;;  %1045 = vst.msk [vmem:[%s3930_s21 + $0x38] sm:$0xf] %vm1030_vm6, %v1026_v11  ;;  %v969_v8 = vadd.f32 %v946_v62, %v813_v15  ;;  %v2472_v62 = vshrl.u32 %v4216_v45, 16 }
 0x11d   : > { %3341 = vmatmul.msk.bf16.gmra.mxu3 %vm349_vm2, %v1740_v9  ;;  %v2469_v9 = vrot.slane %v2467_v60, 3  ;;  %v2477_v11 = vrot.slane %v2475_v63, 3  ;;  %v2126_v45 = vor.u32 %v2124_v35, %v2122_v5 }
 0x11e   : > { %v991_v2 = vadd.f32 %v3914_v24, %v969_v8  ;;  %3308 = vmatmul.msk.bf16.gmra.mxu2 %vm349_vm2, %v1584_v48  ;;  %v2474_v10 = vrot.slane %v2472_v62, 2  ;;  %v2683_v48 = vrot.slane %v2682_v1, 3 }
 0x120   : > { %v949_v16 = vpop.f32.mrf.mxu3  ;;  %v428_v17 = vpop.f32.mrf.mxu0  ;;  %v1009_v18 = vmax.f32 %v991_v2, 0.0  ;;  %v2478_v59 = vor.u32 %v2477_v11, %v2474_v10 }
 0x121   : > { %v528_v19 = vpop.f32.mrf.mxu1  ;;  %v793_v13 = vpop.f32.mrf.mxu2 }
 0x122   : > { %v1027_v12 = vpack.c.bf16 %v1009_v18, %v1009_v18  ;;  %v814_v20 = vadd.f32 %v793_v13, %v527_v14  ;;  %v529_v36 = vadd.f32 %v528_v19, %v428_v17  ;;  %v2123_v17 = vsel %vm253_vm0, %v2118_v61, %v2122_v5  ;;  %v4273_v5 = vld [vmem:[%s3729_s16 + $0xa4] sm:$0xff] }
 0x123   : > { %v2470_v19 = vor.u32 %v2469_v9, %v2466_v6  ;;  %v4276_v6 = vld [vmem:[%s3729_s16 + $0xac] sm:$0xff] }
 0x124   : > { %1046 = vst.msk [vmem:[%s3930_s21 + $0x3c] sm:$0xf] %vm1030_vm6, %v1027_v12  ;;  %v970_v22 = vadd.f32 %v949_v16, %v814_v20  ;;  %v2685_v12 = vsel %vm829_vm1, %v2683_v48, %v2684_v7 }
 0x125   : > { %v2479_v23 = vsel %vm607_vm3, %v2470_v19, %v2478_v59  ;;  %v2493_v19 = vshll.u32 %v4276_v6, 16 }
 0x126   : > { %v992_v26 = vadd.f32 %v3914_v24, %v970_v22 }
 0x128   : > { %v951_v27 = vpop.f32.mrf.mxu3  ;;  %v1278_v31 = vpop.f32.mrf.mxu0  ;;  %v1010_v28 = vmax.f32 %v992_v26, 0.0  ;;  %v4246_v26 = vld [vmem:[%s3729_s16 + $0xa4] sm:$0xff] }
 0x129   : > { %v1401_v32 = vpop.f32.mrf.mxu1  ;;  %v795_v37 = vpop.f32.mrf.mxu2 }
 0x12a   : > { %v1028_v39 = vpack.c.bf16 %v1010_v28, %v1010_v28  ;;  %v815_v40 = vadd.f32 %v795_v37, %v529_v36  ;;  %v1402_v52 = vadd.f32 %v1401_v32, %v1278_v31  ;;  %v2128_v28 = vshll.u32 %v4243_v25, 16 }
 0x12b   : > { %3219 = vmatmul.msk.bf16.gmra.mxu0 %vm349_vm2, %v1217_v33  ;;  %v2481_v36 = vshrl.u32 %v4246_v26, 16  ;;  %v2484_v37 = vshll.u32 %v4246_v26, 16 }
 0x12c   : > { %3244 = vmatmul.msk.bf16.gmra.mxu1 %vm349_vm2, %v1339_v53  ;;  %1047 = vst.msk [vmem:[%s3930_s21 + $0x40] sm:$0xf] %vm1030_vm6, %v1028_v39  ;;  %v971_v47 = vadd.f32 %v951_v27, %v815_v40  ;;  %v2130_v46 = vrot.slane %v2128_v28, 1 }
 0x12d   : > { %3342 = vmatmul.msk.bf16.gmra.mxu3 %vm349_vm2, %v1739_v57  ;;  %v2486_v49 = vrot.slane %v2484_v37, 3 }
 0x12e   : > { %v993_v51 = vadd.f32 %v3914_v24, %v971_v47  ;;  %3309 = vmatmul.msk.bf16.gmra.mxu2 %vm349_vm2, %v1587_v41  ;;  %v2483_v47 = vrot.slane %v2481_v36, 2  ;;  %v2131_v60 = vsel %vm253_vm0, %v2126_v45, %v2130_v46 }
 0x130   : > { %v1801_v53 = vpop.f32.mrf.mxu3  ;;  %v1280_v56 = vpop.f32.mrf.mxu0  ;;  %v1011_v0 = vmax.f32 %v993_v51, 0.0  ;;  %v2487_v62 = vor.u32 %v2486_v49, %v2483_v47  ;;  %v4302_v47 = vld [vmem:[%s3729_s16 + $0xac] sm:$0xff]  ;;  %v4305_v49 = vld [vmem:[%s3729_s16 + $0xb4] sm:$0xff] }
 0x131   : > { %v1403_v57 = vpop.f32.mrf.mxu1  ;;  %v1648_v24 = vpop.f32.mrf.mxu2 }
 0x132   : > { %v1029_v4 = vpack.c.bf16 %v1011_v0, %v1011_v0  ;;  %v1693_v43 = vadd.f32 %v1648_v24, %v1402_v52  ;;  %v1404_v13 = vadd.f32 %v1403_v57, %v1280_v56  ;;  %v2488_v61 = vsel %vm607_vm3, %v2478_v59, %v2487_v62 }
 0x134   : > { %1049 = vst.msk [vmem:[%s3930_s21 + $0x44] sm:$0x3] %vm1048_vm7, %v1029_v4  ;;  %v1846_v15 = vadd.f32 %v1801_v53, %v1693_v43  ;;  %v2686_v53 = vrot.slane %v4246_v26, 3 }
 0x136   : > { %v1868_v8 = vadd.f32 %v4229_v3, %v1846_v15  ;;  %v2687_v1 = vsel %vm829_vm1, %v2684_v7, %v2686_v53 }
 0x138   : > { %v1803_v2 = vpop.f32.mrf.mxu3  ;;  %v1283_v14 = vpop.f32.mrf.mxu0  ;;  %v1886_v18 = vmax.f32 %v1868_v8, 0.0 }
 0x139   : > { %v1406_v16 = vpop.f32.mrf.mxu1  ;;  %v1650_v20 = vpop.f32.mrf.mxu2 }
 0x13a   : > { %v1904_v21 = vpack.c.bf16 %v1886_v18, %v1886_v18  ;;  %v1694_v22 = vadd.f32 %v1650_v20, %v1404_v13  ;;  %v1407_v32 = vadd.f32 %v1406_v16, %v1283_v14  ;;  %v2132_v14 = vshrl.u32 %v4243_v25, 16 }
 0x13b   : > { %3399 = vmatmul.msk.bf16.vlgmr.msra.gmra.mxu0 %vm349_vm2, %v2123_v17  ;;  %v2136_v16 = vshll.u32 %v4273_v5, 16  ;;  %v2490_v17 = vshrl.u32 %v4276_v6, 16 }
 0x13c   : > { %3424 = vmatmul.msk.bf16.vlgmr.msra.gmra.mxu1 %vm349_vm2, %v4204_v30  ;;  %v1943_v27 = vrot.slane %v1904_v21, 6  ;;  %v1847_v29 = vadd.f32 %v1803_v2, %v1694_v22  ;;  %v2134_v20 = vor.u32 %v2132_v14, %v2130_v46 }
 0x13d   : > { %3522 = vmatmul.msk.bf16.vlgmr.msra.gmra.mxu3 %vm349_vm2, %v2685_v12  ;;  %v2138_v21 = vrot.slane %v2136_v16, 1  ;;  %v2492_v22 = vrot.slane %v2490_v17, 2 }
 0x13e   : > { %2014 = vst.msk [vmem:[%s3930_s21 + $0x44] sm:$0xc] %vm2013_vm8, %v1943_v27  ;;  %v1869_v31 = vadd.f32 %v4229_v3, %v1847_v29  ;;  %3489 = vmatmul.msk.bf16.vlgmr.msra.gmra.mxu2 %vm349_vm2, %v2479_v23  ;;  %v1944_v50 = vrot.slane %v1943_v27, 4  ;;  %v2495_v23 = vrot.slane %v2493_v19, 3 }
 0x13f   : > { %v2139_v28 = vsel %vm253_vm0, %v2134_v20, %v2138_v21 }
 0x140   : > { %v1806_v33 = vpop.f32.mrf.mxu3  ;;  %v1285_v34 = vpop.f32.mrf.mxu0  ;;  %v1887_v38 = vmax.f32 %v1869_v31, 0.0  ;;  %v2688_v31 = vrot.slane %v4276_v6, 3  ;;  %v2496_v36 = vor.u32 %v2495_v23, %v2492_v22  ;;  %v4331_v22 = vld [vmem:[%s3729_s16 + $0xb4] sm:$0xff]  ;;  %v4334_v23 = vld [vmem:[%s3729_s16 + $0xbc] sm:$0xff] }
 0x141   : > { %v1408_v30 = vpop.f32.mrf.mxu1  ;;  %v1653_v39 = vpop.f32.mrf.mxu2 }
 0x142   : > { %v1905_v40 = vpack.c.bf16 %v1887_v38, %v1887_v38  ;;  %v1695_v41 = vadd.f32 %v1653_v39, %v1407_v32  ;;  %v1409_v0 = vadd.f32 %v1408_v30, %v1285_v34  ;;  %v2689_v39 = vsel %vm829_vm1, %v2686_v53, %v2688_v31 }
 0x143   : > { %v2497_v46 = vsel %vm607_vm3, %v2487_v62, %v2496_v36  ;;  %v2499_v62 = vshrl.u32 %v4305_v49, 16 }
 0x144   : > { %v1945_v51 = vrot.slane %v1905_v40, 6  ;;  %v1848_v52 = vadd.f32 %v1806_v33, %v1695_v41 }
 0x145   : > { %v2501_v6 = vrot.slane %v2499_v62, 2 }
 0x146   : > { %v1946_v54 = vsel %vm4255_vm11, %v1944_v50, %v1945_v51  ;;  %v1870_v55 = vadd.f32 %v4229_v3, %v1848_v52  ;;  %v1947_v9 = vrot.slane %v1945_v51, 4 }
 0x147   : > { %2015 = vst.msk [vmem:[%s3930_s21 + $0x48] sm:$0xf] %vm1030_vm6, %v1946_v54 }
 0x148   : > { %v1808_v56 = vpop.f32.mrf.mxu3  ;;  %v1288_v57 = vpop.f32.mrf.mxu0  ;;  %v1888_v63 = vmax.f32 %v1870_v55, 0.0 }
 0x149   : > { %v1411_v58 = vpop.f32.mrf.mxu1  ;;  %v1655_v24 = vpop.f32.mrf.mxu2 }
 0x14a   : > { %v1906_v4 = vpack.c.bf16 %v1888_v63, %v1888_v63  ;;  %v1696_v43 = vadd.f32 %v1655_v24, %v1409_v0  ;;  %v1412_v7 = vadd.f32 %v1411_v58, %v1288_v57  ;;  %v2140_v58 = vshrl.u32 %v4273_v5, 16 }
 0x14b   : > { %3400 = vmatmul.msk.bf16.gmra.mxu0 %vm349_vm2, %v2131_v60  ;;  %v2144_v60 = vshll.u32 %v4302_v47, 16  ;;  %v2502_v63 = vshll.u32 %v4305_v49, 16 }
 0x14c   : > { %3425 = vmatmul.msk.bf16.gmra.mxu1 %vm349_vm2, %v4211_v42  ;;  %v1948_v10 = vrot.slane %v1906_v4, 6  ;;  %v1849_v11 = vadd.f32 %v1808_v56, %v1696_v43  ;;  %v2142_v43 = vor.u32 %v2140_v58, %v2138_v21 }
 0x14d   : > { %3523 = vmatmul.msk.bf16.gmra.mxu3 %vm349_vm2, %v2687_v1 }
 0x14e   : > { %v1949_v15 = vsel %vm4255_vm11, %v1947_v9, %v1948_v10  ;;  %v1871_v48 = vadd.f32 %v4229_v3, %v1849_v11  ;;  %3490 = vmatmul.msk.bf16.gmra.mxu2 %vm349_vm2, %v2488_v61  ;;  %v1950_v26 = vrot.slane %v1948_v10, 4  ;;  %v2146_v61 = vrot.slane %v2144_v60, 1 }
 0x14f   : > { %2016 = vst.msk [vmem:[%s3930_s21 + $0x4c] sm:$0xf] %vm1030_vm6, %v1949_v15  ;;  %v2504_v9 = vrot.slane %v2502_v63, 3 }
 0x150   : > { %v1811_v42 = vpop.f32.mrf.mxu3  ;;  %v1290_v8 = vpop.f32.mrf.mxu0  ;;  %v1889_v59 = vmax.f32 %v1871_v48, 0.0  ;;  %v2690_v48 = vrot.slane %v4305_v49, 3  ;;  %v2147_v16 = vsel %vm253_vm0, %v2142_v43, %v2146_v61 }
 0x151   : > { %v1413_v2 = vpop.f32.mrf.mxu1  ;;  %v1658_v18 = vpop.f32.mrf.mxu2  ;;  %v2505_v17 = vor.u32 %v2504_v9, %v2501_v6  ;;  %v4360_v6 = vld [vmem:[%s3729_s16 + $0xbc] sm:$0xff]  ;;  %v4363_v9 = vld [vmem:[%s3729_s16 + $0xc4] sm:$0xff] }
 0x152   : > { %v1907_v13 = vpack.c.bf16 %v1889_v59, %v1889_v59  ;;  %v1697_v12 = vadd.f32 %v1658_v18, %v1412_v7  ;;  %v1414_v38 = vadd.f32 %v1413_v2, %v1290_v8  ;;  %v2691_v18 = vsel %vm829_vm1, %v2688_v31, %v2690_v48 }
 0x153   : > { %v2506_v21 = vsel %vm607_vm3, %v2496_v36, %v2505_v17  ;;  %v2508_v36 = vshrl.u32 %v4334_v23, 16 }
 0x154   : > { %v1951_v27 = vrot.slane %v1907_v13, 6  ;;  %v1850_v29 = vadd.f32 %v1811_v42, %v1697_v12 }
 0x155   : > { %v2510_v49 = vrot.slane %v2508_v36, 2 }
 0x156   : > { %v1952_v32 = vsel %vm4255_vm11, %v1950_v26, %v1951_v27  ;;  %v1872_v33 = vadd.f32 %v4229_v3, %v1850_v29  ;;  %v1953_v50 = vrot.slane %v1951_v27, 4 }
 0x157   : > { %2017 = vst.msk [vmem:[%s3930_s21 + $0x50] sm:$0xf] %vm1030_vm6, %v1952_v32 }
 0x158   : > { %v1813_v34 = vpop.f32.mrf.mxu3  ;;  %v1293_v30 = vpop.f32.mrf.mxu0  ;;  %v1890_v37 = vmax.f32 %v1872_v33, 0.0 }
 0x159   : > { %v1416_v35 = vpop.f32.mrf.mxu1  ;;  %v1660_v40 = vpop.f32.mrf.mxu2 }
 0x15a   : > { %v1908_v41 = vpack.c.bf16 %v1890_v37, %v1890_v37  ;;  %v1698_v45 = vadd.f32 %v1660_v40, %v1414_v38  ;;  %v1417_v55 = vadd.f32 %v1416_v35, %v1293_v30  ;;  %v2148_v35 = vshrl.u32 %v4302_v47, 16 }
 0x15b   : > { %3401 = vmatmul.msk.bf16.gmra.mxu0 %vm349_vm2, %v2139_v28  ;;  %v2152_v28 = vshll.u32 %v4331_v22, 16  ;;  %v2511_v37 = vshll.u32 %v4334_v23, 16 }
 0x15c   : > { %3426 = vmatmul.msk.bf16.gmra.mxu1 %vm349_vm2, %v4243_v25  ;;  %v1954_v51 = vrot.slane %v1908_v41, 6  ;;  %v1851_v52 = vadd.f32 %v1813_v34, %v1698_v45  ;;  %v2150_v45 = vor.u32 %v2148_v35, %v2146_v61 }
 0x15d   : > { %3524 = vmatmul.msk.bf16.gmra.mxu3 %vm349_vm2, %v2689_v39 }
 0x15e   : > { %v1955_v53 = vsel %vm4255_vm11, %v1953_v50, %v1954_v51  ;;  %v1873_v54 = vadd.f32 %v4229_v3, %v1851_v52  ;;  %3491 = vmatmul.msk.bf16.gmra.mxu2 %vm349_vm2, %v2497_v46  ;;  %v1956_v10 = vrot.slane %v1954_v51, 4  ;;  %v2154_v46 = vrot.slane %v2152_v28, 1 }
 0x15f   : > { %2018 = vst.msk [vmem:[%s3930_s21 + $0x54] sm:$0xf] %vm1030_vm6, %v1955_v53  ;;  %v2513_v50 = vrot.slane %v2511_v37, 3 }
 0x160   : > { %v1816_v25 = vpop.f32.mrf.mxu3  ;;  %v1295_v56 = vpop.f32.mrf.mxu0  ;;  %v1891_v0 = vmax.f32 %v1873_v54, 0.0  ;;  %v2692_v54 = vrot.slane %v4334_v23, 3  ;;  %v2155_v60 = vsel %vm253_vm0, %v2150_v45, %v2154_v46 }
 0x161   : > { %v1418_v57 = vpop.f32.mrf.mxu1  ;;  %v1663_v1 = vpop.f32.mrf.mxu2  ;;  %v2514_v62 = vor.u32 %v2513_v50, %v2510_v49  ;;  %v4391_v49 = vld [vmem:[%s3729_s16 + $0xc4] sm:$0xff]  ;;  %v4394_v50 = vld [vmem:[%s3729_s16 + $0xcc] sm:$0xff] }
 0x162   : > { %v1909_v24 = vpack.c.bf16 %v1891_v0, %v1891_v0  ;;  %v1699_v4 = vadd.f32 %v1663_v1, %v1417_v55  ;;  %v1419_v59 = vadd.f32 %v1418_v57, %v1295_v56  ;;  %v2693_v1 = vsel %vm829_vm1, %v2690_v48, %v2692_v54 }
 0x163   : > { %v2515_v61 = vsel %vm607_vm3, %v2505_v17, %v2514_v62  ;;  %v2517_v17 = vshrl.u32 %v4363_v9, 16 }
 0x164   : > { %v1957_v11 = vrot.slane %v1909_v24, 6  ;;  %v1852_v15 = vadd.f32 %v1816_v25, %v1699_v4 }
 0x165   : > { %v2519_v23 = vrot.slane %v2517_v17, 2 }
 0x166   : > { %v1958_v7 = vsel %vm4255_vm11, %v1956_v10, %v1957_v11  ;;  %v1874_v42 = vadd.f32 %v4229_v3, %v1852_v15  ;;  %v1959_v26 = vrot.slane %v1957_v11, 4 }
 0x167   : > { %2019 = vst.msk [vmem:[%s3930_s21 + $0x58] sm:$0xf] %vm1030_vm6, %v1958_v7 }
 0x168   : > { %v1818_v8 = vpop.f32.mrf.mxu3  ;;  %v1298_v2 = vpop.f32.mrf.mxu0  ;;  %v1892_v19 = vmax.f32 %v1874_v42, 0.0 }
 0x169   : > { %v1421_v14 = vpop.f32.mrf.mxu1  ;;  %v1665_v13 = vpop.f32.mrf.mxu2 }
 0x16a   : > { %v1910_v12 = vpack.c.bf16 %v1892_v19, %v1892_v19  ;;  %v1700_v20 = vadd.f32 %v1665_v13, %v1419_v59  ;;  %v1422_v33 = vadd.f32 %v1421_v14, %v1298_v2  ;;  %v2156_v14 = vshrl.u32 %v4331_v22, 16 }
 0x16b   : > { %3402 = vmatmul.msk.bf16.gmra.mxu0 %vm349_vm2, %v2147_v16  ;;  %v2160_v16 = vshll.u32 %v4360_v6, 16  ;;  %v2520_v19 = vshll.u32 %v4363_v9, 16 }
 0x16c   : > { %3427 = vmatmul.msk.bf16.gmra.mxu1 %vm349_vm2, %v4273_v5  ;;  %v1960_v27 = vrot.slane %v1910_v12, 6  ;;  %v1853_v29 = vadd.f32 %v1818_v8, %v1700_v20  ;;  %v2158_v20 = vor.u32 %v2156_v14, %v2154_v46 }
 0x16d   : > { %3525 = vmatmul.msk.bf16.gmra.mxu3 %vm349_vm2, %v2691_v18 }
 0x16e   : > { %v1961_v31 = vsel %vm4255_vm11, %v1959_v26, %v1960_v27  ;;  %v1875_v32 = vadd.f32 %v4229_v3, %v1853_v29  ;;  %3492 = vmatmul.msk.bf16.gmra.mxu2 %vm349_vm2, %v2506_v21  ;;  %v1962_v51 = vrot.slane %v1960_v27, 4  ;;  %v2162_v21 = vrot.slane %v2160_v16, 1 }
 0x16f   : > { %2020 = vst.msk [vmem:[%s3930_s21 + $0x5c] sm:$0xf] %vm1030_vm6, %v1961_v31  ;;  %v2522_v26 = vrot.slane %v2520_v19, 3 }
 0x170   : > { %v1821_v5 = vpop.f32.mrf.mxu3  ;;  %v1300_v34 = vpop.f32.mrf.mxu0  ;;  %v1893_v38 = vmax.f32 %v1875_v32, 0.0  ;;  %v2694_v32 = vrot.slane %v4363_v9, 3  ;;  %v2163_v28 = vsel %vm253_vm0, %v2158_v20, %v2162_v21  ;;  %v4433_v9 = vld [vmem:[%s3729_s16 + $0xd4] sm:$0xff] }
 0x171   : > { %v1423_v30 = vpop.f32.mrf.mxu1  ;;  %v1668_v39 = vpop.f32.mrf.mxu2  ;;  %v2523_v36 = vor.u32 %v2522_v26, %v2519_v23 }
 0x172   : > { %v1911_v40 = vpack.c.bf16 %v1893_v38, %v1893_v38  ;;  %v1701_v41 = vadd.f32 %v1668_v39, %v1422_v33  ;;  %v1424_v0 = vadd.f32 %v1423_v30, %v1300_v34  ;;  %v2695_v39 = vsel %vm829_vm1, %v2692_v54, %v2694_v32 }
 0x173   : > { %v2524_v46 = vsel %vm607_vm3, %v2514_v62, %v2523_v36  ;;  %v2526_v62 = vshrl.u32 %v4394_v50, 16 }
 0x174   : > { %v1963_v52 = vrot.slane %v1911_v40, 6  ;;  %v1854_v53 = vadd.f32 %v1821_v5, %v1701_v41 }
 0x176   : > { %v1964_v55 = vsel %vm4255_vm11, %v1962_v51, %v1963_v52  ;;  %v1876_v25 = vadd.f32 %v4229_v3, %v1854_v53  ;;  %v1965_v10 = vrot.slane %v1963_v52, 4 }
 0x177   : > { %2021 = vst.msk [vmem:[%s3930_s21 + $0x60] sm:$0xf] %vm1030_vm6, %v1964_v55 }
 0x178   : > { %v1823_v56 = vpop.f32.mrf.mxu3  ;;  %v1303_v57 = vpop.f32.mrf.mxu0  ;;  %v1894_v63 = vmax.f32 %v1876_v25, 0.0 }
 0x179   : > { %v1426_v58 = vpop.f32.mrf.mxu1  ;;  %v1670_v24 = vpop.f32.mrf.mxu2 }
 0x17a   : > { %v1912_v4 = vpack.c.bf16 %v1894_v63, %v1894_v63  ;;  %v1702_v43 = vadd.f32 %v1670_v24, %v1424_v0  ;;  %v1427_v42 = vadd.f32 %v1426_v58, %v1303_v57  ;;  %v2529_v63 = vshll.u32 %v4394_v50, 16 }
 0x17b   : > { %3403 = vmatmul.msk.bf16.gmra.mxu0 %vm349_vm2, %v2155_v60  ;;  %v2168_v60 = vshll.u32 %v4391_v49, 16 }
 0x17c   : > { %3428 = vmatmul.msk.bf16.gmra.mxu1 %vm349_vm2, %v4302_v47  ;;  %v1966_v11 = vrot.slane %v1912_v4, 6  ;;  %v1855_v15 = vadd.f32 %v1823_v56, %v1702_v43  ;;  %v2164_v56 = vshrl.u32 %v4360_v6, 16 }
 0x17d   : > { %3526 = vmatmul.msk.bf16.gmra.mxu3 %vm349_vm2, %v2693_v1 }
 0x17e   : > { %v1967_v48 = vsel %vm4255_vm11, %v1965_v10, %v1966_v11  ;;  %v1877_v7 = vadd.f32 %v4229_v3, %v1855_v15  ;;  %3493 = vmatmul.msk.bf16.gmra.mxu2 %vm349_vm2, %v2515_v61  ;;  %v1968_v27 = vrot.slane %v1966_v11, 4  ;;  %v2166_v43 = vor.u32 %v2164_v56, %v2162_v21 }
 0x17f   : > { %2022 = vst.msk [vmem:[%s3930_s21 + $0x64] sm:$0xf] %vm1030_vm6, %v1967_v48  ;;  %v2170_v61 = vrot.slane %v2168_v60, 1  ;;  %v2696_v10 = vrot.slane %v4394_v50, 3  ;;  %v2528_v11 = vrot.slane %v2526_v62, 2  ;;  %v2531_v15 = vrot.slane %v2529_v63, 3 }
 0x180   : > { %v1826_v47 = vpop.f32.mrf.mxu3  ;;  %v1305_v8 = vpop.f32.mrf.mxu0  ;;  %v1895_v59 = vmax.f32 %v1877_v7, 0.0 }
 0x181   : > { %v1428_v2 = vpop.f32.mrf.mxu1  ;;  %v1673_v18 = vpop.f32.mrf.mxu2  ;;  %v2697_v23 = vsel %vm829_vm1, %v2694_v32, %v2696_v10 }
 0x182   : > { %v1913_v13 = vpack.c.bf16 %v1895_v59, %v1895_v59  ;;  %v1703_v12 = vadd.f32 %v1673_v18, %v1427_v42  ;;  %v1429_v38 = vadd.f32 %v1428_v2, %v1305_v8  ;;  %v2058_v8 = vld [vmem:[%s3729_s16 + $0xd0] sm:$0x7]  ;;  %v2171_v59 = vsel %vm253_vm0, %v2166_v43, %v2170_v61 }
 0x183   : > { %v2532_v18 = vor.u32 %v2531_v15, %v2528_v11  ;;  %v2406_v15 = vld [vmem:[%s3729_s16 + $0xdc] sm:$0x1] }
 0x184   : > { %v1969_v29 = vrot.slane %v1913_v13, 6  ;;  %v1856_v31 = vadd.f32 %v1826_v47, %v1703_v12  ;;  %v4408_v47 = vld [vmem:[%s3729_s16 + $0xcc] sm:$0xf]  ;;  %v2102_v12 = vunpack.c.l.b16 %v2058_v8 }
 0x185   : > { %v2101_v13 = vunpack.c.l.b16 %v4408_v47 }
 0x186   : > { %v1970_v33 = vsel %vm4255_vm11, %v1968_v27, %v1969_v29  ;;  %v1878_v5 = vadd.f32 %v4229_v3, %v1856_v31  ;;  %v1971_v51 = vrot.slane %v1969_v29, 4  ;;  %v2533_v31 = vsel %vm607_vm3, %v2523_v36, %v2532_v18 }
 0x187   : > { %2023 = vst.msk [vmem:[%s3930_s21 + $0x68] sm:$0xf] %vm1030_vm6, %v1970_v33  ;;  %v4430_v33 = vpack.c.b16 %v2102_v12, %v2101_v13 }
 0x188   : > { %v1828_v34 = vpop.f32.mrf.mxu3  ;;  %v1308_v30 = vpop.f32.mrf.mxu0  ;;  %v1896_v37 = vmax.f32 %v1878_v5, 0.0 }
 0x189   : > { %v1431_v35 = vpop.f32.mrf.mxu1  ;;  %v1675_v40 = vpop.f32.mrf.mxu2 }
 0x18a   : > { %v1914_v41 = vpack.c.bf16 %v1896_v37, %v1896_v37  ;;  %v1704_v45 = vadd.f32 %v1675_v40, %v1429_v38  ;;  %v1432_v25 = vadd.f32 %v1431_v35, %v1308_v30  ;;  %v2172_v38 = vshrl.u32 %v4391_v49, 16 }
 0x18b   : > { %3404 = vmatmul.msk.bf16.gmra.mxu0 %vm349_vm2, %v2163_v28  ;;  %v2535_v40 = vshrl.u32 %v4433_v9, 16 }
 0x18c   : > { %3429 = vmatmul.msk.bf16.gmra.mxu1 %vm349_vm2, %v4331_v22  ;;  %v1972_v52 = vrot.slane %v1914_v41, 6  ;;  %v1857_v53 = vadd.f32 %v1828_v34, %v1704_v45  ;;  %v2538_v41 = vshll.u32 %v4433_v9, 16 }
 0x18d   : > { %3527 = vmatmul.msk.bf16.gmra.mxu3 %vm349_vm2, %v2695_v39  ;;  %v2176_v39 = vshll.u32 %v4430_v33, 16 }
 0x18e   : > { %v1973_v54 = vsel %vm4255_vm11, %v1971_v51, %v1972_v52  ;;  %v1879_v55 = vadd.f32 %v4229_v3, %v1857_v53  ;;  %3494 = vmatmul.msk.bf16.gmra.mxu2 %vm349_vm2, %v2524_v46  ;;  %v1974_v48 = vrot.slane %v1972_v52, 4  ;;  %v2174_v53 = vor.u32 %v2172_v38, %v2170_v61 }
 0x18f   : > { %2024 = vst.msk [vmem:[%s3930_s21 + $0x6c] sm:$0xf] %vm1030_vm6, %v1973_v54  ;;  %v2178_v54 = vrot.slane %v2176_v39, 1 }
 0x190   : > { %v1831_v22 = vpop.f32.mrf.mxu3  ;;  %v1310_v57 = vpop.f32.mrf.mxu0  ;;  %v1897_v0 = vmax.f32 %v1879_v55, 0.0  ;;  %v2537_v55 = vrot.slane %v2535_v40, 2 }
 0x191   : > { %v1433_v58 = vpop.f32.mrf.mxu1  ;;  %v1678_v1 = vpop.f32.mrf.mxu2 }
 0x192   : > { %v1915_v24 = vpack.c.bf16 %v1897_v0, %v1897_v0  ;;  %v1705_v4 = vadd.f32 %v1678_v1, %v1432_v25  ;;  %v1434_v21 = vadd.f32 %v1433_v58, %v1310_v57  ;;  %v2540_v25 = vrot.slane %v2538_v41, 3 }
 0x193   : > { %v2698_v58 = vrot.slane %v4433_v9, 3 }
 0x194   : > { %v1975_v7 = vrot.slane %v1915_v24, 6  ;;  %v1858_v42 = vadd.f32 %v1831_v22, %v1705_v4  ;;  %v2179_v24 = vsel %vm253_vm0, %v2174_v53, %v2178_v54  ;;  %v2541_v4 = vor.u32 %v2540_v25, %v2537_v55 }
 0x195   : > { %v2699_v11 = vsel %vm829_vm1, %v2696_v10, %v2698_v58 }
 0x196   : > { %v1976_v2 = vsel %vm4255_vm11, %v1974_v48, %v1975_v7  ;;  %v1880_v14 = vadd.f32 %v4229_v3, %v1858_v42  ;;  %v1977_v32 = vrot.slane %v1975_v7, 4  ;;  %v2542_v8 = vsel %vm607_vm3, %v2532_v18, %v2541_v4 }
 0x197   : > { %2025 = vst.msk [vmem:[%s3930_s21 + $0x70] sm:$0xf] %vm1030_vm6, %v1976_v2  ;;  %v2452_v2 = vunpack.c.l.b16 %v2406_v15 }
 0x198   : > { %v1833_v16 = vpop.f32.mrf.mxu3  ;;  %v1313_v17 = vpop.f32.mrf.mxu0  ;;  %v1898_v20 = vmax.f32 %v1880_v14, 0.0 }
 0x199   : > { %v1436_v19 = vpop.f32.mrf.mxu1  ;;  %v1680_v26 = vpop.f32.mrf.mxu2 }
 0x19a   : > { %v1916_v27 = vpack.c.bf16 %v1898_v20, %v1898_v20  ;;  %v1706_v29 = vadd.f32 %v1680_v26, %v1434_v21  ;;  %v1437_v28 = vadd.f32 %v1436_v19, %v1313_v17  ;;  %v2049_v20 = vld [vmem:[%s3729_s16 + $0xd0] sm:$0x3]  ;;  %v2462_v21 = vpack.c.b16 %v2452_v2, %v2452_v2 }
 0x19b   : > { %3405 = vmatmul.msk.bf16.gmra.mxu0 %vm349_vm2, %v2171_v59 }
 0x19c   : > { %3430 = vmatmul.msk.bf16.gmra.mxu1 %vm349_vm2, %v4360_v6  ;;  %v1978_v5 = vrot.slane %v1916_v27, 6  ;;  %v1859_v34 = vadd.f32 %v1833_v16, %v1706_v29  ;;  %v2180_v29 = vshrl.u32 %v4430_v33, 16  ;;  %v2544_v9 = vshll.u32 %v2462_v21, 16 }
 0x19d   : > { %3528 = vmatmul.msk.bf16.gmra.mxu3 %vm349_vm2, %v2697_v23 }
 0x19e   : > { %v1979_v30 = vsel %vm4255_vm11, %v1977_v32, %v1978_v5  ;;  %v1881_v35 = vadd.f32 %v4229_v3, %v1859_v34  ;;  %3495 = vmatmul.msk.bf16.gmra.mxu2 %vm349_vm2, %v2533_v31  ;;  %v1980_v22 = vrot.slane %v1978_v5, 4  ;;  %v2289_v31 = vunpack.c.l.b16 %v2049_v20 }
 0x19f   : > { %2026 = vst.msk [vmem:[%s3930_s21 + $0x74] sm:$0xf] %vm1030_vm6, %v1979_v30  ;;  %v2700_v30 = vrot.slane %v2462_v21, 3  ;;  %v2546_v39 = vrot.slane %v2544_v9, 3 }
 0x1a0   : > { %v1836_v6 = vpop.f32.mrf.mxu3  ;;  %v1315_v36 = vpop.f32.mrf.mxu0  ;;  %v1899_v45 = vmax.f32 %v1881_v35, 0.0 }
 0x1a1   : > { %v1438_v37 = vpop.f32.mrf.mxu1  ;;  %v1683_v46 = vpop.f32.mrf.mxu2  ;;  %v2547_v47 = vsel %vm607_vm3, %v2541_v4, %v2546_v39 }
 0x1a2   : > { %v1917_v51 = vpack.c.bf16 %v1899_v45, %v1899_v45  ;;  %v1707_v52 = vadd.f32 %v1683_v46, %v1437_v28  ;;  %v1439_v61 = vadd.f32 %v1438_v37, %v1315_v36  ;;  %v2182_v36 = vor.u32 %v2180_v29, %v2178_v54 }
 0x1a3   : > { %v2290_v37 = vpack.c.b16 %v2289_v31, %v2101_v13  ;;  %v2701_v45 = vsel %vm829_vm1, %v2698_v58, %v2700_v30 }
 0x1a4   : > { %v1981_v56 = vrot.slane %v1917_v51, 6  ;;  %v1860_v57 = vadd.f32 %v1836_v6, %v1707_v52 }
 0x1a6   : > { %v1982_v60 = vsel %vm4255_vm11, %v1980_v22, %v1981_v56  ;;  %v1882_v62 = vadd.f32 %v4229_v3, %v1860_v57  ;;  %v1983_v14 = vrot.slane %v1981_v56, 4 }
 0x1a7   : > { %2027 = vst.msk [vmem:[%s3930_s21 + $0x78] sm:$0xf] %vm1030_vm6, %v1982_v60 }
 0x1a8   : > { %v1838_v63 = vpop.f32.mrf.mxu3  ;;  %v1318_v0 = vpop.f32.mrf.mxu0  ;;  %v1900_v43 = vmax.f32 %v1882_v62, 0.0 }
 0x1a9   : > { %v1441_v1 = vpop.f32.mrf.mxu1  ;;  %v1685_v48 = vpop.f32.mrf.mxu2 }
 0x1aa   : > { %v1918_v7 = vpack.c.bf16 %v1900_v43, %v1900_v43  ;;  %v1708_v42 = vadd.f32 %v1685_v48, %v1439_v61  ;;  %v1442_v19 = vadd.f32 %v1441_v1, %v1318_v0  ;;  %v4490_v1 = vld [vmem:[%s4555_s2] ss:$0 sm:$0xff] }
 0x1ab   : > { %3406 = vmatmul.msk.bf16.gmra.mxu0 %vm349_vm2, %v2179_v24 }
 0x1ac   : > { %3431 = vmatmul.msk.bf16.gmra.mxu1 %vm349_vm2, %v4391_v49  ;;  %v1984_v50 = vrot.slane %v1918_v7, 6  ;;  %v1861_v16 = vadd.f32 %v1838_v63, %v1708_v42 }
 0x1ad   : > { %3529 = vmatmul.msk.bf16.gmra.mxu3 %vm349_vm2, %v2699_v11 }
 0x1ae   : > { %v1985_v10 = vsel %vm4255_vm11, %v1983_v14, %v1984_v50  ;;  %v1883_v17 = vadd.f32 %v4229_v3, %v1861_v16  ;;  %3496 = vmatmul.msk.bf16.gmra.mxu2 %vm349_vm2, %v2542_v8  ;;  %v1986_v32 = vrot.slane %v1984_v50, 4 }
 0x1af   : > { %2028 = vst.msk [vmem:[%s3930_s21 + $0x7c] sm:$0xf] %vm1030_vm6, %v1985_v10 }
 0x1b0   : > { %v1841_v59 = vpop.f32.mrf.mxu3  ;;  %v1320_v49 = vpop.f32.mrf.mxu0  ;;  %v1901_v18 = vmax.f32 %v1883_v17, 0.0 }
 0x1b1   : > { %v1443_v12 = vpop.f32.mrf.mxu1  ;;  %v1688_v23 = vpop.f32.mrf.mxu2 }
 0x1b2   : > { %v1919_v26 = vpack.c.bf16 %v1901_v18, %v1901_v18  ;;  %v1709_v27 = vadd.f32 %v1688_v23, %v1442_v19  ;;  %v1444_v41 = vadd.f32 %v1443_v12, %v1320_v49 }
 0x1b4   : > { %v1987_v5 = vrot.slane %v1919_v26, 6  ;;  %v1862_v34 = vadd.f32 %v1841_v59, %v1709_v27 }
 0x1b6   : > { %v1988_v35 = vsel %vm4255_vm11, %v1986_v32, %v1987_v5  ;;  %v1884_v28 = vadd.f32 %v4229_v3, %v1862_v34  ;;  %v1989_v13 = vrot.slane %v1987_v5, 4 }
 0x1b7   : > { %2029 = vst.msk [vmem:[%s3930_s21 + $0x80] sm:$0xf] %vm1030_vm6, %v1988_v35 }
 0x1b8   : > { %v1843_v6 = vpop.f32.mrf.mxu3  ;;  %v2243_v38 = vpop.f32.mrf.mxu0  ;;  %v1902_v40 = vmax.f32 %v1884_v28, 0.0 }
 0x1b9   : > { %v2343_v33 = vpop.f32.mrf.mxu1  ;;  %v1690_v46 = vpop.f32.mrf.mxu2 }
 0x1ba   : > { %v1920_v51 = vpack.c.bf16 %v1902_v40, %v1902_v40  ;;  %v1710_v52 = vadd.f32 %v1690_v46, %v1444_v41  ;;  %v2344_v22 = vadd.f32 %v2343_v33, %v2243_v38 }
 0x1bb   : > { %3407 = vmatmul.msk.bf16.gmra.mxu0 %vm349_vm2, %v2182_v36 }
 0x1bc   : > { %3432 = vmatmul.msk.bf16.gmra.mxu1 %vm349_vm2, %v2290_v37  ;;  %v1990_v53 = vrot.slane %v1920_v51, 6  ;;  %v1863_v54 = vadd.f32 %v1843_v6, %v1710_v52 }
 0x1bd   : > { %3530 = vmatmul.msk.bf16.gmra.mxu3 %vm349_vm2, %v2701_v45 }
 0x1be   : > { %v1991_v55 = vsel %vm4255_vm11, %v1989_v13, %v1990_v53  ;;  %v1885_v25 = vadd.f32 %v4229_v3, %v1863_v54  ;;  %3497 = vmatmul.msk.bf16.gmra.mxu2 %vm349_vm2, %v2547_v47  ;;  %v1992_v3 = vrot.slane %v1990_v53, 4 }
 0x1bf   : > { %2030 = vst.msk [vmem:[%s3930_s21 + $0x84] sm:$0xf] %vm1030_vm6, %v1991_v55 }
 0x1c0   : > { %v2762_v56 = vpop.f32.mrf.mxu3  ;;  %v2245_v57 = vpop.f32.mrf.mxu0  ;;  %v1903_v60 = vmax.f32 %v1885_v25, 0.0 }
 0x1c1   : > { %v2345_v58 = vpop.f32.mrf.mxu1  ;;  %v2608_v62 = vpop.f32.mrf.mxu2 }
 0x1c2   : > { %v1921_v63 = vpack.c.bf16 %v1903_v60, %v1903_v60  ;;  %v2653_v0 = vadd.f32 %v2608_v62, %v2344_v22  ;;  %v2346_v42 = vadd.f32 %v2345_v58, %v2245_v57 }
 0x1c4   : > { %v1993_v24 = vrot.slane %v1921_v63, 6  ;;  %v2807_v4 = vadd.f32 %v2762_v56, %v2653_v0 }
 0x1c6   : > { %v1994_v43 = vsel %vm4255_vm11, %v1992_v3, %v1993_v24  ;;  %v2829_v61 = vadd.f32 %v4490_v1, %v2807_v4 }
 0x1c7   : > { %2031 = vst.msk [vmem:[%s3930_s21 + $0x88] sm:$0xf] %vm1030_vm6, %v1994_v43 }
 0x1c8   : > { %v2764_v11 = vpop.f32.mrf.mxu3  ;;  %v2248_v15 = vpop.f32.mrf.mxu0  ;;  %v2847_v7 = vmax.f32 %v2829_v61, 0.0 }
 0x1c9   : > { %v2348_v48 = vpop.f32.mrf.mxu1  ;;  %v2610_v8 = vpop.f32.mrf.mxu2 }
 0x1ca   : > { %v2865_v2 = vpack.c.bf16 %v2847_v7, %v2847_v7  ;;  %v2654_v14 = vadd.f32 %v2610_v8, %v2346_v42  ;;  %v2349_v44 = vadd.f32 %v2348_v48, %v2248_v15 }
 0x1cc   : > { %2883 = vst.msk [vmem:[%s3930_s21 + $0x8c] sm:$0xf] %vm1030_vm6, %v2865_v2  ;;  %v2808_v50 = vadd.f32 %v2764_v11, %v2654_v14 }
 0x1ce   : > { %v2830_v16 = vadd.f32 %v4490_v1, %v2808_v50 }
 0x1d0   : > { %v2767_v10 = vpop.f32.mrf.mxu3  ;;  %v2250_v17 = vpop.f32.mrf.mxu0  ;;  %v2848_v59 = vmax.f32 %v2830_v16, 0.0 }
 0x1d1   : > { %v2350_v19 = vpop.f32.mrf.mxu1  ;;  %v2613_v49 = vpop.f32.mrf.mxu2 }
 0x1d2   : > { %v2866_v12 = vpack.c.bf16 %v2848_v59, %v2848_v59  ;;  %v2655_v20 = vadd.f32 %v2613_v49, %v2349_v44  ;;  %v2351_v31 = vadd.f32 %v2350_v19, %v2250_v17 }
 0x1d4   : > { %2884 = vst.msk [vmem:[%s3930_s21 + $0x90] sm:$0xf] %vm1030_vm6, %v2866_v12  ;;  %v2809_v21 = vadd.f32 %v2767_v10, %v2655_v20 }
 0x1d6   : > { %v2831_v18 = vadd.f32 %v4490_v1, %v2809_v21 }
 0x1d8   : > { %v2769_v23 = vpop.f32.mrf.mxu3  ;;  %v2253_v26 = vpop.f32.mrf.mxu0  ;;  %v2849_v29 = vmax.f32 %v2831_v18, 0.0 }
 0x1d9   : > { %v2353_v27 = vpop.f32.mrf.mxu1  ;;  %v2615_v9 = vpop.f32.mrf.mxu2 }
 0x1da   : > { %v2867_v32 = vpack.c.bf16 %v2849_v29, %v2849_v29  ;;  %v2656_v5 = vadd.f32 %v2615_v9, %v2351_v31  ;;  %v2354_v35 = vadd.f32 %v2353_v27, %v2253_v26 }
 0x1dc   : > { %2885 = vst.msk [vmem:[%s3930_s21 + $0x94] sm:$0xf] %vm1030_vm6, %v2867_v32  ;;  %v2810_v34 = vadd.f32 %v2769_v23, %v2656_v5 }
 0x1de   : > { %v2832_v30 = vadd.f32 %v4490_v1, %v2810_v34 }
 0x1e0   : > { %v2772_v28 = vpop.f32.mrf.mxu3  ;;  %v2255_v6 = vpop.f32.mrf.mxu0  ;;  %v2850_v37 = vmax.f32 %v2832_v30, 0.0 }
 0x1e1   : > { %v2355_v36 = vpop.f32.mrf.mxu1  ;;  %v2618_v38 = vpop.f32.mrf.mxu2 }
 0x1e2   : > { %v2868_v33 = vpack.c.bf16 %v2850_v37, %v2850_v37  ;;  %v2657_v39 = vadd.f32 %v2618_v38, %v2354_v35  ;;  %v2356_v47 = vadd.f32 %v2355_v36, %v2255_v6 }
 0x1e4   : > { %2886 = vst.msk [vmem:[%s3930_s21 + $0x98] sm:$0xf] %vm1030_vm6, %v2868_v33  ;;  %v2811_v40 = vadd.f32 %v2772_v28, %v2657_v39 }
 0x1e6   : > { %v2833_v41 = vadd.f32 %v4490_v1, %v2811_v40 }
 0x1e8   : > { %v2774_v45 = vpop.f32.mrf.mxu3  ;;  %v2258_v46 = vpop.f32.mrf.mxu0  ;;  %v2851_v52 = vmax.f32 %v2833_v41, 0.0 }
 0x1e9   : > { %v2358_v51 = vpop.f32.mrf.mxu1  ;;  %v2620_v13 = vpop.f32.mrf.mxu2 }
 0x1ea   : > { %v2869_v53 = vpack.c.bf16 %v2851_v52, %v2851_v52  ;;  %v2658_v54 = vadd.f32 %v2620_v13, %v2356_v47  ;;  %v2359_v22 = vadd.f32 %v2358_v51, %v2258_v46 }
 0x1ec   : > { %2887 = vst.msk [vmem:[%s3930_s21 + $0x9c] sm:$0xf] %vm1030_vm6, %v2869_v53  ;;  %v2812_v55 = vadd.f32 %v2774_v45, %v2658_v54 }
 0x1ee   : > { %v2834_v25 = vadd.f32 %v4490_v1, %v2812_v55 }
 0x1f0   : > { %v2777_v56 = vpop.f32.mrf.mxu3  ;;  %v2260_v57 = vpop.f32.mrf.mxu0  ;;  %v2852_v60 = vmax.f32 %v2834_v25, 0.0 }
 0x1f1   : > { %v2360_v58 = vpop.f32.mrf.mxu1  ;;  %v2623_v62 = vpop.f32.mrf.mxu2 }
 0x1f2   : > { %v2870_v63 = vpack.c.bf16 %v2852_v60, %v2852_v60  ;;  %v2659_v0 = vadd.f32 %v2623_v62, %v2359_v22  ;;  %v2361_v15 = vadd.f32 %v2360_v58, %v2260_v57 }
 0x1f4   : > { %2888 = vst.msk [vmem:[%s3930_s21 + $0xa0] sm:$0xf] %vm1030_vm6, %v2870_v63  ;;  %v2813_v3 = vadd.f32 %v2777_v56, %v2659_v0 }
 0x1f6   : > { %v2835_v24 = vadd.f32 %v4490_v1, %v2813_v3 }
 0x1f8   : > { %v2779_v4 = vpop.f32.mrf.mxu3  ;;  %v2263_v43 = vpop.f32.mrf.mxu0  ;;  %v2853_v11 = vmax.f32 %v2835_v24, 0.0 }
 0x1f9   : > { %v2363_v61 = vpop.f32.mrf.mxu1  ;;  %v2625_v48 = vpop.f32.mrf.mxu2 }
 0x1fa   : > { %v2871_v7 = vpack.c.bf16 %v2853_v11, %v2853_v11  ;;  %v2660_v42 = vadd.f32 %v2625_v48, %v2361_v15  ;;  %v2364_v14 = vadd.f32 %v2363_v61, %v2263_v43 }
 0x1fc   : > { %2889 = vst.msk [vmem:[%s3930_s21 + $0xa4] sm:$0xf] %vm1030_vm6, %v2871_v7  ;;  %v2814_v8 = vadd.f32 %v2779_v4, %v2660_v42 }
 0x1fe   : > { %v2836_v2 = vadd.f32 %v4490_v1, %v2814_v8 }
 0x200   : > { %v2782_v50 = vpop.f32.mrf.mxu3  ;;  %v2265_v16 = vpop.f32.mrf.mxu0  ;;  %v2854_v10 = vmax.f32 %v2836_v2, 0.0 }
 0x201   : > { %v2365_v44 = vpop.f32.mrf.mxu1  ;;  %v2628_v17 = vpop.f32.mrf.mxu2 }
 0x202   : > { %v2872_v19 = vpack.c.bf16 %v2854_v10, %v2854_v10  ;;  %v2661_v59 = vadd.f32 %v2628_v17, %v2364_v14  ;;  %v2366_v26 = vadd.f32 %v2365_v44, %v2265_v16 }
 0x204   : > { %2890 = vst.msk [vmem:[%s3930_s21 + $0xa8] sm:$0xf] %vm1030_vm6, %v2872_v19  ;;  %v2815_v49 = vadd.f32 %v2782_v50, %v2661_v59 }
 0x206   : > { %v2837_v12 = vadd.f32 %v4490_v1, %v2815_v49 }
 0x208   : > { %v2784_v20 = vpop.f32.mrf.mxu3  ;;  %v2268_v21 = vpop.f32.mrf.mxu0  ;;  %v2855_v23 = vmax.f32 %v2837_v12, 0.0 }
 0x209   : > { %v2368_v18 = vpop.f32.mrf.mxu1  ;;  %v2630_v27 = vpop.f32.mrf.mxu2 }
 0x20a   : > { %v2873_v29 = vpack.c.bf16 %v2855_v23, %v2855_v23  ;;  %v2662_v31 = vadd.f32 %v2630_v27, %v2366_v26  ;;  %v2369_v5 = vadd.f32 %v2368_v18, %v2268_v21 }
 0x20c   : > { %2891 = vst.msk [vmem:[%s3930_s21 + $0xac] sm:$0xf] %vm1030_vm6, %v2873_v29  ;;  %v2816_v9 = vadd.f32 %v2784_v20, %v2662_v31 }
 0x20e   : > { %v2838_v32 = vadd.f32 %v4490_v1, %v2816_v9 }
 0x210   : > { %v2787_v34 = vpop.f32.mrf.mxu3  ;;  %v2270_v30 = vpop.f32.mrf.mxu0  ;;  %v2856_v28 = vmax.f32 %v2838_v32, 0.0 }
 0x211   : > { %v2370_v35 = vpop.f32.mrf.mxu1  ;;  %v2633_v6 = vpop.f32.mrf.mxu2 }
 0x212   : > { %v2874_v36 = vpack.c.bf16 %v2856_v28, %v2856_v28  ;;  %v2663_v37 = vadd.f32 %v2633_v6, %v2369_v5  ;;  %v2371_v46 = vadd.f32 %v2370_v35, %v2270_v30 }
 0x214   : > { %2892 = vst.msk [vmem:[%s3930_s21 + $0xb0] sm:$0xf] %vm1030_vm6, %v2874_v36  ;;  %v2817_v38 = vadd.f32 %v2787_v34, %v2663_v37 }
 0x216   : > { %v2839_v33 = vadd.f32 %v4490_v1, %v2817_v38 }
 0x218   : > { %v2789_v39 = vpop.f32.mrf.mxu3  ;;  %v2273_v40 = vpop.f32.mrf.mxu0  ;;  %v2857_v45 = vmax.f32 %v2839_v33, 0.0 }
 0x219   : > { %v2373_v41 = vpop.f32.mrf.mxu1  ;;  %v2635_v51 = vpop.f32.mrf.mxu2 }
 0x21a   : > { %v2875_v52 = vpack.c.bf16 %v2857_v45, %v2857_v45  ;;  %v2664_v47 = vadd.f32 %v2635_v51, %v2371_v46  ;;  %v2374_v54 = vadd.f32 %v2373_v41, %v2273_v40 }
 0x21c   : > { %2893 = vst.msk [vmem:[%s3930_s21 + $0xb4] sm:$0xf] %vm1030_vm6, %v2875_v52  ;;  %v2818_v13 = vadd.f32 %v2789_v39, %v2664_v47 }
 0x21e   : > { %v2840_v53 = vadd.f32 %v4490_v1, %v2818_v13 }
 0x220   : > { %v2792_v55 = vpop.f32.mrf.mxu3  ;;  %v2275_v25 = vpop.f32.mrf.mxu0  ;;  %v2858_v56 = vmax.f32 %v2840_v53, 0.0 }
 0x221   : > { %v2375_v22 = vpop.f32.mrf.mxu1  ;;  %v2638_v57 = vpop.f32.mrf.mxu2 }
 0x222   : > { %v2876_v58 = vpack.c.bf16 %v2858_v56, %v2858_v56  ;;  %v2665_v60 = vadd.f32 %v2638_v57, %v2374_v54  ;;  %v2376_v43 = vadd.f32 %v2375_v22, %v2275_v25 }
 0x224   : > { %2894 = vst.msk [vmem:[%s3930_s21 + $0xb8] sm:$0xf] %vm1030_vm6, %v2876_v58  ;;  %v2819_v62 = vadd.f32 %v2792_v55, %v2665_v60 }
 0x226   : > { %v2841_v63 = vadd.f32 %v4490_v1, %v2819_v62 }
 0x228   : > { %v2794_v0 = vpop.f32.mrf.mxu3  ;;  %v2278_v3 = vpop.f32.mrf.mxu0  ;;  %v2859_v4 = vmax.f32 %v2841_v63, 0.0 }
 0x229   : > { %v2378_v24 = vpop.f32.mrf.mxu1  ;;  %v2640_v61 = vpop.f32.mrf.mxu2 }
 0x22a   : > { %v2877_v11 = vpack.c.bf16 %v2859_v4, %v2859_v4  ;;  %v2666_v15 = vadd.f32 %v2640_v61, %v2376_v43  ;;  %v2379_v42 = vadd.f32 %v2378_v24, %v2278_v3 }
 0x22c   : > { %2895 = vst.msk [vmem:[%s3930_s21 + $0xbc] sm:$0xf] %vm1030_vm6, %v2877_v11  ;;  %v2820_v48 = vadd.f32 %v2794_v0, %v2666_v15 }
 0x22e   : > { %v2842_v7 = vadd.f32 %v4490_v1, %v2820_v48 }
 0x230   : > { %v2797_v8 = vpop.f32.mrf.mxu3  ;;  %v2860_v2 = vmax.f32 %v2842_v7, 0.0  ;;  %v2280_v14 = vpop.f32.mrf.mxu0 }
 0x231   : > { %v2643_v50 = vpop.f32.mrf.mxu2  ;;  %v2380_v16 = vpop.f32.mrf.mxu1 }
 0x232   : > { %v2878_v44 = vpack.c.bf16 %v2860_v2, %v2860_v2  ;;  %v2667_v10 = vadd.f32 %v2643_v50, %v2379_v42  ;;  %v2381_v12 = vadd.f32 %v2380_v16, %v2280_v14 }
 0x234   : > { %2896 = vst.msk [vmem:[%s3930_s21 + $0xc0] sm:$0xf] %vm1030_vm6, %v2878_v44  ;;  %v2821_v17 = vadd.f32 %v2797_v8, %v2667_v10 }
 0x236   : > { %v2843_v19 = vadd.f32 %v4490_v1, %v2821_v17 }
 0x238   : > { %v2799_v59 = vpop.f32.mrf.mxu3  ;;  %v2861_v49 = vmax.f32 %v2843_v19, 0.0  ;;  %v2283_v23 = vpop.f32.mrf.mxu0 }
 0x239   : > { %v2645_v20 = vpop.f32.mrf.mxu2  ;;  %v2383_v26 = vpop.f32.mrf.mxu1 }
 0x23a   : > { %v2879_v21 = vpack.c.bf16 %v2861_v49, %v2861_v49  ;;  %v2668_v18 = vadd.f32 %v2645_v20, %v2381_v12  ;;  %v2384_v31 = vadd.f32 %v2383_v26, %v2283_v23 }
 0x23c   : > { %2897 = vst.msk [vmem:[%s3930_s21 + $0xc4] sm:$0xf] %vm1030_vm6, %v2879_v21  ;;  %v2822_v27 = vadd.f32 %v2799_v59, %v2668_v18 }
 0x23e   : > { %v2844_v29 = vadd.f32 %v4490_v1, %v2822_v27 }
 0x240   : > { %v2862_v9 = vmax.f32 %v2844_v29, 0.0  ;;  %v2802_v32 = vpop.f32.mrf.mxu3  ;;  %v2285_v28 = vpop.f32.mrf.mxu0 }
 0x241   : > { %v2648_v5 = vpop.f32.mrf.mxu2  ;;  %v2385_v6 = vpop.f32.mrf.mxu1 }
 0x242   : > { %v2880_v34 = vpack.c.bf16 %v2862_v9, %v2862_v9  ;;  %v2669_v30 = vadd.f32 %v2648_v5, %v2384_v31  ;;  %v2386_v38 = vadd.f32 %v2385_v6, %v2285_v28 }
 0x244   : > { %2898 = vst.msk [vmem:[%s3930_s21 + $0xc8] sm:$0xf] %vm1030_vm6, %v2880_v34  ;;  %v2823_v35 = vadd.f32 %v2802_v32, %v2669_v30 }
 0x246   : > { %v2845_v36 = vadd.f32 %v4490_v1, %v2823_v35 }
 0x248   : > { %v2863_v37 = vmax.f32 %v2845_v36, 0.0  ;;  %v2804_v41 = vpop.f32.mrf.mxu3 }
 0x249   : > { %v2650_v33 = vpop.f32.mrf.mxu2 }
 0x24a   : > { %v2881_v39 = vpack.c.bf16 %v2863_v37, %v2863_v37  ;;  %v2670_v40 = vadd.f32 %v2650_v33, %v2386_v38 }
 0x24c   : > { %2899 = vst.msk [vmem:[%s3930_s21 + $0xcc] sm:$0xf] %vm1030_vm6, %v2881_v39  ;;  %v2824_v45 = vadd.f32 %v2804_v41, %v2670_v40 }
 0x24e   : > { %v2846_v46 = vadd.f32 %v4490_v1, %v2824_v45 }
 0x250   : > { %v2864_v51 = vmax.f32 %v2846_v46, 0.0 }
 0x252   : > { %v2882_v52 = vpack.c.bf16 %v2864_v51, %v2864_v51 }
 0x254   : > { %2900 = vst.msk [vmem:[%s3930_s21 + $0xd0] sm:$0x3] %vm1048_vm7, %v2882_v52 }
 0x255 PF: > { %s13_s12 = sadd.s32 1, %s3657_s12  }
 0x256   : > { %p10_p4 = scmp.ge.s32.totalorder %s13_s12, 4  }
 0x258   :  { %12 = sbr.rel (!%p10_p4) target bundleno = 1 (0x1), region = 65 }

// kernel: dqn_forward_pallas.4
= control target key start
LH: loop header
LB: loop body
LE: loop exit
PB: predicated region body
PF: predicated region fallthrough
CT: control target
= control target key end

     0   :  { %s2988_s18 = smov 0   ;;  %s3672_s0 = inlined_call_operand.vmem [shape: bf16[2,112,128], index: 0, kind: input, shape index: {}]   ;;  %s3673_s1 = inlined_call_operand.vmem [shape: bf16[2,2,128,64], index: 1, kind: input, shape index: {}]   ;;  %s3674_s2 = inlined_call_operand.vmem [shape: f32[1,64], index: 2, kind: input, shape index: {}]   ;;  %s3675_s3 = inlined_call_operand.vmem [shape: bf16[3,3,64,64], index: 3, kind: input, shape index: {}]   ;;  %s3676_s4 = inlined_call_operand.vmem [shape: f32[1,64], index: 4, kind: input, shape index: {}]   ;;  %s3677_s5 = inlined_call_operand.vmem [shape: bf16[2,49,64], index: 5, kind: output, shape index: {}]  }
   0x1 LB: > { %s2303_s19 = sadd.s32 4294967295, %s2956_s18   ;;  %p2307_p0 = scmp.ge.s32.totalorder %s2956_s18, 1  ;;  %s2956_s18 = sphi %s2988_s18, %s15_s18  }
   0x2   : > { %p187_p1 = scmp.lt.s32.totalorder %s2956_s18, 3 }
   0x4   : > { %p188_p2 = pnand %p2307_p0, %p187_p1 }
   0x5   : > { %p215_p3 = scmp.lt.s32.totalorder (!%p188_p2), %s2303_s19, 1 }
   0x6   : > { %191 = sbr.rel (%p188_p2) target bundleno = 632 (0x278), region = 40 }
   0xb   : > { %v2847_v0 = vld [vmem:[%s3673_s1 + $0x78] sm:$0xff]  ;;  %v2846_v1 = vld [vmem:[%s3673_s1 + $0x70] sm:$0xff]  ;;  %s3679_s19 = smov (!%p215_p3, %s2303_s19), 1  ;;  %v2845_v4 = vld [vmem:[%s3673_s1 + $0x68] sm:$0xff]  ;;  %vm305_vm0 = vsmask.f32 7424 }
   0xc   : > { %2922 = vmatpush.bf16.msra.mxu1 %v2847_v0  ;;  %2923 = vmatpush.bf16.msra.mxu2 %v2847_v0  ;;  %v2869_v2 = vld [vmem:[%s3673_s1 + $0xf8] sm:$0xff]  ;;  %v2868_v3 = vld [vmem:[%s3673_s1 + $0xf0] sm:$0xff]  ;;  %s2938_s30 = smul.u32 56, %s3679_s19  ;;  %v2867_v5 = vld [vmem:[%s3673_s1 + $0xe8] sm:$0xff]  ;;  %vm747_vm1 = vsmask.f32 6400 }
   0xd   : > { %412 = vmatpush.bf16.msra.mxu0 %v2847_v0  ;;  %864 = vmatpush.bf16.msra.mxu3 %v2869_v2  ;;  %v2844_v6 = vld [vmem:[%s3673_s1 + $0x60] sm:$0xff]  ;;  %v2843_v9 = vld [vmem:[%s3673_s1 + $0x58] sm:$0xff]  ;;  %v2842_v19 = vld [vmem:[%s3673_s1 + $0x50] sm:$0xff]  ;;  %vm607_vm2 = vcmask 1046528   ;;  %vm955_vm3 = vcmask 519168   ;;  %vm1083_vm4 = vcmask 523264  }
   0xe   : > { %s3023_s12 = scalar_lea.vmem %s3672_s0, %s2938_s30  ;;  %v2866_v8 = vld [vmem:[%s3673_s1 + $0xe0] sm:$0xff]  ;;  %v2865_v15 = vld [vmem:[%s3673_s1 + $0xd8] sm:$0xff]  ;;  %v2864_v23 = vld [vmem:[%s3673_s1 + $0xd0] sm:$0xff]  ;;  %vm1966_vm5 = vcmask 1044480   ;;  %vm1589_vm6 = vcmask 1045504   ;;  %s2939_s27 = smul.u32 28, %s3679_s19 }
   0xf   : > { %v254_v7 = vld [vmem:[%s3023_s12 + $0x30] sm:$0x1]  ;;  %v3033_v10 = vld [vmem:[%s3023_s12 + $0x18] sm:$0xff]  ;;  %v3036_v11 = vld [vmem:[%s3023_s12 + $0x28] sm:$0xff]  ;;  %vm1827_vm7 = vsmask.f32 5376 }
  0x10   : > { %2924 = vmatpush.bf16.msra.mxu1 %v2846_v1  ;;  %2925 = vmatpush.bf16.msra.mxu2 %v2846_v1  ;;  %v297_v12 = vunpack.c.l.b16 %v254_v7  ;;  %v2432_v13 = vld [vmem:[%s3023_s12 + $0x4] sm:$0xe]  ;;  %v2848_v14 = vld [vmem:[%s3023_s12 + $0x4] sm:$0xf0]  ;;  %v3044_v16 = vld [vmem:[%s3023_s12 + $0xc] sm:$0xff]  ;;  %v330_v20 = vshll.u32 %v3033_v10, 16  ;;  %s3609_s30 = scalar_lea.vmem %s3677_s5, %s2939_s27 }
  0x11   : > { %413 = vmatpush.bf16.msra.mxu0 %v2846_v1  ;;  %865 = vmatpush.bf16.msra.mxu3 %v2868_v3  ;;  %v3046_v17 = vor.u32 %v2848_v14, %v2432_v13  ;;  %v3049_v18 = vld [vmem:[%s3023_s12 + $0x20] sm:$0xff]  ;;  %v346_v22 = vshll.u32 %v3036_v11, 16  ;;  %v757_v26 = vshrl.u32 %v3044_v16, 16  ;;  %v334_v28 = vshrl.u32 %v3033_v10, 16  ;;  %v2841_v32 = vld [vmem:[%s3673_s1 + $0x48] sm:$0xff]  ;;  %v2861_v51 = vld [vmem:[%s3673_s1 + $0xb8] sm:$0xff] }
  0x12   : > { %v304_v21 = vpack.c.b16 %v297_v12, %v297_v12  ;;  %v3063_v27 = vld [vmem:[%s3023_s12] sm:$0xff]  ;;  %v338_v29 = vshll.u32 %v3049_v18, 16  ;;  %v350_v30 = vshrl.u32 %v3036_v11, 16  ;;  %v760_v31 = vshll.u32 %v3044_v16, 16  ;;  %v3077_v36 = vld [vmem:[%s3023_s12 + $0x8] sm:$0xff]  ;;  %v2839_v52 = vld [vmem:[%s3673_s1 + $0x38] sm:$0xff] }
  0x13   : > { %v749_v24 = vshrl.u32 %v3046_v17, 16  ;;  %v752_v25 = vshll.u32 %v3046_v17, 16  ;;  %v3072_v33 = vrot.slane %v330_v20, 1  ;;  %v3074_v34 = vrot.slane %v346_v22, 1  ;;  %v2863_v38 = vld [vmem:[%s3673_s1 + $0xc8] sm:$0xff]  ;;  %v2840_v46 = vld [vmem:[%s3673_s1 + $0x40] sm:$0xff] }
  0x14   : > { %2926 = vmatpush.bf16.msra.mxu1 %v2845_v4  ;;  %2927 = vmatpush.bf16.msra.mxu2 %v2845_v4  ;;  %v354_v35 = vshll.u32 %v304_v21, 16  ;;  %v309_v37 = vshll.u32 %v3063_v27, 16  ;;  %v759_v41 = vrot.slane %v757_v26, 1  ;;  %v762_v42 = vrot.slane %v760_v31, 2  ;;  %v2862_v53 = vld [vmem:[%s3673_s1 + $0xc0] sm:$0xff]  ;;  %v2860_v60 = vld [vmem:[%s3673_s1 + $0xb0] sm:$0xff] }
  0x15   : > { %414 = vmatpush.bf16.msra.mxu0 %v2845_v4  ;;  %866 = vmatpush.bf16.msra.mxu3 %v2867_v5  ;;  %v751_v39 = vrot.slane %v749_v24, 1  ;;  %v754_v40 = vrot.slane %v752_v25, 2  ;;  %v307_v43 = vshrl.u32 %v3063_v27, 16  ;;  %v314_v45 = vshll.u32 %v3077_v36, 16  ;;  %v2838_v61 = vld [vmem:[%s3673_s1 + $0x30] sm:$0xff]  ;;  %v2859_v1 = vld [vmem:[%s3673_s1 + $0xa8] sm:$0xff] }
  0x16   : > { %v311_v44 = vrot.slane %v309_v37, 1  ;;  %v336_v47 = vor.u32 %v334_v28, %v3072_v33  ;;  %v340_v48 = vrot.slane %v338_v29, 1  ;;  %v352_v49 = vor.u32 %v350_v30, %v3074_v34  ;;  %v3110_v0 = vld [vmem:[%s3023_s12 + $0x14] sm:$0xff]  ;;  %v2837_v2 = vld [vmem:[%s3673_s1 + $0x28] sm:$0xff]  ;;  %v2858_v7 = vld [vmem:[%s3673_s1 + $0xa0] sm:$0xff] }
  0x17   : > { %v356_v50 = vrot.slane %v354_v35, 1  ;;  %v755_v54 = vor.u32 %v754_v40, %v751_v39  ;;  %v763_v55 = vor.u32 %v762_v42, %v759_v41  ;;  %v316_v57 = vrot.slane %v314_v45, 1  ;;  %v3121_v5 = vld [vmem:[%s3023_s12 + $0x10] sm:$0xff]  ;;  %v2835_v20 = vld [vmem:[%s3673_s1 + $0x18] sm:$0xff]  ;;  %v2855_v31 = vld [vmem:[%s3673_s1 + $0x88] sm:$0xff] }
  0x18   : > { %2928 = vmatpush.bf16.msra.mxu1 %v2844_v6  ;;  %2929 = vmatpush.bf16.msra.mxu2 %v2844_v6  ;;  %v312_v56 = vor.u32 %v311_v44, %v307_v43  ;;  %v341_v58 = vsel %vm305_vm0, %v336_v47, %v340_v48  ;;  %v766_v3 = vshrl.u32 %v3110_v0, 16  ;;  %v769_v4 = vshll.u32 %v3110_v0, 16  ;;  %v2856_v25 = vld [vmem:[%s3673_s1 + $0x90] sm:$0xff]  ;;  %v2851_v30 = vld [vmem:[%s3023_s12 + $0x1c] sm:$0xff] }
  0x19   : > { %415 = vmatpush.bf16.msra.mxu0 %v2844_v6  ;;  %867 = vmatpush.bf16.msra.mxu3 %v2866_v8  ;;  %v357_v59 = vsel %vm305_vm0, %v352_v49, %v356_v50  ;;  %v764_v62 = vsel %vm747_vm1, %v755_v54, %v763_v55  ;;  %v342_v6 = vshrl.u32 %v3049_v18, 16  ;;  %v2836_v8 = vld [vmem:[%s3673_s1 + $0x20] sm:$0xff]  ;;  %v318_v13 = vshrl.u32 %v3077_v36, 16  ;;  %v2834_v26 = vld [vmem:[%s3673_s1 + $0x10] sm:$0xff] }
  0x1a   : > { %v317_v63 = vsel %vm305_vm0, %v312_v56, %v316_v57  ;;  %v771_v12 = vrot.slane %v769_v4, 2  ;;  %v322_v14 = vshll.u32 %v3121_v5, 16  ;;  %v778_v35 = vshll.u32 %v2851_v30, 16  ;;  %v2854_v37 = vld [vmem:[%s3673_s1 + $0x80] sm:$0xff] }
  0x1b   : > { %v320_v22 = vor.u32 %v318_v13, %v316_v57  ;;  %v608_v39 = vrot.slane %v3046_v17, 1  ;;  %v609_v40 = vrot.slane %v3044_v16, 1  ;;  %v326_v43 = vshrl.u32 %v3121_v5, 16  ;;  %v2852_v17 = vld [vmem:[%s3023_s12 + $0x24] sm:$0xff]  ;;  %v556_v13 = vld [vmem:[%s3023_s12 + $0x34] sm:$0x1] }
  0x1c   : > { %2930 = vmatpush.bf16.msra.mxu1 %v2843_v9  ;;  %2931 = vmatpush.bf16.msra.mxu2 %v2843_v9  ;;  %v780_v42 = vrot.slane %v778_v35, 2  ;;  %v787_v49 = vshll.u32 %v2852_v17, 16  ;;  %v611_v50 = vrot.slane %v3110_v0, 1  ;;  %v613_v57 = vrot.slane %v2851_v30, 1 }
  0x1d   : > { %416 = vmatpush.bf16.msra.mxu0 %v2843_v9  ;;  %868 = vmatpush.bf16.msra.mxu3 %v2865_v15  ;;  %v768_v9 = vrot.slane %v766_v3, 1  ;;  %v344_v15 = vor.u32 %v342_v6, %v340_v48  ;;  %v610_v44 = vsel %vm607_vm2, %v608_v39, %v609_v40  ;;  %v784_v48 = vshrl.u32 %v2852_v17, 16  ;;  %v2884_v39 = vld [vmem:[%s3675_s3 + $0x58] sm:$0xff] }
  0x1e   : > { %v615_v0 = vrot.slane %v2852_v17, 1  ;;  %vm2099_vm8 = vsmask.f32 3328  ;;  %vm2125_vm10 = vcmask 519171   ;;  %vm2126_vm11 = vsmask.f32 7950 }
  0x1f   : > { %v772_v21 = vor.u32 %v771_v12, %v768_v9  ;;  %v349_v24 = vsel %vm305_vm0, %v344_v15, %v3074_v34  ;;  %v775_v34 = vshrl.u32 %v2851_v30, 16  ;;  %vm2100_vm9 = vmand %vm955_vm3, %vm2099_vm8  ;;  %vm2106_vm13 = vsmask.f32 2304 }
  0x20   : > { %2932 = vmatpush.bf16.msra.mxu1 %v2842_v19  ;;  %2933 = vmatpush.bf16.msra.mxu2 %v2842_v19  ;;  %v616_v4 = vsel %vm607_vm2, %v613_v57, %v615_v0  ;;  %vm2127_vm12 = vmand %vm2125_vm10, %vm2126_vm11  ;;  %vm2107_vm14 = vsmask.f32 6416 }
  0x21   : > { %417 = vmatpush.bf16.msra.mxu0 %v2842_v19  ;;  %869 = vmatpush.bf16.msra.mxu3 %v2864_v23  ;;  %v2857_v19 = vld [vmem:[%s3673_s1 + $0x98] sm:$0xff]  ;;  %v324_v23 = vrot.slane %v322_v14, 1  ;;  %v773_v28 = vsel %vm747_vm1, %v763_v55, %v772_v21  ;;  %v777_v41 = vrot.slane %v775_v34, 1  ;;  %v2853_v55 = vld [vmem:[%s3023_s12 + $0x2c] sm:$0xff]  ;;  %v599_v14 = vunpack.c.l.b16 %v556_v13  ;;  %vm2108_vm15 = vmor %vm2106_vm13, %vm2107_vm14 }
  0x22   : > { %v796_v56 = vshll.u32 %v2853_v55, 16  ;;  %v617_v9 = vrot.slane %v2853_v55, 1  ;;  %v2879_v34 = vld [vmem:[%s3675_s3 + $0x30] sm:$0xff]  ;;  %vm2219_vm14 = vcmask 519169  }
  0x23   : > { %v325_v29 = vsel %vm305_vm0, %v320_v22, %v324_v23  ;;  %v781_v45 = vor.u32 %v780_v42, %v777_v41  ;;  %v606_v15 = vpack.c.b16 %v599_v14, %v599_v14  ;;  %v2876_v22 = vld [vmem:[%s3675_s3 + $0x18] sm:$0xff] }
  0x24   : > { %2934 = vmatpush.bf16.msra.mxu1 %v2841_v32  ;;  %2935 = vmatpush.bf16.msra.mxu2 %v2841_v32  ;;  %v618_v12 = vsel %vm607_vm2, %v615_v0, %v617_v9 }
  0x25   : > { %418 = vmatpush.bf16.msra.mxu0 %v2841_v32  ;;  %870 = vmatpush.bf16.msra.mxu3 %v2863_v38  ;;  %v2833_v32 = vld [vmem:[%s3673_s1 + $0x8] sm:$0xff]  ;;  %v2832_v38 = vld [vmem:[%s3673_s1] sm:$0xff]  ;;  %v782_v47 = vsel %vm747_vm1, %v772_v21, %v781_v45 }
  0x28   : > { %2936 = vmatpush.bf16.msra.mxu1 %v2840_v46  ;;  %2937 = vmatpush.bf16.msra.mxu2 %v2840_v46 }
  0x29   : > { %871 = vmatpush.bf16.msra.mxu3 %v2862_v53  ;;  %419 = vmatpush.bf16.msra.mxu0 %v2840_v46  ;;  %v328_v46 = vor.u32 %v326_v43, %v324_v23  ;;  %v612_v53 = vsel %vm607_vm2, %v609_v40, %v611_v50  ;;  %v2880_v23 = vld [vmem:[%s3675_s3 + $0x38] sm:$0xff]  ;;  %v3223_v43 = vld [vmem:[%s3674_s2] ss:$0 sm:$0xff] }
  0x2b   : > { %435 = vmatmul.bf16.vlgmr.msra.gmra.mxu1 %v341_v58  ;;  %445 = vmatmul.bf16.vlgmr.msra.gmra.mxu2 %v357_v59  ;;  %v333_v16 = vsel %vm305_vm0, %v328_v46, %v3072_v33  ;;  %v793_v33 = vshrl.u32 %v2853_v55, 16  ;;  %v798_v59 = vrot.slane %v796_v56, 2  ;;  %v2878_v46 = vld [vmem:[%s3675_s3 + $0x28] sm:$0xff]  ;;  %v2881_v55 = vld [vmem:[%s3675_s3 + $0x40] sm:$0xff] }
  0x2c   : > { %675 = vmatpush.bf16.msrb.mxu2 %v2861_v51  ;;  %505 = vmatpush.bf16.msrb.mxu1 %v2839_v52  ;;  %v786_v51 = vrot.slane %v784_v48, 1  ;;  %v789_v52 = vrot.slane %v787_v49, 2  ;;  %v2882_v49 = vld [vmem:[%s3675_s3 + $0x48] sm:$0xff] }
  0x2d   : > { %872 = vmatmul.bf16.vlgmr.msra.gmra.mxu3 %v764_v62  ;;  %420 = vmatmul.bf16.vlgmr.msra.gmra.mxu0 %v317_v63  ;;  %v795_v58 = vrot.slane %v793_v33, 1  ;;  %v726_v63 = vld [vmem:[%s3023_s12 + $0x34] sm:$0x3] }
  0x2e   : > { %v790_v54 = vor.u32 %v789_v52, %v786_v51  ;;  %1103 = vmatpush.bf16.msrb.mxu0 %v2880_v23  ;;  %v2890_v33 = vld [vmem:[%s3675_s3 + $0x70] sm:$0xff] }
  0x30   : > { %676 = vmatpush.bf16.msrb.mxu2 %v2860_v60  ;;  %506 = vmatpush.bf16.msrb.mxu1 %v2838_v61  ;;  %v614_v60 = vsel %vm607_vm2, %v611_v50, %v613_v57  ;;  %v799_v61 = vor.u32 %v798_v59, %v795_v58  ;;  %v2877_v57 = vld [vmem:[%s3675_s3 + $0x20] sm:$0xff] }
  0x32   : > { %v800_v62 = vsel %vm747_vm1, %v790_v54, %v799_v61  ;;  %1104 = vmatpush.bf16.msrb.mxu0 %v2879_v34 }
  0x34   : > { %677 = vmatpush.bf16.msrb.mxu2 %v2859_v1  ;;  %507 = vmatpush.bf16.msrb.mxu1 %v2837_v2 }
  0x36   : > { %1105 = vmatpush.bf16.msrb.mxu0 %v2878_v46 }
  0x38   : > { %678 = vmatpush.bf16.msrb.mxu2 %v2858_v7  ;;  %508 = vmatpush.bf16.msrb.mxu1 %v2836_v8 }
  0x3a   : > { %1106 = vmatpush.bf16.msrb.mxu0 %v2877_v57 }
  0x3b   : > { %440 = vmatmul.bf16.gmra.mxu1 %v349_v24 }
  0x3c   : > { %679 = vmatpush.bf16.msrb.mxu2 %v2857_v19  ;;  %509 = vmatpush.bf16.msrb.mxu1 %v2835_v20  ;;  %v619_v19 = vrot.slane %v606_v15, 1 }
  0x3d   : > { %877 = vmatmul.bf16.gmra.mxu3 %v773_v28  ;;  %425 = vmatmul.bf16.gmra.mxu0 %v325_v29 }
  0x3e   : > { %v620_v20 = vsel %vm607_vm2, %v617_v9, %v619_v19 }
  0x40   : > { %680 = vmatpush.bf16.msrb.mxu2 %v2856_v25  ;;  %510 = vmatpush.bf16.msrb.mxu1 %v2834_v26  ;;  %v2874_v26 = vld [vmem:[%s3675_s3 + $0x8] sm:$0xff] }
  0x44   : > { %681 = vmatpush.bf16.msrb.mxu2 %v2855_v31  ;;  %511 = vmatpush.bf16.msrb.mxu1 %v2833_v32  ;;  %v2873_v31 = vld [vmem:[%s3675_s3] sm:$0xff] }
  0x48   : > { %682 = vmatpush.bf16.msrb.mxu2 %v2854_v37  ;;  %512 = vmatpush.bf16.msrb.mxu1 %v2832_v38 }
  0x4b   : > { %683 = vmatmul.bf16.vlgmr.msrb.gmra.mxu2 %v610_v44  ;;  %513 = vmatmul.bf16.vlgmr.msrb.gmra.mxu1 %v3063_v27  ;;  %v791_v27 = vsel %vm747_vm1, %v781_v45, %v790_v54  ;;  %v2883_v44 = vld [vmem:[%s3675_s3 + $0x50] sm:$0xff] }
  0x4c   : > { %1172 = vmatpush.bf16.msra.mxu1 %v2876_v22  ;;  %1266 = vmatpush.bf16.msra.mxu2 %v2884_v39 }
  0x4d   : > { %882 = vmatmul.bf16.gmra.mxu3 %v782_v47  ;;  %430 = vmatmul.bf16.gmra.mxu0 %v333_v16  ;;  %v2891_v47 = vld [vmem:[%s3675_s3 + $0x78] sm:$0xff] }
  0x4e   : > { %1400 = vmatpush.bf16.msrb.mxu3 %v2891_v47 }
  0x50   : > { %1267 = vmatpush.bf16.msra.mxu2 %v2883_v44 }
  0x52   : > { %1401 = vmatpush.bf16.msrb.mxu3 %v2890_v33 }
  0x54   : > { %1268 = vmatpush.bf16.msra.mxu2 %v2882_v49 }
  0x58   : > { %1269 = vmatpush.bf16.msra.mxu2 %v2881_v55 }
  0x5b   : > { %688 = vmatmul.bf16.gmra.mxu2 %v612_v53  ;;  %518 = vmatmul.bf16.gmra.mxu1 %v3077_v36  ;;  %v745_v36 = vunpack.c.l.b16 %v726_v63 }
  0x5d   : > { %887 = vmatmul.bf16.gmra.mxu3 %v791_v27  ;;  %v746_v1 = vpack.c.b16 %v745_v36, %v745_v36 }
  0x5f   : > { %v802_v2 = vshrl.u32 %v746_v1, 16  ;;  %v805_v3 = vshll.u32 %v746_v1, 16 }
  0x61   : > { %v804_v6 = vrot.slane %v802_v2, 1  ;;  %v807_v7 = vrot.slane %v805_v3, 2  ;;  %v2888_v2 = vld [vmem:[%s3675_s3 + $0x60] sm:$0xff] }
  0x63   : > { %v808_v8 = vor.u32 %v807_v7, %v804_v6 }
  0x6b   : > { %693 = vmatmul.bf16.gmra.mxu2 %v614_v60  ;;  %523 = vmatmul.bf16.gmra.mxu1 %v3121_v5  ;;  %v809_v5 = vsel %vm747_vm1, %v799_v61, %v808_v8  ;;  %v2889_v61 = vld [vmem:[%s3675_s3 + $0x68] sm:$0xff] }
  0x6c   : > { %1402 = vmatpush.bf16.msrb.mxu3 %v2889_v61 }
  0x6d   : > { %892 = vmatmul.bf16.gmra.mxu3 %v800_v62 }
  0x70   : > { %1403 = vmatpush.bf16.msrb.mxu3 %v2888_v2 }
  0x7b   : > { %698 = vmatmul.bf16.gmra.mxu2 %v616_v4  ;;  %528 = vmatmul.bf16.gmra.mxu1 %v3033_v10 }
  0x7d   : > { %897 = vmatmul.bf16.gmra.mxu3 %v809_v5 }
  0x8b   : > { %703 = vmatmul.bf16.gmra.mxu2 %v618_v12  ;;  %533 = vmatmul.bf16.gmra.mxu1 %v3049_v18 }
  0x9b   : > { %708 = vmatmul.bf16.gmra.mxu2 %v620_v20  ;;  %538 = vmatmul.bf16.gmra.mxu1 %v3036_v11  ;;  %v2875_v11 = vld [vmem:[%s3675_s3 + $0x10] sm:$0xff]  ;;  %v2895_v20 = vld [vmem:[%s3675_s3 + $0x98] sm:$0xff] }
  0x9c   : > { %1173 = vmatpush.bf16.msra.mxu1 %v2875_v11  ;;  %1538 = vmatpush.bf16.msra.mxu0 %v2895_v20 }
  0xa0   : > { %1174 = vmatpush.bf16.msra.mxu1 %v2874_v26 }
  0xa4   : > { %1175 = vmatpush.bf16.msra.mxu1 %v2873_v31 }
  0xa8   : > { %v3187_v21 = vpop.f32.mrf.mxu1 }
  0xaa   : > { %v421_v28 = vpop.f32.mrf.mxu0 }
  0xae   : > { %v3199_v25 = vpop.f32.mrf.mxu2 }
  0xb0   : > { %v3189_v10 = vpop.f32.mrf.mxu1  ;;  %v873_v18 = vpop.f32.mrf.mxu3 }
  0xb2   : > { %v423_v37 = vpop.f32.mrf.mxu0 }
  0xb6   : > { %v3212_v32 = vpop.f32.mrf.mxu2 }
  0xb8   : > { %v3197_v24 = vpop.f32.mrf.mxu1  ;;  %v875_v30 = vpop.f32.mrf.mxu3 }
  0xba   : > { %v426_v51 = vpop.f32.mrf.mxu0 }
  0xc0   : > { %v3207_v29 = vpop.f32.mrf.mxu1  ;;  %v878_v41 = vpop.f32.mrf.mxu3 }
  0xc2   : > { %v428_v0 = vpop.f32.mrf.mxu0 }
  0xc8   : > { %v514_v35 = vpop.f32.mrf.mxu1  ;;  %v880_v27 = vpop.f32.mrf.mxu3 }
  0xc9   : > { %v515_v38 = vadd.f32 %v514_v35, %v421_v28 }
  0xca   : > { %v431_v15 = vpop.f32.mrf.mxu0 }
  0xce   : > { %v684_v40 = vpop.f32.mrf.mxu2 }
  0xcf   : > { %v714_v42 = vadd.f32 %v684_v40, %v515_v38 }
  0xd0   : > { %v516_v17 = vpop.f32.mrf.mxu1  ;;  %v883_v4 = vpop.f32.mrf.mxu3 }
  0xd1   : > { %v903_v45 = vadd.f32 %v873_v18, %v714_v42  ;;  %v517_v48 = vadd.f32 %v516_v17, %v423_v37 }
  0xd2   : > { %v433_v35 = vpop.f32.mrf.mxu0 }
  0xd3   : > { %v919_v16 = vadd.f32 %v3223_v43, %v903_v45 }
  0xd5   : > { %v931_v50 = vmax.f32 %v919_v16, 0.0 }
  0xd6   : > { %v686_v52 = vpop.f32.mrf.mxu2 }
  0xd7   : > { %v943_v53 = vpack.c.bf16 %v931_v50, %v931_v50  ;;  %v715_v54 = vadd.f32 %v686_v52, %v517_v48 }
  0xd8   : > { %v519_v59 = vpop.f32.mrf.mxu1  ;;  %v885_v11 = vpop.f32.mrf.mxu3 }
  0xd9   : > { %956 = vst.msk [vmem:[#allocation2] sm:$0xf] %vm955_vm3, %v943_v53  ;;  %v904_v56 = vadd.f32 %v875_v30, %v715_v54  ;;  %v520_v60 = vadd.f32 %v519_v59, %v426_v51 }
  0xdb   : > { %v920_v58 = vadd.f32 %v3223_v43, %v904_v56 }
  0xdd   : > { %v932_v62 = vmax.f32 %v920_v58, 0.0 }
  0xde   : > { %v689_v63 = vpop.f32.mrf.mxu2 }
  0xdf   : > { %v944_v36 = vpack.c.bf16 %v932_v62, %v932_v62  ;;  %v716_v1 = vadd.f32 %v689_v63, %v520_v60 }
  0xe0   : > { %v521_v7 = vpop.f32.mrf.mxu1  ;;  %v2920_v44 = vld [vmem:[#allocation2] sm:$0xe]  ;;  %v888_v46 = vpop.f32.mrf.mxu3 }
  0xe1   : > { %957 = vst.msk [vmem:[#allocation2 + $0x4] sm:$0xf] %vm955_vm3, %v944_v36  ;;  %v905_v3 = vadd.f32 %v878_v41, %v716_v1  ;;  %v522_v8 = vadd.f32 %v521_v7, %v428_v0 }
  0xe3   : > { %v921_v6 = vadd.f32 %v3223_v43, %v905_v3 }
  0xe5   : > { %v933_v5 = vmax.f32 %v921_v6, 0.0 }
  0xe6   : > { %v691_v9 = vpop.f32.mrf.mxu2 }
  0xe7   : > { %v945_v12 = vpack.c.bf16 %v933_v5, %v933_v5  ;;  %v717_v13 = vadd.f32 %v691_v9, %v522_v8  ;;  %v2894_v5 = vld [vmem:[%s3675_s3 + $0x90] sm:$0xff] }
  0xe8   : > { %v2916_v14 = vld [vmem:[#allocation2] sm:$0xff]   ;;  %v524_v23 = vpop.f32.mrf.mxu1  ;;  %v890_v7 = vpop.f32.mrf.mxu3  ;;  %1539 = vmatpush.bf16.msra.mxu0 %v2894_v5 }
  0xe9   : > { %958 = vst.msk [vmem:[#allocation2 + $0x8] sm:$0xf] %vm955_vm3, %v945_v12  ;;  %v906_v19 = vadd.f32 %v880_v27, %v717_v13  ;;  %2591 = vmatmul.msk.bf16.vlgmr.msra.gmra.mxu1 %vm1083_vm4, %v2916_v14  ;;  %v525_v18 = vadd.f32 %v524_v23, %v431_v15  ;;  %v2919_v39 = vld [vmem:[#allocation2] sm:$0xf0]  ;;  %v1023_v40 = vshll.u32 %v2916_v14, 16  ;;  %v1021_v27 = vshrl.u32 %v2916_v14, 16 }
  0xea   : > { %v2921_v47 = vor.u32 %v2920_v44, %v2919_v39  ;;  %v1304_v16 = vld [vmem:[#allocation2 + $0x4] sm:$0xe] }
  0xeb   : > { %v922_v22 = vadd.f32 %v3223_v43, %v906_v19  ;;  %v1025_v49 = vrot.slane %v1023_v40, 1  ;;  %v1333_v53 = vunpack.c.l.b16 %v1304_v16 }
  0xec   : > { %v1214_v55 = vrot.slane %v2921_v47, 1 }
  0xed   : > { %v934_v26 = vmax.f32 %v922_v22, 0.0  ;;  %v1026_v62 = vor.u32 %v1025_v49, %v1021_v27 }
  0xee   : > { %v694_v28 = vpop.f32.mrf.mxu2 }
  0xef   : > { %v946_v30 = vpack.c.bf16 %v934_v26, %v934_v26  ;;  %v718_v31 = vadd.f32 %v694_v28, %v525_v18 }
  0xf0   : > { %v526_v38 = vpop.f32.mrf.mxu1  ;;  %v1953_v9 = vld [vmem:[#allocation2 + $0x8] sm:$0x8] }
  0xf1   : > { %959 = vst.msk [vmem:[#allocation2 + $0xc] sm:$0xf] %vm955_vm3, %v946_v30  ;;  %v907_v34 = vadd.f32 %v883_v4, %v718_v31  ;;  %v527_v41 = vadd.f32 %v526_v38, %v433_v35  ;;  %v1964_v30 = vunpack.c.l.b16 %v1953_v9 }
  0xf3   : > { %v923_v37 = vadd.f32 %v3223_v43, %v907_v34 }
  0xf5   : > { %v935_v42 = vmax.f32 %v923_v37, 0.0 }
  0xf6   : > { %v696_v45 = vpop.f32.mrf.mxu2 }
  0xf7   : > { %v947_v17 = vpack.c.bf16 %v935_v42, %v935_v42  ;;  %v719_v48 = vadd.f32 %v696_v45, %v527_v41 }
  0xf8   : > { %v3265_v50 = vld [vmem:[#allocation2 + $0x8] sm:$0xff]  ;;  %v529_v58 = vpop.f32.mrf.mxu1 }
  0xf9   : > { %v3267_v51 = vld [vmem:[#allocation2 + $0x8] sm:$0xff]   ;;  %960 = vst.msk [vmem:[#allocation2 + $0x10] sm:$0xf] %vm955_vm3, %v947_v17  ;;  %v908_v52 = vadd.f32 %v885_v11, %v719_v48  ;;  %2592 = vmatmul.msk.bf16.gmra.mxu1 %vm1083_vm4, %v3265_v50  ;;  %v1215_v33 = vrot.slane %v3265_v50, 1  ;;  %v1028_v56 = vshll.u32 %v3265_v50, 16  ;;  %v530_v60 = vadd.f32 %v529_v58, %v3187_v21 }
  0xfa   : > { %v1334_v54 = vunpack.c.l.b16 %v3267_v51  ;;  %v1710_v14 = vunpack.c.h.b16 %v3267_v51  ;;  %v1032_v16 = vshrl.u32 %v3265_v50, 16 }
  0xfb   : > { %v924_v57 = vadd.f32 %v3223_v43, %v908_v52  ;;  %v1216_v61 = vsel %vm607_vm2, %v1214_v55, %v1215_v33  ;;  %v1030_v63 = vrot.slane %v1028_v56, 1 }
  0xfc   : > { %v1343_v59 = vpack.c.b16 %v1334_v54, %v1333_v53  ;;  %2620 = vmatmul.msk.bf16.vlgmr.msra.gmra.mxu2 %vm1083_vm4, %v1216_v61  ;;  %v1965_v37 = vpack.c.b16 %v1710_v14, %v1964_v30 }
  0xfd   : > { %v936_v36 = vmax.f32 %v924_v57, 0.0  ;;  %v1031_v1 = vsel %vm305_vm0, %v1026_v62, %v1030_v63  ;;  %v1034_v56 = vor.u32 %v1032_v16, %v1030_v63 }
  0xfe   : > { %v699_v0 = vpop.f32.mrf.mxu2  ;;  %2570 = vmatmul.msk.bf16.vlgmr.msrb.gmra.mxu0 %vm1083_vm4, %v1031_v1  ;;  %v1452_v4 = vshrl.u32 %v1343_v59, 16  ;;  %v1455_v6 = vshll.u32 %v1343_v59, 16  ;;  %v1348_v12 = vrot.slane %v1343_v59, 1  ;;  %v1967_v52 = vrot.slane %v1965_v37, 3  ;;  %v2899_v59 = vld [vmem:[%s3675_s3 + $0xb8] sm:$0xff] }
  0xff   : > { %v948_v2 = vpack.c.bf16 %v936_v36, %v936_v36  ;;  %v720_v3 = vadd.f32 %v699_v0, %v530_v60  ;;  %1642 = vmatpush.bf16.msrb.mxu1 %v2899_v59  ;;  %v2893_v36 = vld [vmem:[%s3675_s3 + $0x88] sm:$0xff]  ;;  %v2898_v0 = vld [vmem:[%s3675_s3 + $0xb0] sm:$0xff] }
 0x100   : > { %v3285_v21 = vld [vmem:[#allocation2 + $0xc] sm:$0xff]  ;;  %v531_v20 = vpop.f32.mrf.mxu1  ;;  %v1454_v22 = vrot.slane %v1452_v4, 1  ;;  %v1457_v23 = vrot.slane %v1455_v6, 2  ;;  %1540 = vmatpush.bf16.msra.mxu0 %v2893_v36 }
 0x101   : > { %961 = vst.msk [vmem:[#allocation2 + $0x14] sm:$0xf] %vm955_vm3, %v948_v2  ;;  %v909_v8 = vadd.f32 %v888_v46, %v720_v3  ;;  %v1349_v13 = vrot.slane %v3285_v21, 1  ;;  %v1460_v15 = vshrl.u32 %v3285_v21, 16  ;;  %v1463_v18 = vshll.u32 %v3285_v21, 16  ;;  %v893_v46 = vpop.f32.mrf.mxu3 }
 0x102   : > { %v532_v11 = vadd.f32 %v531_v20, %v3189_v10  ;;  %v1458_v40 = vor.u32 %v1457_v23, %v1454_v22 }
 0x103   : > { %v925_v19 = vadd.f32 %v3223_v43, %v909_v8  ;;  %v1350_v26 = vsel %vm607_vm2, %v1348_v12, %v1349_v13  ;;  %v1462_v28 = vrot.slane %v1460_v15, 1  ;;  %v1465_v34 = vrot.slane %v1463_v18, 2  ;;  %1643 = vmatpush.bf16.msrb.mxu1 %v2898_v0 }
 0x104   : > { %2661 = vmatmul.msk.bf16.vlgmr.msrb.gmra.mxu3 %vm1083_vm4, %v1350_v26 }
 0x105   : > { %v937_v31 = vmax.f32 %v925_v19, 0.0  ;;  %v1466_v41 = vor.u32 %v1465_v34, %v1462_v28 }
 0x106   : > { %v701_v35 = vpop.f32.mrf.mxu2 }
 0x107   : > { %v949_v38 = vpack.c.bf16 %v937_v31, %v937_v31  ;;  %v721_v39 = vadd.f32 %v701_v35, %v532_v11  ;;  %v3309_v45 = vsel %vm747_vm1, %v1458_v40, %v1466_v41 }
 0x108   : > { %v3303_v42 = vld [vmem:[#allocation2 + $0x10] sm:$0xff]  ;;  %v534_v49 = vpop.f32.mrf.mxu1 }
 0x109   : > { %v3305_v10 = vld [vmem:[#allocation2 + $0x10] sm:$0xff]  ;;  %962 = vst.msk [vmem:[#allocation2 + $0x18] sm:$0xf] %vm955_vm3, %v949_v38  ;;  %v910_v44 = vadd.f32 %v890_v7, %v721_v39  ;;  %2593 = vmatmul.msk.bf16.gmra.mxu1 %vm1083_vm4, %v3303_v42  ;;  %v1217_v47 = vrot.slane %v3303_v42, 1  ;;  %v1036_v17 = vshll.u32 %v3303_v42, 16  ;;  %v535_v27 = vadd.f32 %v534_v49, %v3197_v24  ;;  %v2897_v7 = vld [vmem:[%s3675_s3 + $0xa8] sm:$0xff]  ;;  %v895_v8 = vpop.f32.mrf.mxu3 }
 0x10a   : > { %v1968_v53 = vrot.slane %v3305_v10, 3  ;;  %1644 = vmatpush.bf16.msrb.mxu1 %v2897_v7  ;;  %v1040_v31 = vshrl.u32 %v3303_v42, 16 }
 0x10b   : > { %v926_v48 = vadd.f32 %v3223_v43, %v910_v44  ;;  %v1218_v55 = vsel %vm607_vm2, %v1215_v33, %v1217_v47  ;;  %v1038_v57 = vrot.slane %v1036_v17, 1  ;;  %v2892_v17 = vld [vmem:[%s3675_s3 + $0x80] sm:$0xff] }
 0x10c   : > { %2621 = vmatmul.msk.bf16.gmra.mxu2 %vm1083_vm4, %v1218_v55  ;;  %v3331_v60 = vsel %vm1966_vm5, %v1967_v52, %v1968_v53  ;;  %1541 = vmatpush.bf16.msra.mxu0 %v2892_v17  ;;  %v2908_v17 = vld [vmem:[%s3675_s3 + $0xe8] sm:$0xff] }
 0x10d   : > { %v938_v58 = vmax.f32 %v926_v48, 0.0  ;;  %v1039_v61 = vsel %vm305_vm0, %v1034_v56, %v1038_v57  ;;  %v1042_v44 = vor.u32 %v1040_v31, %v1038_v57  ;;  %v2905_v56 = vld [vmem:[%s3675_s3 + $0xd0] sm:$0xff] }
 0x10e   : > { %v704_v24 = vpop.f32.mrf.mxu2  ;;  %2571 = vmatmul.msk.bf16.gmra.mxu0 %vm1083_vm4, %v1039_v61 }
 0x10f   : > { %v950_v50 = vpack.c.bf16 %v938_v58, %v938_v58  ;;  %v722_v62 = vadd.f32 %v704_v24, %v535_v27  ;;  %v2906_v27 = vld [vmem:[%s3675_s3 + $0xd8] sm:$0xff] }
 0x110   : > { %v3335_v33 = vld [vmem:[#allocation2 + $0x14] sm:$0xff]  ;;  %v536_v6 = vpop.f32.mrf.mxu1  ;;  %1776 = vmatpush.bf16.msrb.mxu2 %v2906_v27 }
 0x111   : > { %963 = vst.msk [vmem:[#allocation2 + $0x1c] sm:$0xf] %vm955_vm3, %v950_v50  ;;  %v911_v63 = vadd.f32 %v893_v46, %v722_v62  ;;  %v1351_v1 = vrot.slane %v3335_v33, 1  ;;  %v1469_v2 = vshrl.u32 %v3335_v33, 16  ;;  %v1472_v3 = vshll.u32 %v3335_v33, 16 }
 0x112   : > { %v537_v5 = vadd.f32 %v536_v6, %v3207_v29  ;;  %v2896_v29 = vld [vmem:[%s3675_s3 + $0xa0] sm:$0xff] }
 0x113   : > { %v927_v4 = vadd.f32 %v3223_v43, %v911_v63  ;;  %v1352_v9 = vsel %vm607_vm2, %v1349_v13, %v1351_v1  ;;  %v1471_v12 = vrot.slane %v1469_v2, 1  ;;  %v1474_v19 = vrot.slane %v1472_v3, 2  ;;  %1645 = vmatpush.bf16.msrb.mxu1 %v2896_v29 }
 0x114   : > { %2662 = vmatmul.msk.bf16.gmra.mxu3 %vm1083_vm4, %v1352_v9  ;;  %1777 = vmatpush.bf16.msrb.mxu2 %v2905_v56 }
 0x115   : > { %v939_v15 = vmax.f32 %v927_v4, 0.0  ;;  %v3356_v18 = vor.u32 %v1474_v19, %v1471_v12  ;;  %v2910_v12 = vld [vmem:[%s3675_s3 + $0xf8] sm:$0xff] }
 0x116   : > { %v706_v20 = vpop.f32.mrf.mxu2  ;;  %1915 = vmatpush.bf16.msra.mxu3 %v2910_v12 }
 0x117   : > { %v951_v22 = vpack.c.bf16 %v939_v15, %v939_v15  ;;  %v723_v23 = vadd.f32 %v706_v20, %v537_v5  ;;  %v3368_v28 = vsel %vm747_vm1, %v1466_v41, %v3356_v18  ;;  %v898_v41 = vpop.f32.mrf.mxu3 }
 0x118   : > { %v3358_v11 = vld [vmem:[#allocation2 + $0x18] sm:$0xff]  ;;  %v539_v37 = vpop.f32.mrf.mxu1 }
 0x119   : > { %v3363_v26 = vld [vmem:[#allocation2 + $0x18] sm:$0xff]  ;;  %964 = vst.msk [vmem:[#allocation2 + $0x20] sm:$0xf] %vm955_vm3, %v951_v22  ;;  %v912_v13 = vadd.f32 %v895_v8, %v723_v23  ;;  %2594 = vmatmul.msk.bf16.gmra.mxu1 %vm1083_vm4, %v3358_v11  ;;  %v1219_v30 = vrot.slane %v3358_v11, 1  ;;  %v1044_v34 = vshll.u32 %v3358_v11, 16  ;;  %v540_v39 = vadd.f32 %v539_v37, %v3199_v25  ;;  %v2903_v37 = vld [vmem:[%s3675_s3 + $0xc0] sm:$0xff] }
 0x11a   : > { %v1970_v38 = vrot.slane %v3363_v26, 3 }
 0x11b   : > { %v928_v35 = vadd.f32 %v3223_v43, %v912_v13  ;;  %v1220_v40 = vsel %vm607_vm2, %v1217_v47, %v1219_v30  ;;  %v1046_v46 = vrot.slane %v1044_v34, 1  ;;  %v1048_v34 = vshrl.u32 %v3358_v11, 16 }
 0x11c   : > { %2622 = vmatmul.msk.bf16.gmra.mxu2 %vm1083_vm4, %v1220_v40  ;;  %v3392_v25 = vsel %vm1966_vm5, %v1968_v53, %v1970_v38 }
 0x11d   : > { %v940_v16 = vmax.f32 %v928_v35, 0.0  ;;  %v1047_v47 = vsel %vm305_vm0, %v1042_v44, %v1046_v46 }
 0x11e   : > { %v709_v42 = vpop.f32.mrf.mxu2  ;;  %2572 = vmatmul.msk.bf16.gmra.mxu0 %vm1083_vm4, %v1047_v47  ;;  %v1576_v47 = vld [vmem:[#allocation2 + $0x4] sm:$0xc] }
 0x11f   : > { %v952_v48 = vpack.c.bf16 %v940_v16, %v940_v16  ;;  %v724_v49 = vadd.f32 %v709_v42, %v540_v39  ;;  %v900_v2 = vpop.f32.mrf.mxu3 }
 0x120   : > { %v3396_v52 = vld [vmem:[#allocation2 + $0x1c] sm:$0xff]  ;;  %v541_v24 = vpop.f32.mrf.mxu1 }
 0x121   : > { %965 = vst.msk [vmem:[#allocation2 + $0x24] sm:$0xf] %vm955_vm3, %v952_v48  ;;  %v913_v55 = vadd.f32 %v898_v41, %v724_v49  ;;  %v1353_v53 = vrot.slane %v3396_v52, 1  ;;  %v1478_v57 = vshrl.u32 %v3396_v52, 16  ;;  %v1481_v58 = vshll.u32 %v3396_v52, 16  ;;  %v2907_v48 = vld [vmem:[%s3675_s3 + $0xe0] sm:$0xff] }
 0x122   : > { %v542_v61 = vadd.f32 %v541_v24, %v3212_v32  ;;  %v2904_v32 = vld [vmem:[%s3675_s3 + $0xc8] sm:$0xff]  ;;  %v1050_v41 = vor.u32 %v1048_v34, %v1046_v46  ;;  %v1587_v49 = vunpack.c.l.b16 %v1576_v47  ;;  %v1595_v34 = vrot.slane %v3396_v52, 2 }
 0x123   : > { %v929_v59 = vadd.f32 %v3223_v43, %v913_v55  ;;  %v1354_v50 = vsel %vm607_vm2, %v1351_v1, %v1353_v53  ;;  %v1480_v62 = vrot.slane %v1478_v57, 1  ;;  %v1483_v36 = vrot.slane %v1481_v58, 2  ;;  %1778 = vmatpush.bf16.msrb.mxu2 %v2904_v32 }
 0x124   : > { %2663 = vmatmul.msk.bf16.gmra.mxu3 %vm1083_vm4, %v1354_v50  ;;  %v1588_v55 = vpack.c.b16 %v1334_v54, %v1587_v49  ;;  %v1591_v58 = vrot.slane %v3285_v21, 2  ;;  %v1725_v32 = vrot.slane %v3305_v10, 2 }
 0x125   : > { %v941_v63 = vmax.f32 %v929_v59, 0.0  ;;  %v3414_v6 = vor.u32 %v1483_v36, %v1480_v62 }
 0x126   : > { %v711_v0 = vpop.f32.mrf.mxu2  ;;  %v1590_v50 = vrot.slane %v1588_v55, 2 }
 0x127   : > { %v953_v3 = vpack.c.bf16 %v941_v63, %v941_v63  ;;  %v725_v4 = vadd.f32 %v711_v0, %v542_v61  ;;  %v3431_v19 = vsel %vm747_vm1, %v3356_v18, %v3414_v6  ;;  %1779 = vmatpush.bf16.msrb.mxu2 %v2903_v37  ;;  %v1680_v0 = vld [vmem:[#allocation2 + $0x8] sm:$0xc]  ;;  %v1727_v37 = vrot.slane %v3363_v26, 2 }
 0x128   : > { %v3416_v7 = vld [vmem:[#allocation2 + $0x20] sm:$0xff]   ;;  %v1592_v62 = vsel %vm1589_vm6, %v1590_v50, %v1591_v58 }
 0x129   : > { %v985_v8 = vld [vmem:[#allocation2 + $0x24] sm:$0x1]  ;;  %966 = vst.msk [vmem:[#allocation2 + $0x28] sm:$0xf] %vm955_vm3, %v953_v3  ;;  %v914_v1 = vadd.f32 %v900_v2, %v725_v4  ;;  %v1013_v5 = vunpack.c.l.b16 %v3416_v7  ;;  %v1341_v42 = vunpack.c.h.b16 %v3416_v7  ;;  %v2913_v2 = vld [vmem:[%s3675_s3 + $0x110] sm:$0xff]  ;;  %v1709_v3 = vunpack.c.l.b16 %v1680_v0 }
 0x12a   : > { %v1014_v9 = vunpack.c.l.b16 %v985_v8  ;;  %v3426_v15 = vld [vmem:[#allocation2 + $0x20] sm:$0xff]  ;;  %v1593_v4 = vrot.slane %v3335_v33, 2 }
 0x12b   : > { %v930_v20 = vadd.f32 %v3223_v43, %v914_v1  ;;  %v1132_v22 = vpack.c.b16 %v1013_v5, %v1013_v5  ;;  %v1972_v29 = vrot.slane %v3426_v15, 3  ;;  %v2909_v43 = vld [vmem:[%s3675_s3 + $0xf0] sm:$0xff]  ;;  %v1719_v8 = vpack.c.b16 %v1710_v14, %v1709_v3 }
 0x12c   : > { %v1019_v23 = vpack.c.b16 %v1014_v9, %v1013_v5  ;;  %1916 = vmatpush.bf16.msra.mxu3 %v2909_v43  ;;  %v1837_v1 = vshrl.u32 %v3305_v10, 16  ;;  %v1840_v5 = vshll.u32 %v3305_v10, 16  ;;  %v1594_v9 = vsel %vm1589_vm6, %v1591_v58, %v1593_v4 }
 0x12d   : > { %v942_v13 = vmax.f32 %v930_v20, 0.0  ;;  %2595 = vmatmul.msk.bf16.gmra.mxu1 %vm1083_vm4, %v1132_v22  ;;  %v3446_v18 = vsel %vm1966_vm5, %v1970_v38, %v1972_v29  ;;  %v1724_v12 = vrot.slane %v1719_v8, 2  ;;  %v1829_v20 = vshrl.u32 %v1719_v8, 16 }
 0x12e   : > { %v1221_v31 = vrot.slane %v1019_v23, 1  ;;  %v1052_v35 = vshll.u32 %v1019_v23, 16  ;;  %v1056_v63 = vshrl.u32 %v1019_v23, 16  ;;  %v1832_v22 = vshll.u32 %v1719_v8, 16 }
 0x12f   : > { %v954_v39 = vpack.c.bf16 %v942_v13, %v942_v13  ;;  %v1726_v23 = vsel %vm1589_vm6, %v1724_v12, %v1725_v32  ;;  %v1839_v33 = vrot.slane %v1837_v1, 2  ;;  %v1831_v51 = vrot.slane %v1829_v20, 2 }
 0x130   : > { %v1222_v40 = vsel %vm607_vm2, %v1219_v30, %v1221_v31  ;;  %v1054_v44 = vrot.slane %v1052_v35, 1  ;;  %v1313_v16 = vld [vmem:[#allocation2 + $0x28] sm:$0x1]  ;;  %v2914_v30 = vld [vmem:[%s3675_s3 + $0x118] sm:$0xff]  ;;  %1917 = vmatpush.bf16.msra.mxu3 %v2908_v17  ;;  %v1834_v14 = vrot.slane %v1832_v22, 3  ;;  %v1846_v43 = vshrl.u32 %v3363_v26, 16 }
 0x131   : > { %2623 = vmatmul.msk.bf16.gmra.mxu2 %vm1083_vm4, %v1222_v40  ;;  %967 = vst.msk [vmem:[#allocation2 + $0x2c] sm:$0xf] %vm955_vm3, %v954_v39  ;;  %v1342_v11 = vunpack.c.l.b16 %v1313_v16  ;;  %2019 = vmatpush.bf16.msrb.mxu0 %v2914_v30  ;;  %v3469_v56 = vld [vmem:[#allocation2 + $0x28] sm:$0xf]  ;;  %v1596_v39 = vsel %vm1589_vm6, %v1593_v4, %v1595_v34  ;;  %v1729_v30 = vrot.slane %v3426_v15, 2 }
 0x132   : > { %v1055_v38 = vsel %vm305_vm0, %v1050_v41, %v1054_v44  ;;  %v1717_v24 = vunpack.c.l.b16 %v3469_v56  ;;  %v1058_v36 = vor.u32 %v1056_v63, %v1054_v44  ;;  %v1835_v10 = vor.u32 %v1834_v14, %v1831_v51  ;;  %v2912_v35 = vld [vmem:[%s3675_s3 + $0x108] sm:$0xff] }
 0x133   : > { %2573 = vmatmul.msk.bf16.gmra.mxu0 %vm1083_vm4, %v1055_v38  ;;  %v1347_v46 = vpack.c.b16 %v1342_v11, %v1341_v42  ;;  %v1438_v40 = vld [vmem:[#allocation2 + $0x28] sm:$0x3]  ;;  %v1728_v41 = vsel %vm1589_vm6, %v1725_v32, %v1727_v37  ;;  %v1848_v44 = vrot.slane %v1846_v43, 2  ;;  %vm2131_vm0 = vcmask 518144  }
 0x134   : > { %1918 = vmatpush.bf16.msra.mxu3 %v2907_v48  ;;  %v1449_v16 = vunpack.c.l.b16 %v1438_v40  ;;  %v1858_v48 = vshll.u32 %v3426_v15, 16 }
 0x135   : > { %v1355_v27 = vrot.slane %v1347_v46, 1  ;;  %2020 = vmatpush.bf16.msrb.mxu0 %v2913_v2  ;;  %v1855_v46 = vshrl.u32 %v3426_v15, 16 }
 0x136   : > { %v1450_v38 = vpack.c.b16 %v1449_v16, %v1341_v42  ;;  %v1730_v42 = vsel %vm1589_vm6, %v1727_v37, %v1729_v30  ;;  %v1860_v55 = vrot.slane %v1858_v48, 3 }
 0x137   : > { %v1356_v57 = vsel %vm607_vm2, %v1353_v53, %v1355_v27  ;;  %vm2138_vm2 = vcmask 1044484  }
 0x138   : > { %2664 = vmatmul.msk.bf16.gmra.mxu3 %vm1083_vm4, %v1356_v57  ;;  %v1814_v59 = vld [vmem:[#allocation2 + $0x2c] sm:$0x7]  ;;  %v1597_v47 = vrot.slane %v1450_v38, 2 }
 0x139   : > { %v1825_v61 = vunpack.c.l.b16 %v1814_v59  ;;  %2021 = vmatpush.bf16.msrb.mxu0 %v2912_v35  ;;  %v1689_v57 = vld [vmem:[#allocation2 + $0x2c] sm:$0x3]  ;;  %v1487_v59 = vshrl.u32 %v1450_v38, 16 }
 0x13a   : > { %v1598_v49 = vsel %vm1589_vm6, %v1595_v34, %v1597_v47  ;;  %v1718_v58 = vunpack.c.l.b16 %v1689_v57 }
 0x13b   : > { %v3479_v54 = vpack.c.b16 %v1825_v61, %v1717_v24  ;;  %v1490_v61 = vshll.u32 %v1450_v38, 16 }
 0x13c   : > { %v1723_v63 = vpack.c.b16 %v1718_v58, %v1717_v24 }
 0x13d   : > { %2719 = vmatmul.msk.bf16.vlgmr.msrb.gmra.mxu1 %vm1083_vm4, %v1592_v62  ;;  %v1974_v53 = vrot.slane %v3479_v54, 3  ;;  %v1492_v0 = vrot.slane %v1490_v61, 2  ;;  %v1864_v3 = vshrl.u32 %v3479_v54, 16  ;;  %v1867_v4 = vshll.u32 %v3479_v54, 16 }
 0x13e   : > { %v1731_v2 = vrot.slane %v1723_v63, 2 }
 0x13f   : > { %v3487_v21 = vsel %vm1966_vm5, %v1972_v29, %v1974_v53  ;;  %v1842_v29 = vrot.slane %v1840_v5, 3  ;;  %v1869_v56 = vrot.slane %v1867_v4, 3  ;;  %vm2149_vm5 = vmand %vm2131_vm0, %vm2106_vm13 }
 0x140   : > { %v1732_v5 = vsel %vm1589_vm6, %v1729_v30, %v1731_v2  ;;  %vm2155_vm6 = vsmask.f32 7440 }
 0x141   : > { %2624 = vmatmul.msk.bf16.gmra.mxu2 %vm1083_vm4, %v1221_v31  ;;  %v1843_v13 = vor.u32 %v1842_v29, %v1839_v33 }
 0x143   : > { %2574 = vmatmul.msk.bf16.gmra.mxu0 %vm1083_vm4, %v1058_v36  ;;  %v1844_v31 = vsel %vm1827_vm7, %v1835_v10, %v1843_v13  ;;  %v1489_v36 = vrot.slane %v1487_v59, 1 }
 0x145   : > { %v1493_v32 = vor.u32 %v1492_v0, %v1489_v36 }
 0x147   : > { %v1494_v20 = vsel %vm747_vm1, %v3414_v6, %v1493_v32  ;;  %vm2137_vm1 = vcmask 1040384  }
 0x148   : > { %2665 = vmatmul.msk.bf16.gmra.mxu3 %vm1083_vm4, %v1355_v27  ;;  %v1857_v27 = vrot.slane %v1855_v46, 2 }
 0x14a   : > { %v1861_v15 = vor.u32 %v1860_v55, %v1857_v27 }
 0x14d   : > { %2720 = vmatmul.msk.bf16.gmra.mxu1 %vm1083_vm4, %v1594_v9  ;;  %v1866_v9 = vrot.slane %v1864_v3, 2 }
 0x14f   : > { %v1870_v22 = vor.u32 %v1869_v56, %v1866_v9 }
 0x151   : > { %2760 = vmatmul.msk.bf16.vlgmr.msrb.gmra.mxu2 %vm1083_vm4, %v1726_v23  ;;  %v1871_v51 = vsel %vm1827_vm7, %v1861_v15, %v1870_v22 }
 0x153   : > { %2690 = vmatmul.msk.bf16.vlgmr.msra.gmra.mxu0 %vm1083_vm4, %v3309_v45  ;;  %v1849_v45 = vshll.u32 %v3363_v26, 16 }
 0x155   : > { %v1851_v52 = vrot.slane %v1849_v45, 3 }
 0x157   : > { %v1852_v17 = vor.u32 %v1851_v52, %v1848_v44 }
 0x158   : > { %2789 = vmatmul.msk.bf16.vlgmr.msra.gmra.mxu3 %vm1083_vm4, %v1844_v31 }
 0x159   : > { %v1853_v11 = vsel %vm1827_vm7, %v1843_v13, %v1852_v17  ;;  %v1862_v62 = vsel %vm1827_vm7, %v1852_v17, %v1861_v15  ;;  %vm2178_vm7 = vcmask 519170  }
 0x15d   : > { %2721 = vmatmul.msk.bf16.gmra.mxu1 %vm1083_vm4, %v1596_v39 }
 0x161   : > { %2761 = vmatmul.msk.bf16.gmra.mxu2 %vm1083_vm4, %v1728_v41 }
 0x163   : > { %2691 = vmatmul.msk.bf16.gmra.mxu0 %vm1083_vm4, %v3368_v28  ;;  %v2911_v28 = vld [vmem:[%s3675_s3 + $0x100] sm:$0xff] }
 0x164   : > { %2022 = vmatpush.bf16.msrb.mxu0 %v2911_v28 }
 0x166   : > { %v1177_v26 = vpop.f32.mrf.mxu1 }
 0x168   : > { %2790 = vmatmul.msk.bf16.gmra.mxu3 %vm1083_vm4, %v1853_v11 }
 0x16d   : > { %2722 = vmatmul.msk.bf16.gmra.mxu1 %vm1083_vm4, %v1598_v49 }
 0x16e   : > { %v1179_v7 = vpop.f32.mrf.mxu1 }
 0x171   : > { %2762 = vmatmul.msk.bf16.gmra.mxu2 %vm1083_vm4, %v1730_v42 }
 0x173   : > { %2692 = vmatmul.msk.bf16.gmra.mxu0 %vm1083_vm4, %v3431_v19 }
 0x176   : > { %v1182_v50 = vpop.f32.mrf.mxu1 }
 0x178   : > { %2791 = vmatmul.msk.bf16.gmra.mxu3 %vm1083_vm4, %v1862_v62 }
 0x17b   : > { %v1108_v19 = vpop.f32.mrf.mxu0 }
 0x17c   : > { %v1178_v8 = vadd.f32 %v1177_v26, %v1108_v19 }
 0x17d   : > { %2723 = vmatmul.msk.bf16.gmra.mxu1 %vm1083_vm4, %v1597_v47 }
 0x17e   : > { %v1184_v1 = vpop.f32.mrf.mxu1 }
 0x17f   : > { %v1271_v24 = vpop.f32.mrf.mxu2 }
 0x180   : > { %v1295_v12 = vadd.f32 %v1271_v24, %v1178_v8 }
 0x181   : > { %2763 = vmatmul.msk.bf16.gmra.mxu2 %vm1083_vm4, %v1732_v5 }
 0x183   : > { %2693 = vmatmul.msk.bf16.gmra.mxu0 %vm1083_vm4, %v1494_v20  ;;  %v1110_v23 = vpop.f32.mrf.mxu0 }
 0x184   : > { %v1180_v33 = vadd.f32 %v1179_v7, %v1110_v23 }
 0x186   : > { %v1187_v29 = vpop.f32.mrf.mxu1 }
 0x187   : > { %v1273_v14 = vpop.f32.mrf.mxu2  ;;  %v1405_v13 = vpop.f32.mrf.mxu3 }
 0x188   : > { %2792 = vmatmul.msk.bf16.gmra.mxu3 %vm1083_vm4, %v1871_v51  ;;  %v1296_v10 = vadd.f32 %v1273_v14, %v1180_v33  ;;  %v1429_v31 = vadd.f32 %v1405_v13, %v1295_v12 }
 0x18b   : > { %v1113_v34 = vpop.f32.mrf.mxu0 }
 0x18c   : > { %v1183_v35 = vadd.f32 %v1182_v50, %v1113_v34 }
 0x18e   : > { %v1189_v37 = vpop.f32.mrf.mxu1 }
 0x18f   : > { %v1276_v6 = vpop.f32.mrf.mxu2  ;;  %v1407_v43 = vpop.f32.mrf.mxu3 }
 0x190   : > { %v1297_v45 = vadd.f32 %v1276_v6, %v1183_v35  ;;  %v1430_v39 = vadd.f32 %v1407_v43, %v1296_v10 }
 0x191   : > { %2764 = vmatmul.msk.bf16.gmra.mxu2 %vm1083_vm4, %v1731_v2 }
 0x193   : > { %2694 = vmatmul.msk.bf16.gmra.mxu0 %vm1083_vm4, %v1493_v32  ;;  %v1115_v40 = vpop.f32.mrf.mxu0 }
 0x194   : > { %v1185_v41 = vadd.f32 %v1184_v1, %v1115_v40 }
 0x196   : > { %v1192_v44 = vpop.f32.mrf.mxu1 }
 0x197   : > { %v1278_v52 = vpop.f32.mrf.mxu2  ;;  %v1410_v16 = vpop.f32.mrf.mxu3 }
 0x198   : > { %2793 = vmatmul.msk.bf16.gmra.mxu3 %vm1083_vm4, %v1870_v22  ;;  %v1298_v17 = vadd.f32 %v1278_v52, %v1185_v41  ;;  %v1431_v38 = vadd.f32 %v1410_v16, %v1297_v45 }
 0x19b   : > { %v1118_v26 = vpop.f32.mrf.mxu0 }
 0x19c   : > { %v1188_v11 = vadd.f32 %v1187_v29, %v1118_v26 }
 0x19e   : > { %v1194_v49 = vpop.f32.mrf.mxu1 }
 0x19f   : > { %v1281_v47 = vpop.f32.mrf.mxu2  ;;  %v1412_v30 = vpop.f32.mrf.mxu3 }
 0x1a0   : > { %v1299_v46 = vadd.f32 %v1281_v47, %v1188_v11  ;;  %v3555_v48 = vadd.f32 %v1412_v30, %v1298_v17 }
 0x1a3   : > { %2818 = vmatmul.msk.bf16.vlgmr.msrb.gmra.mxu0 %vm1083_vm4, %v3331_v60  ;;  %v1120_v28 = vpop.f32.mrf.mxu0 }
 0x1a4   : > { %v1190_v7 = vadd.f32 %v1189_v37, %v1120_v28 }
 0x1a7   : > { %v1283_v42 = vpop.f32.mrf.mxu2  ;;  %v1415_v27 = vpop.f32.mrf.mxu3 }
 0x1a8   : > { %v1300_v55 = vadd.f32 %v1283_v42, %v1190_v7  ;;  %v3559_v57 = vadd.f32 %v1415_v27, %v1299_v46 }
 0x1aa   : > { %v1197_v15 = vpop.f32.mrf.mxu1 }
 0x1af   : > { %v1417_v61 = vpop.f32.mrf.mxu3 }
 0x1b0   : > { %v1123_v58 = vpop.f32.mrf.mxu0  ;;  %v3561_v50 = vadd.f32 %v1417_v61, %v1300_v55 }
 0x1b1   : > { %v1193_v59 = vadd.f32 %v1192_v44, %v1123_v58 }
 0x1b2   : > { %v1199_v62 = vpop.f32.mrf.mxu1 }
 0x1b3   : > { %2819 = vmatmul.msk.bf16.gmra.mxu0 %vm1083_vm4, %v3392_v25 }
 0x1b4   : > { %v1286_v63 = vpop.f32.mrf.mxu2 }
 0x1b5   : > { %v1301_v36 = vadd.f32 %v1286_v63, %v1193_v59 }
 0x1b8   : > { %v1125_v60 = vpop.f32.mrf.mxu0 }
 0x1b9   : > { %v1195_v0 = vadd.f32 %v1194_v49, %v1125_v60 }
 0x1ba   : > { %v1647_v2 = vpop.f32.mrf.mxu1 }
 0x1bb   : > { %v1420_v4 = vpop.f32.mrf.mxu3 }
 0x1bc   : > { %v1288_v3 = vpop.f32.mrf.mxu2  ;;  %v3565_v8 = vadd.f32 %v1420_v4, %v1301_v36 }
 0x1bd   : > { %v1302_v19 = vadd.f32 %v1288_v3, %v1195_v0 }
 0x1c0   : > { %v1128_v32 = vpop.f32.mrf.mxu0 }
 0x1c1   : > { %v1198_v1 = vadd.f32 %v1197_v15, %v1128_v32 }
 0x1c2   : > { %v1649_v5 = vpop.f32.mrf.mxu1 }
 0x1c3   : > { %2820 = vmatmul.msk.bf16.gmra.mxu0 %vm1083_vm4, %v3446_v18  ;;  %v1422_v56 = vpop.f32.mrf.mxu3 }
 0x1c4   : > { %v1291_v9 = vpop.f32.mrf.mxu2  ;;  %v3569_v25 = vadd.f32 %v1422_v56, %v1302_v19 }
 0x1c5   : > { %v1303_v24 = vadd.f32 %v1291_v9, %v1198_v1 }
 0x1c8   : > { %v1130_v12 = vpop.f32.mrf.mxu0 }
 0x1ca   : > { %v1652_v20 = vpop.f32.mrf.mxu1 }
 0x1cb   : > { %v1425_v23 = vpop.f32.mrf.mxu3 }
 0x1cc   : > { %v1293_v22 = vpop.f32.mrf.mxu2  ;;  %v3571_v33 = vadd.f32 %v1425_v23, %v1303_v24 }
 0x1d0   : > { %v1543_v29 = vpop.f32.mrf.mxu0 }
 0x1d1   : > { %v1567_v51 = vadd.f32 %v1543_v29, %v1429_v31 }
 0x1d2   : > { %v1654_v14 = vpop.f32.mrf.mxu1 }
 0x1d3   : > { %2821 = vmatmul.msk.bf16.gmra.mxu0 %vm1083_vm4, %v3487_v21  ;;  %v1671_v13 = vadd.f32 %v1647_v2, %v1567_v51  ;;  %v1427_v10 = vpop.f32.mrf.mxu3 }
 0x1d4   : > { %v1781_v18 = vpop.f32.mrf.mxu2 }
 0x1d5   : > { %v1805_v34 = vadd.f32 %v1781_v18, %v1671_v13 }
 0x1d8   : > { %v1545_v35 = vpop.f32.mrf.mxu0 }
 0x1d9   : > { %v1568_v37 = vadd.f32 %v1545_v35, %v1430_v39 }
 0x1da   : > { %v1657_v6 = vpop.f32.mrf.mxu1 }
 0x1db   : > { %v1672_v43 = vadd.f32 %v1649_v5, %v1568_v37  ;;  %v1920_v40 = vpop.f32.mrf.mxu3 }
 0x1dc   : > { %v1783_v45 = vpop.f32.mrf.mxu2  ;;  %v1944_v44 = vadd.f32 %v1920_v40, %v1805_v34 }
 0x1dd   : > { %v1806_v41 = vadd.f32 %v1783_v45, %v1672_v43  ;;  %v3601_v43 = vld [vmem:[%s3676_s4] ss:$0 sm:$0xff] }
 0x1e0   : > { %v1548_v52 = vpop.f32.mrf.mxu0 }
 0x1e1   : > { %v1569_v16 = vadd.f32 %v1548_v52, %v1431_v38 }
 0x1e2   : > { %v1659_v17 = vpop.f32.mrf.mxu1 }
 0x1e3   : > { %2822 = vmatmul.msk.bf16.gmra.mxu0 %vm1083_vm4, %v1974_v53  ;;  %v1673_v21 = vadd.f32 %v1652_v20, %v1569_v16  ;;  %v1922_v26 = vpop.f32.mrf.mxu3  ;;  %vm2139_vm4 = vmor %vm2137_vm1, %vm2138_vm2  ;;  %vm2203_vm2 = vsmask.f32 4368 }
 0x1e4   : > { %v1786_v31 = vpop.f32.mrf.mxu2  ;;  %v1945_v47 = vadd.f32 %v1922_v26, %v1806_v41  ;;  %v2101_v26 = vld [vmem:[%s3609_s30] sm:$0xf] }
 0x1e5   : > { %v1807_v11 = vadd.f32 %v1786_v31, %v1673_v21 }
 0x1e8   : > { %v1550_v30 = vpop.f32.mrf.mxu0 }
 0x1e9   : > { %v1570_v39 = vadd.f32 %v1550_v30, %v3555_v48 }
 0x1ea   : > { %v1662_v46 = vpop.f32.mrf.mxu1 }
 0x1eb   : > { %v1674_v49 = vadd.f32 %v1654_v14, %v1570_v39  ;;  %v1925_v7 = vpop.f32.mrf.mxu3 }
 0x1ec   : > { %v1788_v28 = vpop.f32.mrf.mxu2  ;;  %v3579_v27 = vadd.f32 %v1925_v7, %v1807_v11 }
 0x1ed   : > { %v1808_v42 = vadd.f32 %v1788_v28, %v1674_v49 }
 0x1f0   : > { %v1553_v38 = vpop.f32.mrf.mxu0 }
 0x1f1   : > { %v1571_v54 = vadd.f32 %v1553_v38, %v3559_v57 }
 0x1f2   : > { %v1664_v55 = vpop.f32.mrf.mxu1 }
 0x1f3   : > { %v1675_v53 = vadd.f32 %v1657_v6, %v1571_v54  ;;  %v1927_v58 = vpop.f32.mrf.mxu3 }
 0x1f4   : > { %v1791_v15 = vpop.f32.mrf.mxu2  ;;  %v3582_v61 = vadd.f32 %v1927_v58, %v1808_v42 }
 0x1f5   : > { %v1809_v59 = vadd.f32 %v1791_v15, %v1675_v53 }
 0x1f8   : > { %v1555_v62 = vpop.f32.mrf.mxu0 }
 0x1f9   : > { %v1572_v48 = vadd.f32 %v1555_v62, %v3561_v50 }
 0x1fa   : > { %v1667_v63 = vpop.f32.mrf.mxu1 }
 0x1fb   : > { %v1676_v36 = vadd.f32 %v1659_v17, %v1572_v48  ;;  %v1930_v0 = vpop.f32.mrf.mxu3 }
 0x1fc   : > { %v1793_v60 = vpop.f32.mrf.mxu2  ;;  %v3585_v3 = vadd.f32 %v1930_v0, %v1809_v59 }
 0x1fd   : > { %v1810_v2 = vadd.f32 %v1793_v60, %v1676_v36 }
 0x200   : > { %v1558_v4 = vpop.f32.mrf.mxu0 }
 0x201   : > { %v1573_v57 = vadd.f32 %v1558_v4, %v3565_v8 }
 0x202   : > { %v1669_v19 = vpop.f32.mrf.mxu1 }
 0x203   : > { %v1677_v32 = vadd.f32 %v1662_v46, %v1573_v57  ;;  %v1932_v5 = vpop.f32.mrf.mxu3 }
 0x204   : > { %v1796_v1 = vpop.f32.mrf.mxu2  ;;  %v3588_v56 = vadd.f32 %v1932_v5, %v1810_v2 }
 0x205   : > { %v1811_v9 = vadd.f32 %v1796_v1, %v1677_v32 }
 0x208   : > { %v1560_v24 = vpop.f32.mrf.mxu0 }
 0x209   : > { %v1574_v50 = vadd.f32 %v1560_v24, %v3569_v25  ;;  %v2150_v24 = vld [vmem:[%s3609_s30 + $0x8] sm:$0x7] }
 0x20b   : > { %v1678_v12 = vadd.f32 %v1664_v55, %v1574_v50  ;;  %v1935_v22 = vpop.f32.mrf.mxu3 }
 0x20c   : > { %v1798_v20 = vpop.f32.mrf.mxu2  ;;  %v3591_v29 = vadd.f32 %v1935_v22, %v1811_v9 }
 0x20d   : > { %v1812_v23 = vadd.f32 %v1798_v20, %v1678_v12 }
 0x210   : > { %v1563_v51 = vpop.f32.mrf.mxu0 }
 0x211   : > { %v1575_v14 = vadd.f32 %v1563_v51, %v3571_v33 }
 0x213   : > { %v1679_v8 = vadd.f32 %v1667_v63, %v1575_v14  ;;  %v1937_v10 = vpop.f32.mrf.mxu3 }
 0x214   : > { %v1801_v13 = vpop.f32.mrf.mxu2  ;;  %v3594_v34 = vadd.f32 %v1937_v10, %v1812_v23 }
 0x215   : > { %v1813_v18 = vadd.f32 %v1801_v13, %v1679_v8 }
 0x218   : > { %v1565_v35 = vpop.f32.mrf.mxu0 }
 0x21b   : > { %v1940_v6 = vpop.f32.mrf.mxu3 }
 0x21c   : > { %v1803_v37 = vpop.f32.mrf.mxu2  ;;  %v3596_v25 = vadd.f32 %v1940_v6, %v1813_v18 }
 0x220   : > { %v2024_v45 = vpop.f32.mrf.mxu0 }
 0x221   : > { %v2048_v40 = vadd.f32 %v2024_v45, %v1944_v44 }
 0x223   : > { %v2061_v33 = vadd.f32 %v3601_v43, %v2048_v40  ;;  %v1942_v41 = vpop.f32.mrf.mxu3 }
 0x225   : > { %v2070_v52 = vmax.f32 %v2061_v33, 0.0 }
 0x227   : > { %v2079_v16 = vpack.c.bf16 %v2070_v52, %v2070_v52 }
 0x228   : > { %v2026_v17 = vpop.f32.mrf.mxu0 }
 0x229   : > { %2088 = vst.msk [vmem:[#allocation3] sm:$0xf] %vm955_vm3, %v2079_v16  ;;  %v2049_v21 = vadd.f32 %v2026_v17, %v1945_v47 }
 0x22b   : > { %v2062_v44 = vadd.f32 %v3601_v43, %v2049_v21 }
 0x22d   : > { %v2071_v31 = vmax.f32 %v2062_v44, 0.0 }
 0x22f   : > { %v2080_v11 = vpack.c.bf16 %v2071_v31, %v2071_v31 }
 0x230   : > { %v2097_v30 = vld [vmem:[#allocation3] sm:$0xf]  ;;  %v2029_v39 = vpop.f32.mrf.mxu0 }
 0x231   : > { %v2102_v46 = vsel %vm2100_vm9, %v2097_v30, %v2101_v26  ;;  %2089 = vst.msk [vmem:[#allocation3 + $0x4] sm:$0xf] %vm955_vm3, %v2080_v11  ;;  %v2050_v47 = vadd.f32 %v2029_v39, %v3579_v27  ;;  %vm2179_vm9 = vsmask.f32 7946 }
 0x232   : > { %2103 = vst [vmem:[%s3609_s30] sm:$0xf] %v2102_v46  ;;  %vm2180_vm11 = vmand %vm2178_vm7, %vm2179_vm9 }
 0x233   : > { %v2063_v49 = vadd.f32 %v3601_v43, %v2050_v47 }
 0x235   : > { %v2072_v28 = vmax.f32 %v2063_v49, 0.0 }
 0x237   : > { %v2081_v7 = vpack.c.bf16 %v2072_v28, %v2072_v28 }
 0x238   : > { %v2104_v42 = vld [vmem:[#allocation3 + $0x4] sm:$0xe]  ;;  %v2031_v38 = vpop.f32.mrf.mxu0 }
 0x239   : > { %v2110_v54 = vshll.u32 %v2104_v42, 16  ;;  %v2113_v55 = vshrl.u32 %v2104_v42, 16  ;;  %2090 = vst.msk [vmem:[#allocation3 + $0x8] sm:$0xf] %vm955_vm3, %v2081_v7  ;;  %v2051_v53 = vadd.f32 %v2031_v38, %v3582_v61  ;;  %v2128_v59 = vld [vmem:[%s3609_s30] sm:$0x8] }
 0x23a   : > { %v2197_v38 = vld [vmem:[%s3609_s30 + $0x10] sm:$0x3] }
 0x23b   : > { %v2112_v27 = vrot.slane %v2110_v54, 6  ;;  %v2115_v15 = vrot.slane %v2113_v55, 5  ;;  %v2064_v58 = vadd.f32 %v3601_v43, %v2051_v53 }
 0x23d   : > { %v2129_v62 = vsel %vm2127_vm12, %v2112_v27, %v2128_v59  ;;  %v2073_v48 = vmax.f32 %v2064_v58, 0.0  ;;  %v2116_v63 = vor.u32 %v2115_v15, %v2112_v27  ;;  %vm2184_vm12 = vcmask 517120  }
 0x23e   : > { %2130 = vst [vmem:[%s3609_s30] sm:$0x8] %v2129_v62 }
 0x23f   : > { %v2082_v36 = vpack.c.bf16 %v2073_v48, %v2073_v48  ;;  %v2117_v19 = vrot.slane %v2116_v63, 4 }
 0x240   : > { %v2105_v60 = vld [vmem:[#allocation3 + $0x8] sm:$0x1]  ;;  %v2133_v0 = vld [vmem:[#allocation3 + $0x8] sm:$0xc]  ;;  %v2034_v2 = vpop.f32.mrf.mxu0 }
 0x241   : > { %v2119_v61 = vshll.u32 %v2105_v60, 16  ;;  %v2140_v4 = vrot.slane %v2133_v0, 7  ;;  %2091 = vst.msk [vmem:[#allocation3 + $0xc] sm:$0xf] %vm955_vm3, %v2082_v36  ;;  %v2052_v57 = vadd.f32 %v2034_v2, %v3585_v3 }
 0x243   : > { %v2121_v32 = vrot.slane %v2119_v61, 6  ;;  %2147 = vst.msk [vmem:[%s3609_s30 + $0x4] sm:$0x8] %vm2125_vm10, %v2140_v4  ;;  %v2065_v1 = vadd.f32 %v3601_v43, %v2052_v57  ;;  %v2141_v12 = vrot.slane %v2140_v4, 4  ;;  %vm2156_vm10 = vmor %vm2099_vm8, %vm2155_vm6  ;;  %vm2195_vm8 = vsmask.f32 1280 }
 0x244   : > { %vm2196_vm13 = vmand %vm2184_vm12, %vm2195_vm8  ;;  %vm2231_vm6 = vcmask 1042432  }
 0x245   : > { %v2122_v5 = vsel %vm2108_vm15, %v2117_v19, %v2121_v32  ;;  %v2074_v9 = vmax.f32 %v2065_v1, 0.0  ;;  %vm2220_vm15 = vsmask.f32 7942 }
 0x246   : > { %2132 = vst.msk [vmem:[%s3609_s30 + $0x4] sm:$0x7] %vm2131_vm0, %v2122_v5  ;;  %vm2202_vm0 = vsmask.f32 256  ;;  %vm2221_vm1 = vmand %vm2219_vm14, %vm2220_vm15 }
 0x247   : > { %v2083_v50 = vpack.c.bf16 %v2074_v9, %v2074_v9 }
 0x248   : > { %v2134_v3 = vld [vmem:[#allocation3 + $0xc] sm:$0x3]  ;;  %v2153_v20 = vld [vmem:[#allocation3 + $0xc] sm:$0x8]  ;;  %v2036_v22 = vpop.f32.mrf.mxu0 }
 0x249   : > { %v2142_v23 = vrot.slane %v2134_v3, 7  ;;  %v2158_v51 = vshrl.u32 %v2153_v20, 16  ;;  %v2161_v14 = vshll.u32 %v2153_v20, 16  ;;  %2092 = vst.msk [vmem:[#allocation3 + $0x10] sm:$0xf] %vm955_vm3, %v2083_v50  ;;  %v2053_v8 = vadd.f32 %v2036_v22, %v3588_v56 }
 0x24a   : > { %v2245_v50 = vld [vmem:[%s3609_s30 + $0x18] sm:$0x1] }
 0x24b   : > { %v2143_v13 = vsel %vm2139_vm4, %v2141_v12, %v2142_v23  ;;  %v2160_v10 = vrot.slane %v2158_v51, 4  ;;  %v2163_v18 = vrot.slane %v2161_v14, 5  ;;  %v2066_v35 = vadd.f32 %v3601_v43, %v2053_v8  ;;  %vm2204_vm4 = vmor %vm2202_vm0, %vm2203_vm2 }
 0x24c   : > { %v2151_v37 = vsel %vm2149_vm5, %v2143_v13, %v2150_v24  ;;  %vm2225_vm5 = vcmask 516096  }
 0x24d   : > { %2152 = vst [vmem:[%s3609_s30 + $0x8] sm:$0x7] %v2151_v37  ;;  %v2075_v6 = vmax.f32 %v2066_v35, 0.0  ;;  %v2164_v45 = vor.u32 %v2163_v18, %v2160_v10 }
 0x24f   : > { %v2084_v40 = vpack.c.bf16 %v2075_v6, %v2075_v6  ;;  %v2165_v17 = vrot.slane %v2164_v45, 4 }
 0x250   : > { %v2154_v33 = vld [vmem:[#allocation3 + $0x10] sm:$0x7]  ;;  %v2039_v41 = vpop.f32.mrf.mxu0 }
 0x251   : > { %v2167_v52 = vshll.u32 %v2154_v33, 16  ;;  %v2171_v16 = vshrl.u32 %v2154_v33, 16  ;;  %2093 = vst.msk [vmem:[#allocation3 + $0x14] sm:$0xf] %vm955_vm3, %v2084_v40  ;;  %v2054_v56 = vadd.f32 %v2039_v41, %v3591_v29 }
 0x253   : > { %v2169_v21 = vrot.slane %v2167_v52, 5  ;;  %v2173_v44 = vrot.slane %v2171_v16, 4  ;;  %v2067_v31 = vadd.f32 %v3601_v43, %v2054_v56 }
 0x254   : > { %v2181_v26 = vld [vmem:[%s3609_s30 + $0x8] sm:$0xc] }
 0x255   : > { %v2170_v11 = vsel %vm2156_vm10, %v2165_v17, %v2169_v21  ;;  %v2174_v30 = vor.u32 %v2173_v44, %v2169_v21  ;;  %v2076_v39 = vmax.f32 %v2067_v31, 0.0  ;;  %vm2244_vm10 = vmand %vm2225_vm5, %vm2202_vm0 }
 0x256   : > { %v2182_v46 = vsel %vm2180_vm11, %v2170_v11, %v2181_v26 }
 0x257   : > { %v2175_v47 = vrot.slane %v2174_v30, 4  ;;  %2183 = vst [vmem:[%s3609_s30 + $0x8] sm:$0xc] %v2182_v46  ;;  %v2085_v29 = vpack.c.bf16 %v2076_v39, %v2076_v39 }
 0x258   : > { %v2186_v49 = vld [vmem:[#allocation3 + $0x14] sm:$0xf]  ;;  %v2041_v28 = vpop.f32.mrf.mxu0 }
 0x259   : > { %2185 = vst.msk [vmem:[%s3609_s30 + $0xc] sm:$0x3] %vm2184_vm12, %v2175_v47  ;;  %v2188_v7 = vrot.slane %v2186_v49, 6  ;;  %v2055_v42 = vadd.f32 %v2041_v28, %v3594_v34 }
 0x25a   : > { %2094 = vst.msk [vmem:[#allocation3 + $0x18] sm:$0xf] %vm955_vm3, %v2085_v29 }
 0x25b   : > { %v2189_v54 = vrot.slane %v2188_v7, 4  ;;  %2193 = vst.msk [vmem:[%s3609_s30 + $0xc] sm:$0xc] %vm2178_vm7, %v2188_v7  ;;  %v2068_v55 = vadd.f32 %v3601_v43, %v2055_v42  ;;  %vm2232_vm7 = vcmask 1046532  }
 0x25c   : > { %vm2233_vm9 = vmor %vm2231_vm6, %vm2232_vm7 }
 0x25d   : > { %v2198_v53 = vsel %vm2196_vm13, %v2189_v54, %v2197_v38  ;;  %v2077_v27 = vmax.f32 %v2068_v55, 0.0 }
 0x25e   : > { %2199 = vst [vmem:[%s3609_s30 + $0x10] sm:$0x3] %v2198_v53 }
 0x25f   : > { %v2086_v15 = vpack.c.bf16 %v2077_v27, %v2077_v27 }
 0x260   : > { %v2044_v58 = vpop.f32.mrf.mxu0 }
 0x261   : > { %v2200_v59 = vld [vmem:[#allocation3 + $0x18] sm:$0xe]  ;;  %2095 = vst.msk [vmem:[#allocation3 + $0x1c] sm:$0xf] %vm955_vm3, %v2086_v15  ;;  %v2056_v34 = vadd.f32 %v2044_v58, %v3596_v25 }
 0x262   : > { %v2206_v62 = vshrl.u32 %v2200_v59, 16  ;;  %v2209_v36 = vshll.u32 %v2200_v59, 16 }
 0x263   : > { %v2069_v48 = vadd.f32 %v3601_v43, %v2056_v34 }
 0x264   : > { %v2208_v63 = vrot.slane %v2206_v62, 7 }
 0x265   : > { %v2222_v60 = vld [vmem:[%s3609_s30 + $0x10] sm:$0xe]  ;;  %v2078_v0 = vmax.f32 %v2069_v48, 0.0 }
 0x266   : > { %v2211_v2 = vor.u32 %v2209_v36, %v2208_v63  ;;  %v2212_v19 = vrot.slane %v2208_v63, 4 }
 0x267   : > { %v2087_v61 = vpack.c.bf16 %v2078_v0, %v2078_v0 }
 0x268   : > { %v2223_v4 = vsel %vm2221_vm1, %v2211_v2, %v2222_v60  ;;  %v2201_v57 = vld [vmem:[#allocation3 + $0x1c] sm:$0x1]  ;;  %v2046_v25 = vpop.f32.mrf.mxu0  ;;  %v2227_v1 = vld [vmem:[#allocation3 + $0x1c] sm:$0xc] }
 0x269   : > { %2224 = vst [vmem:[%s3609_s30 + $0x10] sm:$0xe] %v2223_v4  ;;  %v2214_v43 = vshll.u32 %v2201_v57, 16  ;;  %v2823_v9 = vrot.slane %v2227_v1, 9 }
 0x26a   : > { %2096 = vst.msk [vmem:[#allocation3 + $0x20] sm:$0xf] %vm955_vm3, %v2087_v61 }
 0x26b   : > { %v2216_v32 = vsel %vm2204_vm4, %v2212_v19, %v2214_v43 }
 0x26c   : > { %2226 = vst.msk [vmem:[%s3609_s30 + $0x14] sm:$0x1] %vm2225_vm5, %v2216_v32 }
 0x271   : > { %v2228_v5 = vld [vmem:[#allocation3 + $0x20] sm:$0x3] }
 0x272   : > { %v2236_v24 = vrot.slane %v2228_v5, 5 }
 0x274   : > { %v2237_v12 = vsel %vm2233_vm9, %v2823_v9, %v2236_v24  ;;  %v2238_v3 = vrot.slane %v2236_v24, 4 }
 0x275   : > { %2242 = vst.msk [vmem:[%s3609_s30 + $0x14] sm:$0xe] %vm2219_vm14, %v2237_v12 }
 0x276   : > { %v2246_v20 = vsel %vm2244_vm10, %v2238_v3, %v2245_v50 }
 0x277   : > { %2247 = vst [vmem:[%s3609_s30 + $0x18] sm:$0x1] %v2246_v20 }
 0x278 PF: > { %s15_s18 = sadd.s32 1, %s2956_s18  }
 0x279   : > { %p12_p4 = scmp.ge.s32.totalorder %s15_s18, 4  }
 0x27b   :  { %14 = sbr.rel (!%p12_p4) target bundleno = 1 (0x1), region = 81 }

// kernel: dqn_forward_pallas.5
= control target key start
LH: loop header
LB: loop body
LE: loop exit
PB: predicated region body
PF: predicated region fallthrough
CT: control target
= control target key end

     0   :  { %vm4835_vm0 = vcmask 523264   ;;  %s15650_s1 = inlined_call_operand.vmem [shape: bf16[3136,512], index: 1, kind: input, shape index: {}]   ;;  %s15651_s0 = inlined_call_operand.vmem [shape: bf16[8,3136], index: 0, kind: input, shape index: {}]   ;;  %s15652_s2 = inlined_call_operand.vmem [shape: f32[1,512], index: 2, kind: input, shape index: {}]   ;;  %s15653_s3 = inlined_call_operand.vmem [shape: bf16[512,128], index: 3, kind: input, shape index: {}]   ;;  %s15654_s4 = inlined_call_operand.vmem [shape: f32[1,128], index: 4, kind: input, shape index: {}]   ;;  %s15655_s5 = inlined_call_operand.vmem [shape: f32[8,128], index: 5, kind: output, shape index: {}]  }
   0x1   :  { %v6578_v0 = vld [vmem:[%s15650_s1 + $0xe0] sm:$0xf]  ;;  %v9762_v1 = vld [vmem:[%s15650_s1 + $0xec] sm:$0xf0] }
   0x2   :  { %v6706_v2 = vld [vmem:[%s15650_s1 + $0x1e0] sm:$0xf]  ;;  %v6579_v3 = vor.u32 %v9762_v1, %v6578_v0  ;;  %v9794_v4 = vld [vmem:[%s15650_s1 + $0x1ec] sm:$0xf0] }
   0x3   :  { %v6834_v5 = vld [vmem:[%s15650_s1 + $0x2e0] sm:$0xf]  ;;  %v9826_v6 = vld [vmem:[%s15650_s1 + $0x2ec] sm:$0xf0]  ;;  %v6707_v7 = vor.u32 %v9794_v4, %v6706_v2 }
   0x4   :  { %v6835_v8 = vor.u32 %v9826_v6, %v6834_v5  ;;  %v6962_v9 = vld [vmem:[%s15650_s1 + $0x3e0] sm:$0xf]  ;;  %v9858_v10 = vld [vmem:[%s15650_s1 + $0x3ec] sm:$0xf0]  ;;  %4839 = vmatpush.bf16.msra.mxu0 %v6579_v3 }
   0x5   :  { %v6562_v11 = vld [vmem:[%s15650_s1 + $0xc0] sm:$0xf]  ;;  %v6963_v12 = vor.u32 %v9858_v10, %v6962_v9  ;;  %v9758_v13 = vld [vmem:[%s15650_s1 + $0xcc] sm:$0xf0]  ;;  %4852 = vmatpush.bf16.msra.mxu1 %v6707_v7 }
   0x6   :  { %v6690_v14 = vld [vmem:[%s15650_s1 + $0x1c0] sm:$0xf]  ;;  %v9790_v15 = vld [vmem:[%s15650_s1 + $0x1cc] sm:$0xf0]  ;;  %4865 = vmatpush.bf16.msra.mxu2 %v6835_v8  ;;  %v6563_v16 = vor.u32 %v9758_v13, %v6562_v11 }
   0x7   :  { %v6691_v17 = vor.u32 %v9790_v15, %v6690_v14  ;;  %v6818_v18 = vld [vmem:[%s15650_s1 + $0x2c0] sm:$0xf]  ;;  %v9822_v19 = vld [vmem:[%s15650_s1 + $0x2cc] sm:$0xf0]  ;;  %4878 = vmatpush.bf16.msra.mxu3 %v6963_v12 }
   0x8   :  { %v6946_v20 = vld [vmem:[%s15650_s1 + $0x3c0] sm:$0xf]  ;;  %v6819_v21 = vor.u32 %v9822_v19, %v6818_v18  ;;  %v9854_v22 = vld [vmem:[%s15650_s1 + $0x3cc] sm:$0xf0]  ;;  %4840 = vmatpush.bf16.msra.mxu0 %v6563_v16 }
   0x9   :  { %v6546_v23 = vld [vmem:[%s15650_s1 + $0xa0] sm:$0xf]  ;;  %v9754_v24 = vld [vmem:[%s15650_s1 + $0xac] sm:$0xf0]  ;;  %v6947_v25 = vor.u32 %v9854_v22, %v6946_v20  ;;  %4853 = vmatpush.bf16.msra.mxu1 %v6691_v17 }
   0xa   :  { %v6674_v26 = vld [vmem:[%s15650_s1 + $0x1a0] sm:$0xf]  ;;  %v9786_v27 = vld [vmem:[%s15650_s1 + $0x1ac] sm:$0xf0]  ;;  %v6547_v29 = vor.u32 %v9754_v24, %v6546_v23  ;;  %4866 = vmatpush.bf16.msra.mxu2 %v6819_v21 }
   0xb   :  { %v6802_v28 = vld [vmem:[%s15650_s1 + $0x2a0] sm:$0xf]  ;;  %v9818_v30 = vld [vmem:[%s15650_s1 + $0x2ac] sm:$0xf0]  ;;  %v6675_v33 = vor.u32 %v9786_v27, %v6674_v26  ;;  %4879 = vmatpush.bf16.msra.mxu3 %v6947_v25 }
   0xc   :  { %v6930_v31 = vld [vmem:[%s15650_s1 + $0x3a0] sm:$0xf]  ;;  %v9850_v32 = vld [vmem:[%s15650_s1 + $0x3ac] sm:$0xf0]  ;;  %v6803_v34 = vor.u32 %v9818_v30, %v6802_v28  ;;  %4841 = vmatpush.bf16.msra.mxu0 %v6547_v29 }
   0xd   :  { %v6530_v35 = vld [vmem:[%s15650_s1 + $0x80] sm:$0xf]  ;;  %v9750_v36 = vld [vmem:[%s15650_s1 + $0x8c] sm:$0xf0]  ;;  %v6931_v38 = vor.u32 %v9850_v32, %v6930_v31  ;;  %4854 = vmatpush.bf16.msra.mxu1 %v6675_v33 }
   0xe   :  { %v6658_v37 = vld [vmem:[%s15650_s1 + $0x180] sm:$0xf]  ;;  %v9782_v39 = vld [vmem:[%s15650_s1 + $0x18c] sm:$0xf0]  ;;  %v6531_v44 = vor.u32 %v9750_v36, %v6530_v35  ;;  %4867 = vmatpush.bf16.msra.mxu2 %v6803_v34 }
   0xf   :  { %v6786_v40 = vld [vmem:[%s15650_s1 + $0x280] sm:$0xf]  ;;  %v9814_v41 = vld [vmem:[%s15650_s1 + $0x28c] sm:$0xf0]  ;;  %v6659_v45 = vor.u32 %v9782_v39, %v6658_v37  ;;  %4880 = vmatpush.bf16.msra.mxu3 %v6931_v38 }
  0x10   :  { %v6914_v42 = vld [vmem:[%s15650_s1 + $0x380] sm:$0xf]  ;;  %v9846_v43 = vld [vmem:[%s15650_s1 + $0x38c] sm:$0xf0]  ;;  %v6787_v46 = vor.u32 %v9814_v41, %v6786_v40  ;;  %4842 = vmatpush.bf16.msra.mxu0 %v6531_v44 }
  0x11   :  { %v6514_v47 = vld [vmem:[%s15650_s1 + $0x60] sm:$0xf]  ;;  %v9746_v48 = vld [vmem:[%s15650_s1 + $0x6c] sm:$0xf0]  ;;  %v6915_v50 = vor.u32 %v9846_v43, %v6914_v42  ;;  %4855 = vmatpush.bf16.msra.mxu1 %v6659_v45 }
  0x12   :  { %v6642_v49 = vld [vmem:[%s15650_s1 + $0x160] sm:$0xf]  ;;  %v9778_v51 = vld [vmem:[%s15650_s1 + $0x16c] sm:$0xf0]  ;;  %v6515_v56 = vor.u32 %v9746_v48, %v6514_v47  ;;  %4868 = vmatpush.bf16.msra.mxu2 %v6787_v46 }
  0x13   :  { %v6770_v52 = vld [vmem:[%s15650_s1 + $0x260] sm:$0xf]  ;;  %v9810_v53 = vld [vmem:[%s15650_s1 + $0x26c] sm:$0xf0]  ;;  %v6643_v57 = vor.u32 %v9778_v51, %v6642_v49  ;;  %4881 = vmatpush.bf16.msra.mxu3 %v6915_v50 }
  0x14   :  { %v6898_v54 = vld [vmem:[%s15650_s1 + $0x360] sm:$0xf]  ;;  %v9842_v55 = vld [vmem:[%s15650_s1 + $0x36c] sm:$0xf0]  ;;  %v6771_v58 = vor.u32 %v9810_v53, %v6770_v52  ;;  %4843 = vmatpush.bf16.msra.mxu0 %v6515_v56 }
  0x15   :  { %v6498_v59 = vld [vmem:[%s15650_s1 + $0x40] sm:$0xf]  ;;  %v9742_v60 = vld [vmem:[%s15650_s1 + $0x4c] sm:$0xf0]  ;;  %v6899_v62 = vor.u32 %v9842_v55, %v6898_v54  ;;  %4856 = vmatpush.bf16.msra.mxu1 %v6643_v57 }
  0x16   :  { %v6626_v61 = vld [vmem:[%s15650_s1 + $0x140] sm:$0xf]  ;;  %v9774_v63 = vld [vmem:[%s15650_s1 + $0x14c] sm:$0xf0]  ;;  %v6499_v4 = vor.u32 %v9742_v60, %v6498_v59  ;;  %4869 = vmatpush.bf16.msra.mxu2 %v6771_v58  ;;  %v22_v58 = vld [vmem:[%s15651_s0 + $0x8] sm:$0xff] }
  0x17   :  { %v6754_v0 = vld [vmem:[%s15650_s1 + $0x240] sm:$0xf]  ;;  %v9806_v1 = vld [vmem:[%s15650_s1 + $0x24c] sm:$0xf0]  ;;  %v6627_v5 = vor.u32 %v9774_v63, %v6626_v61  ;;  %4882 = vmatpush.bf16.msra.mxu3 %v6899_v62  ;;  %v843_v63 = vunpack.c.l.b16 %v22_v58 }
  0x18   :  { %v6882_v2 = vld [vmem:[%s15650_s1 + $0x340] sm:$0xf]  ;;  %v9838_v3 = vld [vmem:[%s15650_s1 + $0x34c] sm:$0xf0]  ;;  %v6755_v6 = vor.u32 %v9806_v1, %v6754_v0  ;;  %4844 = vmatpush.bf16.msra.mxu0 %v6499_v4  ;;  %v844_v0 = vunpack.c.h.b16 %v22_v58 }
  0x19   :  { %v6482_v7 = vld [vmem:[%s15650_s1 + $0x20] sm:$0xf]  ;;  %v9738_v8 = vld [vmem:[%s15650_s1 + $0x2c] sm:$0xf0]  ;;  %v6883_v10 = vor.u32 %v9838_v3, %v6882_v2  ;;  %4857 = vmatpush.bf16.msra.mxu1 %v6627_v5  ;;  %v10849_v4 = vpack.c.b16 %v843_v63, %v843_v63 }
  0x1a   :  { %v6610_v9 = vld [vmem:[%s15650_s1 + $0x120] sm:$0xf]  ;;  %v9770_v11 = vld [vmem:[%s15650_s1 + $0x12c] sm:$0xf0]  ;;  %v6483_v16 = vor.u32 %v9738_v8, %v6482_v7  ;;  %4870 = vmatpush.bf16.msra.mxu2 %v6755_v6  ;;  %v10854_v6 = vpack.c.b16 %v844_v0, %v844_v0 }
  0x1b   :  { %v6738_v12 = vld [vmem:[%s15650_s1 + $0x220] sm:$0xf]  ;;  %v9802_v13 = vld [vmem:[%s15650_s1 + $0x22c] sm:$0xf0]  ;;  %v6611_v19 = vor.u32 %v9770_v11, %v6610_v9  ;;  %4883 = vmatpush.bf16.msra.mxu3 %v6883_v10 }
  0x1c   :  { %v6866_v14 = vld [vmem:[%s15650_s1 + $0x320] sm:$0xf]  ;;  %v9834_v15 = vld [vmem:[%s15650_s1 + $0x32c] sm:$0xf0]  ;;  %v6739_v20 = vor.u32 %v9802_v13, %v6738_v12  ;;  %4845 = vmatpush.bf16.msra.mxu0 %v6483_v16 }
  0x1d   :  { %v6466_v17 = vld [vmem:[%s15650_s1] sm:$0xf]  ;;  %v9734_v18 = vld [vmem:[%s15650_s1 + $0xc] sm:$0xf0]  ;;  %v6867_v24 = vor.u32 %v9834_v15, %v6866_v14  ;;  %4858 = vmatpush.bf16.msra.mxu1 %v6611_v19 }
  0x1e   :  { %v6594_v21 = vld [vmem:[%s15650_s1 + $0x100] sm:$0xf]  ;;  %v9766_v22 = vld [vmem:[%s15650_s1 + $0x10c] sm:$0xf0]  ;;  %v6467_v31 = vor.u32 %v9734_v18, %v6466_v17  ;;  %4871 = vmatpush.bf16.msra.mxu2 %v6739_v20 }
  0x1f   :  { %v6722_v23 = vld [vmem:[%s15650_s1 + $0x200] sm:$0xf]  ;;  %v9798_v25 = vld [vmem:[%s15650_s1 + $0x20c] sm:$0xf0]  ;;  %v6595_v35 = vor.u32 %v9766_v22, %v6594_v21  ;;  %4884 = vmatpush.bf16.msra.mxu3 %v6867_v24 }
  0x20   :  { %v6850_v26 = vld [vmem:[%s15650_s1 + $0x300] sm:$0xf]  ;;  %v9830_v27 = vld [vmem:[%s15650_s1 + $0x30c] sm:$0xf0]  ;;  %v6723_v36 = vor.u32 %v9798_v25, %v6722_v23  ;;  %4846 = vmatpush.bf16.msra.mxu0 %v6467_v31 }
  0x21   :  { %v7090_v28 = vld [vmem:[%s15650_s1 + $0x4e0] sm:$0xf]  ;;  %v9890_v29 = vld [vmem:[%s15650_s1 + $0x4ec] sm:$0xf0]  ;;  %v6851_v39 = vor.u32 %v9830_v27, %v6850_v26  ;;  %4859 = vmatpush.bf16.msra.mxu1 %v6595_v35 }
  0x22   :  { %v7218_v30 = vld [vmem:[%s15650_s1 + $0x5e0] sm:$0xf]  ;;  %v9922_v32 = vld [vmem:[%s15650_s1 + $0x5ec] sm:$0xf0]  ;;  %v7091_v40 = vor.u32 %v9890_v29, %v7090_v28  ;;  %4872 = vmatpush.bf16.msra.mxu2 %v6723_v36 }
  0x23   :  { %v7346_v33 = vld [vmem:[%s15650_s1 + $0x6e0] sm:$0xf]  ;;  %v9954_v34 = vld [vmem:[%s15650_s1 + $0x6ec] sm:$0xf0]  ;;  %v7219_v41 = vor.u32 %v9922_v32, %v7218_v30  ;;  %4885 = vmatpush.bf16.msra.mxu3 %v6851_v39 }
  0x24   :  { %v7474_v37 = vld [vmem:[%s15650_s1 + $0x7e0] sm:$0xf]  ;;  %v9986_v38 = vld [vmem:[%s15650_s1 + $0x7ec] sm:$0xf0]  ;;  %v7347_v42 = vor.u32 %v9954_v34, %v7346_v33  ;;  %4891 = vmatpush.bf16.msrb.mxu0 %v7091_v40 }
  0x25   :  { %v7074_v43 = vld [vmem:[%s15650_s1 + $0x4c0] sm:$0xf]  ;;  %v9886_v44 = vld [vmem:[%s15650_s1 + $0x4cc] sm:$0xf0]  ;;  %v7475_v46 = vor.u32 %v9986_v38, %v7474_v37  ;;  %4904 = vmatpush.bf16.msrb.mxu1 %v7219_v41  ;;  %4873 = vmatmul.bf16.vlgmr.msra.gmra.mxu2 %v10849_v4 }
  0x26   :  { %v7202_v45 = vld [vmem:[%s15650_s1 + $0x5c0] sm:$0xf]  ;;  %v9918_v47 = vld [vmem:[%s15650_s1 + $0x5cc] sm:$0xf0]  ;;  %v7075_v52 = vor.u32 %v9886_v44, %v7074_v43  ;;  %4917 = vmatpush.bf16.msrb.mxu2 %v7347_v42  ;;  %4886 = vmatmul.bf16.vlgmr.msra.gmra.mxu3 %v10854_v6 }
  0x27   :  { %v7330_v48 = vld [vmem:[%s15650_s1 + $0x6c0] sm:$0xf]  ;;  %v9950_v49 = vld [vmem:[%s15650_s1 + $0x6cc] sm:$0xf0]  ;;  %v7203_v54 = vor.u32 %v9918_v47, %v7202_v45  ;;  %4930 = vmatpush.bf16.msrb.mxu3 %v7475_v46 }
  0x28   :  { %v7458_v50 = vld [vmem:[%s15650_s1 + $0x7c0] sm:$0xf]  ;;  %v9982_v51 = vld [vmem:[%s15650_s1 + $0x7cc] sm:$0xf0]  ;;  %v7331_v55 = vor.u32 %v9950_v49, %v7330_v48  ;;  %4892 = vmatpush.bf16.msrb.mxu0 %v7075_v52 }
  0x29   :  { %v7058_v53 = vld [vmem:[%s15650_s1 + $0x4a0] sm:$0xf]  ;;  %v9882_v56 = vld [vmem:[%s15650_s1 + $0x4ac] sm:$0xf0]  ;;  %v7459_v59 = vor.u32 %v9982_v51, %v7458_v50  ;;  %4905 = vmatpush.bf16.msrb.mxu1 %v7203_v54 }
  0x2a   :  { %v7186_v57 = vld [vmem:[%s15650_s1 + $0x5a0] sm:$0xf]  ;;  %v9914_v60 = vld [vmem:[%s15650_s1 + $0x5ac] sm:$0xf0]  ;;  %v7059_v3 = vor.u32 %v9882_v56, %v7058_v53  ;;  %4918 = vmatpush.bf16.msrb.mxu2 %v7331_v55 }
  0x2b   :  { %v7314_v61 = vld [vmem:[%s15650_s1 + $0x6a0] sm:$0xf]  ;;  %v9946_v62 = vld [vmem:[%s15650_s1 + $0x6ac] sm:$0xf0]  ;;  %v7187_v7 = vor.u32 %v9914_v60, %v7186_v57  ;;  %4931 = vmatpush.bf16.msrb.mxu3 %v7459_v59 }
  0x2c   :  { %v7442_v1 = vld [vmem:[%s15650_s1 + $0x7a0] sm:$0xf]  ;;  %v9978_v2 = vld [vmem:[%s15650_s1 + $0x7ac] sm:$0xf0]  ;;  %v7315_v8 = vor.u32 %v9946_v62, %v7314_v61  ;;  %4893 = vmatpush.bf16.msrb.mxu0 %v7059_v3  ;;  %v24_v3 = vld [vmem:[%s15651_s0 + $0x18] sm:$0xff] }
  0x2d   :  { %v21_v5 = vld [vmem:[%s15651_s0] sm:$0xff]  ;;  %v9878_v10 = vld [vmem:[%s15650_s1 + $0x48c] sm:$0xf0]  ;;  %v7443_v14 = vor.u32 %v9978_v2, %v7442_v1  ;;  %4906 = vmatpush.bf16.msrb.mxu1 %v7187_v7 }
  0x2e   :  { %v7042_v9 = vld [vmem:[%s15650_s1 + $0x480] sm:$0xf]  ;;  %v841_v12 = vunpack.c.l.b16 %v21_v5  ;;  %v842_v13 = vunpack.c.h.b16 %v21_v5  ;;  %v9910_v15 = vld [vmem:[%s15650_s1 + $0x58c] sm:$0xf0]  ;;  %4919 = vmatpush.bf16.msrb.mxu2 %v7315_v8 }
  0x2f   :  { %v7170_v11 = vld [vmem:[%s15650_s1 + $0x580] sm:$0xf]  ;;  %v9942_v17 = vld [vmem:[%s15650_s1 + $0x68c] sm:$0xf0]  ;;  %v7043_v22 = vor.u32 %v9878_v10, %v7042_v9  ;;  %4932 = vmatpush.bf16.msrb.mxu3 %v7443_v14 }
  0x30   :  { %v7298_v16 = vld [vmem:[%s15650_s1 + $0x680] sm:$0xf]  ;;  %v9974_v19 = vld [vmem:[%s15650_s1 + $0x78c] sm:$0xf0]  ;;  %v10881_v20 = vpack.c.b16 %v841_v12, %v841_v12  ;;  %v10884_v21 = vpack.c.b16 %v842_v13, %v842_v13  ;;  %v7171_v23 = vor.u32 %v9910_v15, %v7170_v11 }
  0x31   :  { %v7426_v18 = vld [vmem:[%s15650_s1 + $0x780] sm:$0xf]  ;;  %v7299_v24 = vor.u32 %v9942_v17, %v7298_v16  ;;  %v9874_v26 = vld [vmem:[%s15650_s1 + $0x46c] sm:$0xf0]  ;;  %4894 = vmatpush.bf16.msrb.mxu0 %v7043_v22  ;;  %v847_v17 = vunpack.c.l.b16 %v24_v3 }
  0x32   :  { %v7026_v25 = vld [vmem:[%s15650_s1 + $0x460] sm:$0xf]  ;;  %v7427_v28 = vor.u32 %v9974_v19, %v7426_v18  ;;  %v9906_v29 = vld [vmem:[%s15650_s1 + $0x56c] sm:$0xf0]  ;;  %4847 = vmatmul.bf16.vlgmr.msra.gmra.mxu0 %v10881_v20  ;;  %4860 = vmatmul.bf16.vlgmr.msra.gmra.mxu1 %v10884_v21 }
  0x33   :  { %v7154_v27 = vld [vmem:[%s15650_s1 + $0x560] sm:$0xf]  ;;  %v9938_v31 = vld [vmem:[%s15650_s1 + $0x66c] sm:$0xf0]  ;;  %v7027_v34 = vor.u32 %v9874_v26, %v7026_v25  ;;  %4907 = vmatpush.bf16.msrb.mxu1 %v7171_v23  ;;  %4920 = vmatpush.bf16.msrb.mxu2 %v7299_v24  ;;  %v848_v25 = vunpack.c.h.b16 %v24_v3 }
  0x34   :  { %v7282_v30 = vld [vmem:[%s15650_s1 + $0x660] sm:$0xf]  ;;  %v9970_v33 = vld [vmem:[%s15650_s1 + $0x76c] sm:$0xf0]  ;;  %v7155_v35 = vor.u32 %v9906_v29, %v7154_v27  ;;  %4933 = vmatpush.bf16.msrb.mxu3 %v7427_v28 }
  0x35   :  { %v7410_v32 = vld [vmem:[%s15650_s1 + $0x760] sm:$0xf]  ;;  %v7283_v36 = vor.u32 %v9938_v31, %v7282_v30  ;;  %v9870_v38 = vld [vmem:[%s15650_s1 + $0x44c] sm:$0xf0]  ;;  %4895 = vmatpush.bf16.msrb.mxu0 %v7027_v34 }
  0x36   :  { %v7010_v37 = vld [vmem:[%s15650_s1 + $0x440] sm:$0xf]  ;;  %v7411_v40 = vor.u32 %v9970_v33, %v7410_v32  ;;  %v9902_v41 = vld [vmem:[%s15650_s1 + $0x54c] sm:$0xf0] }
  0x37   :  { %v7138_v39 = vld [vmem:[%s15650_s1 + $0x540] sm:$0xf]  ;;  %v9934_v43 = vld [vmem:[%s15650_s1 + $0x64c] sm:$0xf0]  ;;  %v7011_v46 = vor.u32 %v9870_v38, %v7010_v37  ;;  %4908 = vmatpush.bf16.msrb.mxu1 %v7155_v35  ;;  %4921 = vmatpush.bf16.msrb.mxu2 %v7283_v36  ;;  %v11032_v38 = vpack.c.b16 %v847_v17, %v847_v17 }
  0x38   :  { %v7266_v42 = vld [vmem:[%s15650_s1 + $0x640] sm:$0xf]  ;;  %v9966_v45 = vld [vmem:[%s15650_s1 + $0x74c] sm:$0xf0]  ;;  %v7139_v47 = vor.u32 %v9902_v41, %v7138_v39  ;;  %4934 = vmatpush.bf16.msrb.mxu3 %v7411_v40 }
  0x39   :  { %v7394_v44 = vld [vmem:[%s15650_s1 + $0x740] sm:$0xf]  ;;  %v7267_v48 = vor.u32 %v9934_v43, %v7266_v42  ;;  %v9866_v50 = vld [vmem:[%s15650_s1 + $0x42c] sm:$0xf0]  ;;  %4896 = vmatpush.bf16.msrb.mxu0 %v7011_v46  ;;  %v11042_v42 = vpack.c.b16 %v848_v25, %v848_v25 }
  0x3a   :  { %v6994_v49 = vld [vmem:[%s15650_s1 + $0x420] sm:$0xf]  ;;  %v7395_v52 = vor.u32 %v9966_v45, %v7394_v44  ;;  %v9898_v53 = vld [vmem:[%s15650_s1 + $0x52c] sm:$0xf0] }
  0x3b   :  { %v7122_v51 = vld [vmem:[%s15650_s1 + $0x520] sm:$0xf]  ;;  %v9930_v55 = vld [vmem:[%s15650_s1 + $0x62c] sm:$0xf0]  ;;  %v6995_v59 = vor.u32 %v9866_v50, %v6994_v49  ;;  %4909 = vmatpush.bf16.msrb.mxu1 %v7139_v47  ;;  %4922 = vmatpush.bf16.msrb.mxu2 %v7267_v48 }
  0x3c   :  { %v7250_v54 = vld [vmem:[%s15650_s1 + $0x620] sm:$0xf]  ;;  %v9962_v57 = vld [vmem:[%s15650_s1 + $0x72c] sm:$0xf0]  ;;  %v7123_v63 = vor.u32 %v9898_v53, %v7122_v51  ;;  %4935 = vmatpush.bf16.msrb.mxu3 %v7395_v52 }
  0x3d   :  { %v7378_v56 = vld [vmem:[%s15650_s1 + $0x720] sm:$0xf]  ;;  %v9862_v60 = vld [vmem:[%s15650_s1 + $0x40c] sm:$0xf0]  ;;  %v7251_v0 = vor.u32 %v9930_v55, %v7250_v54  ;;  %4897 = vmatpush.bf16.msrb.mxu0 %v6995_v59 }
  0x3e   :  { %v6978_v58 = vld [vmem:[%s15650_s1 + $0x400] sm:$0xf]  ;;  %v9894_v62 = vld [vmem:[%s15650_s1 + $0x50c] sm:$0xf0]  ;;  %v7379_v5 = vor.u32 %v9962_v57, %v7378_v56 }
  0x3f   :  { %v7106_v61 = vld [vmem:[%s15650_s1 + $0x500] sm:$0xf]  ;;  %v9926_v2 = vld [vmem:[%s15650_s1 + $0x60c] sm:$0xf0]  ;;  %v6979_v13 = vor.u32 %v9862_v60, %v6978_v58  ;;  %4910 = vmatpush.bf16.msrb.mxu1 %v7123_v63  ;;  %4923 = vmatpush.bf16.msrb.mxu2 %v7251_v0 }
  0x40   :  { %v7234_v1 = vld [vmem:[%s15650_s1 + $0x600] sm:$0xf]  ;;  %v9958_v8 = vld [vmem:[%s15650_s1 + $0x70c] sm:$0xf0]  ;;  %v7107_v18 = vor.u32 %v9894_v62, %v7106_v61  ;;  %4936 = vmatpush.bf16.msrb.mxu3 %v7379_v5 }
  0x41   :  { %v7362_v7 = vld [vmem:[%s15650_s1 + $0x700] sm:$0xf]  ;;  %v23_v9 = vld [vmem:[%s15651_s0 + $0x10] sm:$0xff]  ;;  %v7235_v19 = vor.u32 %v9926_v2, %v7234_v1  ;;  %4898 = vmatpush.bf16.msrb.mxu0 %v6979_v13 }
  0x42   :  { %v7602_v10 = vld [vmem:[%s15650_s1 + $0x8e0] sm:$0xf]  ;;  %v10018_v11 = vld [vmem:[%s15650_s1 + $0x8ec] sm:$0xf0]  ;;  %v845_v24 = vunpack.c.l.b16 %v23_v9  ;;  %v7363_v26 = vor.u32 %v9958_v8, %v7362_v7  ;;  %v846_v28 = vunpack.c.h.b16 %v23_v9 }
  0x43   :  { %v7730_v12 = vld [vmem:[%s15650_s1 + $0x9e0] sm:$0xf]  ;;  %v10050_v14 = vld [vmem:[%s15650_s1 + $0x9ec] sm:$0xf0]  ;;  %v7603_v27 = vor.u32 %v10018_v11, %v7602_v10  ;;  %4911 = vmatpush.bf16.msrb.mxu1 %v7107_v18  ;;  %4924 = vmatpush.bf16.msrb.mxu2 %v7235_v19 }
  0x44   :  { %v7858_v15 = vld [vmem:[%s15650_s1 + $0xae0] sm:$0xf]  ;;  %v10082_v16 = vld [vmem:[%s15650_s1 + $0xaec] sm:$0xf0]  ;;  %v7731_v29 = vor.u32 %v10050_v14, %v7730_v12  ;;  %v11040_v41 = vpack.c.b16 %v845_v24, %v845_v24  ;;  %4937 = vmatpush.bf16.msrb.mxu3 %v7363_v26  ;;  %v11044_v44 = vpack.c.b16 %v846_v28, %v846_v28 }
  0x45   :  { %v7986_v22 = vld [vmem:[%s15650_s1 + $0xbe0] sm:$0xf]  ;;  %v10114_v23 = vld [vmem:[%s15650_s1 + $0xbec] sm:$0xf0]  ;;  %v7859_v30 = vor.u32 %v10082_v16, %v7858_v15  ;;  %4943 = vmatpush.bf16.msra.mxu0 %v7603_v27 }
  0x46   :  { %v7586_v31 = vld [vmem:[%s15650_s1 + $0x8c0] sm:$0xf]  ;;  %v10014_v32 = vld [vmem:[%s15650_s1 + $0x8cc] sm:$0xf0]  ;;  %v7987_v34 = vor.u32 %v10114_v23, %v7986_v22  ;;  %4925 = vmatmul.bf16.vlgmr.msrb.gmra.mxu2 %v11032_v38  ;;  %4899 = vmatmul.bf16.vlgmr.msrb.gmra.mxu0 %v11040_v41 }
  0x47   :  { %v7714_v33 = vld [vmem:[%s15650_s1 + $0x9c0] sm:$0xf]  ;;  %v10046_v35 = vld [vmem:[%s15650_s1 + $0x9cc] sm:$0xf0]  ;;  %v7587_v43 = vor.u32 %v10014_v32, %v7586_v31  ;;  %4956 = vmatpush.bf16.msra.mxu1 %v7731_v29  ;;  %4969 = vmatpush.bf16.msra.mxu2 %v7859_v30 }
  0x48   :  { %v7842_v36 = vld [vmem:[%s15650_s1 + $0xac0] sm:$0xf]  ;;  %v10078_v37 = vld [vmem:[%s15650_s1 + $0xacc] sm:$0xf0]  ;;  %v7715_v45 = vor.u32 %v10046_v35, %v7714_v33  ;;  %4982 = vmatpush.bf16.msra.mxu3 %v7987_v34  ;;  %4912 = vmatmul.bf16.vlgmr.msrb.gmra.mxu1 %v11044_v44 }
  0x49   :  { %v7970_v39 = vld [vmem:[%s15650_s1 + $0xbc0] sm:$0xf]  ;;  %v10110_v40 = vld [vmem:[%s15650_s1 + $0xbcc] sm:$0xf0]  ;;  %v7843_v46 = vor.u32 %v10078_v37, %v7842_v36  ;;  %4938 = vmatmul.bf16.vlgmr.msrb.gmra.mxu3 %v11042_v42  ;;  %4944 = vmatpush.bf16.msra.mxu0 %v7587_v43 }
  0x4a   :  { %v7570_v47 = vld [vmem:[%s15650_s1 + $0x8a0] sm:$0xf]  ;;  %v10010_v48 = vld [vmem:[%s15650_s1 + $0x8ac] sm:$0xf0]  ;;  %v7971_v50 = vor.u32 %v10110_v40, %v7970_v39 }
  0x4b   :  { %v7698_v49 = vld [vmem:[%s15650_s1 + $0x9a0] sm:$0xf]  ;;  %v10042_v51 = vld [vmem:[%s15650_s1 + $0x9ac] sm:$0xf0]  ;;  %v7571_v56 = vor.u32 %v10010_v48, %v7570_v47  ;;  %4957 = vmatpush.bf16.msra.mxu1 %v7715_v45  ;;  %4970 = vmatpush.bf16.msra.mxu2 %v7843_v46 }
  0x4c   :  { %v7826_v52 = vld [vmem:[%s15650_s1 + $0xaa0] sm:$0xf]  ;;  %v10074_v53 = vld [vmem:[%s15650_s1 + $0xaac] sm:$0xf0]  ;;  %v7699_v57 = vor.u32 %v10042_v51, %v7698_v49  ;;  %4983 = vmatpush.bf16.msra.mxu3 %v7971_v50 }
  0x4d   :  { %v7954_v54 = vld [vmem:[%s15650_s1 + $0xba0] sm:$0xf]  ;;  %v10106_v55 = vld [vmem:[%s15650_s1 + $0xbac] sm:$0xf0]  ;;  %v7827_v58 = vor.u32 %v10074_v53, %v7826_v52  ;;  %4945 = vmatpush.bf16.msra.mxu0 %v7571_v56 }
  0x4e   :  { %v7554_v59 = vld [vmem:[%s15650_s1 + $0x880] sm:$0xf]  ;;  %v10006_v60 = vld [vmem:[%s15650_s1 + $0x88c] sm:$0xf0]  ;;  %v7955_v62 = vor.u32 %v10106_v55, %v7954_v54 }
  0x4f   :  { %v7682_v61 = vld [vmem:[%s15650_s1 + $0x980] sm:$0xf]  ;;  %v10038_v63 = vld [vmem:[%s15650_s1 + $0x98c] sm:$0xf0]  ;;  %v7555_v5 = vor.u32 %v10006_v60, %v7554_v59  ;;  %4958 = vmatpush.bf16.msra.mxu1 %v7699_v57  ;;  %4971 = vmatpush.bf16.msra.mxu2 %v7827_v58 }
  0x50   :  { %v7810_v0 = vld [vmem:[%s15650_s1 + $0xa80] sm:$0xf]  ;;  %v10070_v1 = vld [vmem:[%s15650_s1 + $0xa8c] sm:$0xf0]  ;;  %v7683_v7 = vor.u32 %v10038_v63, %v7682_v61  ;;  %4984 = vmatpush.bf16.msra.mxu3 %v7955_v62  ;;  %v26_v61 = vld [vmem:[%s15651_s0 + $0x28] sm:$0xff] }
  0x51   :  { %v7938_v2 = vld [vmem:[%s15650_s1 + $0xb80] sm:$0xf]  ;;  %v10102_v3 = vld [vmem:[%s15650_s1 + $0xb8c] sm:$0xf0]  ;;  %v7811_v8 = vor.u32 %v10070_v1, %v7810_v0  ;;  %4946 = vmatpush.bf16.msra.mxu0 %v7555_v5 }
  0x52   :  { %v7538_v9 = vld [vmem:[%s15650_s1 + $0x860] sm:$0xf]  ;;  %v10002_v10 = vld [vmem:[%s15650_s1 + $0x86c] sm:$0xf0]  ;;  %v7939_v12 = vor.u32 %v10102_v3, %v7938_v2 }
  0x53   :  { %v7666_v11 = vld [vmem:[%s15650_s1 + $0x960] sm:$0xf]  ;;  %v10034_v13 = vld [vmem:[%s15650_s1 + $0x96c] sm:$0xf0]  ;;  %v7539_v18 = vor.u32 %v10002_v10, %v7538_v9  ;;  %4959 = vmatpush.bf16.msra.mxu1 %v7683_v7  ;;  %4972 = vmatpush.bf16.msra.mxu2 %v7811_v8 }
  0x54   :  { %v7794_v14 = vld [vmem:[%s15650_s1 + $0xa60] sm:$0xf]  ;;  %v10066_v15 = vld [vmem:[%s15650_s1 + $0xa6c] sm:$0xf0]  ;;  %v7667_v19 = vor.u32 %v10034_v13, %v7666_v11  ;;  %4985 = vmatpush.bf16.msra.mxu3 %v7939_v12  ;;  %v851_v12 = vunpack.c.l.b16 %v26_v61 }
  0x55   :  { %v7922_v16 = vld [vmem:[%s15650_s1 + $0xb60] sm:$0xf]  ;;  %v10098_v17 = vld [vmem:[%s15650_s1 + $0xb6c] sm:$0xf0]  ;;  %v7795_v22 = vor.u32 %v10066_v15, %v7794_v14  ;;  %4947 = vmatpush.bf16.msra.mxu0 %v7539_v18 }
  0x56   :  { %v7522_v23 = vld [vmem:[%s15650_s1 + $0x840] sm:$0xf]  ;;  %v9998_v24 = vld [vmem:[%s15650_s1 + $0x84c] sm:$0xf0]  ;;  %v7923_v26 = vor.u32 %v10098_v17, %v7922_v16  ;;  %v852_v16 = vunpack.c.h.b16 %v26_v61 }
  0x57   :  { %v7650_v25 = vld [vmem:[%s15650_s1 + $0x940] sm:$0xf]  ;;  %v10030_v27 = vld [vmem:[%s15650_s1 + $0x94c] sm:$0xf0]  ;;  %v7523_v32 = vor.u32 %v9998_v24, %v7522_v23  ;;  %4960 = vmatpush.bf16.msra.mxu1 %v7667_v19  ;;  %4973 = vmatpush.bf16.msra.mxu2 %v7795_v22 }
  0x58   :  { %v7778_v28 = vld [vmem:[%s15650_s1 + $0xa40] sm:$0xf]  ;;  %v10062_v29 = vld [vmem:[%s15650_s1 + $0xa4c] sm:$0xf0]  ;;  %v7651_v33 = vor.u32 %v10030_v27, %v7650_v25  ;;  %4986 = vmatpush.bf16.msra.mxu3 %v7923_v26 }
  0x59   :  { %v7906_v30 = vld [vmem:[%s15650_s1 + $0xb40] sm:$0xf]  ;;  %v10094_v31 = vld [vmem:[%s15650_s1 + $0xb4c] sm:$0xf0]  ;;  %v7779_v34 = vor.u32 %v10062_v29, %v7778_v28  ;;  %4948 = vmatpush.bf16.msra.mxu0 %v7523_v32  ;;  %v11244_v29 = vpack.c.b16 %v851_v12, %v851_v12 }
  0x5a   :  { %v7506_v35 = vld [vmem:[%s15650_s1 + $0x820] sm:$0xf]  ;;  %v9994_v36 = vld [vmem:[%s15650_s1 + $0x82c] sm:$0xf0]  ;;  %v7907_v39 = vor.u32 %v10094_v31, %v7906_v30 }
  0x5b   :  { %v7634_v37 = vld [vmem:[%s15650_s1 + $0x920] sm:$0xf]  ;;  %v10026_v40 = vld [vmem:[%s15650_s1 + $0x92c] sm:$0xf0]  ;;  %v7507_v49 = vor.u32 %v9994_v36, %v7506_v35  ;;  %4961 = vmatpush.bf16.msra.mxu1 %v7651_v33  ;;  %4974 = vmatpush.bf16.msra.mxu2 %v7779_v34  ;;  %v11254_v33 = vpack.c.b16 %v852_v16, %v852_v16 }
  0x5c   :  { %v7762_v43 = vld [vmem:[%s15650_s1 + $0xa20] sm:$0xf]  ;;  %v10058_v45 = vld [vmem:[%s15650_s1 + $0xa2c] sm:$0xf0]  ;;  %v7635_v53 = vor.u32 %v10026_v40, %v7634_v37  ;;  %4987 = vmatpush.bf16.msra.mxu3 %v7907_v39 }
  0x5d   :  { %v7890_v46 = vld [vmem:[%s15650_s1 + $0xb20] sm:$0xf]  ;;  %v10090_v47 = vld [vmem:[%s15650_s1 + $0xb2c] sm:$0xf0]  ;;  %v7763_v54 = vor.u32 %v10058_v45, %v7762_v43  ;;  %4949 = vmatpush.bf16.msra.mxu0 %v7507_v49 }
  0x5e   :  { %v7490_v48 = vld [vmem:[%s15650_s1 + $0x800] sm:$0xf]  ;;  %v9990_v50 = vld [vmem:[%s15650_s1 + $0x80c] sm:$0xf0]  ;;  %v7891_v58 = vor.u32 %v10090_v47, %v7890_v46 }
  0x5f   :  { %v7618_v51 = vld [vmem:[%s15650_s1 + $0x900] sm:$0xf]  ;;  %v10022_v52 = vld [vmem:[%s15650_s1 + $0x90c] sm:$0xf0]  ;;  %v7491_v1 = vor.u32 %v9990_v50, %v7490_v48  ;;  %4962 = vmatpush.bf16.msra.mxu1 %v7635_v53  ;;  %4975 = vmatpush.bf16.msra.mxu2 %v7763_v54 }
  0x60   :  { %v7746_v55 = vld [vmem:[%s15650_s1 + $0xa00] sm:$0xf]  ;;  %v10054_v56 = vld [vmem:[%s15650_s1 + $0xa0c] sm:$0xf0]  ;;  %v7619_v8 = vor.u32 %v10022_v52, %v7618_v51  ;;  %4988 = vmatpush.bf16.msra.mxu3 %v7891_v58 }
  0x61   :  { %v25_v57 = vld [vmem:[%s15651_s0 + $0x20] sm:$0xff]  ;;  %v10086_v60 = vld [vmem:[%s15650_s1 + $0xb0c] sm:$0xf0]  ;;  %v7747_v9 = vor.u32 %v10054_v56, %v7746_v55  ;;  %4950 = vmatpush.bf16.msra.mxu0 %v7491_v1 }
  0x62   :  { %v7874_v59 = vld [vmem:[%s15650_s1 + $0xb00] sm:$0xf]  ;;  %v10146_v63 = vld [vmem:[%s15650_s1 + $0xcec] sm:$0xf0]  ;;  %v849_v7 = vunpack.c.l.b16 %v25_v57  ;;  %v850_v13 = vunpack.c.h.b16 %v25_v57 }
  0x63   :  { %v8114_v62 = vld [vmem:[%s15650_s1 + $0xce0] sm:$0xf]  ;;  %v10178_v2 = vld [vmem:[%s15650_s1 + $0xdec] sm:$0xf0]  ;;  %v7875_v14 = vor.u32 %v10086_v60, %v7874_v59  ;;  %4963 = vmatpush.bf16.msra.mxu1 %v7619_v8  ;;  %4976 = vmatpush.bf16.msra.mxu2 %v7747_v9 }
  0x64   :  { %v8242_v0 = vld [vmem:[%s15650_s1 + $0xde0] sm:$0xf]  ;;  %v10210_v5 = vld [vmem:[%s15650_s1 + $0xeec] sm:$0xf0]  ;;  %v8115_v15 = vor.u32 %v10146_v63, %v8114_v62  ;;  %v11233_v25 = vpack.c.b16 %v849_v7, %v849_v7  ;;  %v11246_v30 = vpack.c.b16 %v850_v13, %v850_v13 }
  0x65   :  { %v8370_v3 = vld [vmem:[%s15650_s1 + $0xee0] sm:$0xf]  ;;  %v10242_v11 = vld [vmem:[%s15650_s1 + $0xfec] sm:$0xf0]  ;;  %v8243_v17 = vor.u32 %v10178_v2, %v8242_v0  ;;  %4989 = vmatpush.bf16.msra.mxu3 %v7875_v14 }
  0x66   :  { %v8498_v10 = vld [vmem:[%s15650_s1 + $0xfe0] sm:$0xf]  ;;  %v8371_v18 = vor.u32 %v10210_v5, %v8370_v3  ;;  %v10142_v22 = vld [vmem:[%s15650_s1 + $0xccc] sm:$0xf0]  ;;  %4995 = vmatpush.bf16.msrb.mxu0 %v8115_v15  ;;  %4977 = vmatmul.bf16.vlgmr.msra.gmra.mxu2 %v11244_v29 }
  0x67   :  { %v8098_v19 = vld [vmem:[%s15650_s1 + $0xcc0] sm:$0xf]  ;;  %v8499_v24 = vor.u32 %v10242_v11, %v8498_v10  ;;  %v10174_v26 = vld [vmem:[%s15650_s1 + $0xdcc] sm:$0xf0]  ;;  %5008 = vmatpush.bf16.msrb.mxu1 %v8243_v17  ;;  %4951 = vmatmul.bf16.vlgmr.msra.gmra.mxu0 %v11233_v25 }
  0x68   :  { %v8226_v23 = vld [vmem:[%s15650_s1 + $0xdc0] sm:$0xf]  ;;  %v10206_v28 = vld [vmem:[%s15650_s1 + $0xecc] sm:$0xf0]  ;;  %v8099_v34 = vor.u32 %v10142_v22, %v8098_v19  ;;  %5021 = vmatpush.bf16.msrb.mxu2 %v8371_v18  ;;  %4964 = vmatmul.bf16.vlgmr.msra.gmra.mxu1 %v11246_v30 }
  0x69   :  { %v8354_v27 = vld [vmem:[%s15650_s1 + $0xec0] sm:$0xf]  ;;  %v10238_v32 = vld [vmem:[%s15650_s1 + $0xfcc] sm:$0xf0]  ;;  %v8227_v35 = vor.u32 %v10174_v26, %v8226_v23  ;;  %5034 = vmatpush.bf16.msrb.mxu3 %v8499_v24 }
  0x6a   :  { %v8482_v31 = vld [vmem:[%s15650_s1 + $0xfc0] sm:$0xf]  ;;  %v8355_v36 = vor.u32 %v10206_v28, %v8354_v27  ;;  %v10138_v39 = vld [vmem:[%s15650_s1 + $0xcac] sm:$0xf0]  ;;  %4990 = vmatmul.bf16.vlgmr.msra.gmra.mxu3 %v11254_v33  ;;  %4996 = vmatpush.bf16.msrb.mxu0 %v8099_v34 }
  0x6b   :  { %v8082_v37 = vld [vmem:[%s15650_s1 + $0xca0] sm:$0xf]  ;;  %v8483_v43 = vor.u32 %v10238_v32, %v8482_v31  ;;  %v10170_v45 = vld [vmem:[%s15650_s1 + $0xdac] sm:$0xf0]  ;;  %5009 = vmatpush.bf16.msrb.mxu1 %v8227_v35 }
  0x6c   :  { %v8210_v40 = vld [vmem:[%s15650_s1 + $0xda0] sm:$0xf]  ;;  %v10202_v47 = vld [vmem:[%s15650_s1 + $0xeac] sm:$0xf0]  ;;  %v8083_v50 = vor.u32 %v10138_v39, %v8082_v37  ;;  %5022 = vmatpush.bf16.msrb.mxu2 %v8355_v36 }
  0x6d   :  { %v8338_v46 = vld [vmem:[%s15650_s1 + $0xea0] sm:$0xf]  ;;  %v10234_v49 = vld [vmem:[%s15650_s1 + $0xfac] sm:$0xf0]  ;;  %v8211_v51 = vor.u32 %v10170_v45, %v8210_v40  ;;  %5035 = vmatpush.bf16.msrb.mxu3 %v8483_v43 }
  0x6e   :  { %v8466_v48 = vld [vmem:[%s15650_s1 + $0xfa0] sm:$0xf]  ;;  %v8339_v52 = vor.u32 %v10202_v47, %v8338_v46  ;;  %v10134_v54 = vld [vmem:[%s15650_s1 + $0xc8c] sm:$0xf0]  ;;  %4997 = vmatpush.bf16.msrb.mxu0 %v8083_v50 }
  0x6f   :  { %v8066_v53 = vld [vmem:[%s15650_s1 + $0xc80] sm:$0xf]  ;;  %v8467_v56 = vor.u32 %v10234_v49, %v8466_v48  ;;  %v10166_v57 = vld [vmem:[%s15650_s1 + $0xd8c] sm:$0xf0]  ;;  %5010 = vmatpush.bf16.msrb.mxu1 %v8211_v51 }
  0x70   :  { %v8194_v55 = vld [vmem:[%s15650_s1 + $0xd80] sm:$0xf]  ;;  %v10198_v59 = vld [vmem:[%s15650_s1 + $0xe8c] sm:$0xf0]  ;;  %v8067_v62 = vor.u32 %v10134_v54, %v8066_v53  ;;  %5023 = vmatpush.bf16.msrb.mxu2 %v8339_v52 }
  0x71   :  { %v8322_v58 = vld [vmem:[%s15650_s1 + $0xe80] sm:$0xf]  ;;  %v10230_v61 = vld [vmem:[%s15650_s1 + $0xf8c] sm:$0xf0]  ;;  %v8195_v63 = vor.u32 %v10166_v57, %v8194_v55  ;;  %5036 = vmatpush.bf16.msrb.mxu3 %v8467_v56 }
  0x72   :  { %v8450_v60 = vld [vmem:[%s15650_s1 + $0xf80] sm:$0xf]  ;;  %v8323_v0 = vor.u32 %v10198_v59, %v8322_v58  ;;  %v10130_v2 = vld [vmem:[%s15650_s1 + $0xc6c] sm:$0xf0]  ;;  %4998 = vmatpush.bf16.msrb.mxu0 %v8067_v62  ;;  %v28_v59 = vld [vmem:[%s15651_s0 + $0x38] sm:$0xff] }
  0x73   :  { %v8050_v1 = vld [vmem:[%s15650_s1 + $0xc60] sm:$0xf]  ;;  %v8451_v5 = vor.u32 %v10230_v61, %v8450_v60  ;;  %v10162_v7 = vld [vmem:[%s15650_s1 + $0xd6c] sm:$0xf0]  ;;  %5011 = vmatpush.bf16.msrb.mxu1 %v8195_v63 }
  0x74   :  { %v8178_v3 = vld [vmem:[%s15650_s1 + $0xd60] sm:$0xf]  ;;  %v10194_v9 = vld [vmem:[%s15650_s1 + $0xe6c] sm:$0xf0]  ;;  %v8051_v12 = vor.u32 %v10130_v2, %v8050_v1  ;;  %5024 = vmatpush.bf16.msrb.mxu2 %v8323_v0 }
  0x75   :  { %v8306_v8 = vld [vmem:[%s15650_s1 + $0xe60] sm:$0xf]  ;;  %v10226_v11 = vld [vmem:[%s15650_s1 + $0xf6c] sm:$0xf0]  ;;  %v8179_v13 = vor.u32 %v10162_v7, %v8178_v3  ;;  %5037 = vmatpush.bf16.msrb.mxu3 %v8451_v5 }
  0x76   :  { %v8434_v10 = vld [vmem:[%s15650_s1 + $0xf60] sm:$0xf]  ;;  %v8307_v14 = vor.u32 %v10194_v9, %v8306_v8  ;;  %v10126_v16 = vld [vmem:[%s15650_s1 + $0xc4c] sm:$0xf0]  ;;  %4999 = vmatpush.bf16.msrb.mxu0 %v8051_v12 }
  0x77   :  { %v8034_v15 = vld [vmem:[%s15650_s1 + $0xc40] sm:$0xf]  ;;  %v8435_v18 = vor.u32 %v10226_v11, %v8434_v10  ;;  %v10158_v19 = vld [vmem:[%s15650_s1 + $0xd4c] sm:$0xf0]  ;;  %5012 = vmatpush.bf16.msrb.mxu1 %v8179_v13  ;;  %v855_v10 = vunpack.c.l.b16 %v28_v59 }
  0x78   :  { %v8162_v17 = vld [vmem:[%s15650_s1 + $0xd40] sm:$0xf]  ;;  %v10190_v23 = vld [vmem:[%s15650_s1 + $0xe4c] sm:$0xf0]  ;;  %v8035_v27 = vor.u32 %v10126_v16, %v8034_v15  ;;  %5025 = vmatpush.bf16.msrb.mxu2 %v8307_v14  ;;  %v856_v14 = vunpack.c.h.b16 %v28_v59 }
  0x79   :  { %v8290_v22 = vld [vmem:[%s15650_s1 + $0xe40] sm:$0xf]  ;;  %v10222_v26 = vld [vmem:[%s15650_s1 + $0xf4c] sm:$0xf0]  ;;  %v8163_v28 = vor.u32 %v10158_v19, %v8162_v17  ;;  %5038 = vmatpush.bf16.msrb.mxu3 %v8435_v18 }
  0x7a   :  { %v8418_v24 = vld [vmem:[%s15650_s1 + $0xf40] sm:$0xf]  ;;  %v8291_v31 = vor.u32 %v10190_v23, %v8290_v22  ;;  %v10122_v34 = vld [vmem:[%s15650_s1 + $0xc2c] sm:$0xf0]  ;;  %5000 = vmatpush.bf16.msrb.mxu0 %v8035_v27 }
  0x7b   :  { %v8018_v32 = vld [vmem:[%s15650_s1 + $0xc20] sm:$0xf]  ;;  %v8419_v36 = vor.u32 %v10222_v26, %v8418_v24  ;;  %v10154_v37 = vld [vmem:[%s15650_s1 + $0xd2c] sm:$0xf0]  ;;  %5013 = vmatpush.bf16.msrb.mxu1 %v8163_v28  ;;  %v11454_v28 = vpack.c.b16 %v855_v10, %v855_v10 }
  0x7c   :  { %v8146_v35 = vld [vmem:[%s15650_s1 + $0xd20] sm:$0xf]  ;;  %v10186_v40 = vld [vmem:[%s15650_s1 + $0xe2c] sm:$0xf0]  ;;  %v8019_v47 = vor.u32 %v10122_v34, %v8018_v32  ;;  %5026 = vmatpush.bf16.msrb.mxu2 %v8291_v31 }
  0x7d   :  { %v8274_v39 = vld [vmem:[%s15650_s1 + $0xe20] sm:$0xf]  ;;  %v10218_v45 = vld [vmem:[%s15650_s1 + $0xf2c] sm:$0xf0]  ;;  %v8147_v51 = vor.u32 %v10154_v37, %v8146_v35  ;;  %5039 = vmatpush.bf16.msrb.mxu3 %v8419_v36  ;;  %v11464_v35 = vpack.c.b16 %v856_v14, %v856_v14 }
  0x7e   :  { %v8402_v43 = vld [vmem:[%s15650_s1 + $0xf20] sm:$0xf]  ;;  %v10118_v48 = vld [vmem:[%s15650_s1 + $0xc0c] sm:$0xf0]  ;;  %v8275_v52 = vor.u32 %v10186_v40, %v8274_v39  ;;  %5001 = vmatpush.bf16.msrb.mxu0 %v8019_v47 }
  0x7f   :  { %v8002_v46 = vld [vmem:[%s15650_s1 + $0xc00] sm:$0xf]  ;;  %v10150_v50 = vld [vmem:[%s15650_s1 + $0xd0c] sm:$0xf0]  ;;  %v8403_v56 = vor.u32 %v10218_v45, %v8402_v43  ;;  %5014 = vmatpush.bf16.msrb.mxu1 %v8147_v51 }
  0x80   :  { %v8130_v49 = vld [vmem:[%s15650_s1 + $0xd00] sm:$0xf]  ;;  %v10182_v54 = vld [vmem:[%s15650_s1 + $0xe0c] sm:$0xf0]  ;;  %v8003_v63 = vor.u32 %v10118_v48, %v8002_v46  ;;  %5027 = vmatpush.bf16.msrb.mxu2 %v8275_v52 }
  0x81   :  { %v8258_v53 = vld [vmem:[%s15650_s1 + $0xe00] sm:$0xf]  ;;  %v27_v55 = vld [vmem:[%s15651_s0 + $0x30] sm:$0xff]  ;;  %v8131_v5 = vor.u32 %v10150_v50, %v8130_v49  ;;  %5040 = vmatpush.bf16.msrb.mxu3 %v8403_v56 }
  0x82   :  { %v8386_v57 = vld [vmem:[%s15650_s1 + $0xf00] sm:$0xf]  ;;  %v10214_v58 = vld [vmem:[%s15650_s1 + $0xf0c] sm:$0xf0]  ;;  %v853_v3 = vunpack.c.l.b16 %v27_v55  ;;  %v8259_v7 = vor.u32 %v10182_v54, %v8258_v53  ;;  %v854_v11 = vunpack.c.h.b16 %v27_v55  ;;  %5002 = vmatpush.bf16.msrb.mxu0 %v8003_v63 }
  0x83   :  { %v8626_v60 = vld [vmem:[%s15650_s1 + $0x10e0] sm:$0xf]  ;;  %v10274_v61 = vld [vmem:[%s15650_s1 + $0x10ec] sm:$0xf0]  ;;  %v8387_v12 = vor.u32 %v10214_v58, %v8386_v57  ;;  %5015 = vmatpush.bf16.msrb.mxu1 %v8131_v5 }
  0x84   :  { %v8754_v62 = vld [vmem:[%s15650_s1 + $0x11e0] sm:$0xf]  ;;  %v10306_v0 = vld [vmem:[%s15650_s1 + $0x11ec] sm:$0xf0]  ;;  %v8627_v13 = vor.u32 %v10274_v61, %v8626_v60  ;;  %v11443_v23 = vpack.c.b16 %v853_v3, %v853_v3  ;;  %5028 = vmatpush.bf16.msrb.mxu2 %v8259_v7  ;;  %v11456_v31 = vpack.c.b16 %v854_v11, %v854_v11 }
  0x85   :  { %v8882_v1 = vld [vmem:[%s15650_s1 + $0x12e0] sm:$0xf]  ;;  %v10338_v2 = vld [vmem:[%s15650_s1 + $0x12ec] sm:$0xf0]  ;;  %v8755_v15 = vor.u32 %v10306_v0, %v8754_v62  ;;  %5041 = vmatpush.bf16.msrb.mxu3 %v8387_v12 }
  0x86   :  { %v9010_v8 = vld [vmem:[%s15650_s1 + $0x13e0] sm:$0xf]  ;;  %v10370_v9 = vld [vmem:[%s15650_s1 + $0x13ec] sm:$0xf0]  ;;  %v8883_v16 = vor.u32 %v10338_v2, %v8882_v1  ;;  %5047 = vmatpush.bf16.msra.mxu0 %v8627_v13  ;;  %5016 = vmatmul.bf16.vlgmr.msrb.gmra.mxu1 %v11456_v31 }
  0x87   :  { %v8610_v17 = vld [vmem:[%s15650_s1 + $0x10c0] sm:$0xf]  ;;  %v10270_v18 = vld [vmem:[%s15650_s1 + $0x10cc] sm:$0xf0]  ;;  %v9011_v22 = vor.u32 %v10370_v9, %v9010_v8  ;;  %5060 = vmatpush.bf16.msra.mxu1 %v8755_v15  ;;  %5003 = vmatmul.bf16.vlgmr.msrb.gmra.mxu0 %v11443_v23 }
  0x88   :  { %v8738_v19 = vld [vmem:[%s15650_s1 + $0x11c0] sm:$0xf]  ;;  %v10302_v24 = vld [vmem:[%s15650_s1 + $0x11cc] sm:$0xf0]  ;;  %v8611_v36 = vor.u32 %v10270_v18, %v8610_v17  ;;  %5073 = vmatpush.bf16.msra.mxu2 %v8883_v16  ;;  %5042 = vmatmul.bf16.vlgmr.msrb.gmra.mxu3 %v11464_v35 }
  0x89   :  { %v8866_v26 = vld [vmem:[%s15650_s1 + $0x12c0] sm:$0xf]  ;;  %v10334_v27 = vld [vmem:[%s15650_s1 + $0x12cc] sm:$0xf0]  ;;  %v8739_v37 = vor.u32 %v10302_v24, %v8738_v19  ;;  %5086 = vmatpush.bf16.msra.mxu3 %v9011_v22  ;;  %5029 = vmatmul.bf16.vlgmr.msrb.gmra.mxu2 %v11454_v28 }
  0x8a   :  { %v8994_v32 = vld [vmem:[%s15650_s1 + $0x13c0] sm:$0xf]  ;;  %v10366_v34 = vld [vmem:[%s15650_s1 + $0x13cc] sm:$0xf0]  ;;  %v8867_v39 = vor.u32 %v10334_v27, %v8866_v26  ;;  %5048 = vmatpush.bf16.msra.mxu0 %v8611_v36 }
  0x8b   :  { %v8594_v40 = vld [vmem:[%s15650_s1 + $0x10a0] sm:$0xf]  ;;  %v10266_v43 = vld [vmem:[%s15650_s1 + $0x10ac] sm:$0xf0]  ;;  %v8995_v46 = vor.u32 %v10366_v34, %v8994_v32  ;;  %5061 = vmatpush.bf16.msra.mxu1 %v8739_v37 }
  0x8c   :  { %v8722_v45 = vld [vmem:[%s15650_s1 + $0x11a0] sm:$0xf]  ;;  %v10298_v47 = vld [vmem:[%s15650_s1 + $0x11ac] sm:$0xf0]  ;;  %v8595_v52 = vor.u32 %v10266_v43, %v8594_v40  ;;  %5074 = vmatpush.bf16.msra.mxu2 %v8867_v39 }
  0x8d   :  { %v8850_v48 = vld [vmem:[%s15650_s1 + $0x12a0] sm:$0xf]  ;;  %v10330_v49 = vld [vmem:[%s15650_s1 + $0x12ac] sm:$0xf0]  ;;  %v8723_v53 = vor.u32 %v10298_v47, %v8722_v45  ;;  %5087 = vmatpush.bf16.msra.mxu3 %v8995_v46 }
  0x8e   :  { %v8978_v50 = vld [vmem:[%s15650_s1 + $0x13a0] sm:$0xf]  ;;  %v10362_v51 = vld [vmem:[%s15650_s1 + $0x13ac] sm:$0xf0]  ;;  %v8851_v54 = vor.u32 %v10330_v49, %v8850_v48  ;;  %5049 = vmatpush.bf16.msra.mxu0 %v8595_v52 }
  0x8f   :  { %v8578_v55 = vld [vmem:[%s15650_s1 + $0x1080] sm:$0xf]  ;;  %v10262_v56 = vld [vmem:[%s15650_s1 + $0x108c] sm:$0xf0]  ;;  %v8979_v58 = vor.u32 %v10362_v51, %v8978_v50  ;;  %5062 = vmatpush.bf16.msra.mxu1 %v8723_v53 }
  0x90   :  { %v8706_v57 = vld [vmem:[%s15650_s1 + $0x1180] sm:$0xf]  ;;  %v10294_v59 = vld [vmem:[%s15650_s1 + $0x118c] sm:$0xf0]  ;;  %v8579_v0 = vor.u32 %v10262_v56, %v8578_v55  ;;  %5075 = vmatpush.bf16.msra.mxu2 %v8851_v54 }
  0x91   :  { %v8834_v60 = vld [vmem:[%s15650_s1 + $0x1280] sm:$0xf]  ;;  %v10326_v61 = vld [vmem:[%s15650_s1 + $0x128c] sm:$0xf0]  ;;  %v8707_v1 = vor.u32 %v10294_v59, %v8706_v57  ;;  %5088 = vmatpush.bf16.msra.mxu3 %v8979_v58 }
  0x92   :  { %v8962_v62 = vld [vmem:[%s15650_s1 + $0x1380] sm:$0xf]  ;;  %v10358_v63 = vld [vmem:[%s15650_s1 + $0x138c] sm:$0xf0]  ;;  %v8835_v2 = vor.u32 %v10326_v61, %v8834_v60  ;;  %5050 = vmatpush.bf16.msra.mxu0 %v8579_v0 }
  0x93   :  { %v8562_v3 = vld [vmem:[%s15650_s1 + $0x1060] sm:$0xf]  ;;  %v10258_v5 = vld [vmem:[%s15650_s1 + $0x106c] sm:$0xf0]  ;;  %v8963_v8 = vor.u32 %v10358_v63, %v8962_v62  ;;  %5063 = vmatpush.bf16.msra.mxu1 %v8707_v1  ;;  %v30_v1 = vld [vmem:[%s15651_s0 + $0x48] sm:$0xff] }
  0x94   :  { %v8690_v7 = vld [vmem:[%s15650_s1 + $0x1160] sm:$0xf]  ;;  %v10290_v9 = vld [vmem:[%s15650_s1 + $0x116c] sm:$0xf0]  ;;  %v8563_v14 = vor.u32 %v10258_v5, %v8562_v3  ;;  %5076 = vmatpush.bf16.msra.mxu2 %v8835_v2 }
  0x95   :  { %v8818_v10 = vld [vmem:[%s15650_s1 + $0x1260] sm:$0xf]  ;;  %v10322_v11 = vld [vmem:[%s15650_s1 + $0x126c] sm:$0xf0]  ;;  %v8691_v15 = vor.u32 %v10290_v9, %v8690_v7  ;;  %5089 = vmatpush.bf16.msra.mxu3 %v8963_v8 }
  0x96   :  { %v8946_v12 = vld [vmem:[%s15650_s1 + $0x1360] sm:$0xf]  ;;  %v10354_v13 = vld [vmem:[%s15650_s1 + $0x136c] sm:$0xf0]  ;;  %v8819_v16 = vor.u32 %v10322_v11, %v8818_v10  ;;  %5051 = vmatpush.bf16.msra.mxu0 %v8563_v14 }
  0x97   :  { %v8546_v17 = vld [vmem:[%s15650_s1 + $0x1040] sm:$0xf]  ;;  %v10254_v18 = vld [vmem:[%s15650_s1 + $0x104c] sm:$0xf0]  ;;  %v8947_v22 = vor.u32 %v10354_v13, %v8946_v12  ;;  %5064 = vmatpush.bf16.msra.mxu1 %v8691_v15 }
  0x98   :  { %v8674_v19 = vld [vmem:[%s15650_s1 + $0x1140] sm:$0xf]  ;;  %v10286_v24 = vld [vmem:[%s15650_s1 + $0x114c] sm:$0xf0]  ;;  %v8547_v36 = vor.u32 %v10254_v18, %v8546_v17  ;;  %5077 = vmatpush.bf16.msra.mxu2 %v8819_v16  ;;  %v859_v16 = vunpack.c.l.b16 %v30_v1 }
  0x99   :  { %v8802_v26 = vld [vmem:[%s15650_s1 + $0x1240] sm:$0xf]  ;;  %v10318_v27 = vld [vmem:[%s15650_s1 + $0x124c] sm:$0xf0]  ;;  %v8675_v37 = vor.u32 %v10286_v24, %v8674_v19  ;;  %5090 = vmatpush.bf16.msra.mxu3 %v8947_v22  ;;  %v860_v22 = vunpack.c.h.b16 %v30_v1 }
  0x9a   :  { %v8930_v32 = vld [vmem:[%s15650_s1 + $0x1340] sm:$0xf]  ;;  %v10350_v34 = vld [vmem:[%s15650_s1 + $0x134c] sm:$0xf0]  ;;  %v8803_v39 = vor.u32 %v10318_v27, %v8802_v26  ;;  %5052 = vmatpush.bf16.msra.mxu0 %v8547_v36 }
  0x9b   :  { %v8530_v40 = vld [vmem:[%s15650_s1 + $0x1020] sm:$0xf]  ;;  %v10250_v43 = vld [vmem:[%s15650_s1 + $0x102c] sm:$0xf0]  ;;  %v8931_v46 = vor.u32 %v10350_v34, %v8930_v32  ;;  %5065 = vmatpush.bf16.msra.mxu1 %v8675_v37 }
  0x9c   :  { %v8658_v45 = vld [vmem:[%s15650_s1 + $0x1120] sm:$0xf]  ;;  %v10282_v47 = vld [vmem:[%s15650_s1 + $0x112c] sm:$0xf0]  ;;  %v8531_v53 = vor.u32 %v10250_v43, %v8530_v40  ;;  %5078 = vmatpush.bf16.msra.mxu2 %v8803_v39 }
  0x9d   :  { %v8786_v48 = vld [vmem:[%s15650_s1 + $0x1220] sm:$0xf]  ;;  %v10314_v49 = vld [vmem:[%s15650_s1 + $0x122c] sm:$0xf0]  ;;  %v8659_v57 = vor.u32 %v10282_v47, %v8658_v45  ;;  %5091 = vmatpush.bf16.msra.mxu3 %v8931_v46  ;;  %v11664_v45 = vpack.c.b16 %v859_v16, %v859_v16 }
  0x9e   :  { %v8914_v50 = vld [vmem:[%s15650_s1 + $0x1320] sm:$0xf]  ;;  %v10346_v51 = vld [vmem:[%s15650_s1 + $0x132c] sm:$0xf0]  ;;  %v8787_v58 = vor.u32 %v10314_v49, %v8786_v48  ;;  %5053 = vmatpush.bf16.msra.mxu0 %v8531_v53  ;;  %v11674_v49 = vpack.c.b16 %v860_v22, %v860_v22 }
  0x9f   :  { %v8514_v52 = vld [vmem:[%s15650_s1 + $0x1000] sm:$0xf]  ;;  %v10246_v54 = vld [vmem:[%s15650_s1 + $0x100c] sm:$0xf0]  ;;  %v8915_v62 = vor.u32 %v10346_v51, %v8914_v50  ;;  %5066 = vmatpush.bf16.msra.mxu1 %v8659_v57 }
  0xa0   :  { %v8642_v55 = vld [vmem:[%s15650_s1 + $0x1100] sm:$0xf]  ;;  %v10278_v56 = vld [vmem:[%s15650_s1 + $0x110c] sm:$0xf0]  ;;  %v8515_v7 = vor.u32 %v10246_v54, %v8514_v52  ;;  %5079 = vmatpush.bf16.msra.mxu2 %v8787_v58 }
  0xa1   :  { %v8770_v59 = vld [vmem:[%s15650_s1 + $0x1200] sm:$0xf]  ;;  %v10310_v60 = vld [vmem:[%s15650_s1 + $0x120c] sm:$0xf0]  ;;  %v8643_v12 = vor.u32 %v10278_v56, %v8642_v55  ;;  %5092 = vmatpush.bf16.msra.mxu3 %v8915_v62 }
  0xa2   :  { %v29_v61 = vld [vmem:[%s15651_s0 + $0x40] sm:$0xff]  ;;  %v10342_v0 = vld [vmem:[%s15650_s1 + $0x130c] sm:$0xf0]  ;;  %v8771_v13 = vor.u32 %v10310_v60, %v8770_v59  ;;  %5054 = vmatpush.bf16.msra.mxu0 %v8515_v7 }
  0xa3   :  { %v8898_v63 = vld [vmem:[%s15650_s1 + $0x1300] sm:$0xf]  ;;  %v10402_v3 = vld [vmem:[%s15650_s1 + $0x14ec] sm:$0xf0]  ;;  %v857_v11 = vunpack.c.l.b16 %v29_v61  ;;  %v858_v17 = vunpack.c.h.b16 %v29_v61  ;;  %5067 = vmatpush.bf16.msra.mxu1 %v8643_v12 }
  0xa4   :  { %v9138_v2 = vld [vmem:[%s15650_s1 + $0x14e0] sm:$0xf]  ;;  %v10434_v8 = vld [vmem:[%s15650_s1 + $0x15ec] sm:$0xf0]  ;;  %v8899_v18 = vor.u32 %v10342_v0, %v8898_v63  ;;  %5080 = vmatpush.bf16.msra.mxu2 %v8771_v13 }
  0xa5   :  { %v9266_v5 = vld [vmem:[%s15650_s1 + $0x15e0] sm:$0xf]  ;;  %v10466_v10 = vld [vmem:[%s15650_s1 + $0x16ec] sm:$0xf0]  ;;  %v9139_v19 = vor.u32 %v10402_v3, %v9138_v2  ;;  %v11653_v37 = vpack.c.b16 %v857_v11, %v857_v11  ;;  %v11666_v46 = vpack.c.b16 %v858_v17, %v858_v17 }
  0xa6   :  { %v9394_v9 = vld [vmem:[%s15650_s1 + $0x16e0] sm:$0xf]  ;;  %v10498_v15 = vld [vmem:[%s15650_s1 + $0x17ec] sm:$0xf0]  ;;  %v9267_v24 = vor.u32 %v10434_v8, %v9266_v5  ;;  %5093 = vmatpush.bf16.msra.mxu3 %v8899_v18 }
  0xa7   :  { %v9522_v14 = vld [vmem:[%s15650_s1 + $0x17e0] sm:$0xf]  ;;  %v9395_v26 = vor.u32 %v10466_v10, %v9394_v9  ;;  %v10398_v32 = vld [vmem:[%s15650_s1 + $0x14cc] sm:$0xf0]  ;;  %5099 = vmatpush.bf16.msrb.mxu0 %v9139_v19  ;;  %5081 = vmatmul.bf16.vlgmr.msra.gmra.mxu2 %v11664_v45 }
  0xa8   :  { %v9122_v27 = vld [vmem:[%s15650_s1 + $0x14c0] sm:$0xf]  ;;  %v9523_v36 = vor.u32 %v10498_v15, %v9522_v14  ;;  %v10430_v39 = vld [vmem:[%s15650_s1 + $0x15cc] sm:$0xf0]  ;;  %5112 = vmatpush.bf16.msrb.mxu1 %v9267_v24  ;;  %5055 = vmatmul.bf16.vlgmr.msra.gmra.mxu0 %v11653_v37 }
  0xa9   :  { %v9250_v34 = vld [vmem:[%s15650_s1 + $0x15c0] sm:$0xf]  ;;  %v10462_v43 = vld [vmem:[%s15650_s1 + $0x16cc] sm:$0xf0]  ;;  %v9123_v50 = vor.u32 %v10398_v32, %v9122_v27  ;;  %5125 = vmatpush.bf16.msrb.mxu2 %v9395_v26  ;;  %5068 = vmatmul.bf16.vlgmr.msra.gmra.mxu1 %v11666_v46 }
  0xaa   :  { %v9378_v40 = vld [vmem:[%s15650_s1 + $0x16c0] sm:$0xf]  ;;  %v10494_v48 = vld [vmem:[%s15650_s1 + $0x17cc] sm:$0xf0]  ;;  %v9251_v51 = vor.u32 %v10430_v39, %v9250_v34  ;;  %5138 = vmatpush.bf16.msrb.mxu3 %v9523_v36 }
  0xab   :  { %v9506_v47 = vld [vmem:[%s15650_s1 + $0x17c0] sm:$0xf]  ;;  %v9379_v52 = vor.u32 %v10462_v43, %v9378_v40  ;;  %v10394_v54 = vld [vmem:[%s15650_s1 + $0x14ac] sm:$0xf0]  ;;  %5094 = vmatmul.bf16.vlgmr.msra.gmra.mxu3 %v11674_v49  ;;  %5100 = vmatpush.bf16.msrb.mxu0 %v9123_v50 }
  0xac   :  { %v9106_v53 = vld [vmem:[%s15650_s1 + $0x14a0] sm:$0xf]  ;;  %v9507_v56 = vor.u32 %v10494_v48, %v9506_v47  ;;  %v10426_v57 = vld [vmem:[%s15650_s1 + $0x15ac] sm:$0xf0]  ;;  %5113 = vmatpush.bf16.msrb.mxu1 %v9251_v51 }
  0xad   :  { %v9234_v55 = vld [vmem:[%s15650_s1 + $0x15a0] sm:$0xf]  ;;  %v10458_v59 = vld [vmem:[%s15650_s1 + $0x16ac] sm:$0xf0]  ;;  %v9107_v62 = vor.u32 %v10394_v54, %v9106_v53  ;;  %5126 = vmatpush.bf16.msrb.mxu2 %v9379_v52 }
  0xae   :  { %v9362_v58 = vld [vmem:[%s15650_s1 + $0x16a0] sm:$0xf]  ;;  %v10490_v61 = vld [vmem:[%s15650_s1 + $0x17ac] sm:$0xf0]  ;;  %v9235_v63 = vor.u32 %v10426_v57, %v9234_v55  ;;  %5139 = vmatpush.bf16.msrb.mxu3 %v9507_v56 }
  0xaf   :  { %v9490_v60 = vld [vmem:[%s15650_s1 + $0x17a0] sm:$0xf]  ;;  %v9363_v0 = vor.u32 %v10458_v59, %v9362_v58  ;;  %v10390_v2 = vld [vmem:[%s15650_s1 + $0x148c] sm:$0xf0]  ;;  %5101 = vmatpush.bf16.msrb.mxu0 %v9107_v62  ;;  %v4848_v56 = vpop.f32.mrf.mxu0  ;;  %v4861_v59 = vpop.f32.mrf.mxu1 }
  0xb0   :  { %v9090_v1 = vld [vmem:[%s15650_s1 + $0x1480] sm:$0xf]  ;;  %v9491_v5 = vor.u32 %v10490_v61, %v9490_v60  ;;  %v10422_v7 = vld [vmem:[%s15650_s1 + $0x158c] sm:$0xf0]  ;;  %5114 = vmatpush.bf16.msrb.mxu1 %v9235_v63 }
  0xb1   :  { %v9218_v3 = vld [vmem:[%s15650_s1 + $0x1580] sm:$0xf]  ;;  %v10454_v9 = vld [vmem:[%s15650_s1 + $0x168c] sm:$0xf0]  ;;  %v9091_v12 = vor.u32 %v10390_v2, %v9090_v1  ;;  %5127 = vmatpush.bf16.msrb.mxu2 %v9363_v0  ;;  %v4874_v1 = vpop.f32.mrf.mxu2 }
  0xb2   :  { %v9346_v8 = vld [vmem:[%s15650_s1 + $0x1680] sm:$0xf]  ;;  %v10486_v11 = vld [vmem:[%s15650_s1 + $0x178c] sm:$0xf0]  ;;  %v9219_v14 = vor.u32 %v10422_v7, %v9218_v3  ;;  %5140 = vmatpush.bf16.msrb.mxu3 %v9491_v5 }
  0xb3   :  { %v9474_v10 = vld [vmem:[%s15650_s1 + $0x1780] sm:$0xf]  ;;  %v9347_v15 = vor.u32 %v10454_v9, %v9346_v8  ;;  %v10386_v16 = vld [vmem:[%s15650_s1 + $0x146c] sm:$0xf0]  ;;  %5102 = vmatpush.bf16.msrb.mxu0 %v9091_v12  ;;  %v4887_v9 = vpop.f32.mrf.mxu3 }
  0xb4   :  { %v9074_v13 = vld [vmem:[%s15650_s1 + $0x1460] sm:$0xf]  ;;  %v9475_v19 = vor.u32 %v10486_v11, %v9474_v10  ;;  %v10418_v22 = vld [vmem:[%s15650_s1 + $0x156c] sm:$0xf0]  ;;  %5115 = vmatpush.bf16.msrb.mxu1 %v9219_v14 }
  0xb5   :  { %v9202_v17 = vld [vmem:[%s15650_s1 + $0x1560] sm:$0xf]  ;;  %v10450_v26 = vld [vmem:[%s15650_s1 + $0x166c] sm:$0xf0]  ;;  %v9075_v34 = vor.u32 %v10386_v16, %v9074_v13  ;;  %5128 = vmatpush.bf16.msrb.mxu2 %v9347_v15 }
  0xb6   :  { %v818_v18 = vld [vmem:[%s15652_s2] sm:$0xf]  ;;  %v10482_v32 = vld [vmem:[%s15650_s1 + $0x176c] sm:$0xf0]  ;;  %v9203_v39 = vor.u32 %v10418_v22, %v9202_v17  ;;  %5141 = vmatpush.bf16.msrb.mxu3 %v9475_v19 }
  0xb7   :  { %v9330_v24 = vld [vmem:[%s15650_s1 + $0x1660] sm:$0xf]  ;;  %v820_v36 = vperm.slane %v818_v18, 0  ;;  %v10382_v47 = vld [vmem:[%s15650_s1 + $0x144c] sm:$0xf0]  ;;  %5103 = vmatpush.bf16.msrb.mxu0 %v9075_v34 }
  0xb8   :  { %v9458_v27 = vld [vmem:[%s15650_s1 + $0x1760] sm:$0xf]  ;;  %v9331_v40 = vor.u32 %v10450_v26, %v9330_v24  ;;  %v10414_v51 = vld [vmem:[%s15650_s1 + $0x154c] sm:$0xf0]  ;;  %5116 = vmatpush.bf16.msrb.mxu1 %v9203_v39 }
  0xb9   :  { %v9058_v43 = vld [vmem:[%s15650_s1 + $0x1440] sm:$0xf]  ;;  %v9459_v50 = vor.u32 %v10482_v32, %v9458_v27  ;;  %v10446_v53 = vld [vmem:[%s15650_s1 + $0x164c] sm:$0xf0]  ;;  %v4849_v58 = vadd.f32 %v4848_v56, %v820_v36  ;;  %v32_v36 = vld [vmem:[%s15651_s0 + $0x58] sm:$0xff] }
  0xba   :  { %v9186_v48 = vld [vmem:[%s15650_s1 + $0x1540] sm:$0xf]  ;;  %v10478_v55 = vld [vmem:[%s15650_s1 + $0x174c] sm:$0xf0]  ;;  %v9059_v57 = vor.u32 %v10382_v47, %v9058_v43  ;;  %5129 = vmatpush.bf16.msrb.mxu2 %v9331_v40  ;;  %v9760_v47 = vld [vmem:[%s15650_s1 + $0xe4] sm:$0xf] }
  0xbb   :  { %v9314_v52 = vld [vmem:[%s15650_s1 + $0x1640] sm:$0xf]  ;;  %v9187_v60 = vor.u32 %v10414_v51, %v9186_v48  ;;  %v10378_v63 = vld [vmem:[%s15650_s1 + $0x142c] sm:$0xf0]  ;;  %5142 = vmatpush.bf16.msrb.mxu3 %v9459_v50  ;;  %v4862_v8 = vadd.f32 %v4861_v59, %v4849_v58  ;;  %v4850_v48 = vpop.f32.mrf.mxu0  ;;  %v6580_v51 = vld [vmem:[%s15650_s1 + $0xf0] sm:$0xf0] }
  0xbc   :  { %v9442_v54 = vld [vmem:[%s15650_s1 + $0x1740] sm:$0xf]  ;;  %v9315_v61 = vor.u32 %v10446_v53, %v9314_v52  ;;  %v10410_v3 = vld [vmem:[%s15650_s1 + $0x152c] sm:$0xf0]  ;;  %5104 = vmatpush.bf16.msrb.mxu0 %v9059_v57  ;;  %v9792_v52 = vld [vmem:[%s15650_s1 + $0x1e4] sm:$0xf] }
  0xbd   :  { %v9042_v62 = vld [vmem:[%s15650_s1 + $0x1420] sm:$0xf]  ;;  %v9443_v2 = vor.u32 %v10478_v55, %v9442_v54  ;;  %v10442_v7 = vld [vmem:[%s15650_s1 + $0x162c] sm:$0xf0]  ;;  %v4875_v17 = vadd.f32 %v4874_v1, %v4862_v8  ;;  %5117 = vmatpush.bf16.msrb.mxu1 %v9187_v60  ;;  %v6708_v53 = vld [vmem:[%s15650_s1 + $0x1f0] sm:$0xf0]  ;;  %v4863_v55 = vpop.f32.mrf.mxu1  ;;  %v863_v60 = vunpack.c.l.b16 %v32_v36  ;;  %v864_v1 = vunpack.c.h.b16 %v32_v36 }
  0xbe   :  { %v9170_v0 = vld [vmem:[%s15650_s1 + $0x1520] sm:$0xf]  ;;  %v10474_v11 = vld [vmem:[%s15650_s1 + $0x172c] sm:$0xf0]  ;;  %v9043_v13 = vor.u32 %v10378_v63, %v9042_v62  ;;  %5130 = vmatpush.bf16.msrb.mxu2 %v9315_v61  ;;  %v9824_v58 = vld [vmem:[%s15650_s1 + $0x2e4] sm:$0xf]  ;;  %v4876_v62 = vpop.f32.mrf.mxu2 }
  0xbf   :  { %v9298_v5 = vld [vmem:[%s15650_s1 + $0x1620] sm:$0xf]  ;;  %v10374_v14 = vld [vmem:[%s15650_s1 + $0x140c] sm:$0xf0]  ;;  %v9171_v18 = vor.u32 %v10410_v3, %v9170_v0  ;;  %5143 = vmatpush.bf16.msrb.mxu3 %v9443_v2  ;;  %v11833_v39 = vadd.f32 %v4887_v9, %v4875_v17  ;;  %v6836_v59 = vld [vmem:[%s15650_s1 + $0x2f0] sm:$0xf0]  ;;  %v4889_v2 = vpop.f32.mrf.mxu3  ;;  %v6583_v3 = vor.u32 %v9760_v47, %v6580_v51 }
  0xc0   :  { %v9426_v10 = vld [vmem:[%s15650_s1 + $0x1720] sm:$0xf]  ;;  %v10406_v16 = vld [vmem:[%s15650_s1 + $0x150c] sm:$0xf0]  ;;  %v9299_v19 = vor.u32 %v10442_v7, %v9298_v5  ;;  %5105 = vmatpush.bf16.msrb.mxu0 %v9043_v13  ;;  %v6711_v5 = vor.u32 %v9792_v52, %v6708_v53  ;;  %v9756_v9 = vld [vmem:[%s15650_s1 + $0xc4] sm:$0xf] }
  0xc1   :  { %v9026_v12 = vld [vmem:[%s15650_s1 + $0x1400] sm:$0xf]  ;;  %v10438_v24 = vld [vmem:[%s15650_s1 + $0x160c] sm:$0xf0]  ;;  %v9427_v27 = vor.u32 %v10474_v11, %v9426_v10  ;;  %5118 = vmatpush.bf16.msrb.mxu1 %v9171_v18  ;;  %v6839_v10 = vor.u32 %v9824_v58, %v6836_v59  ;;  %v9788_v13 = vld [vmem:[%s15650_s1 + $0x1c4] sm:$0xf] }
  0xc2   :  { %v9154_v15 = vld [vmem:[%s15650_s1 + $0x1500] sm:$0xf]  ;;  %v31_v26 = vld [vmem:[%s15651_s0 + $0x50] sm:$0xff]  ;;  %v9027_v50 = vor.u32 %v10374_v14, %v9026_v12  ;;  %5131 = vmatpush.bf16.msrb.mxu2 %v9299_v19  ;;  %v9820_v17 = vld [vmem:[%s15650_s1 + $0x2c4] sm:$0xf]  ;;  %v11889_v19 = vpack.c.b16 %v864_v1, %v864_v1 }
  0xc3   :  { %v9282_v22 = vld [vmem:[%s15650_s1 + $0x1600] sm:$0xf]  ;;  %v10470_v34 = vld [vmem:[%s15650_s1 + $0x170c] sm:$0xf0]  ;;  %v861_v54 = vunpack.c.l.b16 %v31_v26  ;;  %v9155_v56 = vor.u32 %v10406_v16, %v9154_v15  ;;  %v862_v61 = vunpack.c.h.b16 %v31_v26  ;;  %5144 = vmatpush.bf16.msrb.mxu3 %v9427_v27  ;;  %v6564_v12 = vld [vmem:[%s15650_s1 + $0xd0] sm:$0xf0]  ;;  %v11879_v15 = vpack.c.b16 %v863_v60, %v863_v60  ;;  %v4900_v2 = vpop.f32.mrf.mxu0 }
  0xc4   :  { %v9410_v32 = vld [vmem:[%s15650_s1 + $0x1700] sm:$0xf]  ;;  %v10514_v43 = vld [vmem:[%s15650_s1 + $0x186c] sm:$0xf0]  ;;  %v9283_v57 = vor.u32 %v10438_v24, %v9282_v22  ;;  %5106 = vmatpush.bf16.msrb.mxu0 %v9027_v50  ;;  %v6692_v14 = vld [vmem:[%s15650_s1 + $0x1d0] sm:$0xf0]  ;;  %v6567_v24 = vor.u32 %v9756_v9, %v6564_v12 }
  0xc5   :  { %v9586_v40 = vld [vmem:[%s15650_s1 + $0x1860] sm:$0xf]  ;;  %v9411_v63 = vor.u32 %v10470_v34, %v9410_v32  ;;  %v10510_v8 = vld [vmem:[%s15650_s1 + $0x184c] sm:$0xf0]  ;;  %v11868_v11 = vpack.c.b16 %v861_v54, %v861_v54  ;;  %5119 = vmatpush.bf16.msrb.mxu1 %v9155_v56  ;;  %v11881_v16 = vpack.c.b16 %v862_v61, %v862_v61  ;;  %v6820_v18 = vld [vmem:[%s15650_s1 + $0x2d0] sm:$0xf0]  ;;  %v6695_v26 = vor.u32 %v9788_v13, %v6692_v14  ;;  %v4913_v12 = vpop.f32.mrf.mxu1 }
  0xc6   :  { %v9587_v0 = vor.u32 %v10514_v43, %v9586_v40  ;;  %v9570_v7 = vld [vmem:[%s15650_s1 + $0x1840] sm:$0xf]  ;;  %5132 = vmatpush.bf16.msrb.mxu2 %v9283_v57  ;;  %v10506_v32 = vld [vmem:[%s15650_s1 + $0x182c] sm:$0xf0]  ;;  %v9752_v34 = vld [vmem:[%s15650_s1 + $0xa4] sm:$0xf]  ;;  %v6823_v36 = vor.u32 %v9820_v17, %v6820_v18 }
  0xc7   :  { %5145 = vmatpush.bf16.msrb.mxu3 %v9411_v63  ;;  %v9571_v22 = vor.u32 %v10510_v8, %v9570_v7  ;;  %v9554_v27 = vld [vmem:[%s15650_s1 + $0x1820] sm:$0xf]  ;;  %5107 = vmatmul.bf16.vlgmr.msrb.gmra.mxu0 %v11868_v11  ;;  %v6548_v40 = vld [vmem:[%s15650_s1 + $0xb0] sm:$0xf0]  ;;  %v9784_v43 = vld [vmem:[%s15650_s1 + $0x1a4] sm:$0xf] }
  0xc8   :  { %5155 = vmatpush.bf16.msra.mxu0 %v9587_v0  ;;  %v6676_v47 = vld [vmem:[%s15650_s1 + $0x1b0] sm:$0xf0]  ;;  %5120 = vmatmul.bf16.vlgmr.msrb.gmra.mxu1 %v11881_v16  ;;  %v9816_v48 = vld [vmem:[%s15650_s1 + $0x2a4] sm:$0xf]  ;;  %v9555_v51 = vor.u32 %v10506_v32, %v9554_v27  ;;  %v9538_v52 = vld [vmem:[%s15650_s1 + $0x1800] sm:$0xf]  ;;  %v6551_v53 = vor.u32 %v9752_v34, %v6548_v40 }
  0xc9   :  { %5164 = vmatpush.bf16.msra.mxu1 %v6583_v3  ;;  %5133 = vmatmul.bf16.vlgmr.msrb.gmra.mxu2 %v11879_v15  ;;  %v6804_v50 = vld [vmem:[%s15650_s1 + $0x2b0] sm:$0xf0]  ;;  %v6679_v54 = vor.u32 %v9784_v43, %v6676_v47  ;;  %v10502_v55 = vld [vmem:[%s15650_s1 + $0x180c] sm:$0xf0]  ;;  %v9748_v56 = vld [vmem:[%s15650_s1 + $0x84] sm:$0xf]  ;;  %v4926_v47 = vpop.f32.mrf.mxu2 }
  0xca   :  { %5177 = vmatpush.bf16.msra.mxu2 %v6711_v5  ;;  %5146 = vmatmul.bf16.vlgmr.msrb.gmra.mxu3 %v11889_v19  ;;  %v6532_v57 = vld [vmem:[%s15650_s1 + $0x90] sm:$0xf0]  ;;  %v6807_v58 = vor.u32 %v9816_v48, %v6804_v50  ;;  %v9780_v59 = vld [vmem:[%s15650_s1 + $0x184] sm:$0xf]  ;;  %v9539_v1 = vor.u32 %v10502_v55, %v9538_v52  ;;  %v33_v3 = vld [vmem:[%s15651_s0 + $0x60] sm:$0xf] }
  0xcb   :  { %5190 = vmatpush.bf16.msra.mxu3 %v6839_v10  ;;  %v6660_v60 = vld [vmem:[%s15650_s1 + $0x190] sm:$0xf0]  ;;  %v9812_v61 = vld [vmem:[%s15650_s1 + $0x284] sm:$0xf]  ;;  %v6535_v5 = vor.u32 %v9748_v56, %v6532_v57  ;;  %v4901_v10 = vadd.f32 %v4900_v2, %v11833_v39  ;;  %v865_v27 = vunpack.c.l.b16 %v33_v3 }
  0xcc   :  { %5156 = vmatpush.bf16.msra.mxu0 %v9571_v22  ;;  %v6788_v62 = vld [vmem:[%s15650_s1 + $0x290] sm:$0xf0]  ;;  %v9856_v63 = vld [vmem:[%s15650_s1 + $0x3e4] sm:$0xf]  ;;  %v6663_v7 = vor.u32 %v9780_v59, %v6660_v60  ;;  %v4939_v55 = vpop.f32.mrf.mxu3 }
  0xcd   :  { %5165 = vmatpush.bf16.msra.mxu1 %v6567_v24  ;;  %v6964_v0 = vld [vmem:[%s15650_s1 + $0x3f0] sm:$0xf0]  ;;  %v9744_v8 = vld [vmem:[%s15650_s1 + $0x64] sm:$0xf]  ;;  %v6791_v13 = vor.u32 %v9812_v61, %v6788_v62  ;;  %v4914_v32 = vadd.f32 %v4913_v12, %v4901_v10  ;;  %v11992_v56 = vpack.c.b16 %v865_v27, %v865_v27  ;;  %v4902_v61 = vpop.f32.mrf.mxu0  ;;  %v4915_v2 = vpop.f32.mrf.mxu1 }
  0xce   :  { %5178 = vmatpush.bf16.msra.mxu2 %v6695_v26  ;;  %v6516_v9 = vld [vmem:[%s15650_s1 + $0x70] sm:$0xf0]  ;;  %v6967_v14 = vor.u32 %v9856_v63, %v6964_v0  ;;  %v9776_v17 = vld [vmem:[%s15650_s1 + $0x164] sm:$0xf] }
  0xcf   :  { %5191 = vmatpush.bf16.msra.mxu3 %v6823_v36  ;;  %v6644_v18 = vld [vmem:[%s15650_s1 + $0x170] sm:$0xf0]  ;;  %v9808_v22 = vld [vmem:[%s15650_s1 + $0x264] sm:$0xf]  ;;  %v6519_v34 = vor.u32 %v9744_v8, %v6516_v9 }
  0xd0   :  { %5157 = vmatpush.bf16.msra.mxu0 %v9555_v51  ;;  %v6772_v39 = vld [vmem:[%s15650_s1 + $0x270] sm:$0xf0]  ;;  %v9852_v24 = vld [vmem:[%s15650_s1 + $0x3c4] sm:$0xf]  ;;  %v6647_v36 = vor.u32 %v9776_v17, %v6644_v18 }
  0xd1   :  { %5166 = vmatpush.bf16.msra.mxu1 %v6551_v53  ;;  %v6948_v26 = vld [vmem:[%s15650_s1 + $0x3d0] sm:$0xf0]  ;;  %v9740_v40 = vld [vmem:[%s15650_s1 + $0x44] sm:$0xf]  ;;  %v6775_v48 = vor.u32 %v9808_v22, %v6772_v39 }
  0xd2   :  { %5179 = vmatpush.bf16.msra.mxu2 %v6679_v54  ;;  %v6500_v43 = vld [vmem:[%s15650_s1 + $0x50] sm:$0xf0]  ;;  %v6951_v50 = vor.u32 %v9852_v24, %v6948_v26  ;;  %v9772_v51 = vld [vmem:[%s15650_s1 + $0x144] sm:$0xf]  ;;  %v4927_v54 = vadd.f32 %v4926_v47, %v4914_v32  ;;  %v4928_v24 = vpop.f32.mrf.mxu2 }
  0xd3   :  { %5192 = vmatpush.bf16.msra.mxu3 %v6807_v58  ;;  %v6628_v52 = vld [vmem:[%s15650_s1 + $0x150] sm:$0xf0]  ;;  %v9804_v53 = vld [vmem:[%s15650_s1 + $0x244] sm:$0xf]  ;;  %v6503_v62 = vor.u32 %v9740_v40, %v6500_v43 }
  0xd4   :  { %5158 = vmatpush.bf16.msra.mxu0 %v9539_v1  ;;  %v6756_v57 = vld [vmem:[%s15650_s1 + $0x250] sm:$0xf0]  ;;  %v9848_v58 = vld [vmem:[%s15650_s1 + $0x3a4] sm:$0xf]  ;;  %v12003_v60 = vadd.f32 %v4939_v55, %v4927_v54  ;;  %v6631_v63 = vor.u32 %v9772_v51, %v6628_v52  ;;  %v4941_v40 = vpop.f32.mrf.mxu3 }
  0xd5   :  { %5167 = vmatpush.bf16.msra.mxu1 %v6535_v5  ;;  %v6932_v59 = vld [vmem:[%s15650_s1 + $0x3b0] sm:$0xf0]  ;;  %v9736_v0 = vld [vmem:[%s15650_s1 + $0x24] sm:$0xf]  ;;  %v6759_v3 = vor.u32 %v9804_v53, %v6756_v57 }
  0xd6   :  { %5180 = vmatpush.bf16.msra.mxu2 %v6663_v7  ;;  %v6484_v1 = vld [vmem:[%s15650_s1 + $0x30] sm:$0xf0]  ;;  %v6935_v5 = vor.u32 %v9848_v58, %v6932_v59  ;;  %v9768_v7 = vld [vmem:[%s15650_s1 + $0x124] sm:$0xf] }
  0xd7   :  { %5193 = vmatpush.bf16.msra.mxu3 %v6791_v13  ;;  %v6612_v8 = vld [vmem:[%s15650_s1 + $0x130] sm:$0xf0]  ;;  %v9800_v9 = vld [vmem:[%s15650_s1 + $0x224] sm:$0xf]  ;;  %9600 = vmatmul.msk.bf16.vlgmr.msra.gmra.mxu0 %vm4835_vm0, %v11992_v56 }
  0xd8   :  { %5203 = vmatpush.bf16.msrb.mxu0 %v6967_v14  ;;  %v6740_v10 = vld [vmem:[%s15650_s1 + $0x230] sm:$0xf0]  ;;  %v9844_v12 = vld [vmem:[%s15650_s1 + $0x384] sm:$0xf]  ;;  %v6487_v14 = vor.u32 %v9736_v0, %v6484_v1  ;;  %v6615_v17 = vor.u32 %v9768_v7, %v6612_v8 }
  0xd9   :  { %5168 = vmatpush.bf16.msra.mxu1 %v6519_v34  ;;  %v6916_v13 = vld [vmem:[%s15650_s1 + $0x390] sm:$0xf0]  ;;  %v9732_v18 = vld [vmem:[%s15650_s1 + $0x4] sm:$0xf]  ;;  %v6743_v26 = vor.u32 %v9800_v9, %v6740_v10 }
  0xda   :  { %5181 = vmatpush.bf16.msra.mxu2 %v6647_v36  ;;  %v6468_v22 = vld [vmem:[%s15650_s1 + $0x10] sm:$0xf0]  ;;  %v9764_v39 = vld [vmem:[%s15650_s1 + $0x104] sm:$0xf]  ;;  %v6919_v27 = vor.u32 %v9844_v12, %v6916_v13 }
  0xdb   :  { %5194 = vmatpush.bf16.msra.mxu3 %v6775_v48  ;;  %v6596_v32 = vld [vmem:[%s15650_s1 + $0x110] sm:$0xf0]  ;;  %v9796_v34 = vld [vmem:[%s15650_s1 + $0x204] sm:$0xf]  ;;  %v6471_v53 = vor.u32 %v9732_v18, %v6468_v22 }
  0xdc   :  { %5204 = vmatpush.bf16.msrb.mxu0 %v6951_v50  ;;  %v6724_v36 = vld [vmem:[%s15650_s1 + $0x210] sm:$0xf0]  ;;  %v9840_v43 = vld [vmem:[%s15650_s1 + $0x364] sm:$0xf]  ;;  %v6599_v54 = vor.u32 %v9764_v39, %v6596_v32 }
  0xdd   :  { %5169 = vmatpush.bf16.msra.mxu1 %v6503_v62  ;;  %v6900_v47 = vld [vmem:[%s15650_s1 + $0x370] sm:$0xf0]  ;;  %v9888_v48 = vld [vmem:[%s15650_s1 + $0x4e4] sm:$0xf]  ;;  %v6727_v58 = vor.u32 %v9796_v34, %v6724_v36 }
  0xde   :  { %5182 = vmatpush.bf16.msra.mxu2 %v6631_v63  ;;  %v7092_v50 = vld [vmem:[%s15650_s1 + $0x4f0] sm:$0xf0]  ;;  %v9920_v51 = vld [vmem:[%s15650_s1 + $0x5e4] sm:$0xf]  ;;  %v6903_v59 = vor.u32 %v9840_v43, %v6900_v47 }
  0xdf   :  { %5195 = vmatpush.bf16.msra.mxu3 %v6759_v3  ;;  %v7220_v52 = vld [vmem:[%s15650_s1 + $0x5f0] sm:$0xf0]  ;;  %v9952_v55 = vld [vmem:[%s15650_s1 + $0x6e4] sm:$0xf]  ;;  %v7095_v61 = vor.u32 %v9888_v48, %v7092_v50 }
  0xe0   :  { %5205 = vmatpush.bf16.msrb.mxu0 %v6935_v5  ;;  %v7348_v57 = vld [vmem:[%s15650_s1 + $0x6f0] sm:$0xf0]  ;;  %v7223_v62 = vor.u32 %v9920_v51, %v7220_v52  ;;  %v9836_v63 = vld [vmem:[%s15650_s1 + $0x344] sm:$0xf] }
  0xe1   :  { %5170 = vmatpush.bf16.msra.mxu1 %v6487_v14  ;;  %v6884_v0 = vld [vmem:[%s15650_s1 + $0x350] sm:$0xf0]  ;;  %v9884_v1 = vld [vmem:[%s15650_s1 + $0x4c4] sm:$0xf]  ;;  %v7351_v2 = vor.u32 %v9952_v55, %v7348_v57 }
  0xe2   :  { %5183 = vmatpush.bf16.msra.mxu2 %v6615_v17  ;;  %v7076_v3 = vld [vmem:[%s15650_s1 + $0x4d0] sm:$0xf0]  ;;  %v9916_v5 = vld [vmem:[%s15650_s1 + $0x5c4] sm:$0xf]  ;;  %v6887_v10 = vor.u32 %v9836_v63, %v6884_v0 }
  0xe3   :  { %5196 = vmatpush.bf16.msra.mxu3 %v6743_v26  ;;  %v7204_v7 = vld [vmem:[%s15650_s1 + $0x5d0] sm:$0xf0]  ;;  %v9948_v8 = vld [vmem:[%s15650_s1 + $0x6c4] sm:$0xf]  ;;  %v7079_v12 = vor.u32 %v9884_v1, %v7076_v3 }
  0xe4   :  { %5206 = vmatpush.bf16.msrb.mxu0 %v6919_v27  ;;  %v7332_v9 = vld [vmem:[%s15650_s1 + $0x6d0] sm:$0xf0]  ;;  %v7207_v13 = vor.u32 %v9916_v5, %v7204_v7  ;;  %v9832_v14 = vld [vmem:[%s15650_s1 + $0x324] sm:$0xf]  ;;  %v4952_v55 = vpop.f32.mrf.mxu0 }
  0xe5   :  { %5171 = vmatpush.bf16.msra.mxu1 %v6471_v53  ;;  %v6868_v17 = vld [vmem:[%s15650_s1 + $0x330] sm:$0xf0]  ;;  %v9880_v18 = vld [vmem:[%s15650_s1 + $0x4a4] sm:$0xf]  ;;  %v7335_v22 = vor.u32 %v9948_v8, %v7332_v9  ;;  %v4965_v63 = vpop.f32.mrf.mxu1 }
  0xe6   :  { %5184 = vmatpush.bf16.msra.mxu2 %v6599_v54  ;;  %v7060_v39 = vld [vmem:[%s15650_s1 + $0x4b0] sm:$0xf0]  ;;  %v9912_v24 = vld [vmem:[%s15650_s1 + $0x5a4] sm:$0xf]  ;;  %v6871_v34 = vor.u32 %v9832_v14, %v6868_v17 }
  0xe7   :  { %5197 = vmatpush.bf16.msra.mxu3 %v6727_v58  ;;  %v7188_v26 = vld [vmem:[%s15650_s1 + $0x5b0] sm:$0xf0]  ;;  %v9944_v27 = vld [vmem:[%s15650_s1 + $0x6a4] sm:$0xf]  ;;  %v7063_v40 = vor.u32 %v9880_v18, %v7060_v39 }
  0xe8   :  { %5207 = vmatpush.bf16.msrb.mxu0 %v6903_v59  ;;  %v7316_v32 = vld [vmem:[%s15650_s1 + $0x6b0] sm:$0xf0]  ;;  %5172 = vmatmul.bf16.vlgmr.msra.gmra.mxu1 %v10881_v20  ;;  %v9828_v36 = vld [vmem:[%s15650_s1 + $0x304] sm:$0xf]  ;;  %v7191_v43 = vor.u32 %v9912_v24, %v7188_v26 }
  0xe9   :  { %5216 = vmatpush.bf16.msrb.mxu1 %v7095_v61  ;;  %5185 = vmatmul.bf16.vlgmr.msra.gmra.mxu2 %v10884_v21  ;;  %v6852_v47 = vld [vmem:[%s15650_s1 + $0x310] sm:$0xf0]  ;;  %v9876_v48 = vld [vmem:[%s15650_s1 + $0x484] sm:$0xf]  ;;  %v7319_v51 = vor.u32 %v9944_v27, %v7316_v32  ;;  %v4953_v61 = vadd.f32 %v4952_v55, %v12003_v60  ;;  %v4978_v26 = vpop.f32.mrf.mxu2 }
  0xea   :  { %5229 = vmatpush.bf16.msrb.mxu2 %v7223_v62  ;;  %5198 = vmatmul.bf16.vlgmr.msra.gmra.mxu3 %v10849_v4  ;;  %v7044_v50 = vld [vmem:[%s15650_s1 + $0x490] sm:$0xf0]  ;;  %v9908_v52 = vld [vmem:[%s15650_s1 + $0x584] sm:$0xf]  ;;  %v6855_v62 = vor.u32 %v9828_v36, %v6852_v47 }
  0xeb   :  { %5242 = vmatpush.bf16.msrb.mxu3 %v7351_v2  ;;  %v7172_v53 = vld [vmem:[%s15650_s1 + $0x590] sm:$0xf0]  ;;  %v9940_v54 = vld [vmem:[%s15650_s1 + $0x684] sm:$0xf]  ;;  %v7047_v0 = vor.u32 %v9876_v48, %v7044_v50  ;;  %v4966_v7 = vadd.f32 %v4965_v63, %v4953_v61 }
  0xec   :  { %5208 = vmatpush.bf16.msrb.mxu0 %v6887_v10  ;;  %v7300_v57 = vld [vmem:[%s15650_s1 + $0x690] sm:$0xf0]  ;;  %v9984_v58 = vld [vmem:[%s15650_s1 + $0x7e4] sm:$0xf]  ;;  %v7175_v1 = vor.u32 %v9908_v52, %v7172_v53 }
  0xed   :  { %5217 = vmatpush.bf16.msrb.mxu1 %v7079_v12  ;;  %v7476_v59 = vld [vmem:[%s15650_s1 + $0x7f0] sm:$0xf0]  ;;  %v9872_v2 = vld [vmem:[%s15650_s1 + $0x464] sm:$0xf]  ;;  %v7303_v5 = vor.u32 %v9940_v54, %v7300_v57  ;;  %v4967_v52 = vpop.f32.mrf.mxu1 }
  0xee   :  { %5230 = vmatpush.bf16.msrb.mxu2 %v7207_v13  ;;  %v7028_v3 = vld [vmem:[%s15650_s1 + $0x470] sm:$0xf0]  ;;  %v7479_v8 = vor.u32 %v9984_v58, %v7476_v59  ;;  %v9904_v60 = vld [vmem:[%s15650_s1 + $0x564] sm:$0xf] }
  0xef   :  { %5243 = vmatpush.bf16.msrb.mxu3 %v7335_v22  ;;  %v7156_v9 = vld [vmem:[%s15650_s1 + $0x570] sm:$0xf0]  ;;  %v9936_v10 = vld [vmem:[%s15650_s1 + $0x664] sm:$0xf]  ;;  %v7031_v17 = vor.u32 %v9872_v2, %v7028_v3 }
  0xf0   :  { %5209 = vmatpush.bf16.msrb.mxu0 %v6871_v34  ;;  %v7284_v12 = vld [vmem:[%s15650_s1 + $0x670] sm:$0xf0]  ;;  %v9980_v13 = vld [vmem:[%s15650_s1 + $0x7c4] sm:$0xf]  ;;  %v7159_v18 = vor.u32 %v9904_v60, %v7156_v9 }
  0xf1   :  { %5218 = vmatpush.bf16.msrb.mxu1 %v7063_v40  ;;  %v7460_v14 = vld [vmem:[%s15650_s1 + $0x7d0] sm:$0xf0]  ;;  %v9868_v22 = vld [vmem:[%s15650_s1 + $0x444] sm:$0xf]  ;;  %v7287_v24 = vor.u32 %v9936_v10, %v7284_v12  ;;  %v4979_v40 = vadd.f32 %v4978_v26, %v4966_v7 }
  0xf2   :  { %5231 = vmatpush.bf16.msrb.mxu2 %v7191_v43  ;;  %v7012_v39 = vld [vmem:[%s15650_s1 + $0x450] sm:$0xf0]  ;;  %v7463_v27 = vor.u32 %v9980_v13, %v7460_v14  ;;  %v9900_v32 = vld [vmem:[%s15650_s1 + $0x544] sm:$0xf]  ;;  %v4991_v43 = vpop.f32.mrf.mxu3 }
  0xf3   :  { %5244 = vmatpush.bf16.msrb.mxu3 %v7319_v51  ;;  %v7140_v34 = vld [vmem:[%s15650_s1 + $0x550] sm:$0xf0]  ;;  %v9932_v36 = vld [vmem:[%s15650_s1 + $0x644] sm:$0xf]  ;;  %v4954_v51 = vpop.f32.mrf.mxu0  ;;  %v12204_v53 = vadd.f32 %v4991_v43, %v4979_v40  ;;  %v7015_v54 = vor.u32 %v9868_v22, %v7012_v39 }
  0xf4   :  { %5210 = vmatpush.bf16.msrb.mxu0 %v6855_v62  ;;  %v7268_v47 = vld [vmem:[%s15650_s1 + $0x650] sm:$0xf0]  ;;  %v9976_v48 = vld [vmem:[%s15650_s1 + $0x7a4] sm:$0xf]  ;;  %v7143_v55 = vor.u32 %v9900_v32, %v7140_v34 }
  0xf5   :  { %5219 = vmatpush.bf16.msrb.mxu1 %v7047_v0  ;;  %v7444_v50 = vld [vmem:[%s15650_s1 + $0x7b0] sm:$0xf0]  ;;  %v9864_v57 = vld [vmem:[%s15650_s1 + $0x424] sm:$0xf]  ;;  %v7271_v59 = vor.u32 %v9932_v36, %v7268_v47 }
  0xf6   :  { %5232 = vmatpush.bf16.msrb.mxu2 %v7175_v1  ;;  %v6996_v58 = vld [vmem:[%s15650_s1 + $0x430] sm:$0xf0]  ;;  %v7447_v61 = vor.u32 %v9976_v48, %v7444_v50  ;;  %v9896_v62 = vld [vmem:[%s15650_s1 + $0x524] sm:$0xf] }
  0xf7   :  { %5245 = vmatpush.bf16.msrb.mxu3 %v7303_v5  ;;  %5211 = vmatmul.bf16.vlgmr.msrb.gmra.mxu0 %v10854_v6  ;;  %v7124_v63 = vld [vmem:[%s15650_s1 + $0x530] sm:$0xf0]  ;;  %v9928_v0 = vld [vmem:[%s15650_s1 + $0x624] sm:$0xf]  ;;  %v6999_v5 = vor.u32 %v9864_v57, %v6996_v58 }
  0xf8   :  { %5255 = vmatpush.bf16.msra.mxu0 %v7479_v8  ;;  %v7252_v1 = vld [vmem:[%s15650_s1 + $0x630] sm:$0xf0]  ;;  %v9972_v2 = vld [vmem:[%s15650_s1 + $0x784] sm:$0xf]  ;;  %v7127_v7 = vor.u32 %v9896_v62, %v7124_v63 }
  0xf9   :  { %5220 = vmatpush.bf16.msrb.mxu1 %v7031_v17  ;;  %v7428_v3 = vld [vmem:[%s15650_s1 + $0x790] sm:$0xf0]  ;;  %v9860_v8 = vld [vmem:[%s15650_s1 + $0x404] sm:$0xf]  ;;  %v7255_v10 = vor.u32 %v9928_v0, %v7252_v1 }
  0xfa   :  { %5233 = vmatpush.bf16.msrb.mxu2 %v7159_v18  ;;  %v6980_v60 = vld [vmem:[%s15650_s1 + $0x410] sm:$0xf0]  ;;  %v9892_v9 = vld [vmem:[%s15650_s1 + $0x504] sm:$0xf]  ;;  %v7431_v12 = vor.u32 %v9972_v2, %v7428_v3  ;;  %v4980_v18 = vpop.f32.mrf.mxu2  ;;  %v4993_v26 = vpop.f32.mrf.mxu3 }
  0xfb   :  { %5246 = vmatpush.bf16.msrb.mxu3 %v7287_v24  ;;  %v7108_v13 = vld [vmem:[%s15650_s1 + $0x510] sm:$0xf0]  ;;  %v9924_v14 = vld [vmem:[%s15650_s1 + $0x604] sm:$0xf]  ;;  %v6983_v36 = vor.u32 %v9860_v8, %v6980_v60 }
  0xfc   :  { %5256 = vmatpush.bf16.msra.mxu0 %v7463_v27  ;;  %v7236_v17 = vld [vmem:[%s15650_s1 + $0x610] sm:$0xf0]  ;;  %v9968_v22 = vld [vmem:[%s15650_s1 + $0x764] sm:$0xf]  ;;  %v7111_v40 = vor.u32 %v9892_v9, %v7108_v13 }
  0xfd   :  { %5221 = vmatpush.bf16.msrb.mxu1 %v7015_v54  ;;  %v7412_v39 = vld [vmem:[%s15650_s1 + $0x770] sm:$0xf0]  ;;  %v10016_v24 = vld [vmem:[%s15650_s1 + $0x8e4] sm:$0xf]  ;;  %v7239_v48 = vor.u32 %v9924_v14, %v7236_v17 }
  0xfe   :  { %5234 = vmatpush.bf16.msrb.mxu2 %v7143_v55  ;;  %v7604_v27 = vld [vmem:[%s15650_s1 + $0x8f0] sm:$0xf0]  ;;  %v10048_v32 = vld [vmem:[%s15650_s1 + $0x9e4] sm:$0xf]  ;;  %v7415_v50 = vor.u32 %v9968_v22, %v7412_v39 }
  0xff   :  { %5247 = vmatpush.bf16.msrb.mxu3 %v7271_v59  ;;  %v7732_v34 = vld [vmem:[%s15650_s1 + $0x9f0] sm:$0xf0]  ;;  %v10080_v43 = vld [vmem:[%s15650_s1 + $0xae4] sm:$0xf]  ;;  %v7607_v51 = vor.u32 %v10016_v24, %v7604_v27 }
 0x100   :  { %5257 = vmatpush.bf16.msra.mxu0 %v7447_v61  ;;  %v7860_v47 = vld [vmem:[%s15650_s1 + $0xaf0] sm:$0xf0]  ;;  %v7735_v52 = vor.u32 %v10048_v32, %v7732_v34  ;;  %v9964_v54 = vld [vmem:[%s15650_s1 + $0x744] sm:$0xf] }
 0x101   :  { %5222 = vmatpush.bf16.msrb.mxu1 %v6999_v5  ;;  %v7396_v55 = vld [vmem:[%s15650_s1 + $0x750] sm:$0xf0]  ;;  %v10012_v57 = vld [vmem:[%s15650_s1 + $0x8c4] sm:$0xf]  ;;  %v7863_v58 = vor.u32 %v10080_v43, %v7860_v47 }
 0x102   :  { %5235 = vmatpush.bf16.msrb.mxu2 %v7127_v7  ;;  %v7588_v59 = vld [vmem:[%s15650_s1 + $0x8d0] sm:$0xf0]  ;;  %v10044_v61 = vld [vmem:[%s15650_s1 + $0x9c4] sm:$0xf]  ;;  %v7399_v1 = vor.u32 %v9964_v54, %v7396_v55 }
 0x103   :  { %5248 = vmatpush.bf16.msrb.mxu3 %v7255_v10  ;;  %v7716_v62 = vld [vmem:[%s15650_s1 + $0x9d0] sm:$0xf0]  ;;  %v10076_v63 = vld [vmem:[%s15650_s1 + $0xac4] sm:$0xf]  ;;  %v7591_v2 = vor.u32 %v10012_v57, %v7588_v59  ;;  %v5017_v54 = vpop.f32.mrf.mxu1 }
 0x104   :  { %5258 = vmatpush.bf16.msra.mxu0 %v7431_v12  ;;  %v7844_v0 = vld [vmem:[%s15650_s1 + $0xad0] sm:$0xf0]  ;;  %v7719_v3 = vor.u32 %v10044_v61, %v7716_v62  ;;  %v9960_v5 = vld [vmem:[%s15650_s1 + $0x724] sm:$0xf]  ;;  %v5004_v43 = vpop.f32.mrf.mxu0 }
 0x105   :  { %5223 = vmatpush.bf16.msrb.mxu1 %v6983_v36  ;;  %v7380_v7 = vld [vmem:[%s15650_s1 + $0x730] sm:$0xf0]  ;;  %v10008_v8 = vld [vmem:[%s15650_s1 + $0x8a4] sm:$0xf]  ;;  %v7847_v60 = vor.u32 %v10076_v63, %v7844_v0 }
 0x106   :  { %5236 = vmatpush.bf16.msrb.mxu2 %v7111_v40  ;;  %v7572_v9 = vld [vmem:[%s15650_s1 + $0x8b0] sm:$0xf0]  ;;  %v10040_v10 = vld [vmem:[%s15650_s1 + $0x9a4] sm:$0xf]  ;;  %v7383_v17 = vor.u32 %v9960_v5, %v7380_v7 }
 0x107   :  { %5249 = vmatpush.bf16.msrb.mxu3 %v7239_v48  ;;  %v7700_v12 = vld [vmem:[%s15650_s1 + $0x9b0] sm:$0xf0]  ;;  %v10072_v13 = vld [vmem:[%s15650_s1 + $0xaa4] sm:$0xf]  ;;  %v7575_v22 = vor.u32 %v10008_v8, %v7572_v9 }
 0x108   :  { %5259 = vmatpush.bf16.msra.mxu0 %v7415_v50  ;;  %v7828_v14 = vld [vmem:[%s15650_s1 + $0xab0] sm:$0xf0]  ;;  %5224 = vmatmul.bf16.vlgmr.msrb.gmra.mxu1 %v11040_v41  ;;  %v9956_v18 = vld [vmem:[%s15650_s1 + $0x704] sm:$0xf]  ;;  %v7703_v39 = vor.u32 %v10040_v10, %v7700_v12 }
 0x109   :  { %5268 = vmatpush.bf16.msra.mxu1 %v7607_v51  ;;  %5237 = vmatmul.bf16.vlgmr.msrb.gmra.mxu2 %v11044_v44  ;;  %v7364_v24 = vld [vmem:[%s15650_s1 + $0x710] sm:$0xf0]  ;;  %v10004_v26 = vld [vmem:[%s15650_s1 + $0x884] sm:$0xf]  ;;  %v7831_v32 = vor.u32 %v10072_v13, %v7828_v14  ;;  %v5005_v51 = vadd.f32 %v5004_v43, %v12204_v53 }
 0x10a   :  { %5281 = vmatpush.bf16.msra.mxu2 %v7735_v52  ;;  %5250 = vmatmul.bf16.vlgmr.msrb.gmra.mxu3 %v11032_v38  ;;  %v7556_v27 = vld [vmem:[%s15650_s1 + $0x890] sm:$0xf0]  ;;  %v10036_v34 = vld [vmem:[%s15650_s1 + $0x984] sm:$0xf]  ;;  %v7367_v52 = vor.u32 %v9956_v18, %v7364_v24 }
 0x10b   :  { %5294 = vmatpush.bf16.msra.mxu3 %v7863_v58  ;;  %v7684_v36 = vld [vmem:[%s15650_s1 + $0x990] sm:$0xf0]  ;;  %v10068_v40 = vld [vmem:[%s15650_s1 + $0xa84] sm:$0xf]  ;;  %v7559_v55 = vor.u32 %v10004_v26, %v7556_v27  ;;  %v5018_v62 = vadd.f32 %v5017_v54, %v5005_v51 }
 0x10c   :  { %5260 = vmatpush.bf16.msra.mxu0 %v7399_v1  ;;  %v7812_v47 = vld [vmem:[%s15650_s1 + $0xa90] sm:$0xf0]  ;;  %v10112_v48 = vld [vmem:[%s15650_s1 + $0xbe4] sm:$0xf]  ;;  %v7687_v57 = vor.u32 %v10036_v34, %v7684_v36  ;;  %v5030_v12 = vpop.f32.mrf.mxu2  ;;  %v5019_v34 = vpop.f32.mrf.mxu1 }
 0x10d   :  { %5269 = vmatpush.bf16.msra.mxu1 %v7591_v2  ;;  %v7988_v50 = vld [vmem:[%s15650_s1 + $0xbf0] sm:$0xf0]  ;;  %v10000_v58 = vld [vmem:[%s15650_s1 + $0x864] sm:$0xf]  ;;  %v7815_v61 = vor.u32 %v10068_v40, %v7812_v47 }
 0x10e   :  { %5282 = vmatpush.bf16.msra.mxu2 %v7719_v3  ;;  %v7540_v59 = vld [vmem:[%s15650_s1 + $0x870] sm:$0xf0]  ;;  %v7991_v63 = vor.u32 %v10112_v48, %v7988_v50  ;;  %v10032_v53 = vld [vmem:[%s15650_s1 + $0x964] sm:$0xf] }
 0x10f   :  { %5295 = vmatpush.bf16.msra.mxu3 %v7847_v60  ;;  %v7668_v0 = vld [vmem:[%s15650_s1 + $0x970] sm:$0xf0]  ;;  %v10064_v1 = vld [vmem:[%s15650_s1 + $0xa64] sm:$0xf]  ;;  %v7543_v7 = vor.u32 %v10000_v58, %v7540_v59 }
 0x110   :  { %5261 = vmatpush.bf16.msra.mxu0 %v7383_v17  ;;  %v7796_v2 = vld [vmem:[%s15650_s1 + $0xa70] sm:$0xf0]  ;;  %v10108_v3 = vld [vmem:[%s15650_s1 + $0xbc4] sm:$0xf]  ;;  %v7671_v8 = vor.u32 %v10032_v53, %v7668_v0 }
 0x111   :  { %5270 = vmatpush.bf16.msra.mxu1 %v7575_v22  ;;  %v7972_v5 = vld [vmem:[%s15650_s1 + $0xbd0] sm:$0xf0]  ;;  %v9996_v60 = vld [vmem:[%s15650_s1 + $0x844] sm:$0xf]  ;;  %v7799_v10 = vor.u32 %v10064_v1, %v7796_v2  ;;  %v5031_v22 = vadd.f32 %v5030_v12, %v5018_v62 }
 0x112   :  { %5283 = vmatpush.bf16.msra.mxu2 %v7703_v39  ;;  %v7524_v9 = vld [vmem:[%s15650_s1 + $0x850] sm:$0xf0]  ;;  %v7975_v13 = vor.u32 %v10108_v3, %v7972_v5  ;;  %v10028_v14 = vld [vmem:[%s15650_s1 + $0x944] sm:$0xf]  ;;  %v5043_v39 = vpop.f32.mrf.mxu3 }
 0x113   :  { %5296 = vmatpush.bf16.msra.mxu3 %v7831_v32  ;;  %v7652_v17 = vld [vmem:[%s15650_s1 + $0x950] sm:$0xf0]  ;;  %v10060_v18 = vld [vmem:[%s15650_s1 + $0xa44] sm:$0xf]  ;;  %v5006_v32 = vpop.f32.mrf.mxu0  ;;  %v12403_v36 = vadd.f32 %v5043_v39, %v5031_v22  ;;  %v7527_v40 = vor.u32 %v9996_v60, %v7524_v9 }
 0x114   :  { %5262 = vmatpush.bf16.msra.mxu0 %v7367_v52  ;;  %v7780_v24 = vld [vmem:[%s15650_s1 + $0xa50] sm:$0xf0]  ;;  %v10104_v26 = vld [vmem:[%s15650_s1 + $0xba4] sm:$0xf]  ;;  %v7655_v43 = vor.u32 %v10028_v14, %v7652_v17 }
 0x115   :  { %5271 = vmatpush.bf16.msra.mxu1 %v7559_v55  ;;  %v7956_v27 = vld [vmem:[%s15650_s1 + $0xbb0] sm:$0xf0]  ;;  %v9992_v47 = vld [vmem:[%s15650_s1 + $0x824] sm:$0xf]  ;;  %v7783_v50 = vor.u32 %v10060_v18, %v7780_v24 }
 0x116   :  { %5284 = vmatpush.bf16.msra.mxu2 %v7687_v57  ;;  %v7508_v48 = vld [vmem:[%s15650_s1 + $0x830] sm:$0xf0]  ;;  %v7959_v51 = vor.u32 %v10104_v26, %v7956_v27  ;;  %v10024_v52 = vld [vmem:[%s15650_s1 + $0x924] sm:$0xf] }
 0x117   :  { %5297 = vmatpush.bf16.msra.mxu3 %v7815_v61  ;;  %5263 = vmatmul.bf16.vlgmr.msra.gmra.mxu0 %v11042_v42  ;;  %v7636_v54 = vld [vmem:[%s15650_s1 + $0x930] sm:$0xf0]  ;;  %v10056_v55 = vld [vmem:[%s15650_s1 + $0xa24] sm:$0xf]  ;;  %v7511_v61 = vor.u32 %v9992_v47, %v7508_v48 }
 0x118   :  { %5307 = vmatpush.bf16.msrb.mxu0 %v7991_v63  ;;  %v7764_v57 = vld [vmem:[%s15650_s1 + $0xa30] sm:$0xf0]  ;;  %v10100_v58 = vld [vmem:[%s15650_s1 + $0xb84] sm:$0xf]  ;;  %v7639_v62 = vor.u32 %v10024_v52, %v7636_v54 }
 0x119   :  { %5272 = vmatpush.bf16.msra.mxu1 %v7543_v7  ;;  %v7940_v59 = vld [vmem:[%s15650_s1 + $0xb90] sm:$0xf0]  ;;  %v9988_v63 = vld [vmem:[%s15650_s1 + $0x804] sm:$0xf]  ;;  %v7767_v1 = vor.u32 %v10056_v55, %v7764_v57 }
 0x11a   :  { %5285 = vmatpush.bf16.msra.mxu2 %v7671_v8  ;;  %v7492_v53 = vld [vmem:[%s15650_s1 + $0x810] sm:$0xf0]  ;;  %v10020_v0 = vld [vmem:[%s15650_s1 + $0x904] sm:$0xf]  ;;  %v7943_v2 = vor.u32 %v10100_v58, %v7940_v59  ;;  %v5032_v8 = vpop.f32.mrf.mxu2  ;;  %v5045_v12 = vpop.f32.mrf.mxu3 }
 0x11b   :  { %5298 = vmatpush.bf16.msra.mxu3 %v7799_v10  ;;  %v7620_v3 = vld [vmem:[%s15650_s1 + $0x910] sm:$0xf0]  ;;  %v10052_v5 = vld [vmem:[%s15650_s1 + $0xa04] sm:$0xf]  ;;  %v7495_v18 = vor.u32 %v9988_v63, %v7492_v53 }
 0x11c   :  { %5308 = vmatpush.bf16.msrb.mxu0 %v7975_v13  ;;  %v7748_v7 = vld [vmem:[%s15650_s1 + $0xa10] sm:$0xf0]  ;;  %v10096_v60 = vld [vmem:[%s15650_s1 + $0xb64] sm:$0xf]  ;;  %v7623_v22 = vor.u32 %v10020_v0, %v7620_v3 }
 0x11d   :  { %5273 = vmatpush.bf16.msra.mxu1 %v7527_v40  ;;  %v7924_v9 = vld [vmem:[%s15650_s1 + $0xb70] sm:$0xf0]  ;;  %v10144_v10 = vld [vmem:[%s15650_s1 + $0xce4] sm:$0xf]  ;;  %v7751_v26 = vor.u32 %v10052_v5, %v7748_v7 }
 0x11e   :  { %5286 = vmatpush.bf16.msra.mxu2 %v7655_v43  ;;  %v8116_v13 = vld [vmem:[%s15650_s1 + $0xcf0] sm:$0xf0]  ;;  %v10176_v14 = vld [vmem:[%s15650_s1 + $0xde4] sm:$0xf]  ;;  %v7927_v27 = vor.u32 %v10096_v60, %v7924_v9 }
 0x11f   :  { %5299 = vmatpush.bf16.msra.mxu3 %v7783_v50  ;;  %v8244_v17 = vld [vmem:[%s15650_s1 + $0xdf0] sm:$0xf0]  ;;  %v10208_v39 = vld [vmem:[%s15650_s1 + $0xee4] sm:$0xf]  ;;  %v8119_v32 = vor.u32 %v10144_v10, %v8116_v13 }
 0x120   :  { %5309 = vmatpush.bf16.msrb.mxu0 %v7959_v51  ;;  %v8372_v24 = vld [vmem:[%s15650_s1 + $0xef0] sm:$0xf0]  ;;  %v8247_v34 = vor.u32 %v10176_v14, %v8244_v17  ;;  %v10092_v40 = vld [vmem:[%s15650_s1 + $0xb44] sm:$0xf] }
 0x121   :  { %5274 = vmatpush.bf16.msra.mxu1 %v7511_v61  ;;  %v7908_v43 = vld [vmem:[%s15650_s1 + $0xb50] sm:$0xf0]  ;;  %v10140_v47 = vld [vmem:[%s15650_s1 + $0xcc4] sm:$0xf]  ;;  %v8375_v48 = vor.u32 %v10208_v39, %v8372_v24 }
 0x122   :  { %5287 = vmatpush.bf16.msra.mxu2 %v7639_v62  ;;  %v8100_v50 = vld [vmem:[%s15650_s1 + $0xcd0] sm:$0xf0]  ;;  %v10172_v51 = vld [vmem:[%s15650_s1 + $0xdc4] sm:$0xf]  ;;  %v7911_v57 = vor.u32 %v10092_v40, %v7908_v43 }
 0x123   :  { %5300 = vmatpush.bf16.msra.mxu3 %v7767_v1  ;;  %v8228_v52 = vld [vmem:[%s15650_s1 + $0xdd0] sm:$0xf0]  ;;  %v10204_v54 = vld [vmem:[%s15650_s1 + $0xec4] sm:$0xf]  ;;  %v8103_v58 = vor.u32 %v10140_v47, %v8100_v50 }
 0x124   :  { %5310 = vmatpush.bf16.msrb.mxu0 %v7943_v2  ;;  %v8356_v55 = vld [vmem:[%s15650_s1 + $0xed0] sm:$0xf0]  ;;  %v8231_v59 = vor.u32 %v10172_v51, %v8228_v52  ;;  %v10088_v61 = vld [vmem:[%s15650_s1 + $0xb24] sm:$0xf] }
 0x125   :  { %5275 = vmatpush.bf16.msra.mxu1 %v7495_v18  ;;  %v7892_v62 = vld [vmem:[%s15650_s1 + $0xb30] sm:$0xf0]  ;;  %v10136_v63 = vld [vmem:[%s15650_s1 + $0xca4] sm:$0xf]  ;;  %v8359_v53 = vor.u32 %v10204_v54, %v8356_v55  ;;  %v5056_v39 = vpop.f32.mrf.mxu0 }
 0x126   :  { %5288 = vmatpush.bf16.msra.mxu2 %v7623_v22  ;;  %v8084_v0 = vld [vmem:[%s15650_s1 + $0xcb0] sm:$0xf0]  ;;  %v10168_v1 = vld [vmem:[%s15650_s1 + $0xda4] sm:$0xf]  ;;  %v7895_v7 = vor.u32 %v10088_v61, %v7892_v62  ;;  %v5069_v40 = vpop.f32.mrf.mxu1 }
 0x127   :  { %5301 = vmatpush.bf16.msra.mxu3 %v7751_v26  ;;  %v8212_v2 = vld [vmem:[%s15650_s1 + $0xdb0] sm:$0xf0]  ;;  %v10200_v3 = vld [vmem:[%s15650_s1 + $0xea4] sm:$0xf]  ;;  %v8087_v60 = vor.u32 %v10136_v63, %v8084_v0 }
 0x128   :  { %5311 = vmatpush.bf16.msrb.mxu0 %v7927_v27  ;;  %5276 = vmatmul.bf16.vlgmr.msra.gmra.mxu1 %v11233_v25  ;;  %v8340_v5 = vld [vmem:[%s15650_s1 + $0xeb0] sm:$0xf0]  ;;  %v10084_v8 = vld [vmem:[%s15650_s1 + $0xb04] sm:$0xf]  ;;  %v8215_v9 = vor.u32 %v10168_v1, %v8212_v2 }
 0x129   :  { %5320 = vmatpush.bf16.msrb.mxu1 %v8119_v32  ;;  %5289 = vmatmul.bf16.vlgmr.msra.gmra.mxu2 %v11246_v30  ;;  %v7876_v10 = vld [vmem:[%s15650_s1 + $0xb10] sm:$0xf0]  ;;  %v10132_v12 = vld [vmem:[%s15650_s1 + $0xc84] sm:$0xf]  ;;  %v8343_v14 = vor.u32 %v10200_v3, %v8340_v5  ;;  %v5057_v32 = vadd.f32 %v5056_v39, %v12403_v36 }
 0x12a   :  { %5333 = vmatpush.bf16.msrb.mxu2 %v8247_v34  ;;  %5302 = vmatmul.bf16.vlgmr.msra.gmra.mxu3 %v11244_v29  ;;  %v8068_v13 = vld [vmem:[%s15650_s1 + $0xc90] sm:$0xf0]  ;;  %v10164_v17 = vld [vmem:[%s15650_s1 + $0xd84] sm:$0xf]  ;;  %v7879_v34 = vor.u32 %v10084_v8, %v7876_v10  ;;  %v5082_v2 = vpop.f32.mrf.mxu2 }
 0x12b   :  { %5346 = vmatpush.bf16.msrb.mxu3 %v8375_v48  ;;  %v8196_v18 = vld [vmem:[%s15650_s1 + $0xd90] sm:$0xf0]  ;;  %v10196_v22 = vld [vmem:[%s15650_s1 + $0xe84] sm:$0xf]  ;;  %v8071_v43 = vor.u32 %v10132_v12, %v8068_v13  ;;  %v5070_v52 = vadd.f32 %v5069_v40, %v5057_v32 }
 0x12c   :  { %5312 = vmatpush.bf16.msrb.mxu0 %v7911_v57  ;;  %v8324_v24 = vld [vmem:[%s15650_s1 + $0xe90] sm:$0xf0]  ;;  %v10240_v26 = vld [vmem:[%s15650_s1 + $0xfe4] sm:$0xf]  ;;  %v8199_v47 = vor.u32 %v10164_v17, %v8196_v18 }
 0x12d   :  { %5321 = vmatpush.bf16.msrb.mxu1 %v8103_v58  ;;  %v8500_v27 = vld [vmem:[%s15650_s1 + $0xff0] sm:$0xf0]  ;;  %v10128_v48 = vld [vmem:[%s15650_s1 + $0xc64] sm:$0xf]  ;;  %v8327_v51 = vor.u32 %v10196_v22, %v8324_v24 }
 0x12e   :  { %5334 = vmatpush.bf16.msrb.mxu2 %v8231_v59  ;;  %v8052_v50 = vld [vmem:[%s15650_s1 + $0xc70] sm:$0xf0]  ;;  %v8503_v54 = vor.u32 %v10240_v26, %v8500_v27  ;;  %v10160_v36 = vld [vmem:[%s15650_s1 + $0xd64] sm:$0xf]  ;;  %v5071_v17 = vpop.f32.mrf.mxu1 }
 0x12f   :  { %5347 = vmatpush.bf16.msrb.mxu3 %v8359_v53  ;;  %v8180_v55 = vld [vmem:[%s15650_s1 + $0xd70] sm:$0xf0]  ;;  %v10192_v57 = vld [vmem:[%s15650_s1 + $0xe64] sm:$0xf]  ;;  %v8055_v62 = vor.u32 %v10128_v48, %v8052_v50 }
 0x130   :  { %5313 = vmatpush.bf16.msrb.mxu0 %v7895_v7  ;;  %v8308_v58 = vld [vmem:[%s15650_s1 + $0xe70] sm:$0xf0]  ;;  %v10236_v59 = vld [vmem:[%s15650_s1 + $0xfc4] sm:$0xf]  ;;  %v8183_v63 = vor.u32 %v10160_v36, %v8180_v55 }
 0x131   :  { %5322 = vmatpush.bf16.msrb.mxu1 %v8087_v60  ;;  %v8484_v61 = vld [vmem:[%s15650_s1 + $0xfd0] sm:$0xf0]  ;;  %v10124_v53 = vld [vmem:[%s15650_s1 + $0xc44] sm:$0xf]  ;;  %v8311_v1 = vor.u32 %v10192_v57, %v8308_v58  ;;  %v5083_v60 = vadd.f32 %v5082_v2, %v5070_v52 }
 0x132   :  { %5335 = vmatpush.bf16.msrb.mxu2 %v8215_v9  ;;  %v8036_v0 = vld [vmem:[%s15650_s1 + $0xc50] sm:$0xf0]  ;;  %v8487_v3 = vor.u32 %v10236_v59, %v8484_v61  ;;  %v10156_v5 = vld [vmem:[%s15650_s1 + $0xd44] sm:$0xf]  ;;  %v5095_v9 = vpop.f32.mrf.mxu3 }
 0x133   :  { %5348 = vmatpush.bf16.msrb.mxu3 %v8343_v14  ;;  %v8164_v7 = vld [vmem:[%s15650_s1 + $0xd50] sm:$0xf0]  ;;  %v10188_v8 = vld [vmem:[%s15650_s1 + $0xe44] sm:$0xf]  ;;  %v5058_v14 = vpop.f32.mrf.mxu0  ;;  %v12602_v18 = vadd.f32 %v5095_v9, %v5083_v60  ;;  %v8039_v22 = vor.u32 %v10124_v53, %v8036_v0 }
 0x134   :  { %5314 = vmatpush.bf16.msrb.mxu0 %v7879_v34  ;;  %v8292_v10 = vld [vmem:[%s15650_s1 + $0xe50] sm:$0xf0]  ;;  %v10232_v12 = vld [vmem:[%s15650_s1 + $0xfa4] sm:$0xf]  ;;  %v8167_v39 = vor.u32 %v10156_v5, %v8164_v7 }
 0x135   :  { %5323 = vmatpush.bf16.msrb.mxu1 %v8071_v43  ;;  %v8468_v13 = vld [vmem:[%s15650_s1 + $0xfb0] sm:$0xf0]  ;;  %v10120_v24 = vld [vmem:[%s15650_s1 + $0xc24] sm:$0xf]  ;;  %v8295_v27 = vor.u32 %v10188_v8, %v8292_v10 }
 0x136   :  { %5336 = vmatpush.bf16.msrb.mxu2 %v8199_v47  ;;  %v8020_v26 = vld [vmem:[%s15650_s1 + $0xc30] sm:$0xf0]  ;;  %v8471_v32 = vor.u32 %v10232_v12, %v8468_v13  ;;  %v10152_v34 = vld [vmem:[%s15650_s1 + $0xd24] sm:$0xf] }
 0x137   :  { %5349 = vmatpush.bf16.msrb.mxu3 %v8327_v51  ;;  %5315 = vmatmul.bf16.vlgmr.msrb.gmra.mxu0 %v11254_v33  ;;  %v8148_v40 = vld [vmem:[%s15650_s1 + $0xd30] sm:$0xf0]  ;;  %v10184_v43 = vld [vmem:[%s15650_s1 + $0xe24] sm:$0xf]  ;;  %v8023_v51 = vor.u32 %v10120_v24, %v8020_v26 }
 0x138   :  { %5359 = vmatpush.bf16.msra.mxu0 %v8503_v54  ;;  %v8276_v47 = vld [vmem:[%s15650_s1 + $0xe30] sm:$0xf0]  ;;  %v10228_v48 = vld [vmem:[%s15650_s1 + $0xf84] sm:$0xf]  ;;  %v8151_v52 = vor.u32 %v10152_v34, %v8148_v40 }
 0x139   :  { %5324 = vmatpush.bf16.msrb.mxu1 %v8055_v62  ;;  %v8452_v50 = vld [vmem:[%s15650_s1 + $0xf90] sm:$0xf0]  ;;  %v10116_v54 = vld [vmem:[%s15650_s1 + $0xc04] sm:$0xf]  ;;  %v8279_v57 = vor.u32 %v10184_v43, %v8276_v47 }
 0x13a   :  { %5337 = vmatpush.bf16.msrb.mxu2 %v8183_v63  ;;  %v8004_v36 = vld [vmem:[%s15650_s1 + $0xc10] sm:$0xf0]  ;;  %v10148_v55 = vld [vmem:[%s15650_s1 + $0xd04] sm:$0xf]  ;;  %v8455_v58 = vor.u32 %v10228_v48, %v8452_v50  ;;  %v5084_v63 = vpop.f32.mrf.mxu2  ;;  %v5097_v2 = vpop.f32.mrf.mxu3 }
 0x13b   :  { %5350 = vmatpush.bf16.msrb.mxu3 %v8311_v1  ;;  %v8132_v59 = vld [vmem:[%s15650_s1 + $0xd10] sm:$0xf0]  ;;  %v10180_v61 = vld [vmem:[%s15650_s1 + $0xe04] sm:$0xf]  ;;  %v8007_v8 = vor.u32 %v10116_v54, %v8004_v36 }
 0x13c   :  { %5360 = vmatpush.bf16.msra.mxu0 %v8487_v3  ;;  %v8260_v62 = vld [vmem:[%s15650_s1 + $0xe10] sm:$0xf0]  ;;  %v10224_v53 = vld [vmem:[%s15650_s1 + $0xf64] sm:$0xf]  ;;  %v8135_v60 = vor.u32 %v10148_v55, %v8132_v59 }
 0x13d   :  { %5325 = vmatpush.bf16.msrb.mxu1 %v8039_v22  ;;  %v8436_v0 = vld [vmem:[%s15650_s1 + $0xf70] sm:$0xf0]  ;;  %v10272_v1 = vld [vmem:[%s15650_s1 + $0x10e4] sm:$0xf]  ;;  %v8263_v12 = vor.u32 %v10180_v61, %v8260_v62 }
 0x13e   :  { %5338 = vmatpush.bf16.msrb.mxu2 %v8167_v39  ;;  %v8628_v3 = vld [vmem:[%s15650_s1 + $0x10f0] sm:$0xf0]  ;;  %v10304_v5 = vld [vmem:[%s15650_s1 + $0x11e4] sm:$0xf]  ;;  %v8439_v13 = vor.u32 %v10224_v53, %v8436_v0 }
 0x13f   :  { %5351 = vmatpush.bf16.msrb.mxu3 %v8295_v27  ;;  %v8756_v7 = vld [vmem:[%s15650_s1 + $0x11f0] sm:$0xf0]  ;;  %v10336_v9 = vld [vmem:[%s15650_s1 + $0x12e4] sm:$0xf]  ;;  %v8631_v14 = vor.u32 %v10272_v1, %v8628_v3 }
 0x140   :  { %5361 = vmatpush.bf16.msra.mxu0 %v8471_v32  ;;  %v8884_v10 = vld [vmem:[%s15650_s1 + $0x12f0] sm:$0xf0]  ;;  %v8759_v17 = vor.u32 %v10304_v5, %v8756_v7  ;;  %v10220_v22 = vld [vmem:[%s15650_s1 + $0xf44] sm:$0xf] }
 0x141   :  { %5326 = vmatpush.bf16.msrb.mxu1 %v8023_v51  ;;  %v8420_v39 = vld [vmem:[%s15650_s1 + $0xf50] sm:$0xf0]  ;;  %v10268_v24 = vld [vmem:[%s15650_s1 + $0x10c4] sm:$0xf]  ;;  %v8887_v26 = vor.u32 %v10336_v9, %v8884_v10 }
 0x142   :  { %5339 = vmatpush.bf16.msrb.mxu2 %v8151_v52  ;;  %v8612_v27 = vld [vmem:[%s15650_s1 + $0x10d0] sm:$0xf0]  ;;  %v10300_v32 = vld [vmem:[%s15650_s1 + $0x11c4] sm:$0xf]  ;;  %v8423_v47 = vor.u32 %v10220_v22, %v8420_v39 }
 0x143   :  { %5352 = vmatpush.bf16.msrb.mxu3 %v8279_v57  ;;  %v8740_v34 = vld [vmem:[%s15650_s1 + $0x11d0] sm:$0xf0]  ;;  %v10332_v40 = vld [vmem:[%s15650_s1 + $0x12c4] sm:$0xf]  ;;  %v8615_v48 = vor.u32 %v10268_v24, %v8612_v27 }
 0x144   :  { %5362 = vmatpush.bf16.msra.mxu0 %v8455_v58  ;;  %v8868_v43 = vld [vmem:[%s15650_s1 + $0x12d0] sm:$0xf0]  ;;  %v8743_v50 = vor.u32 %v10300_v32, %v8740_v34  ;;  %v10216_v51 = vld [vmem:[%s15650_s1 + $0xf24] sm:$0xf]  ;;  %v5108_v9 = vpop.f32.mrf.mxu0 }
 0x145   :  { %5327 = vmatpush.bf16.msrb.mxu1 %v8007_v8  ;;  %v8404_v52 = vld [vmem:[%s15650_s1 + $0xf30] sm:$0xf0]  ;;  %v10264_v54 = vld [vmem:[%s15650_s1 + $0x10a4] sm:$0xf]  ;;  %v8871_v36 = vor.u32 %v10332_v40, %v8868_v43  ;;  %v5121_v22 = vpop.f32.mrf.mxu1 }
 0x146   :  { %5340 = vmatpush.bf16.msrb.mxu2 %v8135_v60  ;;  %v8596_v55 = vld [vmem:[%s15650_s1 + $0x10b0] sm:$0xf0]  ;;  %v10296_v57 = vld [vmem:[%s15650_s1 + $0x11a4] sm:$0xf]  ;;  %v8407_v62 = vor.u32 %v10216_v51, %v8404_v52 }
 0x147   :  { %5353 = vmatpush.bf16.msrb.mxu3 %v8263_v12  ;;  %v8724_v58 = vld [vmem:[%s15650_s1 + $0x11b0] sm:$0xf0]  ;;  %v10328_v59 = vld [vmem:[%s15650_s1 + $0x12a4] sm:$0xf]  ;;  %v8599_v53 = vor.u32 %v10264_v54, %v8596_v55 }
 0x148   :  { %5363 = vmatpush.bf16.msra.mxu0 %v8439_v13  ;;  %5328 = vmatmul.bf16.vlgmr.msrb.gmra.mxu1 %v11443_v23  ;;  %v8852_v61 = vld [vmem:[%s15650_s1 + $0x12b0] sm:$0xf0]  ;;  %v10212_v63 = vld [vmem:[%s15650_s1 + $0xf04] sm:$0xf]  ;;  %v8727_v0 = vor.u32 %v10296_v57, %v8724_v58 }
 0x149   :  { %5372 = vmatpush.bf16.msra.mxu1 %v8631_v14  ;;  %5341 = vmatmul.bf16.vlgmr.msrb.gmra.mxu2 %v11456_v31  ;;  %v8388_v1 = vld [vmem:[%s15650_s1 + $0xf10] sm:$0xf0]  ;;  %v10260_v2 = vld [vmem:[%s15650_s1 + $0x1084] sm:$0xf]  ;;  %v8855_v5 = vor.u32 %v10328_v59, %v8852_v61  ;;  %v5109_v14 = vadd.f32 %v5108_v9, %v12602_v18 }
 0x14a   :  { %5385 = vmatpush.bf16.msra.mxu2 %v8759_v17  ;;  %5354 = vmatmul.bf16.vlgmr.msrb.gmra.mxu3 %v11454_v28  ;;  %v8580_v3 = vld [vmem:[%s15650_s1 + $0x1090] sm:$0xf0]  ;;  %v10292_v7 = vld [vmem:[%s15650_s1 + $0x1184] sm:$0xf]  ;;  %v8391_v17 = vor.u32 %v10212_v63, %v8388_v1 }
 0x14b   :  { %5398 = vmatpush.bf16.msra.mxu3 %v8887_v26  ;;  %v8708_v8 = vld [vmem:[%s15650_s1 + $0x1190] sm:$0xf0]  ;;  %v10324_v60 = vld [vmem:[%s15650_s1 + $0x1284] sm:$0xf]  ;;  %v8583_v39 = vor.u32 %v10260_v2, %v8580_v3  ;;  %v5122_v34 = vadd.f32 %v5121_v22, %v5109_v14 }
 0x14c   :  { %5364 = vmatpush.bf16.msra.mxu0 %v8423_v47  ;;  %v8836_v10 = vld [vmem:[%s15650_s1 + $0x1290] sm:$0xf0]  ;;  %v10368_v12 = vld [vmem:[%s15650_s1 + $0x13e4] sm:$0xf]  ;;  %v8711_v24 = vor.u32 %v10292_v7, %v8708_v8  ;;  %v5134_v58 = vpop.f32.mrf.mxu2 }
 0x14d   :  { %5373 = vmatpush.bf16.msra.mxu1 %v8615_v48  ;;  %v9012_v13 = vld [vmem:[%s15650_s1 + $0x13f0] sm:$0xf0]  ;;  %v10256_v26 = vld [vmem:[%s15650_s1 + $0x1064] sm:$0xf]  ;;  %v8839_v32 = vor.u32 %v10324_v60, %v8836_v10  ;;  %v5147_v1 = vpop.f32.mrf.mxu3  ;;  %v5123_v7 = vpop.f32.mrf.mxu1 }
 0x14e   :  { %5386 = vmatpush.bf16.msra.mxu2 %v8743_v50  ;;  %v8564_v27 = vld [vmem:[%s15650_s1 + $0x1070] sm:$0xf0]  ;;  %v9015_v40 = vor.u32 %v10368_v12, %v9012_v13  ;;  %v10288_v18 = vld [vmem:[%s15650_s1 + $0x1164] sm:$0xf] }
 0x14f   :  { %5399 = vmatpush.bf16.msra.mxu3 %v8871_v36  ;;  %v8692_v43 = vld [vmem:[%s15650_s1 + $0x1170] sm:$0xf0]  ;;  %v10320_v47 = vld [vmem:[%s15650_s1 + $0x1264] sm:$0xf]  ;;  %v8567_v52 = vor.u32 %v10256_v26, %v8564_v27 }
 0x150   :  { %5365 = vmatpush.bf16.msra.mxu0 %v8407_v62  ;;  %v8820_v48 = vld [vmem:[%s15650_s1 + $0x1270] sm:$0xf0]  ;;  %v10364_v50 = vld [vmem:[%s15650_s1 + $0x13c4] sm:$0xf]  ;;  %v8695_v54 = vor.u32 %v10288_v18, %v8692_v43 }
 0x151   :  { %5374 = vmatpush.bf16.msra.mxu1 %v8599_v53  ;;  %v8996_v51 = vld [vmem:[%s15650_s1 + $0x13d0] sm:$0xf0]  ;;  %v10252_v36 = vld [vmem:[%s15650_s1 + $0x1044] sm:$0xf]  ;;  %v8823_v57 = vor.u32 %v10320_v47, %v8820_v48  ;;  %v5135_v53 = vadd.f32 %v5134_v58, %v5122_v34 }
 0x152   :  { %5387 = vmatpush.bf16.msra.mxu2 %v8727_v0  ;;  %v8548_v55 = vld [vmem:[%s15650_s1 + $0x1050] sm:$0xf0]  ;;  %v8999_v59 = vor.u32 %v10364_v50, %v8996_v51  ;;  %v10284_v61 = vld [vmem:[%s15650_s1 + $0x1144] sm:$0xf]  ;;  %v5110_v0 = vpop.f32.mrf.mxu0 }
 0x153   :  { %5400 = vmatpush.bf16.msra.mxu3 %v8855_v5  ;;  %v8676_v62 = vld [vmem:[%s15650_s1 + $0x1150] sm:$0xf0]  ;;  %v10316_v63 = vld [vmem:[%s15650_s1 + $0x1244] sm:$0xf]  ;;  %v5148_v8 = vadd.f32 %v5147_v1, %v5135_v53  ;;  %v8551_v60 = vor.u32 %v10252_v36, %v8548_v55 }
 0x154   :  { %5366 = vmatpush.bf16.msra.mxu0 %v8391_v17  ;;  %v8804_v2 = vld [vmem:[%s15650_s1 + $0x1250] sm:$0xf0]  ;;  %v10360_v3 = vld [vmem:[%s15650_s1 + $0x13a4] sm:$0xf]  ;;  %v8679_v9 = vor.u32 %v10284_v61, %v8676_v62 }
 0x155   :  { %5375 = vmatpush.bf16.msra.mxu1 %v8583_v39  ;;  %v8980_v5 = vld [vmem:[%s15650_s1 + $0x13b0] sm:$0xf0]  ;;  %v10248_v10 = vld [vmem:[%s15650_s1 + $0x1024] sm:$0xf]  ;;  %v8807_v13 = vor.u32 %v10316_v63, %v8804_v2  ;;  %v5149_v58 = vpop.f32.mrf.mxu3 }
 0x156   :  { %5388 = vmatpush.bf16.msra.mxu2 %v8711_v24  ;;  %v8532_v12 = vld [vmem:[%s15650_s1 + $0x1030] sm:$0xf0]  ;;  %v8983_v14 = vor.u32 %v10360_v3, %v8980_v5  ;;  %v10280_v17 = vld [vmem:[%s15650_s1 + $0x1124] sm:$0xf] }
 0x157   :  { %5401 = vmatpush.bf16.msra.mxu3 %v8839_v32  ;;  %5367 = vmatmul.bf16.vlgmr.msra.gmra.mxu0 %v11464_v35  ;;  %v8660_v22 = vld [vmem:[%s15650_s1 + $0x1130] sm:$0xf0]  ;;  %v10312_v39 = vld [vmem:[%s15650_s1 + $0x1224] sm:$0xf]  ;;  %v8535_v32 = vor.u32 %v10248_v10, %v8532_v12 }
 0x158   :  { %5411 = vmatpush.bf16.msrb.mxu0 %v9015_v40  ;;  %v8788_v24 = vld [vmem:[%s15650_s1 + $0x1230] sm:$0xf0]  ;;  %v10356_v26 = vld [vmem:[%s15650_s1 + $0x1384] sm:$0xf]  ;;  %v8663_v34 = vor.u32 %v10280_v17, %v8660_v22 }
 0x159   :  { %5376 = vmatpush.bf16.msra.mxu1 %v8567_v52  ;;  %v8964_v27 = vld [vmem:[%s15650_s1 + $0x1390] sm:$0xf0]  ;;  %v10244_v40 = vld [vmem:[%s15650_s1 + $0x1004] sm:$0xf]  ;;  %v8791_v47 = vor.u32 %v10312_v39, %v8788_v24 }
 0x15a   :  { %5389 = vmatpush.bf16.msra.mxu2 %v8695_v54  ;;  %v8516_v18 = vld [vmem:[%s15650_s1 + $0x1010] sm:$0xf0]  ;;  %v10276_v43 = vld [vmem:[%s15650_s1 + $0x1104] sm:$0xf]  ;;  %v8967_v48 = vor.u32 %v10356_v26, %v8964_v27  ;;  %v5136_v54 = vpop.f32.mrf.mxu2 }
 0x15b   :  { %5402 = vmatpush.bf16.msra.mxu3 %v8823_v57  ;;  %v8644_v50 = vld [vmem:[%s15650_s1 + $0x1110] sm:$0xf0]  ;;  %v10308_v51 = vld [vmem:[%s15650_s1 + $0x1204] sm:$0xf]  ;;  %v8519_v0 = vor.u32 %v10244_v40, %v8516_v18 }
 0x15c   :  { %5412 = vmatpush.bf16.msrb.mxu0 %v8999_v59  ;;  %v8772_v52 = vld [vmem:[%s15650_s1 + $0x1210] sm:$0xf0]  ;;  %v10352_v36 = vld [vmem:[%s15650_s1 + $0x1364] sm:$0xf]  ;;  %v5160_v59 = vpop.f32.mrf.mxu0  ;;  %v8647_v1 = vor.u32 %v10276_v43, %v8644_v50 }
 0x15d   :  { %5377 = vmatpush.bf16.msra.mxu1 %v8551_v60  ;;  %v8948_v55 = vld [vmem:[%s15650_s1 + $0x1370] sm:$0xf0]  ;;  %v10400_v57 = vld [vmem:[%s15650_s1 + $0x14e4] sm:$0xf]  ;;  %v12861_v53 = vadd.f32 %v5160_v59, %v5148_v8  ;;  %v8775_v5 = vor.u32 %v10308_v51, %v8772_v52 }
 0x15e   :  { %5390 = vmatpush.bf16.msra.mxu2 %v8679_v9  ;;  %v9140_v61 = vld [vmem:[%s15650_s1 + $0x14f0] sm:$0xf0]  ;;  %v10432_v62 = vld [vmem:[%s15650_s1 + $0x15e4] sm:$0xf]  ;;  %v8951_v7 = vor.u32 %v10352_v36, %v8948_v55 }
 0x15f   :  { %5403 = vmatpush.bf16.msra.mxu3 %v8807_v13  ;;  %v9268_v63 = vld [vmem:[%s15650_s1 + $0x15f0] sm:$0xf0]  ;;  %v10464_v2 = vld [vmem:[%s15650_s1 + $0x16e4] sm:$0xf]  ;;  %v9143_v60 = vor.u32 %v10400_v57, %v9140_v61 }
 0x160   :  { %5413 = vmatpush.bf16.msrb.mxu0 %v8983_v14  ;;  %v9396_v3 = vld [vmem:[%s15650_s1 + $0x16f0] sm:$0xf0]  ;;  %v9271_v9 = vor.u32 %v10432_v62, %v9268_v63  ;;  %v10348_v8 = vld [vmem:[%s15650_s1 + $0x1344] sm:$0xf] }
 0x161   :  { %5378 = vmatpush.bf16.msra.mxu1 %v8535_v32  ;;  %v8932_v10 = vld [vmem:[%s15650_s1 + $0x1350] sm:$0xf0]  ;;  %v10396_v12 = vld [vmem:[%s15650_s1 + $0x14c4] sm:$0xf]  ;;  %v9399_v13 = vor.u32 %v10464_v2, %v9396_v3  ;;  %v10549_v3 = vld [vmem:[%s15652_s2] sm:$0xf] }
 0x162   :  { %5391 = vmatpush.bf16.msra.mxu2 %v8663_v34  ;;  %v9124_v14 = vld [vmem:[%s15650_s1 + $0x14d0] sm:$0xf0]  ;;  %v10428_v17 = vld [vmem:[%s15650_s1 + $0x15c4] sm:$0xf]  ;;  %v8935_v26 = vor.u32 %v10348_v8, %v8932_v10 }
 0x163   :  { %5404 = vmatpush.bf16.msra.mxu3 %v8791_v47  ;;  %v9252_v22 = vld [vmem:[%s15650_s1 + $0x15d0] sm:$0xf0]  ;;  %v10460_v39 = vld [vmem:[%s15650_s1 + $0x16c4] sm:$0xf]  ;;  %v9127_v27 = vor.u32 %v10396_v12, %v9124_v14 }
 0x164   :  { %5414 = vmatpush.bf16.msrb.mxu0 %v8967_v48  ;;  %v9380_v24 = vld [vmem:[%s15650_s1 + $0x16d0] sm:$0xf0]  ;;  %v9255_v32 = vor.u32 %v10428_v17, %v9252_v22  ;;  %v10344_v34 = vld [vmem:[%s15650_s1 + $0x1324] sm:$0xf]  ;;  %v5162_v51 = vpop.f32.mrf.mxu0 }
 0x165   :  { %5379 = vmatpush.bf16.msra.mxu1 %v8519_v0  ;;  %v8916_v40 = vld [vmem:[%s15650_s1 + $0x1330] sm:$0xf0]  ;;  %v10392_v18 = vld [vmem:[%s15650_s1 + $0x14a4] sm:$0xf]  ;;  %v9383_v43 = vor.u32 %v10460_v39, %v9380_v24  ;;  %v5173_v10 = vpop.f32.mrf.mxu1 }
 0x166   :  { %5392 = vmatpush.bf16.msra.mxu2 %v8647_v1  ;;  %v9108_v47 = vld [vmem:[%s15650_s1 + $0x14b0] sm:$0xf0]  ;;  %v10424_v48 = vld [vmem:[%s15650_s1 + $0x15a4] sm:$0xf]  ;;  %v8919_v36 = vor.u32 %v10344_v34, %v8916_v40 }
 0x167   :  { %5405 = vmatpush.bf16.msra.mxu3 %v8775_v5  ;;  %v9236_v50 = vld [vmem:[%s15650_s1 + $0x15b0] sm:$0xf0]  ;;  %v10456_v52 = vld [vmem:[%s15650_s1 + $0x16a4] sm:$0xf]  ;;  %v9111_v58 = vor.u32 %v10392_v18, %v9108_v47  ;;  %v821_v5 = vperm.slane %v10549_v3, 1 }
 0x168   :  { %5415 = vmatpush.bf16.msrb.mxu0 %v8951_v7  ;;  %5380 = vmatmul.bf16.vlgmr.msra.gmra.mxu1 %v11653_v37  ;;  %v9364_v54 = vld [vmem:[%s15650_s1 + $0x16b0] sm:$0xf0]  ;;  %v10340_v55 = vld [vmem:[%s15650_s1 + $0x1304] sm:$0xf]  ;;  %v9239_v59 = vor.u32 %v10424_v48, %v9236_v50 }
 0x169   :  { %5424 = vmatpush.bf16.msrb.mxu1 %v9143_v60  ;;  %5393 = vmatmul.bf16.vlgmr.msra.gmra.mxu2 %v11666_v46  ;;  %v8900_v57 = vld [vmem:[%s15650_s1 + $0x1310] sm:$0xf0]  ;;  %v10388_v61 = vld [vmem:[%s15650_s1 + $0x1484] sm:$0xf]  ;;  %v9367_v0 = vor.u32 %v10456_v52, %v9364_v54 }
 0x16a   :  { %5437 = vmatpush.bf16.msrb.mxu2 %v9271_v9  ;;  %5406 = vmatmul.bf16.vlgmr.msra.gmra.mxu3 %v11664_v45  ;;  %v9092_v62 = vld [vmem:[%s15650_s1 + $0x1490] sm:$0xf0]  ;;  %v10420_v63 = vld [vmem:[%s15650_s1 + $0x1584] sm:$0xf]  ;;  %v8903_v8 = vor.u32 %v10340_v55, %v8900_v57 }
 0x16b   :  { %5450 = vmatpush.bf16.msrb.mxu3 %v9399_v13  ;;  %v9220_v1 = vld [vmem:[%s15650_s1 + $0x1590] sm:$0xf0]  ;;  %v10452_v2 = vld [vmem:[%s15650_s1 + $0x1684] sm:$0xf]  ;;  %v9095_v12 = vor.u32 %v10388_v61, %v9092_v62 }
 0x16c   :  { %5416 = vmatpush.bf16.msrb.mxu0 %v8935_v26  ;;  %v9348_v7 = vld [vmem:[%s15650_s1 + $0x1690] sm:$0xf0]  ;;  %v10496_v60 = vld [vmem:[%s15650_s1 + $0x17e4] sm:$0xf]  ;;  %v9223_v13 = vor.u32 %v10420_v63, %v9220_v1  ;;  %v5186_v51 = vpop.f32.mrf.mxu2 }
 0x16d   :  { %5425 = vmatpush.bf16.msrb.mxu1 %v9127_v27  ;;  %v9524_v9 = vld [vmem:[%s15650_s1 + $0x17f0] sm:$0xf0]  ;;  %v10384_v14 = vld [vmem:[%s15650_s1 + $0x1464] sm:$0xf]  ;;  %v9351_v22 = vor.u32 %v10452_v2, %v9348_v7  ;;  %v5175_v1 = vpop.f32.mrf.mxu1 }
 0x16e   :  { %5438 = vmatpush.bf16.msrb.mxu2 %v9255_v32  ;;  %v9076_v17 = vld [vmem:[%s15650_s1 + $0x1470] sm:$0xf0]  ;;  %v9527_v39 = vor.u32 %v10496_v60, %v9524_v9  ;;  %v10416_v24 = vld [vmem:[%s15650_s1 + $0x1564] sm:$0xf]  ;;  %v5174_v32 = vadd.f32 %v5173_v10, %v821_v5 }
 0x16f   :  { %5451 = vmatpush.bf16.msrb.mxu3 %v9383_v43  ;;  %v9204_v26 = vld [vmem:[%s15650_s1 + $0x1570] sm:$0xf0]  ;;  %v10448_v27 = vld [vmem:[%s15650_s1 + $0x1664] sm:$0xf]  ;;  %v9079_v43 = vor.u32 %v10384_v14, %v9076_v17 }
 0x170   :  { %5417 = vmatpush.bf16.msrb.mxu0 %v8919_v36  ;;  %v9332_v34 = vld [vmem:[%s15650_s1 + $0x1670] sm:$0xf0]  ;;  %v10492_v40 = vld [vmem:[%s15650_s1 + $0x17c4] sm:$0xf]  ;;  %v9207_v47 = vor.u32 %v10416_v24, %v9204_v26 }
 0x171   :  { %5426 = vmatpush.bf16.msrb.mxu1 %v9111_v58  ;;  %v9508_v18 = vld [vmem:[%s15650_s1 + $0x17d0] sm:$0xf0]  ;;  %v10380_v48 = vld [vmem:[%s15650_s1 + $0x1444] sm:$0xf]  ;;  %v9335_v52 = vor.u32 %v10448_v27, %v9332_v34  ;;  %v5187_v58 = vadd.f32 %v5186_v51, %v5174_v32 }
 0x172   :  { %5439 = vmatpush.bf16.msrb.mxu2 %v9239_v59  ;;  %v9060_v50 = vld [vmem:[%s15650_s1 + $0x1450] sm:$0xf0]  ;;  %v9511_v54 = vor.u32 %v10492_v40, %v9508_v18  ;;  %v10412_v36 = vld [vmem:[%s15650_s1 + $0x1544] sm:$0xf]  ;;  %v5199_v59 = vpop.f32.mrf.mxu3 }
 0x173   :  { %5452 = vmatpush.bf16.msrb.mxu3 %v9367_v0  ;;  %v9188_v55 = vld [vmem:[%s15650_s1 + $0x1550] sm:$0xf0]  ;;  %v10444_v57 = vld [vmem:[%s15650_s1 + $0x1644] sm:$0xf]  ;;  %v5200_v0 = vadd.f32 %v5199_v59, %v5187_v58  ;;  %v9063_v2 = vor.u32 %v10380_v48, %v9060_v50  ;;  %v9763_v58 = vld [vmem:[%s15650_s1 + $0xf4] sm:$0xf0] }
 0x174   :  { %5418 = vmatpush.bf16.msrb.mxu0 %v8903_v8  ;;  %v9316_v61 = vld [vmem:[%s15650_s1 + $0x1650] sm:$0xf0]  ;;  %v10488_v62 = vld [vmem:[%s15650_s1 + $0x17a4] sm:$0xf]  ;;  %v9191_v3 = vor.u32 %v10412_v36, %v9188_v55  ;;  %v5188_v40 = vpop.f32.mrf.mxu2 }
 0x175   :  { %5427 = vmatpush.bf16.msrb.mxu1 %v9095_v12  ;;  %v9492_v63 = vld [vmem:[%s15650_s1 + $0x17b0] sm:$0xf0]  ;;  %v10376_v5 = vld [vmem:[%s15650_s1 + $0x1424] sm:$0xf]  ;;  %v9319_v60 = vor.u32 %v10444_v57, %v9316_v61  ;;  %v6586_v57 = vld [vmem:[%s15650_s1 + $0xe8] sm:$0xf] }
 0x176   :  { %5440 = vmatpush.bf16.msrb.mxu2 %v9223_v13  ;;  %v9044_v7 = vld [vmem:[%s15650_s1 + $0x1430] sm:$0xf0]  ;;  %v9495_v9 = vor.u32 %v10488_v62, %v9492_v63  ;;  %v10408_v8 = vld [vmem:[%s15650_s1 + $0x1524] sm:$0xf]  ;;  %v6714_v62 = vld [vmem:[%s15650_s1 + $0x1e8] sm:$0xf] }
 0x177   :  { %5453 = vmatpush.bf16.msrb.mxu3 %v9351_v22  ;;  %5419 = vmatmul.bf16.vlgmr.msrb.gmra.mxu0 %v11674_v49  ;;  %v9172_v10 = vld [vmem:[%s15650_s1 + $0x1530] sm:$0xf0]  ;;  %v10440_v12 = vld [vmem:[%s15650_s1 + $0x1624] sm:$0xf]  ;;  %v5212_v22 = vpop.f32.mrf.mxu0  ;;  %v9795_v63 = vld [vmem:[%s15650_s1 + $0x1f4] sm:$0xf0] }
 0x178   :  { %5463 = vmatpush.bf16.msra.mxu0 %v9527_v39  ;;  %v9300_v13 = vld [vmem:[%s15650_s1 + $0x1630] sm:$0xf0]  ;;  %v10484_v14 = vld [vmem:[%s15650_s1 + $0x1784] sm:$0xf]  ;;  %v9047_v39 = vor.u32 %v10376_v5, %v9044_v7  ;;  %v9175_v24 = vor.u32 %v10408_v8, %v9172_v10  ;;  %v13035_v34 = vadd.f32 %v5212_v22, %v5200_v0  ;;  %v6570_v10 = vld [vmem:[%s15650_s1 + $0xc8] sm:$0xf] }
 0x179   :  { %5428 = vmatpush.bf16.msrb.mxu1 %v9079_v43  ;;  %v9476_v17 = vld [vmem:[%s15650_s1 + $0x1790] sm:$0xf0]  ;;  %v10372_v26 = vld [vmem:[%s15650_s1 + $0x1404] sm:$0xf]  ;;  %v9303_v18 = vor.u32 %v10440_v12, %v9300_v13  ;;  %v9759_v12 = vld [vmem:[%s15650_s1 + $0xd4] sm:$0xf0] }
 0x17a   :  { %5441 = vmatpush.bf16.msrb.mxu2 %v9207_v47  ;;  %v9028_v27 = vld [vmem:[%s15650_s1 + $0x1410] sm:$0xf0]  ;;  %v10404_v32 = vld [vmem:[%s15650_s1 + $0x1504] sm:$0xf]  ;;  %v9479_v43 = vor.u32 %v10484_v14, %v9476_v17  ;;  %v5201_v51 = vpop.f32.mrf.mxu3  ;;  %v6698_v14 = vld [vmem:[%s15650_s1 + $0x1c8] sm:$0xf] }
 0x17b   :  { %5454 = vmatpush.bf16.msrb.mxu3 %v9335_v52  ;;  %v9156_v47 = vld [vmem:[%s15650_s1 + $0x1510] sm:$0xf0]  ;;  %v10436_v48 = vld [vmem:[%s15650_s1 + $0x1604] sm:$0xf]  ;;  %v9031_v59 = vor.u32 %v10372_v26, %v9028_v27  ;;  %v9791_v17 = vld [vmem:[%s15650_s1 + $0x1d4] sm:$0xf0] }
 0x17c   :  { %5464 = vmatpush.bf16.msra.mxu0 %v9511_v54  ;;  %v9284_v50 = vld [vmem:[%s15650_s1 + $0x1610] sm:$0xf0]  ;;  %v10480_v52 = vld [vmem:[%s15650_s1 + $0x1764] sm:$0xf]  ;;  %v9159_v61 = vor.u32 %v10404_v32, %v9156_v47  ;;  %v6699_v40 = vor.u32 %v9791_v17, %v6698_v14  ;;  %v9755_v47 = vld [vmem:[%s15650_s1 + $0xb4] sm:$0xf0] }
 0x17d   :  { %5429 = vmatpush.bf16.msrb.mxu1 %v9063_v2  ;;  %v9460_v54 = vld [vmem:[%s15650_s1 + $0x1770] sm:$0xf0]  ;;  %v10512_v36 = vld [vmem:[%s15650_s1 + $0x1864] sm:$0xf]  ;;  %v9287_v0 = vor.u32 %v10436_v48, %v9284_v50  ;;  %v6682_v48 = vld [vmem:[%s15650_s1 + $0x1a8] sm:$0xf] }
 0x17e   :  { %5442 = vmatpush.bf16.msrb.mxu2 %v9191_v3  ;;  %v9588_v55 = vld [vmem:[%s15650_s1 + $0x1870] sm:$0xf0]  ;;  %v9463_v1 = vor.u32 %v10480_v52, %v9460_v54  ;;  %v6587_v3 = vor.u32 %v9763_v58, %v6586_v57  ;;  %v10476_v5 = vld [vmem:[%s15650_s1 + $0x1744] sm:$0xf]  ;;  %v9787_v50 = vld [vmem:[%s15650_s1 + $0x1b4] sm:$0xf0] }
 0x17f   :  { %5455 = vmatpush.bf16.msrb.mxu3 %v9319_v60  ;;  %v9591_v2 = vor.u32 %v10512_v36, %v9588_v55  ;;  %v9444_v7 = vld [vmem:[%s15650_s1 + $0x1750] sm:$0xf0]  ;;  %v10508_v60 = vld [vmem:[%s15650_s1 + $0x1844] sm:$0xf]  ;;  %v5214_v13 = vpop.f32.mrf.mxu0  ;;  %v6522_v14 = vld [vmem:[%s15650_s1 + $0x68] sm:$0xf] }
 0x180   :  { %5465 = vmatpush.bf16.msra.mxu0 %v9495_v9  ;;  %v6715_v9 = vor.u32 %v9795_v63, %v6714_v62  ;;  %v9572_v8 = vld [vmem:[%s15650_s1 + $0x1850] sm:$0xf0]  ;;  %v9447_v22 = vor.u32 %v10476_v5, %v9444_v7  ;;  %v10472_v26 = vld [vmem:[%s15650_s1 + $0x1724] sm:$0xf]  ;;  %v9751_v62 = vld [vmem:[%s15650_s1 + $0x94] sm:$0xf0] }
 0x181   :  { %5430 = vmatpush.bf16.msrb.mxu1 %v9047_v39  ;;  %v9575_v39 = vor.u32 %v10508_v60, %v9572_v8  ;;  %v9428_v27 = vld [vmem:[%s15650_s1 + $0x1730] sm:$0xf0]  ;;  %v10504_v32 = vld [vmem:[%s15650_s1 + $0x1824] sm:$0xf]  ;;  %v6666_v63 = vld [vmem:[%s15650_s1 + $0x188] sm:$0xf] }
 0x182   :  { %5443 = vmatpush.bf16.msrb.mxu2 %v9175_v24  ;;  %v6571_v24 = vor.u32 %v9759_v12, %v6570_v10  ;;  %v9431_v51 = vor.u32 %v10472_v26, %v9428_v27  ;;  %v10468_v52 = vld [vmem:[%s15650_s1 + $0x1704] sm:$0xf]  ;;  %v9412_v55 = vld [vmem:[%s15650_s1 + $0x1710] sm:$0xf0]  ;;  %v6970_v5 = vld [vmem:[%s15650_s1 + $0x3e8] sm:$0xf] }
 0x183   :  { %5456 = vmatpush.bf16.msrb.mxu3 %v9303_v18  ;;  %v9556_v18 = vld [vmem:[%s15650_s1 + $0x1830] sm:$0xf0]  ;;  %v10500_v57 = vld [vmem:[%s15650_s1 + $0x1804] sm:$0xf]  ;;  %v9859_v7 = vld [vmem:[%s15650_s1 + $0x3f4] sm:$0xf0] }
 0x184   :  { %5466 = vmatpush.bf16.msra.mxu0 %v9479_v43  ;;  %v6554_v43 = vld [vmem:[%s15650_s1 + $0xa8] sm:$0xf]  ;;  %v9559_v54 = vor.u32 %v10504_v32, %v9556_v18  ;;  %v9540_v58 = vld [vmem:[%s15650_s1 + $0x1810] sm:$0xf0]  ;;  %v9747_v17 = vld [vmem:[%s15650_s1 + $0x74] sm:$0xf0] }
 0x185   :  { %5431 = vmatpush.bf16.msrb.mxu1 %v9031_v59  ;;  %v6555_v36 = vor.u32 %v9755_v47, %v6554_v43  ;;  %v6683_v59 = vor.u32 %v9787_v50, %v6682_v48  ;;  %v5225_v60 = vpop.f32.mrf.mxu1  ;;  %v9823_v26 = vld [vmem:[%s15650_s1 + $0x2d4] sm:$0xf0]  ;;  %v6954_v27 = vld [vmem:[%s15650_s1 + $0x3c8] sm:$0xf] }
 0x186   :  { %5444 = vmatpush.bf16.msrb.mxu2 %v9159_v61  ;;  %v6538_v61 = vld [vmem:[%s15650_s1 + $0x88] sm:$0xf]  ;;  %v5226_v10 = vadd.f32 %v5225_v60, %v13035_v34  ;;  %v9779_v34 = vld [vmem:[%s15650_s1 + $0x174] sm:$0xf0] }
 0x187   :  { %5457 = vmatpush.bf16.msrb.mxu3 %v9287_v0  ;;  %v9783_v0 = vld [vmem:[%s15650_s1 + $0x194] sm:$0xf0]  ;;  %v6539_v8 = vor.u32 %v9751_v62, %v6538_v61  ;;  %v6506_v48 = vld [vmem:[%s15650_s1 + $0x48] sm:$0xf] }
 0x188   :  { %5467 = vmatpush.bf16.msra.mxu0 %v9463_v1  ;;  %5432 = vmatmul.bf16.vlgmr.msrb.gmra.mxu1 %v11868_v11  ;;  %v6842_v1 = vld [vmem:[%s15650_s1 + $0x2e8] sm:$0xf]  ;;  %v6667_v12 = vor.u32 %v9783_v0, %v6666_v63  ;;  %v9855_v32 = vld [vmem:[%s15650_s1 + $0x3d4] sm:$0xf0] }
 0x189   :  { %5480 = vmatpush.bf16.msra.mxu1 %v9591_v2  ;;  %5445 = vmatmul.bf16.vlgmr.msrb.gmra.mxu2 %v11881_v16  ;;  %v9827_v2 = vld [vmem:[%s15650_s1 + $0x2f4] sm:$0xf0] }
 0x18a   :  { %5489 = vmatpush.bf16.msra.mxu2 %v6587_v3  ;;  %5458 = vmatmul.bf16.vlgmr.msrb.gmra.mxu3 %v11879_v15  ;;  %v9415_v3 = vor.u32 %v10468_v52, %v9412_v55  ;;  %v6843_v13 = vor.u32 %v9827_v2, %v6842_v1  ;;  %v9743_v50 = vld [vmem:[%s15650_s1 + $0x54] sm:$0xf0] }
 0x18b   :  { %5502 = vmatpush.bf16.msra.mxu3 %v6715_v9  ;;  %v9543_v9 = vor.u32 %v10500_v57, %v9540_v58  ;;  %v9775_v55 = vld [vmem:[%s15650_s1 + $0x154] sm:$0xf0]  ;;  %v6810_v57 = vld [vmem:[%s15650_s1 + $0x2a8] sm:$0xf]  ;;  %v6507_v0 = vor.u32 %v9743_v50, %v6506_v48 }
 0x18c   :  { %5468 = vmatpush.bf16.msra.mxu0 %v9447_v22  ;;  %v6650_v22 = vld [vmem:[%s15650_s1 + $0x168] sm:$0xf]  ;;  %v5238_v18 = vpop.f32.mrf.mxu2  ;;  %v9819_v58 = vld [vmem:[%s15650_s1 + $0x2b4] sm:$0xf0] }
 0x18d   :  { %5481 = vmatpush.bf16.msra.mxu1 %v9575_v39  ;;  %v6971_v39 = vor.u32 %v9859_v7, %v6970_v5  ;;  %v6651_v43 = vor.u32 %v9779_v34, %v6650_v22  ;;  %v5239_v52 = vadd.f32 %v5238_v18, %v5226_v10  ;;  %v9851_v61 = vld [vmem:[%s15650_s1 + $0x3b4] sm:$0xf0]  ;;  %v5227_v63 = vpop.f32.mrf.mxu1  ;;  %v6811_v2 = vor.u32 %v9819_v58, %v6810_v57  ;;  %v6618_v7 = vld [vmem:[%s15650_s1 + $0x128] sm:$0xf] }
 0x18e   :  { %5490 = vmatpush.bf16.msra.mxu2 %v6571_v24  ;;  %v6826_v24 = vld [vmem:[%s15650_s1 + $0x2c8] sm:$0xf]  ;;  %v9739_v5 = vld [vmem:[%s15650_s1 + $0x34] sm:$0xf0] }
 0x18f   :  { %5503 = vmatpush.bf16.msra.mxu3 %v6699_v40  ;;  %v6523_v40 = vor.u32 %v9747_v17, %v6522_v14  ;;  %v6827_v47 = vor.u32 %v9823_v26, %v6826_v24  ;;  %v9815_v10 = vld [vmem:[%s15650_s1 + $0x294] sm:$0xf0]  ;;  %v6906_v50 = vld [vmem:[%s15650_s1 + $0x368] sm:$0xf] }
 0x190   :  { %5469 = vmatpush.bf16.msra.mxu0 %v9431_v51  ;;  %v6634_v51 = vld [vmem:[%s15650_s1 + $0x148] sm:$0xf]  ;;  %v9847_v14 = vld [vmem:[%s15650_s1 + $0x394] sm:$0xf0] }
 0x191   :  { %5482 = vmatpush.bf16.msra.mxu1 %v9559_v54  ;;  %v5251_v54 = vpop.f32.mrf.mxu3  ;;  %v6635_v1 = vor.u32 %v9775_v55, %v6634_v51  ;;  %v9811_v48 = vld [vmem:[%s15650_s1 + $0x274] sm:$0xf0]  ;;  %v7226_v55 = vld [vmem:[%s15650_s1 + $0x5e8] sm:$0xf] }
 0x192   :  { %5491 = vmatpush.bf16.msra.mxu2 %v6555_v36  ;;  %v6955_v36 = vor.u32 %v9855_v32, %v6954_v27  ;;  %v5252_v62 = vadd.f32 %v5251_v54, %v5239_v52  ;;  %v9735_v27 = vld [vmem:[%s15650_s1 + $0x14] sm:$0xf0]  ;;  %v6602_v32 = vld [vmem:[%s15650_s1 + $0x108] sm:$0xf] }
 0x193   :  { %5504 = vmatpush.bf16.msra.mxu3 %v6683_v59  ;;  %v6938_v59 = vld [vmem:[%s15650_s1 + $0x3a8] sm:$0xf]  ;;  %v9843_v51 = vld [vmem:[%s15650_s1 + $0x374] sm:$0xf0] }
 0x194   :  { %5470 = vmatpush.bf16.msra.mxu0 %v9415_v3  ;;  %v6490_v3 = vld [vmem:[%s15650_s1 + $0x28] sm:$0xf]  ;;  %v6939_v60 = vor.u32 %v9851_v61, %v6938_v59  ;;  %v5240_v34 = vpop.f32.mrf.mxu2  ;;  %v9891_v54 = vld [vmem:[%s15650_s1 + $0x4f4] sm:$0xf0]  ;;  %v6907_v61 = vor.u32 %v9843_v51, %v6906_v50 }
 0x195   :  { %5483 = vmatpush.bf16.msra.mxu1 %v9543_v9  ;;  %v9771_v9 = vld [vmem:[%s15650_s1 + $0x134] sm:$0xf0]  ;;  %v6491_v17 = vor.u32 %v9739_v5, %v6490_v3  ;;  %v7098_v52 = vld [vmem:[%s15650_s1 + $0x4e8] sm:$0xf] }
 0x196   :  { %5492 = vmatpush.bf16.msra.mxu2 %v6539_v8  ;;  %v6794_v8 = vld [vmem:[%s15650_s1 + $0x288] sm:$0xf]  ;;  %v6619_v24 = vor.u32 %v9771_v9, %v6618_v7  ;;  %v9923_v57 = vld [vmem:[%s15650_s1 + $0x5f4] sm:$0xf0] }
 0x197   :  { %5505 = vmatpush.bf16.msra.mxu3 %v6667_v12  ;;  %5471 = vmatmul.bf16.vlgmr.msra.gmra.mxu0 %v11889_v19  ;;  %v5264_v12 = vpop.f32.mrf.mxu0  ;;  %v6795_v26 = vor.u32 %v9815_v10, %v6794_v8  ;;  %v6762_v63 = vld [vmem:[%s15650_s1 + $0x248] sm:$0xf]  ;;  %v9839_v3 = vld [vmem:[%s15650_s1 + $0x354] sm:$0xf0] }
 0x198   :  { %5515 = vmatpush.bf16.msrb.mxu0 %v6843_v13  ;;  %9601 = vmatmul.msk.bf16.vlgmr.msra.gmra.mxu1 %vm4835_vm0, %v11992_v56  ;;  %v6922_v13 = vld [vmem:[%s15650_s1 + $0x388] sm:$0xf]  ;;  %v13233_v22 = vadd.f32 %v5264_v12, %v5252_v62  ;;  %v7099_v62 = vor.u32 %v9891_v54, %v7098_v52  ;;  %v9887_v7 = vld [vmem:[%s15650_s1 + $0x4d4] sm:$0xf0] }
 0x199   :  { %5528 = vmatpush.bf16.msrb.mxu1 %v6971_v39  ;;  %v6474_v39 = vld [vmem:[%s15650_s1 + $0x8] sm:$0xf]  ;;  %v5253_v18 = vpop.f32.mrf.mxu3  ;;  %v9919_v8 = vld [vmem:[%s15650_s1 + $0x5d4] sm:$0xf0] }
 0x19a   :  { %5493 = vmatpush.bf16.msra.mxu2 %v6523_v40  ;;  %v9767_v40 = vld [vmem:[%s15650_s1 + $0x114] sm:$0xf0]  ;;  %v7082_v5 = vld [vmem:[%s15650_s1 + $0x4c8] sm:$0xf] }
 0x19b   :  { %5506 = vmatpush.bf16.msra.mxu3 %v6651_v43  ;;  %v6923_v43 = vor.u32 %v9847_v14, %v6922_v13  ;;  %v6603_v58 = vor.u32 %v9767_v40, %v6602_v32  ;;  %v7210_v9 = vld [vmem:[%s15650_s1 + $0x5c8] sm:$0xf]  ;;  %v7083_v13 = vor.u32 %v9887_v7, %v7082_v5  ;;  %v9915_v40 = vld [vmem:[%s15650_s1 + $0x5b4] sm:$0xf0] }
 0x19c   :  { %5516 = vmatpush.bf16.msrb.mxu0 %v6827_v47  ;;  %v6778_v47 = vld [vmem:[%s15650_s1 + $0x268] sm:$0xf]  ;;  %v7211_v34 = vor.u32 %v9919_v8, %v7210_v9  ;;  %v9799_v50 = vld [vmem:[%s15650_s1 + $0x214] sm:$0xf0] }
 0x19d   :  { %5529 = vmatpush.bf16.msrb.mxu1 %v6955_v36  ;;  %v6475_v36 = vor.u32 %v9735_v27, %v6474_v39  ;;  %v6779_v59 = vor.u32 %v9811_v48, %v6778_v47  ;;  %v6746_v14 = vld [vmem:[%s15650_s1 + $0x228] sm:$0xf]  ;;  %v9883_v27 = vld [vmem:[%s15650_s1 + $0x4b4] sm:$0xf0] }
 0x19e   :  { %5494 = vmatpush.bf16.msra.mxu2 %v6507_v0  ;;  %v9807_v0 = vld [vmem:[%s15650_s1 + $0x254] sm:$0xf0]  ;;  %v6874_v39 = vld [vmem:[%s15650_s1 + $0x328] sm:$0xf] }
 0x19f   :  { %5507 = vmatpush.bf16.msra.mxu3 %v6635_v1  ;;  %v6890_v1 = vld [vmem:[%s15650_s1 + $0x348] sm:$0xf]  ;;  %v6763_v10 = vor.u32 %v9807_v0, %v6762_v63  ;;  %v9831_v52 = vld [vmem:[%s15650_s1 + $0x314] sm:$0xf0] }
 0x1a0   :  { %5517 = vmatpush.bf16.msrb.mxu0 %v6811_v2  ;;  %v7227_v2 = vor.u32 %v9923_v57, %v7226_v55  ;;  %v6891_v12 = vor.u32 %v9839_v3, %v6890_v1  ;;  %v7194_v32 = vld [vmem:[%s15650_s1 + $0x5a8] sm:$0xf]  ;;  %v9879_v55 = vld [vmem:[%s15650_s1 + $0x494] sm:$0xf0] }
 0x1a1   :  { %5530 = vmatpush.bf16.msrb.mxu1 %v6939_v60  ;;  %v5266_v60 = vpop.f32.mrf.mxu0  ;;  %v6858_v51 = vld [vmem:[%s15650_s1 + $0x308] sm:$0xf]  ;;  %v7195_v54 = vor.u32 %v9915_v40, %v7194_v32  ;;  %v9875_v9 = vld [vmem:[%s15650_s1 + $0x474] sm:$0xf0] }
 0x1a2   :  { %5495 = vmatpush.bf16.msra.mxu2 %v6491_v17  ;;  %v9803_v17 = vld [vmem:[%s15650_s1 + $0x234] sm:$0xf0]  ;;  %v7178_v57 = vld [vmem:[%s15650_s1 + $0x588] sm:$0xf]  ;;  %v6859_v3 = vor.u32 %v9831_v52, %v6858_v51 }
 0x1a3   :  { %5508 = vmatpush.bf16.msra.mxu3 %v6619_v24  ;;  %v9835_v24 = vld [vmem:[%s15650_s1 + $0x334] sm:$0xf0]  ;;  %v6747_v18 = vor.u32 %v9803_v17, %v6746_v14  ;;  %v7482_v1 = vld [vmem:[%s15650_s1 + $0x7e8] sm:$0xf] }
 0x1a4   :  { %5518 = vmatpush.bf16.msrb.mxu0 %v6795_v26  ;;  %v7066_v26 = vld [vmem:[%s15650_s1 + $0x4a8] sm:$0xf]  ;;  %v6875_v47 = vor.u32 %v9835_v24, %v6874_v39  ;;  %v9951_v14 = vld [vmem:[%s15650_s1 + $0x6d4] sm:$0xf0] }
 0x1a5   :  { %5531 = vmatpush.bf16.msrb.mxu1 %v6923_v43  ;;  %v6730_v43 = vld [vmem:[%s15650_s1 + $0x208] sm:$0xf]  ;;  %v7067_v48 = vor.u32 %v9883_v27, %v7066_v26  ;;  %v9983_v39 = vld [vmem:[%s15650_s1 + $0x7d4] sm:$0xf0] }
 0x1a6   :  { %5496 = vmatpush.bf16.msra.mxu2 %v6475_v36  ;;  %v7050_v36 = vld [vmem:[%s15650_s1 + $0x488] sm:$0xf]  ;;  %v6731_v0 = vor.u32 %v9799_v50, %v6730_v43  ;;  %v9903_v50 = vld [vmem:[%s15650_s1 + $0x554] sm:$0xf0] }
 0x1a7   :  { %5509 = vmatpush.bf16.msra.mxu3 %v6603_v58  ;;  %v5277_v58 = vpop.f32.mrf.mxu1  ;;  %v7051_v5 = vor.u32 %v9879_v55, %v7050_v36  ;;  %v7162_v8 = vld [vmem:[%s15650_s1 + $0x568] sm:$0xf]  ;;  %v9947_v52 = vld [vmem:[%s15650_s1 + $0x6b4] sm:$0xf0] }
 0x1a8   :  { %5519 = vmatpush.bf16.msrb.mxu0 %v6779_v59  ;;  %v9911_v59 = vld [vmem:[%s15650_s1 + $0x594] sm:$0xf0]  ;;  %v5278_v63 = vadd.f32 %v5277_v58, %v13233_v22  ;;  %v7034_v22 = vld [vmem:[%s15650_s1 + $0x468] sm:$0xf] }
 0x1a9   :  { %5532 = vmatpush.bf16.msrb.mxu1 %v6907_v61  ;;  %5497 = vmatmul.bf16.vlgmr.msra.gmra.mxu2 %v10881_v20  ;;  %v7354_v61 = vld [vmem:[%s15650_s1 + $0x6e8] sm:$0xf]  ;;  %v7179_v7 = vor.u32 %v9911_v59, %v7178_v57  ;;  %v9979_v55 = vld [vmem:[%s15650_s1 + $0x7b4] sm:$0xf0] }
 0x1aa   :  { %5541 = vmatpush.bf16.msrb.mxu2 %v7099_v62  ;;  %5510 = vmatmul.bf16.vlgmr.msra.gmra.mxu3 %v10884_v21  ;;  %v9955_v62 = vld [vmem:[%s15650_s1 + $0x6f4] sm:$0xf0]  ;;  %v7466_v17 = vld [vmem:[%s15650_s1 + $0x7c8] sm:$0xf] }
 0x1ab   :  { %5554 = vmatpush.bf16.msrb.mxu3 %v7227_v2  ;;  %v9987_v2 = vld [vmem:[%s15650_s1 + $0x7f4] sm:$0xf0]  ;;  %v7355_v60 = vor.u32 %v9955_v62, %v7354_v61  ;;  %v7018_v40 = vld [vmem:[%s15650_s1 + $0x448] sm:$0xf] }
 0x1ac   :  { %5520 = vmatpush.bf16.msrb.mxu0 %v6763_v10  ;;  %v7483_v10 = vor.u32 %v9987_v2, %v7482_v1  ;;  %v5290_v26 = vpop.f32.mrf.mxu2  ;;  %v7146_v43 = vld [vmem:[%s15650_s1 + $0x548] sm:$0xf]  ;;  %v9899_v2 = vld [vmem:[%s15650_s1 + $0x534] sm:$0xf0] }
 0x1ad   :  { %5533 = vmatpush.bf16.msrb.mxu1 %v6891_v12  ;;  %v9907_v12 = vld [vmem:[%s15650_s1 + $0x574] sm:$0xf0]  ;;  %v5303_v32 = vpop.f32.mrf.mxu3  ;;  %v7322_v51 = vld [vmem:[%s15650_s1 + $0x6a8] sm:$0xf]  ;;  %v7147_v59 = vor.u32 %v9903_v50, %v7146_v43 }
 0x1ae   :  { %5542 = vmatpush.bf16.msrb.mxu2 %v7083_v13  ;;  %v7338_v13 = vld [vmem:[%s15650_s1 + $0x6c8] sm:$0xf]  ;;  %v7163_v24 = vor.u32 %v9907_v12, %v7162_v8  ;;  %v7323_v61 = vor.u32 %v9947_v52, %v7322_v51  ;;  %v10051_v51 = vld [vmem:[%s15650_s1 + $0x9f4] sm:$0xf0] }
 0x1af   :  { %5555 = vmatpush.bf16.msrb.mxu3 %v7211_v34  ;;  %v7035_v34 = vor.u32 %v9875_v9, %v7034_v22  ;;  %v7339_v27 = vor.u32 %v9951_v14, %v7338_v13  ;;  %v7450_v36 = vld [vmem:[%s15650_s1 + $0x7a8] sm:$0xf]  ;;  %v9975_v22 = vld [vmem:[%s15650_s1 + $0x794] sm:$0xf0] }
 0x1b0   :  { %5521 = vmatpush.bf16.msrb.mxu0 %v6747_v18  ;;  %v9871_v18 = vld [vmem:[%s15650_s1 + $0x454] sm:$0xf0]  ;;  %v7002_v62 = vld [vmem:[%s15650_s1 + $0x428] sm:$0xf]  ;;  %v7451_v1 = vor.u32 %v9979_v55, %v7450_v36 }
 0x1b1   :  { %5534 = vmatpush.bf16.msrb.mxu1 %v6875_v47  ;;  %v5291_v47 = vadd.f32 %v5290_v26, %v5278_v63  ;;  %v7019_v58 = vor.u32 %v9871_v18, %v7018_v40  ;;  %v9867_v63 = vld [vmem:[%s15650_s1 + $0x434] sm:$0xf0]  ;;  %v7418_v40 = vld [vmem:[%s15650_s1 + $0x768] sm:$0xf] }
 0x1b2   :  { %5543 = vmatpush.bf16.msrb.mxu2 %v7067_v48  ;;  %v7467_v48 = vor.u32 %v9983_v39, %v7466_v17  ;;  %v7003_v8 = vor.u32 %v9867_v63, %v7002_v62  ;;  %v9863_v14 = vld [vmem:[%s15650_s1 + $0x414] sm:$0xf0]  ;;  %v7114_v17 = vld [vmem:[%s15650_s1 + $0x508] sm:$0xf] }
 0x1b3   :  { %5556 = vmatpush.bf16.msrb.mxu3 %v7195_v54  ;;  %v5279_v54 = vpop.f32.mrf.mxu1  ;;  %v5304_v57 = vadd.f32 %v5303_v32, %v5291_v47  ;;  %v9895_v39 = vld [vmem:[%s15650_s1 + $0x514] sm:$0xf0]  ;;  %v7610_v43 = vld [vmem:[%s15650_s1 + $0x8e8] sm:$0xf] }
 0x1b4   :  { %5522 = vmatpush.bf16.msrb.mxu0 %v6731_v0  ;;  %v7130_v0 = vld [vmem:[%s15650_s1 + $0x528] sm:$0xf]  ;;  %v9939_v32 = vld [vmem:[%s15650_s1 + $0x674] sm:$0xf0]  ;;  %v7115_v52 = vor.u32 %v9895_v39, %v7114_v17 }
 0x1b5   :  { %5535 = vmatpush.bf16.msrb.mxu1 %v6859_v3  ;;  %v7306_v3 = vld [vmem:[%s15650_s1 + $0x688] sm:$0xf]  ;;  %v7131_v12 = vor.u32 %v9899_v2, %v7130_v0  ;;  %v9971_v18 = vld [vmem:[%s15650_s1 + $0x774] sm:$0xf0] }
 0x1b6   :  { %5544 = vmatpush.bf16.msrb.mxu2 %v7051_v5  ;;  %v9943_v5 = vld [vmem:[%s15650_s1 + $0x694] sm:$0xf0]  ;;  %v7738_v50 = vld [vmem:[%s15650_s1 + $0x9e8] sm:$0xf]  ;;  %v7419_v36 = vor.u32 %v9971_v18, %v7418_v40 }
 0x1b7   :  { %5557 = vmatpush.bf16.msrb.mxu3 %v7179_v7  ;;  %5523 = vmatmul.bf16.vlgmr.msrb.gmra.mxu0 %v10849_v4  ;;  %v5316_v7 = vpop.f32.mrf.mxu0  ;;  %v7307_v13 = vor.u32 %v9943_v5, %v7306_v3  ;;  %v10019_v47 = vld [vmem:[%s15650_s1 + $0x8f4] sm:$0xf0]  ;;  %v7594_v63 = vld [vmem:[%s15650_s1 + $0x8c8] sm:$0xf] }
 0x1b8   :  { %5567 = vmatpush.bf16.msra.mxu0 %v7355_v60  ;;  %5536 = vmatmul.bf16.vlgmr.msrb.gmra.mxu1 %v10854_v6  ;;  %v7434_v60 = vld [vmem:[%s15650_s1 + $0x788] sm:$0xf]  ;;  %v13432_v9 = vadd.f32 %v5316_v7, %v5304_v57  ;;  %v7611_v55 = vor.u32 %v10019_v47, %v7610_v43  ;;  %v9967_v62 = vld [vmem:[%s15650_s1 + $0x754] sm:$0xf0] }
 0x1b9   :  { %5580 = vmatpush.bf16.msra.mxu1 %v7483_v10  ;;  %v6986_v10 = vld [vmem:[%s15650_s1 + $0x408] sm:$0xf]  ;;  %v7435_v26 = vor.u32 %v9975_v22, %v7434_v60  ;;  %v10015_v0 = vld [vmem:[%s15650_s1 + $0x8d4] sm:$0xf0] }
 0x1ba   :  { %5545 = vmatpush.bf16.msrb.mxu2 %v7035_v34  ;;  %v5292_v34 = vpop.f32.mrf.mxu2  ;;  %v7274_v57 = vld [vmem:[%s15650_s1 + $0x648] sm:$0xf]  ;;  %v10047_v3 = vld [vmem:[%s15650_s1 + $0x9d4] sm:$0xf0]  ;;  %v7595_v60 = vor.u32 %v10015_v0, %v7594_v63 }
 0x1bb   :  { %5558 = vmatpush.bf16.msrb.mxu3 %v7163_v24  ;;  %v5305_v24 = vpop.f32.mrf.mxu3  ;;  %v7722_v2 = vld [vmem:[%s15650_s1 + $0x9c8] sm:$0xf]  ;;  %v10011_v17 = vld [vmem:[%s15650_s1 + $0x8b4] sm:$0xf0] }
 0x1bc   :  { %5568 = vmatpush.bf16.msra.mxu0 %v7339_v27  ;;  %v7290_v27 = vld [vmem:[%s15650_s1 + $0x668] sm:$0xf]  ;;  %v10043_v34 = vld [vmem:[%s15650_s1 + $0x9b4] sm:$0xf0] }
 0x1bd   :  { %5581 = vmatpush.bf16.msra.mxu1 %v7467_v48  ;;  %v6987_v48 = vor.u32 %v9863_v14, %v6986_v10  ;;  %v7291_v54 = vor.u32 %v9939_v32, %v7290_v27  ;;  %v7258_v22 = vld [vmem:[%s15650_s1 + $0x628] sm:$0xf]  ;;  %v9927_v40 = vld [vmem:[%s15650_s1 + $0x614] sm:$0xf0] }
 0x1be   :  { %5546 = vmatpush.bf16.msrb.mxu2 %v7019_v58  ;;  %v9935_v58 = vld [vmem:[%s15650_s1 + $0x654] sm:$0xf0]  ;;  %v7386_v10 = vld [vmem:[%s15650_s1 + $0x728] sm:$0xf] }
 0x1bf   :  { %5559 = vmatpush.bf16.msrb.mxu3 %v7147_v59  ;;  %v7402_v59 = vld [vmem:[%s15650_s1 + $0x748] sm:$0xf]  ;;  %v7275_v5 = vor.u32 %v9935_v58, %v7274_v57  ;;  %v9959_v43 = vld [vmem:[%s15650_s1 + $0x714] sm:$0xf0] }
 0x1c0   :  { %5569 = vmatpush.bf16.msra.mxu0 %v7323_v61  ;;  %v7739_v61 = vor.u32 %v10051_v51, %v7738_v50  ;;  %v7403_v7 = vor.u32 %v9967_v62, %v7402_v59  ;;  %v7578_v14 = vld [vmem:[%s15650_s1 + $0x8a8] sm:$0xf]  ;;  %v10007_v50 = vld [vmem:[%s15650_s1 + $0x894] sm:$0xf0] }
 0x1c1   :  { %5582 = vmatpush.bf16.msra.mxu1 %v7451_v1  ;;  %v5318_v1 = vpop.f32.mrf.mxu0  ;;  %v7706_v39 = vld [vmem:[%s15650_s1 + $0x9a8] sm:$0xf]  ;;  %v7579_v32 = vor.u32 %v10011_v17, %v7578_v14 }
 0x1c2   :  { %5547 = vmatpush.bf16.msrb.mxu2 %v7003_v8  ;;  %v9931_v8 = vld [vmem:[%s15650_s1 + $0x634] sm:$0xf0]  ;;  %v7370_v18 = vld [vmem:[%s15650_s1 + $0x708] sm:$0xf]  ;;  %v7707_v47 = vor.u32 %v10043_v34, %v7706_v39 }
 0x1c3   :  { %5560 = vmatpush.bf16.msrb.mxu3 %v7131_v12  ;;  %v7723_v12 = vor.u32 %v10047_v3, %v7722_v2  ;;  %v7259_v24 = vor.u32 %v9931_v8, %v7258_v22  ;;  %v7690_v51 = vld [vmem:[%s15650_s1 + $0x988] sm:$0xf]  ;;  %v7371_v62 = vor.u32 %v9959_v43, %v7370_v18  ;;  %v10003_v2 = vld [vmem:[%s15650_s1 + $0x874] sm:$0xf0] }
 0x1c4   :  { %5570 = vmatpush.bf16.msra.mxu0 %v7307_v13  ;;  %v9963_v13 = vld [vmem:[%s15650_s1 + $0x734] sm:$0xf0]  ;;  %v7994_v59 = vld [vmem:[%s15650_s1 + $0xbe8] sm:$0xf] }
 0x1c5   :  { %5583 = vmatpush.bf16.msra.mxu1 %v7435_v26  ;;  %v7242_v26 = vld [vmem:[%s15650_s1 + $0x608] sm:$0xf]  ;;  %v7387_v27 = vor.u32 %v9963_v13, %v7386_v10  ;;  %v10079_v22 = vld [vmem:[%s15650_s1 + $0xad4] sm:$0xf0] }
 0x1c6   :  { %5548 = vmatpush.bf16.msrb.mxu2 %v6987_v48  ;;  %v7562_v48 = vld [vmem:[%s15650_s1 + $0x888] sm:$0xf]  ;;  %v7243_v58 = vor.u32 %v9927_v40, %v7242_v26  ;;  %v10111_v10 = vld [vmem:[%s15650_s1 + $0xbd4] sm:$0xf0] }
 0x1c7   :  { %5561 = vmatpush.bf16.msrb.mxu3 %v7115_v52  ;;  %v5329_v52 = vpop.f32.mrf.mxu1  ;;  %v7563_v63 = vor.u32 %v10007_v50, %v7562_v48  ;;  %v7674_v3 = vld [vmem:[%s15650_s1 + $0x968] sm:$0xf]  ;;  %v10031_v40 = vld [vmem:[%s15650_s1 + $0x954] sm:$0xf0] }
 0x1c8   :  { %5571 = vmatpush.bf16.msra.mxu0 %v7291_v54  ;;  %v10039_v54 = vld [vmem:[%s15650_s1 + $0x994] sm:$0xf0]  ;;  %v5330_v57 = vadd.f32 %v5329_v52, %v13432_v9  ;;  %v7546_v9 = vld [vmem:[%s15650_s1 + $0x868] sm:$0xf] }
 0x1c9   :  { %5584 = vmatpush.bf16.msra.mxu1 %v7419_v36  ;;  %5549 = vmatmul.bf16.vlgmr.msrb.gmra.mxu2 %v11040_v41  ;;  %v7866_v36 = vld [vmem:[%s15650_s1 + $0xae8] sm:$0xf]  ;;  %v7691_v0 = vor.u32 %v10039_v54, %v7690_v51  ;;  %v10075_v43 = vld [vmem:[%s15650_s1 + $0xab4] sm:$0xf0] }
 0x1ca   :  { %5593 = vmatpush.bf16.msra.mxu2 %v7611_v55  ;;  %5562 = vmatmul.bf16.vlgmr.msrb.gmra.mxu3 %v11044_v44  ;;  %v10083_v55 = vld [vmem:[%s15650_s1 + $0xaf4] sm:$0xf0]  ;;  %v7978_v8 = vld [vmem:[%s15650_s1 + $0xbc8] sm:$0xf] }
 0x1cb   :  { %5606 = vmatpush.bf16.msra.mxu3 %v7739_v61  ;;  %v10115_v61 = vld [vmem:[%s15650_s1 + $0xbf4] sm:$0xf0]  ;;  %v7867_v1 = vor.u32 %v10083_v55, %v7866_v36  ;;  %v7530_v34 = vld [vmem:[%s15650_s1 + $0x848] sm:$0xf] }
 0x1cc   :  { %5572 = vmatpush.bf16.msra.mxu0 %v7275_v5  ;;  %v7995_v5 = vor.u32 %v10115_v61, %v7994_v59  ;;  %v5342_v14 = vpop.f32.mrf.mxu2  ;;  %v7658_v26 = vld [vmem:[%s15650_s1 + $0x948] sm:$0xf]  ;;  %v10107_v50 = vld [vmem:[%s15650_s1 + $0xbb4] sm:$0xf0] }
 0x1cd   :  { %5585 = vmatpush.bf16.msra.mxu1 %v7403_v7  ;;  %v10035_v7 = vld [vmem:[%s15650_s1 + $0x974] sm:$0xf0]  ;;  %v5355_v39 = vpop.f32.mrf.mxu3  ;;  %v7834_v18 = vld [vmem:[%s15650_s1 + $0xaa8] sm:$0xf]  ;;  %v7659_v54 = vor.u32 %v10031_v40, %v7658_v26 }
 0x1ce   :  { %5594 = vmatpush.bf16.msra.mxu2 %v7595_v60  ;;  %v7850_v60 = vld [vmem:[%s15650_s1 + $0xac8] sm:$0xf]  ;;  %v7675_v13 = vor.u32 %v10035_v7, %v7674_v3  ;;  %v7835_v36 = vor.u32 %v10075_v43, %v7834_v18  ;;  %v10027_v61 = vld [vmem:[%s15650_s1 + $0x934] sm:$0xf0] }
 0x1cf   :  { %5607 = vmatpush.bf16.msra.mxu3 %v7723_v12  ;;  %v7547_v12 = vor.u32 %v10003_v2, %v7546_v9  ;;  %v7851_v17 = vor.u32 %v10079_v22, %v7850_v60  ;;  %v7962_v48 = vld [vmem:[%s15650_s1 + $0xba8] sm:$0xf]  ;;  %v10103_v9 = vld [vmem:[%s15650_s1 + $0xb94] sm:$0xf0] }
 0x1d0   :  { %5573 = vmatpush.bf16.msra.mxu0 %v7259_v24  ;;  %v9999_v24 = vld [vmem:[%s15650_s1 + $0x854] sm:$0xf0]  ;;  %v7514_v55 = vld [vmem:[%s15650_s1 + $0x828] sm:$0xf]  ;;  %v7963_v59 = vor.u32 %v10107_v50, %v7962_v48 }
 0x1d1   :  { %5586 = vmatpush.bf16.msra.mxu1 %v7387_v27  ;;  %v5343_v27 = vadd.f32 %v5342_v14, %v5330_v57  ;;  %v7531_v52 = vor.u32 %v9999_v24, %v7530_v34  ;;  %v9995_v57 = vld [vmem:[%s15650_s1 + $0x834] sm:$0xf0]  ;;  %v7930_v34 = vld [vmem:[%s15650_s1 + $0xb68] sm:$0xf] }
 0x1d2   :  { %5595 = vmatpush.bf16.msra.mxu2 %v7579_v32  ;;  %v7979_v32 = vor.u32 %v10111_v10, %v7978_v8  ;;  %v7515_v3 = vor.u32 %v9995_v57, %v7514_v55  ;;  %v9991_v22 = vld [vmem:[%s15650_s1 + $0x814] sm:$0xf0]  ;;  %v7626_v8 = vld [vmem:[%s15650_s1 + $0x908] sm:$0xf] }
 0x1d3   :  { %5608 = vmatpush.bf16.msra.mxu3 %v7707_v47  ;;  %v5331_v47 = vpop.f32.mrf.mxu1  ;;  %v5356_v51 = vadd.f32 %v5355_v39, %v5343_v27  ;;  %v10023_v10 = vld [vmem:[%s15650_s1 + $0x914] sm:$0xf0]  ;;  %v8122_v26 = vld [vmem:[%s15650_s1 + $0xce8] sm:$0xf] }
 0x1d4   :  { %5574 = vmatpush.bf16.msra.mxu0 %v7243_v58  ;;  %v7642_v58 = vld [vmem:[%s15650_s1 + $0x928] sm:$0xf]  ;;  %v10067_v39 = vld [vmem:[%s15650_s1 + $0xa74] sm:$0xf0]  ;;  %v7627_v43 = vor.u32 %v10023_v10, %v7626_v8 }
 0x1d5   :  { %5587 = vmatpush.bf16.msra.mxu1 %v7371_v62  ;;  %v7818_v62 = vld [vmem:[%s15650_s1 + $0xa88] sm:$0xf]  ;;  %v7643_v7 = vor.u32 %v10027_v61, %v7642_v58  ;;  %v10099_v24 = vld [vmem:[%s15650_s1 + $0xb74] sm:$0xf0] }
 0x1d6   :  { %5596 = vmatpush.bf16.msra.mxu2 %v7563_v63  ;;  %v10071_v63 = vld [vmem:[%s15650_s1 + $0xa94] sm:$0xf0]  ;;  %v8250_v40 = vld [vmem:[%s15650_s1 + $0xde8] sm:$0xf]  ;;  %v7931_v48 = vor.u32 %v10099_v24, %v7930_v34 }
 0x1d7   :  { %5609 = vmatpush.bf16.msra.mxu3 %v7691_v0  ;;  %5575 = vmatmul.bf16.vlgmr.msra.gmra.mxu0 %v11032_v38  ;;  %v5368_v0 = vpop.f32.mrf.mxu0  ;;  %v7819_v60 = vor.u32 %v10071_v63, %v7818_v62  ;;  %v10147_v27 = vld [vmem:[%s15650_s1 + $0xcf4] sm:$0xf0]  ;;  %v8106_v57 = vld [vmem:[%s15650_s1 + $0xcc8] sm:$0xf] }
 0x1d8   :  { %5619 = vmatpush.bf16.msrb.mxu0 %v7867_v1  ;;  %5588 = vmatmul.bf16.vlgmr.msra.gmra.mxu1 %v11042_v42  ;;  %v7946_v1 = vld [vmem:[%s15650_s1 + $0xb88] sm:$0xf]  ;;  %v13631_v2 = vadd.f32 %v5368_v0, %v5356_v51  ;;  %v10179_v18 = vld [vmem:[%s15650_s1 + $0xdf4] sm:$0xf0]  ;;  %v8123_v50 = vor.u32 %v10147_v27, %v8122_v26 }
 0x1d9   :  { %5632 = vmatpush.bf16.msrb.mxu1 %v7995_v5  ;;  %v7498_v5 = vld [vmem:[%s15650_s1 + $0x808] sm:$0xf]  ;;  %v7947_v14 = vor.u32 %v10103_v9, %v7946_v1  ;;  %v10095_v55 = vld [vmem:[%s15650_s1 + $0xb54] sm:$0xf0] }
 0x1da   :  { %5597 = vmatpush.bf16.msra.mxu2 %v7547_v12  ;;  %v5344_v12 = vpop.f32.mrf.mxu2  ;;  %v7786_v51 = vld [vmem:[%s15650_s1 + $0xa48] sm:$0xf]  ;;  %v10143_v58 = vld [vmem:[%s15650_s1 + $0xcd4] sm:$0xf0] }
 0x1db   :  { %5610 = vmatpush.bf16.msra.mxu3 %v7675_v13  ;;  %v5357_v13 = vpop.f32.mrf.mxu3  ;;  %v8234_v61 = vld [vmem:[%s15650_s1 + $0xdc8] sm:$0xf]  ;;  %v10175_v62 = vld [vmem:[%s15650_s1 + $0xdd4] sm:$0xf0]  ;;  %v8107_v1 = vor.u32 %v10143_v58, %v8106_v57 }
 0x1dc   :  { %5620 = vmatpush.bf16.msrb.mxu0 %v7851_v17  ;;  %v7802_v17 = vld [vmem:[%s15650_s1 + $0xa68] sm:$0xf]  ;;  %v10139_v8 = vld [vmem:[%s15650_s1 + $0xcb4] sm:$0xf0] }
 0x1dd   :  { %5633 = vmatpush.bf16.msrb.mxu1 %v7979_v32  ;;  %v7499_v32 = vor.u32 %v9991_v22, %v7498_v5  ;;  %v7803_v47 = vor.u32 %v10067_v39, %v7802_v17  ;;  %v7770_v9 = vld [vmem:[%s15650_s1 + $0xa28] sm:$0xf]  ;;  %v10171_v12 = vld [vmem:[%s15650_s1 + $0xdb4] sm:$0xf0] }
 0x1de   :  { %5598 = vmatpush.bf16.msra.mxu2 %v7531_v52  ;;  %v10063_v52 = vld [vmem:[%s15650_s1 + $0xa54] sm:$0xf0]  ;;  %v7898_v5 = vld [vmem:[%s15650_s1 + $0xb28] sm:$0xf] }
 0x1df   :  { %5611 = vmatpush.bf16.msra.mxu3 %v7659_v54  ;;  %v7914_v54 = vld [vmem:[%s15650_s1 + $0xb48] sm:$0xf]  ;;  %v7787_v63 = vor.u32 %v10063_v52, %v7786_v51  ;;  %v10055_v34 = vld [vmem:[%s15650_s1 + $0xa14] sm:$0xf0] }
 0x1e0   :  { %5621 = vmatpush.bf16.msrb.mxu0 %v7835_v36  ;;  %v8251_v36 = vor.u32 %v10179_v18, %v8250_v40  ;;  %v7915_v0 = vor.u32 %v10095_v55, %v7914_v54  ;;  %v8090_v22 = vld [vmem:[%s15650_s1 + $0xca8] sm:$0xf]  ;;  %v10087_v26 = vld [vmem:[%s15650_s1 + $0xb14] sm:$0xf0] }
 0x1e1   :  { %5634 = vmatpush.bf16.msrb.mxu1 %v7963_v59  ;;  %v5370_v59 = vpop.f32.mrf.mxu0  ;;  %v8218_v10 = vld [vmem:[%s15650_s1 + $0xda8] sm:$0xf]  ;;  %v8091_v39 = vor.u32 %v10139_v8, %v8090_v22  ;;  %v10135_v40 = vld [vmem:[%s15650_s1 + $0xc94] sm:$0xf0] }
 0x1e2   :  { %5599 = vmatpush.bf16.msra.mxu2 %v7515_v3  ;;  %v10059_v3 = vld [vmem:[%s15650_s1 + $0xa34] sm:$0xf0]  ;;  %v7882_v24 = vld [vmem:[%s15650_s1 + $0xb08] sm:$0xf]  ;;  %v8219_v27 = vor.u32 %v10171_v12, %v8218_v10 }
 0x1e3   :  { %5612 = vmatpush.bf16.msra.mxu3 %v7643_v7  ;;  %v8235_v7 = vor.u32 %v10175_v62, %v8234_v61  ;;  %v7771_v13 = vor.u32 %v10059_v3, %v7770_v9  ;;  %v8202_v18 = vld [vmem:[%s15650_s1 + $0xd88] sm:$0xf]  ;;  %v7883_v55 = vor.u32 %v10087_v26, %v7882_v24  ;;  %v10131_v61 = vld [vmem:[%s15650_s1 + $0xc74] sm:$0xf0] }
 0x1e4   :  { %5622 = vmatpush.bf16.msrb.mxu0 %v7819_v60  ;;  %v10091_v60 = vld [vmem:[%s15650_s1 + $0xb34] sm:$0xf0]  ;;  %v8506_v54 = vld [vmem:[%s15650_s1 + $0xfe8] sm:$0xf] }
 0x1e5   :  { %5635 = vmatpush.bf16.msrb.mxu1 %v7947_v14  ;;  %v7754_v14 = vld [vmem:[%s15650_s1 + $0xa08] sm:$0xf]  ;;  %v7899_v17 = vor.u32 %v10091_v60, %v7898_v5  ;;  %v10207_v9 = vld [vmem:[%s15650_s1 + $0xed4] sm:$0xf0] }
 0x1e6   :  { %5600 = vmatpush.bf16.msra.mxu2 %v7499_v32  ;;  %v8074_v32 = vld [vmem:[%s15650_s1 + $0xc88] sm:$0xf]  ;;  %v7755_v52 = vor.u32 %v10055_v34, %v7754_v14  ;;  %v10239_v5 = vld [vmem:[%s15650_s1 + $0xfd4] sm:$0xf0] }
 0x1e7   :  { %5613 = vmatpush.bf16.msra.mxu3 %v7627_v43  ;;  %v5381_v43 = vpop.f32.mrf.mxu1  ;;  %v8075_v57 = vor.u32 %v10135_v40, %v8074_v32  ;;  %v8186_v62 = vld [vmem:[%s15650_s1 + $0xd68] sm:$0xf]  ;;  %v10159_v34 = vld [vmem:[%s15650_s1 + $0xd54] sm:$0xf0] }
 0x1e8   :  { %5623 = vmatpush.bf16.msrb.mxu0 %v7803_v47  ;;  %v10167_v47 = vld [vmem:[%s15650_s1 + $0xd94] sm:$0xf0]  ;;  %v5382_v51 = vadd.f32 %v5381_v43, %v13631_v2  ;;  %v8058_v2 = vld [vmem:[%s15650_s1 + $0xc68] sm:$0xf] }
 0x1e9   :  { %5636 = vmatpush.bf16.msrb.mxu1 %v7931_v48  ;;  %5601 = vmatmul.bf16.vlgmr.msra.gmra.mxu2 %v11233_v25  ;;  %v8378_v48 = vld [vmem:[%s15650_s1 + $0xee8] sm:$0xf]  ;;  %v8203_v58 = vor.u32 %v10167_v47, %v8202_v18  ;;  %v10203_v26 = vld [vmem:[%s15650_s1 + $0xeb4] sm:$0xf0] }
 0x1ea   :  { %5645 = vmatpush.bf16.msrb.mxu2 %v8123_v50  ;;  %5614 = vmatmul.bf16.vlgmr.msra.gmra.mxu3 %v11246_v30  ;;  %v10211_v50 = vld [vmem:[%s15650_s1 + $0xef4] sm:$0xf0]  ;;  %v8490_v3 = vld [vmem:[%s15650_s1 + $0xfc8] sm:$0xf] }
 0x1eb   :  { %5658 = vmatpush.bf16.msrb.mxu3 %v8251_v36  ;;  %v10243_v36 = vld [vmem:[%s15650_s1 + $0xff4] sm:$0xf0]  ;;  %v8379_v59 = vor.u32 %v10211_v50, %v8378_v48  ;;  %v8042_v12 = vld [vmem:[%s15650_s1 + $0xc48] sm:$0xf] }
 0x1ec   :  { %5624 = vmatpush.bf16.msrb.mxu0 %v7787_v63  ;;  %v8507_v63 = vor.u32 %v10243_v36, %v8506_v54  ;;  %v5394_v22 = vpop.f32.mrf.mxu2  ;;  %v8170_v14 = vld [vmem:[%s15650_s1 + $0xd48] sm:$0xf]  ;;  %v10235_v40 = vld [vmem:[%s15650_s1 + $0xfb4] sm:$0xf0] }
 0x1ed   :  { %5637 = vmatpush.bf16.msrb.mxu1 %v7915_v0  ;;  %v10163_v0 = vld [vmem:[%s15650_s1 + $0xd74] sm:$0xf0]  ;;  %v5407_v10 = vpop.f32.mrf.mxu3  ;;  %v8346_v24 = vld [vmem:[%s15650_s1 + $0xea8] sm:$0xf]  ;;  %v8171_v47 = vor.u32 %v10159_v34, %v8170_v14 }
 0x1ee   :  { %5646 = vmatpush.bf16.msrb.mxu2 %v8107_v1  ;;  %v8362_v1 = vld [vmem:[%s15650_s1 + $0xec8] sm:$0xf]  ;;  %v8187_v60 = vor.u32 %v10163_v0, %v8186_v62  ;;  %v8347_v48 = vor.u32 %v10203_v26, %v8346_v24  ;;  %v10155_v36 = vld [vmem:[%s15650_s1 + $0xd34] sm:$0xf0] }
 0x1ef   :  { %5659 = vmatpush.bf16.msrb.mxu3 %v8235_v7  ;;  %v8059_v7 = vor.u32 %v10131_v61, %v8058_v2  ;;  %v8363_v8 = vor.u32 %v10207_v9, %v8362_v1  ;;  %v8474_v32 = vld [vmem:[%s15650_s1 + $0xfa8] sm:$0xf]  ;;  %v10231_v2 = vld [vmem:[%s15650_s1 + $0xf94] sm:$0xf0] }
 0x1f0   :  { %5625 = vmatpush.bf16.msrb.mxu0 %v7771_v13  ;;  %v10127_v13 = vld [vmem:[%s15650_s1 + $0xc54] sm:$0xf0]  ;;  %v8026_v50 = vld [vmem:[%s15650_s1 + $0xc28] sm:$0xf]  ;;  %v8475_v54 = vor.u32 %v10235_v40, %v8474_v32 }
 0x1f1   :  { %5638 = vmatpush.bf16.msrb.mxu1 %v7899_v17  ;;  %v5395_v17 = vadd.f32 %v5394_v22, %v5382_v51  ;;  %v8043_v43 = vor.u32 %v10127_v13, %v8042_v12  ;;  %v10123_v51 = vld [vmem:[%s15650_s1 + $0xc34] sm:$0xf0]  ;;  %v8442_v12 = vld [vmem:[%s15650_s1 + $0xf68] sm:$0xf] }
 0x1f2   :  { %5647 = vmatpush.bf16.msrb.mxu2 %v8091_v39  ;;  %v8491_v39 = vor.u32 %v10239_v5, %v8490_v3  ;;  %v8027_v62 = vor.u32 %v10123_v51, %v8026_v50  ;;  %v10119_v9 = vld [vmem:[%s15650_s1 + $0xc14] sm:$0xf0]  ;;  %v8138_v3 = vld [vmem:[%s15650_s1 + $0xd08] sm:$0xf] }
 0x1f3   :  { %5660 = vmatpush.bf16.msrb.mxu3 %v8219_v27  ;;  %v5383_v27 = vpop.f32.mrf.mxu1  ;;  %v5408_v18 = vadd.f32 %v5407_v10, %v5395_v17  ;;  %v10151_v5 = vld [vmem:[%s15650_s1 + $0xd14] sm:$0xf0]  ;;  %v8634_v14 = vld [vmem:[%s15650_s1 + $0x10e8] sm:$0xf] }
 0x1f4   :  { %5626 = vmatpush.bf16.msrb.mxu0 %v7755_v52  ;;  %v8154_v52 = vld [vmem:[%s15650_s1 + $0xd28] sm:$0xf]  ;;  %v10195_v10 = vld [vmem:[%s15650_s1 + $0xe74] sm:$0xf0]  ;;  %v8139_v26 = vor.u32 %v10151_v5, %v8138_v3 }
 0x1f5   :  { %5639 = vmatpush.bf16.msrb.mxu1 %v7883_v55  ;;  %v8330_v55 = vld [vmem:[%s15650_s1 + $0xe88] sm:$0xf]  ;;  %v8155_v0 = vor.u32 %v10155_v36, %v8154_v52  ;;  %v10227_v13 = vld [vmem:[%s15650_s1 + $0xf74] sm:$0xf0] }
 0x1f6   :  { %5648 = vmatpush.bf16.msrb.mxu2 %v8075_v57  ;;  %v10199_v57 = vld [vmem:[%s15650_s1 + $0xe94] sm:$0xf0]  ;;  %v8762_v34 = vld [vmem:[%s15650_s1 + $0x11e8] sm:$0xf]  ;;  %v8443_v32 = vor.u32 %v10227_v13, %v8442_v12 }
 0x1f7   :  { %5661 = vmatpush.bf16.msrb.mxu3 %v8203_v58  ;;  %5627 = vmatmul.bf16.vlgmr.msrb.gmra.mxu0 %v11244_v29  ;;  %v5420_v58 = vpop.f32.mrf.mxu0  ;;  %v8331_v1 = vor.u32 %v10199_v57, %v8330_v55  ;;  %v10275_v17 = vld [vmem:[%s15650_s1 + $0x10f4] sm:$0xf0]  ;;  %v8618_v51 = vld [vmem:[%s15650_s1 + $0x10c8] sm:$0xf] }
 0x1f8   :  { %5671 = vmatpush.bf16.msra.mxu0 %v8379_v59  ;;  %5640 = vmatmul.bf16.vlgmr.msrb.gmra.mxu1 %v11254_v33  ;;  %v8458_v59 = vld [vmem:[%s15650_s1 + $0xf88] sm:$0xf]  ;;  %v13830_v61 = vadd.f32 %v5420_v58, %v5408_v18  ;;  %v10307_v24 = vld [vmem:[%s15650_s1 + $0x11f4] sm:$0xf0]  ;;  %v8635_v40 = vor.u32 %v10275_v17, %v8634_v14 }
 0x1f9   :  { %5684 = vmatpush.bf16.msra.mxu1 %v8507_v63  ;;  %v8010_v63 = vld [vmem:[%s15650_s1 + $0xc08] sm:$0xf]  ;;  %v8459_v22 = vor.u32 %v10231_v2, %v8458_v59  ;;  %v10223_v50 = vld [vmem:[%s15650_s1 + $0xf54] sm:$0xf0] }
 0x1fa   :  { %5649 = vmatpush.bf16.msrb.mxu2 %v8059_v7  ;;  %v5396_v7 = vpop.f32.mrf.mxu2  ;;  %v8298_v18 = vld [vmem:[%s15650_s1 + $0xe48] sm:$0xf]  ;;  %v10271_v52 = vld [vmem:[%s15650_s1 + $0x10d4] sm:$0xf0] }
 0x1fb   :  { %5662 = vmatpush.bf16.msrb.mxu3 %v8187_v60  ;;  %v5409_v60 = vpop.f32.mrf.mxu3  ;;  %v8746_v36 = vld [vmem:[%s15650_s1 + $0x11c8] sm:$0xf]  ;;  %v10303_v55 = vld [vmem:[%s15650_s1 + $0x11d4] sm:$0xf0]  ;;  %v8619_v59 = vor.u32 %v10271_v52, %v8618_v51 }
 0x1fc   :  { %5672 = vmatpush.bf16.msra.mxu0 %v8363_v8  ;;  %v8314_v8 = vld [vmem:[%s15650_s1 + $0xe68] sm:$0xf]  ;;  %v10267_v3 = vld [vmem:[%s15650_s1 + $0x10b4] sm:$0xf0] }
 0x1fd   :  { %5685 = vmatpush.bf16.msra.mxu1 %v8491_v39  ;;  %v8011_v39 = vor.u32 %v10119_v9, %v8010_v63  ;;  %v8315_v27 = vor.u32 %v10195_v10, %v8314_v8  ;;  %v8282_v2 = vld [vmem:[%s15650_s1 + $0xe28] sm:$0xf]  ;;  %v10299_v7 = vld [vmem:[%s15650_s1 + $0x11b4] sm:$0xf0] }
 0x1fe   :  { %5650 = vmatpush.bf16.msrb.mxu2 %v8043_v43  ;;  %v10191_v43 = vld [vmem:[%s15650_s1 + $0xe54] sm:$0xf0]  ;;  %v8410_v63 = vld [vmem:[%s15650_s1 + $0xf28] sm:$0xf] }
 0x1ff   :  { %5663 = vmatpush.bf16.msrb.mxu3 %v8171_v47  ;;  %v8426_v47 = vld [vmem:[%s15650_s1 + $0xf48] sm:$0xf]  ;;  %v8299_v57 = vor.u32 %v10191_v43, %v8298_v18  ;;  %v10183_v12 = vld [vmem:[%s15650_s1 + $0xe14] sm:$0xf0] }
 0x200   :  { %5673 = vmatpush.bf16.msra.mxu0 %v8347_v48  ;;  %v8763_v48 = vor.u32 %v10307_v24, %v8762_v34  ;;  %v8427_v58 = vor.u32 %v10223_v50, %v8426_v47  ;;  %v8602_v9 = vld [vmem:[%s15650_s1 + $0x10a8] sm:$0xf]  ;;  %v10215_v14 = vld [vmem:[%s15650_s1 + $0xf14] sm:$0xf0] }
 0x201   :  { %5686 = vmatpush.bf16.msra.mxu1 %v8475_v54  ;;  %v5422_v54 = vpop.f32.mrf.mxu0  ;;  %v8730_v5 = vld [vmem:[%s15650_s1 + $0x11a8] sm:$0xf]  ;;  %v8603_v10 = vor.u32 %v10267_v3, %v8602_v9  ;;  %v10263_v34 = vld [vmem:[%s15650_s1 + $0x1094] sm:$0xf0] }
 0x202   :  { %5651 = vmatpush.bf16.msrb.mxu2 %v8027_v62  ;;  %v10187_v62 = vld [vmem:[%s15650_s1 + $0xe34] sm:$0xf0]  ;;  %v8394_v13 = vld [vmem:[%s15650_s1 + $0xf08] sm:$0xf]  ;;  %v8731_v17 = vor.u32 %v10299_v7, %v8730_v5 }
 0x203   :  { %5664 = vmatpush.bf16.msrb.mxu3 %v8155_v0  ;;  %v8747_v0 = vor.u32 %v10303_v55, %v8746_v36  ;;  %v8283_v60 = vor.u32 %v10187_v62, %v8282_v2  ;;  %v8714_v24 = vld [vmem:[%s15650_s1 + $0x1188] sm:$0xf]  ;;  %v8395_v50 = vor.u32 %v10215_v14, %v8394_v13  ;;  %v10259_v36 = vld [vmem:[%s15650_s1 + $0x1074] sm:$0xf0] }
 0x204   :  { %5674 = vmatpush.bf16.msra.mxu0 %v8331_v1  ;;  %v10219_v1 = vld [vmem:[%s15650_s1 + $0xf34] sm:$0xf0]  ;;  %v9018_v47 = vld [vmem:[%s15650_s1 + $0x13e8] sm:$0xf] }
 0x205   :  { %5687 = vmatpush.bf16.msra.mxu1 %v8459_v22  ;;  %v8266_v22 = vld [vmem:[%s15650_s1 + $0xe08] sm:$0xf]  ;;  %v8411_v8 = vor.u32 %v10219_v1, %v8410_v63  ;;  %v10335_v2 = vld [vmem:[%s15650_s1 + $0x12d4] sm:$0xf0] }
 0x206   :  { %5652 = vmatpush.bf16.msrb.mxu2 %v8011_v39  ;;  %v8586_v39 = vld [vmem:[%s15650_s1 + $0x1088] sm:$0xf]  ;;  %v8267_v43 = vor.u32 %v10183_v12, %v8266_v22  ;;  %v10367_v63 = vld [vmem:[%s15650_s1 + $0x13d4] sm:$0xf0] }
 0x207   :  { %5665 = vmatpush.bf16.msrb.mxu3 %v8139_v26  ;;  %v5433_v26 = vpop.f32.mrf.mxu1  ;;  %v8587_v51 = vor.u32 %v10263_v34, %v8586_v39  ;;  %v8698_v55 = vld [vmem:[%s15650_s1 + $0x1168] sm:$0xf]  ;;  %v10287_v13 = vld [vmem:[%s15650_s1 + $0x1154] sm:$0xf0] }
 0x208   :  { %5675 = vmatpush.bf16.msra.mxu0 %v8315_v27  ;;  %v10295_v27 = vld [vmem:[%s15650_s1 + $0x1194] sm:$0xf0]  ;;  %v5434_v18 = vadd.f32 %v5433_v26, %v13830_v61  ;;  %v8570_v61 = vld [vmem:[%s15650_s1 + $0x1068] sm:$0xf] }
 0x209   :  { %5688 = vmatpush.bf16.msra.mxu1 %v8443_v32  ;;  %5653 = vmatmul.bf16.vlgmr.msrb.gmra.mxu2 %v11443_v23  ;;  %v8890_v32 = vld [vmem:[%s15650_s1 + $0x12e8] sm:$0xf]  ;;  %v8715_v52 = vor.u32 %v10295_v27, %v8714_v24  ;;  %v10363_v34 = vld [vmem:[%s15650_s1 + $0x13b4] sm:$0xf0] }
 0x20a   :  { %5697 = vmatpush.bf16.msra.mxu2 %v8635_v40  ;;  %5666 = vmatmul.bf16.vlgmr.msrb.gmra.mxu3 %v11456_v31  ;;  %v10339_v40 = vld [vmem:[%s15650_s1 + $0x12f4] sm:$0xf0]  ;;  %v9002_v62 = vld [vmem:[%s15650_s1 + $0x13c8] sm:$0xf] }
 0x20b   :  { %5710 = vmatpush.bf16.msra.mxu3 %v8763_v48  ;;  %v10371_v48 = vld [vmem:[%s15650_s1 + $0x13f4] sm:$0xf0]  ;;  %v8891_v54 = vor.u32 %v10339_v40, %v8890_v32  ;;  %v8554_v7 = vld [vmem:[%s15650_s1 + $0x1048] sm:$0xf] }
 0x20c   :  { %5676 = vmatpush.bf16.msra.mxu0 %v8299_v57  ;;  %v9019_v57 = vor.u32 %v10371_v48, %v9018_v47  ;;  %v5446_v9 = vpop.f32.mrf.mxu2  ;;  %v8682_v22 = vld [vmem:[%s15650_s1 + $0x1148] sm:$0xf]  ;;  %v10283_v48 = vld [vmem:[%s15650_s1 + $0x1134] sm:$0xf0] }
 0x20d   :  { %5689 = vmatpush.bf16.msra.mxu1 %v8427_v58  ;;  %v10291_v58 = vld [vmem:[%s15650_s1 + $0x1174] sm:$0xf0]  ;;  %v5459_v5 = vpop.f32.mrf.mxu3  ;;  %v8858_v14 = vld [vmem:[%s15650_s1 + $0x12a8] sm:$0xf]  ;;  %v8683_v27 = vor.u32 %v10287_v13, %v8682_v22 }
 0x20e   :  { %5698 = vmatpush.bf16.msra.mxu2 %v8619_v59  ;;  %v8874_v59 = vld [vmem:[%s15650_s1 + $0x12c8] sm:$0xf]  ;;  %v8699_v1 = vor.u32 %v10291_v58, %v8698_v55 }
 0x20f   :  { %5711 = vmatpush.bf16.msra.mxu3 %v8747_v0  ;;  %v8571_v0 = vor.u32 %v10259_v36, %v8570_v61  ;;  %v8875_v3 = vor.u32 %v10335_v2, %v8874_v59  ;;  %v5435_v12 = vpop.f32.mrf.mxu1  ;;  %v8986_v39 = vld [vmem:[%s15650_s1 + $0x13a8] sm:$0xf]  ;;  %v10359_v61 = vld [vmem:[%s15650_s1 + $0x1394] sm:$0xf0] }
 0x210   :  { %5677 = vmatpush.bf16.msra.mxu0 %v8283_v60  ;;  %v10255_v60 = vld [vmem:[%s15650_s1 + $0x1054] sm:$0xf0]  ;;  %v8538_v40 = vld [vmem:[%s15650_s1 + $0x1028] sm:$0xf]  ;;  %v8987_v47 = vor.u32 %v10363_v34, %v8986_v39 }
 0x211   :  { %5690 = vmatpush.bf16.msra.mxu1 %v8411_v8  ;;  %v5447_v8 = vadd.f32 %v5446_v9, %v5434_v18  ;;  %v8555_v26 = vor.u32 %v10255_v60, %v8554_v7  ;;  %v10251_v18 = vld [vmem:[%s15650_s1 + $0x1034] sm:$0xf0]  ;;  %v8954_v7 = vld [vmem:[%s15650_s1 + $0x1368] sm:$0xf] }
 0x212   :  { %5699 = vmatpush.bf16.msra.mxu2 %v8603_v10  ;;  %v9003_v10 = vor.u32 %v10367_v63, %v9002_v62  ;;  %v8539_v55 = vor.u32 %v10251_v18, %v8538_v40  ;;  %v10247_v2 = vld [vmem:[%s15650_s1 + $0x1014] sm:$0xf0]  ;;  %v8650_v62 = vld [vmem:[%s15650_s1 + $0x1108] sm:$0xf] }
 0x213   :  { %5712 = vmatpush.bf16.msra.mxu3 %v8731_v17  ;;  %v10331_v17 = vld [vmem:[%s15650_s1 + $0x12b4] sm:$0xf0]  ;;  %v5460_v24 = vadd.f32 %v5459_v5, %v5447_v8  ;;  %v9146_v22 = vld [vmem:[%s15650_s1 + $0x14e8] sm:$0xf] }
 0x214   :  { %5678 = vmatpush.bf16.msra.mxu0 %v8267_v43  ;;  %v8859_v32 = vor.u32 %v10331_v17, %v8858_v14  ;;  %v8666_v43 = vld [vmem:[%s15650_s1 + $0x1128] sm:$0xf]  ;;  %v10279_v63 = vld [vmem:[%s15650_s1 + $0x1114] sm:$0xf0] }
 0x215   :  { %5691 = vmatpush.bf16.msra.mxu1 %v8395_v50  ;;  %v8842_v50 = vld [vmem:[%s15650_s1 + $0x1288] sm:$0xf]  ;;  %v8667_v58 = vor.u32 %v10283_v48, %v8666_v43  ;;  %v10323_v5 = vld [vmem:[%s15650_s1 + $0x1274] sm:$0xf0]  ;;  %v8651_v39 = vor.u32 %v10279_v63, %v8650_v62 }
 0x216   :  { %5700 = vmatpush.bf16.msra.mxu2 %v8587_v51  ;;  %v10327_v51 = vld [vmem:[%s15650_s1 + $0x1294] sm:$0xf0]  ;;  %v9274_v13 = vld [vmem:[%s15650_s1 + $0x15e8] sm:$0xf] }
 0x217   :  { %5713 = vmatpush.bf16.msra.mxu3 %v8715_v52  ;;  %5679 = vmatmul.bf16.vlgmr.msra.gmra.mxu0 %v11454_v28  ;;  %v5472_v52 = vpop.f32.mrf.mxu0  ;;  %v8843_v59 = vor.u32 %v10327_v51, %v8842_v50  ;;  %v10355_v60 = vld [vmem:[%s15650_s1 + $0x1374] sm:$0xf0]  ;;  %v8938_v40 = vld [vmem:[%s15650_s1 + $0x1348] sm:$0xf] }
 0x218   :  { %5723 = vmatpush.bf16.msrb.mxu0 %v8891_v54  ;;  %5692 = vmatmul.bf16.vlgmr.msra.gmra.mxu1 %v11464_v35  ;;  %v8970_v54 = vld [vmem:[%s15650_s1 + $0x1388] sm:$0xf]  ;;  %v5473_v36 = vadd.f32 %v5472_v52, %v5460_v24  ;;  %v10403_v8 = vld [vmem:[%s15650_s1 + $0x14f4] sm:$0xf0]  ;;  %v8955_v24 = vor.u32 %v10355_v60, %v8954_v7 }
 0x219   :  { %5736 = vmatpush.bf16.msrb.mxu1 %v9019_v57  ;;  %v8522_v57 = vld [vmem:[%s15650_s1 + $0x1008] sm:$0xf]  ;;  %v8971_v9 = vor.u32 %v10359_v61, %v8970_v54  ;;  %v10435_v14 = vld [vmem:[%s15650_s1 + $0x15f4] sm:$0xf0] }
 0x21a   :  { %5701 = vmatpush.bf16.msra.mxu2 %v8571_v0  ;;  %v5461_v0 = vpop.f32.mrf.mxu3  ;;  %v8523_v12 = vor.u32 %v10247_v2, %v8522_v57  ;;  %v9275_v18 = vor.u32 %v10435_v14, %v9274_v13  ;;  %v10351_v43 = vld [vmem:[%s15650_s1 + $0x1354] sm:$0xf0]  ;;  %v9258_v51 = vld [vmem:[%s15650_s1 + $0x15c8] sm:$0xf] }
 0x21b   :  { %5714 = vmatpush.bf16.msra.mxu3 %v8699_v1  ;;  %v5448_v1 = vpop.f32.mrf.mxu2  ;;  %v10399_v48 = vld [vmem:[%s15650_s1 + $0x14d4] sm:$0xf0]  ;;  %v8939_v61 = vor.u32 %v10351_v43, %v8938_v40  ;;  %v9114_v62 = vld [vmem:[%s15650_s1 + $0x14a8] sm:$0xf] }
 0x21c   :  { %5724 = vmatpush.bf16.msrb.mxu0 %v8875_v3  ;;  %v8826_v3 = vld [vmem:[%s15650_s1 + $0x1268] sm:$0xf]  ;;  %v10431_v52 = vld [vmem:[%s15650_s1 + $0x15d4] sm:$0xf0] }
 0x21d   :  { %5737 = vmatpush.bf16.msrb.mxu1 %v9003_v10  ;;  %v5485_v10 = vpop.f32.mrf.mxu1  ;;  %v8827_v34 = vor.u32 %v10323_v5, %v8826_v3  ;;  %v10315_v57 = vld [vmem:[%s15650_s1 + $0x1234] sm:$0xf0]  ;;  %v9242_v0 = vld [vmem:[%s15650_s1 + $0x15a8] sm:$0xf] }
 0x21e   :  { %5702 = vmatpush.bf16.msra.mxu2 %v8555_v26  ;;  %v14065_v17 = vadd.f32 %v5485_v10, %v5473_v36  ;;  %v9147_v26 = vor.u32 %v10403_v8, %v9146_v22  ;;  %v10347_v2 = vld [vmem:[%s15650_s1 + $0x1334] sm:$0xf0]  ;;  %v8778_v5 = vld [vmem:[%s15650_s1 + $0x1208] sm:$0xf] }
 0x21f   :  { %5715 = vmatpush.bf16.msra.mxu3 %v8683_v27  ;;  %v8810_v27 = vld [vmem:[%s15650_s1 + $0x1248] sm:$0xf]  ;;  %v5474_v50 = vpop.f32.mrf.mxu0  ;;  %v10395_v63 = vld [vmem:[%s15650_s1 + $0x14b4] sm:$0xf0] }
 0x220   :  { %5725 = vmatpush.bf16.msrb.mxu0 %v8859_v32  ;;  %v10319_v32 = vld [vmem:[%s15650_s1 + $0x1254] sm:$0xf0]  ;;  %v9115_v60 = vor.u32 %v10395_v63, %v9114_v62  ;;  %v8906_v8 = vld [vmem:[%s15650_s1 + $0x1308] sm:$0xf] }
 0x221   :  { %5738 = vmatpush.bf16.msrb.mxu1 %v8987_v47  ;;  %v9130_v47 = vld [vmem:[%s15650_s1 + $0x14c8] sm:$0xf]  ;;  %v8811_v54 = vor.u32 %v10319_v32, %v8810_v27  ;;  %v10427_v1 = vld [vmem:[%s15650_s1 + $0x15b4] sm:$0xf0] }
 0x222   :  { %5703 = vmatpush.bf16.msra.mxu2 %v8539_v55  ;;  %v9131_v36 = vor.u32 %v10399_v48, %v9130_v47  ;;  %v8794_v55 = vld [vmem:[%s15650_s1 + $0x1228] sm:$0xf]  ;;  %v10311_v22 = vld [vmem:[%s15650_s1 + $0x1214] sm:$0xf0] }
 0x223   :  { %5716 = vmatpush.bf16.msra.mxu3 %v8667_v58  ;;  %v8922_v58 = vld [vmem:[%s15650_s1 + $0x1328] sm:$0xf]  ;;  %v8795_v3 = vor.u32 %v10315_v57, %v8794_v55  ;;  %v10343_v10 = vld [vmem:[%s15650_s1 + $0x1314] sm:$0xf0]  ;;  %v8779_v27 = vor.u32 %v10311_v22, %v8778_v5 }
 0x224   :  { %5726 = vmatpush.bf16.msrb.mxu0 %v8843_v59  ;;  %v9259_v59 = vor.u32 %v10431_v52, %v9258_v51  ;;  %v8923_v7 = vor.u32 %v10347_v2, %v8922_v58  ;;  %v9098_v13 = vld [vmem:[%s15650_s1 + $0x1488] sm:$0xf]  ;;  %v10391_v14 = vld [vmem:[%s15650_s1 + $0x1494] sm:$0xf0] }
 0x225   :  { %5739 = vmatpush.bf16.msrb.mxu1 %v8971_v9  ;;  %v5487_v9 = vpop.f32.mrf.mxu1  ;;  %v9530_v32 = vld [vmem:[%s15650_s1 + $0x17e8] sm:$0xf]  ;;  %v10499_v40 = vld [vmem:[%s15650_s1 + $0x17f4] sm:$0xf0]  ;;  %v9099_v43 = vor.u32 %v10391_v14, %v9098_v13 }
 0x226   :  { %5704 = vmatpush.bf16.msra.mxu2 %v8523_v12  ;;  %v9243_v12 = vor.u32 %v10427_v1, %v9242_v0  ;;  %v9082_v47 = vld [vmem:[%s15650_s1 + $0x1468] sm:$0xf]  ;;  %v10387_v51 = vld [vmem:[%s15650_s1 + $0x1474] sm:$0xf0] }
 0x227   :  { %5717 = vmatpush.bf16.msra.mxu3 %v8651_v39  ;;  %v9226_v39 = vld [vmem:[%s15650_s1 + $0x1588] sm:$0xf]  ;;  %v10419_v55 = vld [vmem:[%s15650_s1 + $0x1574] sm:$0xf0]  ;;  %v9083_v62 = vor.u32 %v10387_v51, %v9082_v47 }
 0x228   :  { %5727 = vmatpush.bf16.msrb.mxu0 %v8827_v34  ;;  %v10423_v34 = vld [vmem:[%s15650_s1 + $0x1594] sm:$0xf0]  ;;  %v9210_v52 = vld [vmem:[%s15650_s1 + $0x1568] sm:$0xf] }
 0x229   :  { %5740 = vmatpush.bf16.msrb.mxu1 %v8955_v24  ;;  %5705 = vmatmul.bf16.vlgmr.msra.gmra.mxu2 %v11653_v37  ;;  %v9402_v24 = vld [vmem:[%s15650_s1 + $0x16e8] sm:$0xf]  ;;  %v9227_v48 = vor.u32 %v10423_v34, %v9226_v39  ;;  %v10463_v58 = vld [vmem:[%s15650_s1 + $0x16d4] sm:$0xf0]  ;;  %v9211_v0 = vor.u32 %v10419_v55, %v9210_v52 }
 0x22a   :  { %5749 = vmatpush.bf16.msrb.mxu2 %v9147_v26  ;;  %5718 = vmatmul.bf16.vlgmr.msra.gmra.mxu3 %v11666_v46  ;;  %v10467_v26 = vld [vmem:[%s15650_s1 + $0x16f4] sm:$0xf0]  ;;  %v9386_v57 = vld [vmem:[%s15650_s1 + $0x16c8] sm:$0xf] }
 0x22b   :  { %5762 = vmatpush.bf16.msrb.mxu3 %v9275_v18  ;;  %v8907_v18 = vor.u32 %v10343_v10, %v8906_v8  ;;  %v9403_v50 = vor.u32 %v10467_v26, %v9402_v24  ;;  %v10495_v2 = vld [vmem:[%s15650_s1 + $0x17d4] sm:$0xf0]  ;;  %v9387_v1 = vor.u32 %v10463_v58, %v9386_v57  ;;  %v9066_v9 = vld [vmem:[%s15650_s1 + $0x1448] sm:$0xf] }
 0x22c   :  { %5728 = vmatpush.bf16.msrb.mxu0 %v8811_v54  ;;  %v10550_v54 = vld [vmem:[%s15652_s2] sm:$0xf]  ;;  %v5498_v63 = vpop.f32.mrf.mxu2  ;;  %v9194_v5 = vld [vmem:[%s15650_s1 + $0x1548] sm:$0xf]  ;;  %v10415_v8 = vld [vmem:[%s15650_s1 + $0x1554] sm:$0xf0] }
 0x22d   :  { %5741 = vmatpush.bf16.msrb.mxu1 %v8939_v61  ;;  %v822_v61 = vperm.slane %v10550_v54, 2  ;;  %v9370_v10 = vld [vmem:[%s15650_s1 + $0x16a8] sm:$0xf]  ;;  %v10491_v14 = vld [vmem:[%s15650_s1 + $0x17b4] sm:$0xf0]  ;;  %v9195_v24 = vor.u32 %v10415_v8, %v9194_v5 }
 0x22e   :  { %5750 = vmatpush.bf16.msrb.mxu2 %v9131_v36  ;;  %v9531_v36 = vor.u32 %v10499_v40, %v9530_v32  ;;  %v9498_v13 = vld [vmem:[%s15650_s1 + $0x17a8] sm:$0xf]  ;;  %v10379_v32 = vld [vmem:[%s15650_s1 + $0x1434] sm:$0xf0] }
 0x22f   :  { %5763 = vmatpush.bf16.msrb.mxu3 %v9259_v59  ;;  %v9514_v59 = vld [vmem:[%s15650_s1 + $0x17c8] sm:$0xf]  ;;  %v10487_v51 = vld [vmem:[%s15650_s1 + $0x1794] sm:$0xf0] }
 0x230   :  { %5729 = vmatpush.bf16.msrb.mxu0 %v8795_v3  ;;  %v10383_v3 = vld [vmem:[%s15650_s1 + $0x1454] sm:$0xf0]  ;;  %v9515_v22 = vor.u32 %v10495_v2, %v9514_v59  ;;  %v9178_v40 = vld [vmem:[%s15650_s1 + $0x1528] sm:$0xf] }
 0x231   :  { %5742 = vmatpush.bf16.msrb.mxu1 %v8923_v7  ;;  %v5499_v7 = vadd.f32 %v5498_v63, %v822_v61  ;;  %v9067_v34 = vor.u32 %v10383_v3, %v9066_v9  ;;  %v9354_v47 = vld [vmem:[%s15650_s1 + $0x1688] sm:$0xf]  ;;  %v10375_v2 = vld [vmem:[%s15650_s1 + $0x1414] sm:$0xf0] }
 0x232   :  { %5751 = vmatpush.bf16.msrb.mxu2 %v9115_v60  ;;  %v5511_v60 = vpop.f32.mrf.mxu3  ;;  %v9034_v61 = vld [vmem:[%s15650_s1 + $0x1408] sm:$0xf]  ;;  %v10407_v63 = vld [vmem:[%s15650_s1 + $0x1514] sm:$0xf0] }
 0x233   :  { %5764 = vmatpush.bf16.msrb.mxu3 %v9243_v12  ;;  %v10459_v12 = vld [vmem:[%s15650_s1 + $0x16b4] sm:$0xf0]  ;;  %v5512_v39 = vadd.f32 %v5511_v60, %v5499_v7  ;;  %v9338_v9 = vld [vmem:[%s15650_s1 + $0x1668] sm:$0xf] }
 0x234   :  { %5730 = vmatpush.bf16.msrb.mxu0 %v8779_v27  ;;  %v9371_v26 = vor.u32 %v10459_v12, %v9370_v10  ;;  %v9050_v27 = vld [vmem:[%s15650_s1 + $0x1428] sm:$0xf]  ;;  %v5524_v52 = vpop.f32.mrf.mxu0  ;;  %v5500_v57 = vpop.f32.mrf.mxu2  ;;  %v10451_v3 = vld [vmem:[%s15650_s1 + $0x1674] sm:$0xf0]  ;;  %v9035_v10 = vor.u32 %v10375_v2, %v9034_v61  ;;  %v9761_v12 = vld [vmem:[%s15650_s1 + $0xec] sm:$0xf] }
 0x235   :  { %5743 = vmatpush.bf16.msrb.mxu1 %v8907_v18  ;;  %v9499_v18 = vor.u32 %v10491_v14, %v9498_v13  ;;  %v9051_v54 = vor.u32 %v10379_v32, %v9050_v27  ;;  %v5537_v55 = vpop.f32.mrf.mxu1  ;;  %v9466_v5 = vld [vmem:[%s15650_s1 + $0x1768] sm:$0xf]  ;;  %v10483_v60 = vld [vmem:[%s15650_s1 + $0x1774] sm:$0xf0]  ;;  %v6588_v13 = vld [vmem:[%s15650_s1 + $0xf8] sm:$0xf0] }
 0x236   :  { %5752 = vmatpush.bf16.msrb.mxu2 %v9099_v43  ;;  %v10411_v43 = vld [vmem:[%s15650_s1 + $0x1534] sm:$0xf0]  ;;  %v9450_v32 = vld [vmem:[%s15650_s1 + $0x1748] sm:$0xf] }
 0x237   :  { %5765 = vmatpush.bf16.msrb.mxu3 %v9227_v48  ;;  %5731 = vmatmul.bf16.vlgmr.msrb.gmra.mxu0 %v11664_v45  ;;  %v10455_v48 = vld [vmem:[%s15650_s1 + $0x1694] sm:$0xf0]  ;;  %v9179_v58 = vor.u32 %v10411_v43, %v9178_v40  ;;  %v6591_v40 = vor.u32 %v9761_v12, %v6588_v13  ;;  %v9578_v43 = vld [vmem:[%s15650_s1 + $0x1848] sm:$0xf] }
 0x238   :  { %5775 = vmatpush.bf16.msra.mxu0 %v9403_v50  ;;  %5744 = vmatmul.bf16.vlgmr.msrb.gmra.mxu1 %v11674_v49  ;;  %v9482_v50 = vld [vmem:[%s15650_s1 + $0x1788] sm:$0xf]  ;;  %v9355_v59 = vor.u32 %v10455_v48, %v9354_v47  ;;  %v10515_v8 = vld [vmem:[%s15650_s1 + $0x1874] sm:$0xf0] }
 0x239   :  { %5788 = vmatpush.bf16.msra.mxu1 %v9531_v36  ;;  %v5525_v36 = vadd.f32 %v5524_v52, %v5512_v39  ;;  %v9339_v39 = vor.u32 %v10451_v3, %v9338_v9  ;;  %v10447_v27 = vld [vmem:[%s15650_s1 + $0x1654] sm:$0xf0]  ;;  %v9290_v3 = vld [vmem:[%s15650_s1 + $0x1608] sm:$0xf] }
 0x23a   :  { %5753 = vmatpush.bf16.msrb.mxu2 %v9083_v62  ;;  %v9162_v62 = vld [vmem:[%s15650_s1 + $0x1508] sm:$0xf]  ;;  %v10511_v47 = vld [vmem:[%s15650_s1 + $0x1854] sm:$0xf0] }
 0x23b   :  { %5766 = vmatpush.bf16.msrb.mxu3 %v9211_v0  ;;  %v5513_v0 = vpop.f32.mrf.mxu3  ;;  %v14251_v7 = vadd.f32 %v5537_v55, %v5525_v36  ;;  %v9163_v14 = vor.u32 %v10407_v63, %v9162_v62  ;;  %v9579_v36 = vor.u32 %v10511_v47, %v9578_v43  ;;  %v9306_v55 = vld [vmem:[%s15650_s1 + $0x1628] sm:$0xf]  ;;  %v10443_v57 = vld [vmem:[%s15650_s1 + $0x1634] sm:$0xf0]  ;;  %v6972_v43 = vld [vmem:[%s15650_s1 + $0x3f8] sm:$0xf0] }
 0x23c   :  { %5776 = vmatpush.bf16.msra.mxu0 %v9387_v1  ;;  %v9483_v1 = vor.u32 %v10487_v51, %v9482_v50  ;;  %v5526_v48 = vpop.f32.mrf.mxu0  ;;  %v9757_v50 = vld [vmem:[%s15650_s1 + $0xcc] sm:$0xf]  ;;  %v6572_v51 = vld [vmem:[%s15650_s1 + $0xd8] sm:$0xf0]  ;;  %v10475_v2 = vld [vmem:[%s15650_s1 + $0x1734] sm:$0xf0]  ;;  %v9307_v9 = vor.u32 %v10443_v57, %v9306_v55 }
 0x23d   :  { %5789 = vmatpush.bf16.msra.mxu1 %v9515_v22  ;;  %v9594_v22 = vld [vmem:[%s15650_s1 + $0x1868] sm:$0xf]  ;;  %v5539_v52 = vpop.f32.mrf.mxu1  ;;  %v10507_v63 = vld [vmem:[%s15650_s1 + $0x1834] sm:$0xf0]  ;;  %v9753_v0 = vld [vmem:[%s15650_s1 + $0xac] sm:$0xf] }
 0x23e   :  { %5754 = vmatpush.bf16.msrb.mxu2 %v9067_v34  ;;  %v9467_v34 = vor.u32 %v10483_v60, %v9466_v5  ;;  %v9562_v62 = vld [vmem:[%s15650_s1 + $0x1828] sm:$0xf]  ;;  %v10439_v5 = vld [vmem:[%s15650_s1 + $0x1614] sm:$0xf0]  ;;  %v9745_v52 = vld [vmem:[%s15650_s1 + $0x6c] sm:$0xf] }
 0x23f   :  { %5767 = vmatpush.bf16.msrb.mxu3 %v9195_v24  ;;  %v9595_v24 = vor.u32 %v10515_v8, %v9594_v22  ;;  %v9563_v22 = vor.u32 %v10507_v63, %v9562_v62  ;;  %v9418_v8 = vld [vmem:[%s15650_s1 + $0x1708] sm:$0xf]  ;;  %v9789_v55 = vld [vmem:[%s15650_s1 + $0x1cc] sm:$0xf]  ;;  %v6700_v57 = vld [vmem:[%s15650_s1 + $0x1d8] sm:$0xf0] }
 0x240   :  { %5777 = vmatpush.bf16.msra.mxu0 %v9371_v26  ;;  %v9322_v26 = vld [vmem:[%s15650_s1 + $0x1648] sm:$0xf]  ;;  %v6956_v62 = vld [vmem:[%s15650_s1 + $0x3d8] sm:$0xf0] }
 0x241   :  { %5790 = vmatpush.bf16.msra.mxu1 %v9499_v18  ;;  %v10479_v18 = vld [vmem:[%s15650_s1 + $0x1754] sm:$0xf0]  ;;  %v9546_v12 = vld [vmem:[%s15650_s1 + $0x1808] sm:$0xf] }
 0x242   :  { %5755 = vmatpush.bf16.msrb.mxu2 %v9051_v54  ;;  %v9323_v54 = vor.u32 %v10447_v27, %v9322_v26  ;;  %v9451_v61 = vor.u32 %v10479_v18, %v9450_v32  ;;  %v6716_v26 = vld [vmem:[%s15650_s1 + $0x1f8] sm:$0xf0]  ;;  %v9825_v27 = vld [vmem:[%s15650_s1 + $0x2ec] sm:$0xf]  ;;  %v9291_v32 = vor.u32 %v10439_v5, %v9290_v3 }
 0x243   :  { %5768 = vmatpush.bf16.msrb.mxu3 %v9179_v58  ;;  %v9434_v58 = vld [vmem:[%s15650_s1 + $0x1728] sm:$0xf]  ;;  %v9857_v18 = vld [vmem:[%s15650_s1 + $0x3ec] sm:$0xf]  ;;  %v6508_v3 = vld [vmem:[%s15650_s1 + $0x58] sm:$0xf0] }
 0x244   :  { %5778 = vmatpush.bf16.msra.mxu0 %v9355_v59  ;;  %v6575_v59 = vor.u32 %v9757_v50, %v6572_v51  ;;  %v9435_v60 = vor.u32 %v10475_v2, %v9434_v58  ;;  %v9821_v58 = vld [vmem:[%s15650_s1 + $0x2cc] sm:$0xf] }
 0x245   :  { %5791 = vmatpush.bf16.msra.mxu1 %v9483_v1  ;;  %v6556_v1 = vld [vmem:[%s15650_s1 + $0xb8] sm:$0xf0]  ;;  %v9853_v2 = vld [vmem:[%s15650_s1 + $0x3cc] sm:$0xf] }
 0x246   :  { %5756 = vmatpush.bf16.msrb.mxu2 %v9035_v10  ;;  %v10471_v10 = vld [vmem:[%s15650_s1 + $0x1714] sm:$0xf0]  ;;  %v6559_v13 = vor.u32 %v9753_v0, %v6556_v1  ;;  %v6703_v1 = vor.u32 %v9789_v55, %v6700_v57 }
 0x247   :  { %5769 = vmatpush.bf16.msrb.mxu3 %v9163_v14  ;;  %v10503_v14 = vld [vmem:[%s15650_s1 + $0x1814] sm:$0xf0]  ;;  %v9419_v47 = vor.u32 %v10471_v10, %v9418_v8  ;;  %v6959_v8 = vor.u32 %v9853_v2, %v6956_v62  ;;  %v9785_v10 = vld [vmem:[%s15650_s1 + $0x1ac] sm:$0xf]  ;;  %v6476_v2 = vld [vmem:[%s15650_s1 + $0x18] sm:$0xf0] }
 0x248   :  { %5779 = vmatpush.bf16.msra.mxu0 %v9339_v39  ;;  %v9749_v39 = vld [vmem:[%s15650_s1 + $0x8c] sm:$0xf]  ;;  %v9547_v48 = vor.u32 %v10503_v14, %v9546_v12  ;;  %v6684_v12 = vld [vmem:[%s15650_s1 + $0x1b8] sm:$0xf0] }
 0x249   :  { %5792 = vmatpush.bf16.msra.mxu1 %v9467_v34  ;;  %5757 = vmatmul.bf16.vlgmr.msrb.gmra.mxu2 %v11868_v11  ;;  %v6540_v34 = vld [vmem:[%s15650_s1 + $0x98] sm:$0xf0]  ;;  %v9849_v14 = vld [vmem:[%s15650_s1 + $0x3ac] sm:$0xf] }
 0x24a   :  { %5805 = vmatpush.bf16.msra.mxu2 %v9595_v24  ;;  %5770 = vmatmul.bf16.vlgmr.msrb.gmra.mxu3 %v11881_v16  ;;  %v9793_v24 = vld [vmem:[%s15650_s1 + $0x1ec] sm:$0xf]  ;;  %v6543_v50 = vor.u32 %v9749_v39, %v6540_v34  ;;  %v6940_v39 = vld [vmem:[%s15650_s1 + $0x3b8] sm:$0xf0] }
 0x24b   :  { %5814 = vmatpush.bf16.msra.mxu3 %v6591_v40  ;;  %v6844_v40 = vld [vmem:[%s15650_s1 + $0x2f8] sm:$0xf0]  ;;  %v6719_v51 = vor.u32 %v9793_v24, %v6716_v26  ;;  %v6687_v26 = vor.u32 %v9785_v10, %v6684_v12  ;;  %v9889_v10 = vld [vmem:[%s15650_s1 + $0x4ec] sm:$0xf] }
 0x24c   :  { %5780 = vmatpush.bf16.msra.mxu0 %v9323_v54  ;;  %v6524_v54 = vld [vmem:[%s15650_s1 + $0x78] sm:$0xf0]  ;;  %v5550_v63 = vpop.f32.mrf.mxu2 }
 0x24d   :  { %5793 = vmatpush.bf16.msra.mxu1 %v9451_v61  ;;  %v6847_v61 = vor.u32 %v9825_v27, %v6844_v40  ;;  %v6527_v0 = vor.u32 %v9745_v52, %v6524_v54  ;;  %v5551_v5 = vadd.f32 %v5550_v63, %v14251_v7  ;;  %v6812_v7 = vld [vmem:[%s15650_s1 + $0x2b8] sm:$0xf0]  ;;  %v9737_v27 = vld [vmem:[%s15650_s1 + $0x2c] sm:$0xf] }
 0x24e   :  { %5806 = vmatpush.bf16.msra.mxu2 %v9579_v36  ;;  %v6975_v36 = vor.u32 %v9857_v18, %v6972_v43  ;;  %v6943_v18 = vor.u32 %v9849_v14, %v6940_v39  ;;  %v9781_v43 = vld [vmem:[%s15650_s1 + $0x18c] sm:$0xf]  ;;  %v6924_v54 = vld [vmem:[%s15650_s1 + $0x398] sm:$0xf0] }
 0x24f   :  { %5815 = vmatpush.bf16.msra.mxu3 %v6575_v59  ;;  %v6828_v59 = vld [vmem:[%s15650_s1 + $0x2d8] sm:$0xf0]  ;;  %v9845_v52 = vld [vmem:[%s15650_s1 + $0x38c] sm:$0xf] }
 0x250   :  { %5781 = vmatpush.bf16.msra.mxu0 %v9307_v9  ;;  %v9741_v9 = vld [vmem:[%s15650_s1 + $0x4c] sm:$0xf]  ;;  %v7100_v12 = vld [vmem:[%s15650_s1 + $0x4f8] sm:$0xf0] }
 0x251   :  { %5794 = vmatpush.bf16.msra.mxu1 %v9435_v60  ;;  %v5563_v60 = vpop.f32.mrf.mxu3  ;;  %v6511_v24 = vor.u32 %v9741_v9, %v6508_v3  ;;  %v9777_v9 = vld [vmem:[%s15650_s1 + $0x16c] sm:$0xf]  ;;  %v6652_v3 = vld [vmem:[%s15650_s1 + $0x178] sm:$0xf0] }
 0x252   :  { %5807 = vmatpush.bf16.msra.mxu2 %v9563_v22  ;;  %v6831_v22 = vor.u32 %v9821_v58, %v6828_v59  ;;  %v5564_v34 = vadd.f32 %v5563_v60, %v5551_v5  ;;  %v9733_v59 = vld [vmem:[%s15650_s1 + $0xc] sm:$0xf]  ;;  %v6780_v60 = vld [vmem:[%s15650_s1 + $0x278] sm:$0xf0] }
 0x253   :  { %5816 = vmatpush.bf16.msra.mxu3 %v6559_v13  ;;  %v9817_v13 = vld [vmem:[%s15650_s1 + $0x2ac] sm:$0xf] }
 0x254   :  { %5782 = vmatpush.bf16.msra.mxu0 %v9291_v32  ;;  %v6492_v32 = vld [vmem:[%s15650_s1 + $0x38] sm:$0xf0]  ;;  %v6815_v40 = vor.u32 %v9817_v13, %v6812_v7  ;;  %v5552_v55 = vpop.f32.mrf.mxu2  ;;  %v9809_v5 = vld [vmem:[%s15650_s1 + $0x26c] sm:$0xf]  ;;  %v6479_v13 = vor.u32 %v9733_v59, %v6476_v2  ;;  %v6655_v7 = vor.u32 %v9777_v9, %v6652_v3 }
 0x255   :  { %5795 = vmatpush.bf16.msra.mxu1 %v9419_v47  ;;  %v6668_v47 = vld [vmem:[%s15650_s1 + $0x198] sm:$0xf0]  ;;  %v6495_v57 = vor.u32 %v9737_v27, %v6492_v32  ;;  %v6783_v14 = vor.u32 %v9809_v5, %v6780_v60  ;;  %v7103_v27 = vor.u32 %v9889_v10, %v7100_v12  ;;  %v9801_v55 = vld [vmem:[%s15650_s1 + $0x22c] sm:$0xf] }
 0x256   :  { %5808 = vmatpush.bf16.msra.mxu2 %v9547_v48  ;;  %v9813_v48 = vld [vmem:[%s15650_s1 + $0x28c] sm:$0xf]  ;;  %v6671_v58 = vor.u32 %v9781_v43, %v6668_v47  ;;  %v6764_v32 = vld [vmem:[%s15650_s1 + $0x258] sm:$0xf0] }
 0x257   :  { %5817 = vmatpush.bf16.msra.mxu3 %v6543_v50  ;;  %5783 = vmatmul.bf16.vlgmr.msra.gmra.mxu0 %v11879_v15  ;;  %v5576_v50 = vpop.f32.mrf.mxu0  ;;  %v9885_v47 = vld [vmem:[%s15650_s1 + $0x4cc] sm:$0xf]  ;;  %v6876_v2 = vld [vmem:[%s15650_s1 + $0x338] sm:$0xf0] }
 0x258   :  { %5827 = vmatpush.bf16.msrb.mxu0 %v6719_v51  ;;  %5796 = vmatmul.bf16.vlgmr.msra.gmra.mxu1 %v11889_v19  ;;  %v6796_v51 = vld [vmem:[%s15650_s1 + $0x298] sm:$0xf0]  ;;  %v9833_v59 = vld [vmem:[%s15650_s1 + $0x32c] sm:$0xf] }
 0x259   :  { %5840 = vmatpush.bf16.msrb.mxu1 %v6847_v61  ;;  %9602 = vmatmul.msk.bf16.vlgmr.msra.gmra.mxu2 %vm4835_vm0, %v11992_v56  ;;  %v5577_v61 = vadd.f32 %v5576_v50, %v5564_v34  ;;  %v5565_v62 = vpop.f32.mrf.mxu3  ;;  %v6799_v63 = vor.u32 %v9813_v48, %v6796_v51  ;;  %v9773_v34 = vld [vmem:[%s15650_s1 + $0x14c] sm:$0xf]  ;;  %v7084_v48 = vld [vmem:[%s15650_s1 + $0x4d8] sm:$0xf0]  ;;  %v6879_v60 = vor.u32 %v9833_v59, %v6876_v2 }
 0x25a   :  { %5853 = vmatpush.bf16.msrb.mxu2 %v6975_v36  ;;  %v5589_v36 = vpop.f32.mrf.mxu1  ;;  %v9881_v62 = vld [vmem:[%s15650_s1 + $0x4ac] sm:$0xf]  ;;  %v6604_v3 = vld [vmem:[%s15650_s1 + $0x118] sm:$0xf0] }
 0x25b   :  { %5818 = vmatpush.bf16.msra.mxu3 %v6527_v0  ;;  %v6927_v0 = vor.u32 %v9845_v52, %v6924_v54  ;;  %v9765_v9 = vld [vmem:[%s15650_s1 + $0x10c] sm:$0xf]  ;;  %v6860_v12 = vld [vmem:[%s15650_s1 + $0x318] sm:$0xf0] }
 0x25c   :  { %5828 = vmatpush.bf16.msrb.mxu0 %v6703_v1  ;;  %v14443_v1 = vadd.f32 %v5589_v36, %v5577_v61  ;;  %v9769_v61 = vld [vmem:[%s15650_s1 + $0x12c] sm:$0xf]  ;;  %v6620_v36 = vld [vmem:[%s15650_s1 + $0x138] sm:$0xf0] }
 0x25d   :  { %5841 = vmatpush.bf16.msrb.mxu1 %v6831_v22  ;;  %v9841_v22 = vld [vmem:[%s15650_s1 + $0x36c] sm:$0xf] }
 0x25e   :  { %5854 = vmatpush.bf16.msrb.mxu2 %v6959_v8  ;;  %v6908_v8 = vld [vmem:[%s15650_s1 + $0x378] sm:$0xf0] }
 0x25f   :  { %5819 = vmatpush.bf16.msra.mxu3 %v6511_v24  ;;  %v6911_v39 = vor.u32 %v9841_v22, %v6908_v8  ;;  %v6636_v24 = vld [vmem:[%s15650_s1 + $0x158] sm:$0xf0]  ;;  %v5578_v43 = vpop.f32.mrf.mxu0  ;;  %v9797_v22 = vld [vmem:[%s15650_s1 + $0x20c] sm:$0xf] }
 0x260   :  { %5829 = vmatpush.bf16.msrb.mxu0 %v6687_v26  ;;  %v9805_v26 = vld [vmem:[%s15650_s1 + $0x24c] sm:$0xf]  ;;  %v6639_v51 = vor.u32 %v9773_v34, %v6636_v24  ;;  %v6607_v24 = vor.u32 %v9765_v9, %v6604_v3  ;;  %v7020_v3 = vld [vmem:[%s15650_s1 + $0x458] sm:$0xf0] }
 0x261   :  { %5842 = vmatpush.bf16.msrb.mxu1 %v6815_v40  ;;  %v9837_v40 = vld [vmem:[%s15650_s1 + $0x34c] sm:$0xf]  ;;  %v6767_v52 = vor.u32 %v9805_v26, %v6764_v32  ;;  %v7356_v26 = vld [vmem:[%s15650_s1 + $0x6f8] sm:$0xf0] }
 0x262   :  { %5855 = vmatpush.bf16.msrb.mxu2 %v6943_v18  ;;  %v6892_v18 = vld [vmem:[%s15650_s1 + $0x358] sm:$0xf0]  ;;  %v5591_v50 = vpop.f32.mrf.mxu1  ;;  %v9829_v8 = vld [vmem:[%s15650_s1 + $0x30c] sm:$0xf] }
 0x263   :  { %5820 = vmatpush.bf16.msra.mxu3 %v6495_v57  ;;  %v6895_v54 = vor.u32 %v9837_v40, %v6892_v18  ;;  %v7087_v57 = vor.u32 %v9885_v47, %v7084_v48  ;;  %v9953_v34 = vld [vmem:[%s15650_s1 + $0x6ec] sm:$0xf]  ;;  %v7484_v32 = vld [vmem:[%s15650_s1 + $0x7f8] sm:$0xf0]  ;;  %v6863_v18 = vor.u32 %v9829_v8, %v6860_v12 }
 0x264   :  { %5830 = vmatpush.bf16.msrb.mxu0 %v6671_v58  ;;  %v6748_v58 = vld [vmem:[%s15650_s1 + $0x238] sm:$0xf0]  ;;  %v9873_v48 = vld [vmem:[%s15650_s1 + $0x46c] sm:$0xf] }
 0x265   :  { %5843 = vmatpush.bf16.msrb.mxu1 %v6799_v63  ;;  %v7068_v63 = vld [vmem:[%s15650_s1 + $0x4b8] sm:$0xf0]  ;;  %v6751_v5 = vor.u32 %v9801_v55, %v6748_v58  ;;  %v9869_v9 = vld [vmem:[%s15650_s1 + $0x44c] sm:$0xf] }
 0x266   :  { %5856 = vmatpush.bf16.msrb.mxu2 %v6927_v0  ;;  %v6623_v0 = vor.u32 %v9769_v61, %v6620_v36  ;;  %v7071_v10 = vor.u32 %v9881_v62, %v7068_v63  ;;  %v7036_v50 = vld [vmem:[%s15650_s1 + $0x478] sm:$0xf0]  ;;  %v9949_v36 = vld [vmem:[%s15650_s1 + $0x6cc] sm:$0xf] }
 0x267   :  { %5821 = vmatpush.bf16.msra.mxu3 %v6479_v13  ;;  %v9877_v13 = vld [vmem:[%s15650_s1 + $0x48c] sm:$0xf]  ;;  %v7212_v61 = vld [vmem:[%s15650_s1 + $0x5d8] sm:$0xf0]  ;;  %v7039_v2 = vor.u32 %v9873_v48, %v7036_v50 }
 0x268   :  { %5831 = vmatpush.bf16.msrb.mxu0 %v6655_v7  ;;  %v7052_v7 = vld [vmem:[%s15650_s1 + $0x498] sm:$0xf0]  ;;  %v9977_v12 = vld [vmem:[%s15650_s1 + $0x7ac] sm:$0xf] }
 0x269   :  { %5844 = vmatpush.bf16.msrb.mxu1 %v6783_v14  ;;  %v9921_v14 = vld [vmem:[%s15650_s1 + $0x5ec] sm:$0xf]  ;;  %v7055_v43 = vor.u32 %v9877_v13, %v7052_v7  ;;  %v7340_v55 = vld [vmem:[%s15650_s1 + $0x6d8] sm:$0xf0]  ;;  %v7023_v7 = vor.u32 %v9869_v9, %v7020_v3 }
 0x26a   :  { %5857 = vmatpush.bf16.msrb.mxu2 %v6911_v39  ;;  %5822 = vmatmul.bf16.vlgmr.msra.gmra.mxu3 %v10881_v20  ;;  %v6732_v20 = vld [vmem:[%s15650_s1 + $0x218] sm:$0xf0]  ;;  %v10017_v9 = vld [vmem:[%s15650_s1 + $0x8ec] sm:$0xf] }
 0x26b   :  { %5866 = vmatpush.bf16.msrb.mxu3 %v7103_v27  ;;  %v7228_v39 = vld [vmem:[%s15650_s1 + $0x5f8] sm:$0xf0]  ;;  %v9985_v27 = vld [vmem:[%s15650_s1 + $0x7ec] sm:$0xf]  ;;  %v6735_v40 = vor.u32 %v9797_v22, %v6732_v20 }
 0x26c   :  { %5832 = vmatpush.bf16.msrb.mxu0 %v6639_v51  ;;  %v7231_v47 = vor.u32 %v9921_v14, %v7228_v39  ;;  %v7359_v51 = vor.u32 %v9953_v34, %v7356_v26  ;;  %v7468_v58 = vld [vmem:[%s15650_s1 + $0x7d8] sm:$0xf0]  ;;  %v5602_v59 = vpop.f32.mrf.mxu2  ;;  %v9913_v22 = vld [vmem:[%s15650_s1 + $0x5ac] sm:$0xf] }
 0x26d   :  { %5845 = vmatpush.bf16.msrb.mxu1 %v6767_v52  ;;  %v7487_v52 = vor.u32 %v9985_v27, %v7484_v32  ;;  %v5603_v62 = vadd.f32 %v5602_v59, %v14443_v1  ;;  %v7196_v1 = vld [vmem:[%s15650_s1 + $0x5b8] sm:$0xf0]  ;;  %v9945_v20 = vld [vmem:[%s15650_s1 + $0x6ac] sm:$0xf] }
 0x26e   :  { %5858 = vmatpush.bf16.msrb.mxu2 %v6895_v54  ;;  %v9917_v54 = vld [vmem:[%s15650_s1 + $0x5cc] sm:$0xf]  ;;  %v7452_v13 = vld [vmem:[%s15650_s1 + $0x7b8] sm:$0xf0]  ;;  %v7199_v14 = vor.u32 %v9913_v22, %v7196_v1 }
 0x26f   :  { %5867 = vmatpush.bf16.msrb.mxu3 %v7087_v57  ;;  %v9981_v57 = vld [vmem:[%s15650_s1 + $0x7cc] sm:$0xf]  ;;  %v7215_v63 = vor.u32 %v9917_v54, %v7212_v61  ;;  %v7004_v34 = vld [vmem:[%s15650_s1 + $0x438] sm:$0xf0] }
 0x270   :  { %5833 = vmatpush.bf16.msrb.mxu0 %v6623_v0  ;;  %v5615_v0 = vpop.f32.mrf.mxu3  ;;  %v9865_v39 = vld [vmem:[%s15650_s1 + $0x42c] sm:$0xf]  ;;  %v7308_v32 = vld [vmem:[%s15650_s1 + $0x698] sm:$0xf0] }
 0x271   :  { %5846 = vmatpush.bf16.msrb.mxu1 %v6751_v5  ;;  %v7343_v5 = vor.u32 %v9949_v36, %v7340_v55  ;;  %v5616_v8 = vadd.f32 %v5615_v0, %v5603_v62  ;;  %v9941_v26 = vld [vmem:[%s15650_s1 + $0x68c] sm:$0xf]  ;;  %v7007_v50 = vor.u32 %v9865_v39, %v7004_v34  ;;  %v6988_v54 = vld [vmem:[%s15650_s1 + $0x418] sm:$0xf0] }
 0x272   :  { %5859 = vmatpush.bf16.msrb.mxu2 %v6879_v60  ;;  %v7471_v60 = vor.u32 %v9981_v57, %v7468_v58  ;;  %v7311_v36 = vor.u32 %v9941_v26, %v7308_v32  ;;  %v9905_v58 = vld [vmem:[%s15650_s1 + $0x56c] sm:$0xf]  ;;  %v7164_v59 = vld [vmem:[%s15650_s1 + $0x578] sm:$0xf0] }
 0x273   :  { %5868 = vmatpush.bf16.msrb.mxu3 %v7071_v10  ;;  %v7324_v10 = vld [vmem:[%s15650_s1 + $0x6b8] sm:$0xf0]  ;;  %v10013_v34 = vld [vmem:[%s15650_s1 + $0x8cc] sm:$0xf] }
 0x274   :  { %5834 = vmatpush.bf16.msrb.mxu0 %v6607_v24  ;;  %v7327_v24 = vor.u32 %v9945_v20, %v7324_v10  ;;  %v5628_v27 = vpop.f32.mrf.mxu0  ;;  %v5604_v48 = vpop.f32.mrf.mxu2  ;;  %v7292_v62 = vld [vmem:[%s15650_s1 + $0x678] sm:$0xf0]  ;;  %v9901_v20 = vld [vmem:[%s15650_s1 + $0x54c] sm:$0xf] }
 0x275   :  { %5847 = vmatpush.bf16.msrb.mxu1 %v6735_v40  ;;  %v9973_v40 = vld [vmem:[%s15650_s1 + $0x78c] sm:$0xf]  ;;  %v7420_v0 = vld [vmem:[%s15650_s1 + $0x778] sm:$0xf0] }
 0x276   :  { %5860 = vmatpush.bf16.msrb.mxu2 %v6863_v18  ;;  %v7436_v18 = vld [vmem:[%s15650_s1 + $0x798] sm:$0xf0]  ;;  %v9933_v10 = vld [vmem:[%s15650_s1 + $0x64c] sm:$0xf] }
 0x277   :  { %5869 = vmatpush.bf16.msrb.mxu3 %v7055_v43  ;;  %5835 = vmatmul.bf16.vlgmr.msrb.gmra.mxu0 %v10884_v21  ;;  %v7180_v21 = vld [vmem:[%s15650_s1 + $0x598] sm:$0xf0]  ;;  %v5629_v43 = vadd.f32 %v5628_v27, %v5616_v8  ;;  %v7439_v55 = vor.u32 %v9973_v40, %v7436_v18  ;;  %v9897_v27 = vld [vmem:[%s15650_s1 + $0x52c] sm:$0xf] }
 0x278   :  { %5879 = vmatpush.bf16.msra.mxu0 %v7231_v47  ;;  %5848 = vmatmul.bf16.vlgmr.msrb.gmra.mxu1 %v10849_v4  ;;  %v9909_v4 = vld [vmem:[%s15650_s1 + $0x58c] sm:$0xf]  ;;  %v5641_v47 = vpop.f32.mrf.mxu1  ;;  %v5617_v61 = vpop.f32.mrf.mxu3  ;;  %v7612_v3 = vld [vmem:[%s15650_s1 + $0x8f8] sm:$0xf0] }
 0x279   :  { %5892 = vmatpush.bf16.msra.mxu1 %v7359_v51  ;;  %5861 = vmatmul.bf16.vlgmr.msrb.gmra.mxu2 %v10854_v6  ;;  %v7455_v6 = vor.u32 %v9977_v12, %v7452_v13  ;;  %v7183_v51 = vor.u32 %v9909_v4, %v7180_v21  ;;  %v14642_v57 = vadd.f32 %v5641_v47, %v5629_v43  ;;  %v7148_v8 = vld [vmem:[%s15650_s1 + $0x558] sm:$0xf0]  ;;  %v9929_v40 = vld [vmem:[%s15650_s1 + $0x62c] sm:$0xf] }
 0x27a   :  { %5905 = vmatpush.bf16.msra.mxu2 %v7487_v52  ;;  %v9861_v52 = vld [vmem:[%s15650_s1 + $0x40c] sm:$0xf]  ;;  %v7615_v12 = vor.u32 %v10017_v9, %v7612_v3  ;;  %v7276_v13 = vld [vmem:[%s15650_s1 + $0x658] sm:$0xf0]  ;;  %v7151_v4 = vor.u32 %v9901_v20, %v7148_v8 }
 0x27b   :  { %5870 = vmatpush.bf16.msrb.mxu3 %v7039_v2  ;;  %v9937_v2 = vld [vmem:[%s15650_s1 + $0x66c] sm:$0xf]  ;;  %v7279_v21 = vor.u32 %v9933_v10, %v7276_v13  ;;  %v7132_v32 = vld [vmem:[%s15650_s1 + $0x538] sm:$0xf0] }
 0x27c   :  { %5880 = vmatpush.bf16.msra.mxu0 %v7215_v63  ;;  %v9969_v63 = vld [vmem:[%s15650_s1 + $0x76c] sm:$0xf]  ;;  %v7295_v22 = vor.u32 %v9937_v2, %v7292_v62  ;;  %v5630_v39 = vpop.f32.mrf.mxu0  ;;  %v7260_v43 = vld [vmem:[%s15650_s1 + $0x638] sm:$0xf0] }
 0x27d   :  { %5893 = vmatpush.bf16.msra.mxu1 %v7343_v5  ;;  %v6991_v5 = vor.u32 %v9861_v52, %v6988_v54  ;;  %v7423_v1 = vor.u32 %v9969_v63, %v7420_v0  ;;  %v9961_v47 = vld [vmem:[%s15650_s1 + $0x72c] sm:$0xf]  ;;  %v7388_v48 = vld [vmem:[%s15650_s1 + $0x738] sm:$0xf0]  ;;  %v7135_v52 = vor.u32 %v9897_v27, %v7132_v32 }
 0x27e   :  { %5906 = vmatpush.bf16.msra.mxu2 %v7471_v60  ;;  %v7167_v60 = vor.u32 %v9905_v58, %v7164_v59  ;;  %v9893_v54 = vld [vmem:[%s15650_s1 + $0x50c] sm:$0xf]  ;;  %v7116_v61 = vld [vmem:[%s15650_s1 + $0x518] sm:$0xf0] }
 0x27f   :  { %5871 = vmatpush.bf16.msrb.mxu3 %v7023_v7  ;;  %v9965_v7 = vld [vmem:[%s15650_s1 + $0x74c] sm:$0xf]  ;;  %v7244_v58 = vld [vmem:[%s15650_s1 + $0x618] sm:$0xf0] }
 0x280   :  { %5881 = vmatpush.bf16.msra.mxu0 %v7199_v14  ;;  %v7404_v14 = vld [vmem:[%s15650_s1 + $0x758] sm:$0xf0]  ;;  %v9957_v59 = vld [vmem:[%s15650_s1 + $0x70c] sm:$0xf] }
 0x281   :  { %5894 = vmatpush.bf16.msra.mxu1 %v7327_v24  ;;  %v7596_v24 = vld [vmem:[%s15650_s1 + $0x8d8] sm:$0xf0]  ;;  %v7407_v26 = vor.u32 %v9965_v7, %v7404_v14  ;;  %v10005_v63 = vld [vmem:[%s15650_s1 + $0x88c] sm:$0xf] }
 0x282   :  { %5907 = vmatpush.bf16.msra.mxu2 %v7455_v6  ;;  %v5643_v6 = vpop.f32.mrf.mxu1  ;;  %v7599_v18 = vor.u32 %v10013_v34, %v7596_v24  ;;  %v7372_v62 = vld [vmem:[%s15650_s1 + $0x718] sm:$0xf0]  ;;  %v10049_v9 = vld [vmem:[%s15650_s1 + $0x9ec] sm:$0xf] }
 0x283   :  { %5872 = vmatpush.bf16.msrb.mxu3 %v7007_v50  ;;  %v10009_v50 = vld [vmem:[%s15650_s1 + $0x8ac] sm:$0xf]  ;;  %v7564_v0 = vld [vmem:[%s15650_s1 + $0x898] sm:$0xf0]  ;;  %v7375_v10 = vor.u32 %v9957_v59, %v7372_v62 }
 0x284   :  { %5882 = vmatpush.bf16.msra.mxu0 %v7183_v51  ;;  %v7580_v51 = vld [vmem:[%s15650_s1 + $0x8b8] sm:$0xf0]  ;;  %v10001_v7 = vld [vmem:[%s15650_s1 + $0x86c] sm:$0xf] }
 0x285   :  { %5895 = vmatpush.bf16.msra.mxu1 %v7311_v36  ;;  %v7391_v36 = vor.u32 %v9961_v47, %v7388_v48  ;;  %v7583_v2 = vor.u32 %v10009_v50, %v7580_v51  ;;  %v7740_v3 = vld [vmem:[%s15650_s1 + $0x9f8] sm:$0xf0]  ;;  %v10045_v24 = vld [vmem:[%s15650_s1 + $0x9cc] sm:$0xf] }
 0x286   :  { %5908 = vmatpush.bf16.msra.mxu2 %v7439_v55  ;;  %v9925_v55 = vld [vmem:[%s15650_s1 + $0x60c] sm:$0xf]  ;;  %v7996_v20 = vld [vmem:[%s15650_s1 + $0xbf8] sm:$0xf0]  ;;  %v7743_v13 = vor.u32 %v10049_v9, %v7740_v3 }
 0x287   :  { %5873 = vmatpush.bf16.msrb.mxu3 %v6991_v5  ;;  %v10081_v5 = vld [vmem:[%s15650_s1 + $0xaec] sm:$0xf]  ;;  %v7247_v8 = vor.u32 %v9925_v55, %v7244_v58  ;;  %v7548_v14 = vld [vmem:[%s15650_s1 + $0x878] sm:$0xf0] }
 0x288   :  { %5883 = vmatpush.bf16.msra.mxu0 %v7167_v60  ;;  %v7119_v60 = vor.u32 %v9893_v54, %v7116_v61  ;;  %v7724_v6 = vld [vmem:[%s15650_s1 + $0x9d8] sm:$0xf0]  ;;  %v9997_v48 = vld [vmem:[%s15650_s1 + $0x84c] sm:$0xf] }
 0x289   :  { %5896 = vmatpush.bf16.msra.mxu1 %v7295_v22  ;;  %v7868_v22 = vld [vmem:[%s15650_s1 + $0xaf8] sm:$0xf0]  ;;  %v10041_v54 = vld [vmem:[%s15650_s1 + $0x9ac] sm:$0xf] }
 0x28a   :  { %5909 = vmatpush.bf16.msra.mxu2 %v7423_v1  ;;  %5874 = vmatmul.bf16.vlgmr.msrb.gmra.mxu3 %v11040_v41  ;;  %v7263_v41 = vor.u32 %v9929_v40, %v7260_v43  ;;  %v10113_v1 = vld [vmem:[%s15650_s1 + $0xbec] sm:$0xf]  ;;  %v7871_v39 = vor.u32 %v10081_v5, %v7868_v22  ;;  %v7980_v27 = vld [vmem:[%s15650_s1 + $0xbd8] sm:$0xf0]  ;;  %v7551_v40 = vor.u32 %v10001_v7, %v7548_v14 }
 0x28b   :  { %5918 = vmatpush.bf16.msra.mxu3 %v7615_v12  ;;  %v7567_v12 = vor.u32 %v10005_v63, %v7564_v0  ;;  %v7999_v34 = vor.u32 %v10113_v1, %v7996_v20  ;;  %v7727_v43 = vor.u32 %v10045_v24, %v7724_v6  ;;  %v7532_v50 = vld [vmem:[%s15650_s1 + $0x858] sm:$0xf0]  ;;  %v10073_v61 = vld [vmem:[%s15650_s1 + $0xaac] sm:$0xf] }
 0x28c   :  { %5884 = vmatpush.bf16.msra.mxu0 %v7151_v4  ;;  %v10077_v4 = vld [vmem:[%s15650_s1 + $0xacc] sm:$0xf]  ;;  %v5654_v32 = vpop.f32.mrf.mxu2  ;;  %v7964_v58 = vld [vmem:[%s15650_s1 + $0xbb8] sm:$0xf0] }
 0x28d   :  { %5897 = vmatpush.bf16.msra.mxu1 %v7279_v21  ;;  %v7852_v21 = vld [vmem:[%s15650_s1 + $0xad8] sm:$0xf0]  ;;  %v5667_v47 = vpop.f32.mrf.mxu3  ;;  %v10105_v55 = vld [vmem:[%s15650_s1 + $0xbac] sm:$0xf] }
 0x28e   :  { %5910 = vmatpush.bf16.msra.mxu2 %v7407_v26  ;;  %v10109_v26 = vld [vmem:[%s15650_s1 + $0xbcc] sm:$0xf]  ;;  %v7855_v51 = vor.u32 %v10077_v4, %v7852_v21  ;;  %v7967_v63 = vor.u32 %v10105_v55, %v7964_v58  ;;  %v7692_v0 = vld [vmem:[%s15650_s1 + $0x998] sm:$0xf0] }
 0x28f   :  { %5919 = vmatpush.bf16.msra.mxu3 %v7599_v18  ;;  %v5655_v18 = vadd.f32 %v5654_v32, %v14642_v57  ;;  %v7708_v57 = vld [vmem:[%s15650_s1 + $0x9b8] sm:$0xf0]  ;;  %v10069_v9 = vld [vmem:[%s15650_s1 + $0xa8c] sm:$0xf] }
 0x290   :  { %5885 = vmatpush.bf16.msra.mxu0 %v7135_v52  ;;  %v7983_v52 = vor.u32 %v10109_v26, %v7980_v27  ;;  %v7711_v59 = vor.u32 %v10041_v54, %v7708_v57  ;;  %v7820_v5 = vld [vmem:[%s15650_s1 + $0xa98] sm:$0xf0]  ;;  %v10033_v6 = vld [vmem:[%s15650_s1 + $0x96c] sm:$0xf] }
 0x291   :  { %5898 = vmatpush.bf16.msra.mxu1 %v7263_v41  ;;  %v5668_v41 = vadd.f32 %v5667_v47, %v5655_v18  ;;  %v7948_v22 = vld [vmem:[%s15650_s1 + $0xb98] sm:$0xf0]  ;;  %v10065_v21 = vld [vmem:[%s15650_s1 + $0xa6c] sm:$0xf] }
 0x292   :  { %5911 = vmatpush.bf16.msra.mxu2 %v7391_v36  ;;  %v7836_v36 = vld [vmem:[%s15650_s1 + $0xab8] sm:$0xf0]  ;;  %v10097_v27 = vld [vmem:[%s15650_s1 + $0xb6c] sm:$0xf] }
 0x293   :  { %5920 = vmatpush.bf16.msra.mxu3 %v7583_v2  ;;  %v7516_v2 = vld [vmem:[%s15650_s1 + $0x838] sm:$0xf0]  ;;  %v7839_v62 = vor.u32 %v10073_v61, %v7836_v36  ;;  %v10061_v54 = vld [vmem:[%s15650_s1 + $0xa4c] sm:$0xf] }
 0x294   :  { %5886 = vmatpush.bf16.msra.mxu0 %v7119_v60  ;;  %v5680_v3 = vpop.f32.mrf.mxu0  ;;  %v10101_v60 = vld [vmem:[%s15650_s1 + $0xb8c] sm:$0xf]  ;;  %v7500_v7 = vld [vmem:[%s15650_s1 + $0x818] sm:$0xf0] }
 0x295   :  { %5899 = vmatpush.bf16.msra.mxu1 %v7247_v8  ;;  %v5681_v1 = vadd.f32 %v5680_v3, %v5668_v41  ;;  %v5693_v20 = vpop.f32.mrf.mxu1  ;;  %v5656_v8 = vpop.f32.mrf.mxu2  ;;  %v7676_v4 = vld [vmem:[%s15650_s1 + $0x978] sm:$0xf0]  ;;  %v10093_v41 = vld [vmem:[%s15650_s1 + $0xb4c] sm:$0xf] }
 0x296   :  { %5912 = vmatpush.bf16.msra.mxu2 %v7375_v10  ;;  %v5669_v14 = vpop.f32.mrf.mxu3  ;;  %v7804_v26 = vld [vmem:[%s15650_s1 + $0xa78] sm:$0xf0]  ;;  %v7679_v47 = vor.u32 %v10033_v6, %v7676_v4  ;;  %v10141_v58 = vld [vmem:[%s15650_s1 + $0xccc] sm:$0xf] }
 0x297   :  { %5921 = vmatpush.bf16.msra.mxu3 %v7567_v12  ;;  %5887 = vmatmul.bf16.vlgmr.msra.gmra.mxu0 %v11044_v44  ;;  %v9993_v44 = vld [vmem:[%s15650_s1 + $0x82c] sm:$0xf]  ;;  %v14841_v24 = vadd.f32 %v5693_v20, %v5681_v1  ;;  %v7932_v32 = vld [vmem:[%s15650_s1 + $0xb78] sm:$0xf0] }
 0x298   :  { %5931 = vmatpush.bf16.msrb.mxu0 %v7743_v13  ;;  %5900 = vmatmul.bf16.vlgmr.msra.gmra.mxu1 %v11032_v38  ;;  %v10037_v38 = vld [vmem:[%s15650_s1 + $0x98c] sm:$0xf]  ;;  %v7519_v10 = vor.u32 %v9993_v44, %v7516_v2  ;;  %v8124_v18 = vld [vmem:[%s15650_s1 + $0xcf8] sm:$0xf0] }
 0x299   :  { %5944 = vmatpush.bf16.msrb.mxu1 %v7871_v39  ;;  %5913 = vmatmul.bf16.vlgmr.msra.gmra.mxu2 %v11042_v42  ;;  %v7535_v42 = vor.u32 %v9997_v48, %v7532_v50  ;;  %v7695_v12 = vor.u32 %v10037_v38, %v7692_v0  ;;  %v9989_v13 = vld [vmem:[%s15650_s1 + $0x80c] sm:$0xf]  ;;  %v7823_v39 = vor.u32 %v10069_v9, %v7820_v5  ;;  %v7788_v61 = vld [vmem:[%s15650_s1 + $0xa58] sm:$0xf0] }
 0x29a   :  { %5957 = vmatpush.bf16.msrb.mxu2 %v7999_v34  ;;  %v7951_v34 = vor.u32 %v10101_v60, %v7948_v22  ;;  %v7807_v48 = vor.u32 %v10065_v21, %v7804_v26  ;;  %v7935_v50 = vor.u32 %v10097_v27, %v7932_v32  ;;  %v7916_v36 = vld [vmem:[%s15650_s1 + $0xb58] sm:$0xf0]  ;;  %v7791_v2 = vor.u32 %v10061_v54, %v7788_v61  ;;  %v10057_v0 = vld [vmem:[%s15650_s1 + $0xa2c] sm:$0xf] }
 0x29b   :  { %5922 = vmatpush.bf16.msra.mxu3 %v7551_v40  ;;  %v10145_v40 = vld [vmem:[%s15650_s1 + $0xcec] sm:$0xf]  ;;  %v7644_v38 = vld [vmem:[%s15650_s1 + $0x938] sm:$0xf0] }
 0x29c   :  { %5932 = vmatpush.bf16.msrb.mxu0 %v7727_v43  ;;  %v7503_v43 = vor.u32 %v9989_v13, %v7500_v7  ;;  %v8127_v57 = vor.u32 %v10145_v40, %v8124_v18  ;;  %v5682_v55 = vpop.f32.mrf.mxu0  ;;  %v7772_v3 = vld [vmem:[%s15650_s1 + $0xa38] sm:$0xf0]  ;;  %v10089_v5 = vld [vmem:[%s15650_s1 + $0xb2c] sm:$0xf] }
 0x29d   :  { %5945 = vmatpush.bf16.msrb.mxu1 %v7855_v51  ;;  %v10029_v51 = vld [vmem:[%s15650_s1 + $0x94c] sm:$0xf]  ;;  %v7900_v60 = vld [vmem:[%s15650_s1 + $0xb38] sm:$0xf0] }
 0x29e   :  { %5958 = vmatpush.bf16.msrb.mxu2 %v7983_v52  ;;  %v7660_v52 = vld [vmem:[%s15650_s1 + $0x958] sm:$0xf0]  ;;  %v10137_v22 = vld [vmem:[%s15650_s1 + $0xcac] sm:$0xf] }
 0x29f   :  { %5923 = vmatpush.bf16.msra.mxu3 %v7535_v42  ;;  %v8108_v42 = vld [vmem:[%s15650_s1 + $0xcd8] sm:$0xf0]  ;;  %v7663_v44 = vor.u32 %v10029_v51, %v7660_v52  ;;  %v10021_v8 = vld [vmem:[%s15650_s1 + $0x90c] sm:$0xf] }
 0x2a0   :  { %5933 = vmatpush.bf16.msrb.mxu0 %v7711_v59  ;;  %v5695_v59 = vpop.f32.mrf.mxu1  ;;  %v8111_v9 = vor.u32 %v10141_v58, %v8108_v42  ;;  %v8092_v1 = vld [vmem:[%s15650_s1 + $0xcb8] sm:$0xf0]  ;;  %v10053_v13 = vld [vmem:[%s15650_s1 + $0xa0c] sm:$0xf] }
 0x2a1   :  { %5946 = vmatpush.bf16.msrb.mxu1 %v7839_v62  ;;  %v7919_v62 = vor.u32 %v10093_v41, %v7916_v36  ;;  %v7756_v7 = vld [vmem:[%s15650_s1 + $0xa18] sm:$0xf0]  ;;  %v10085_v14 = vld [vmem:[%s15650_s1 + $0xb0c] sm:$0xf] }
 0x2a2   :  { %5959 = vmatpush.bf16.msrb.mxu2 %v7967_v63  ;;  %v10025_v63 = vld [vmem:[%s15650_s1 + $0x92c] sm:$0xf]  ;;  %v8076_v4 = vld [vmem:[%s15650_s1 + $0xc98] sm:$0xf0] }
 0x2a3   :  { %5924 = vmatpush.bf16.msra.mxu3 %v7519_v10  ;;  %v7647_v20 = vor.u32 %v10025_v63, %v7644_v38  ;;  %v7628_v10 = vld [vmem:[%s15650_s1 + $0x918] sm:$0xf0]  ;;  %v10133_v6 = vld [vmem:[%s15650_s1 + $0xc8c] sm:$0xf] }
 0x2a4   :  { %5934 = vmatpush.bf16.msrb.mxu0 %v7695_v12  ;;  %v7903_v12 = vor.u32 %v10089_v5, %v7900_v60  ;;  %v10177_v21 = vld [vmem:[%s15650_s1 + $0xdec] sm:$0xf]  ;;  %v8252_v26 = vld [vmem:[%s15650_s1 + $0xdf8] sm:$0xf0]  ;;  %v7631_v32 = vor.u32 %v10021_v8, %v7628_v10 }
 0x2a5   :  { %5947 = vmatpush.bf16.msrb.mxu1 %v7823_v39  ;;  %v8095_v39 = vor.u32 %v10137_v22, %v8092_v1  ;;  %v10209_v27 = vld [vmem:[%s15650_s1 + $0xeec] sm:$0xf]  ;;  %v8380_v40 = vld [vmem:[%s15650_s1 + $0xef8] sm:$0xf0]  ;;  %v8255_v51 = vor.u32 %v10177_v21, %v8252_v26 }
 0x2a6   :  { %5960 = vmatpush.bf16.msrb.mxu2 %v7951_v34  ;;  %v7884_v34 = vld [vmem:[%s15650_s1 + $0xb18] sm:$0xf0]  ;;  %v10241_v18 = vld [vmem:[%s15650_s1 + $0xfec] sm:$0xf] }
 0x2a7   :  { %5925 = vmatpush.bf16.msra.mxu3 %v7503_v43  ;;  %v8508_v43 = vld [vmem:[%s15650_s1 + $0xff8] sm:$0xf0]  ;;  %v10129_v52 = vld [vmem:[%s15650_s1 + $0xc6c] sm:$0xf] }
 0x2a8   :  { %5935 = vmatpush.bf16.msrb.mxu0 %v7679_v47  ;;  %v7759_v47 = vor.u32 %v10053_v13, %v7756_v7  ;;  %v8060_v54 = vld [vmem:[%s15650_s1 + $0xc78] sm:$0xf0]  ;;  %v8511_v61 = vor.u32 %v10241_v18, %v8508_v43  ;;  %v10173_v41 = vld [vmem:[%s15650_s1 + $0xdcc] sm:$0xf] }
 0x2a9   :  { %5948 = vmatpush.bf16.msrb.mxu1 %v7807_v48  ;;  %v7887_v48 = vor.u32 %v10085_v14, %v7884_v34  ;;  %v8236_v36 = vld [vmem:[%s15650_s1 + $0xdd8] sm:$0xf0]  ;;  %v10205_v55 = vld [vmem:[%s15650_s1 + $0xecc] sm:$0xf] }
 0x2aa   :  { %5961 = vmatpush.bf16.msrb.mxu2 %v7935_v50  ;;  %5926 = vmatmul.bf16.vlgmr.msra.gmra.mxu3 %v11233_v25  ;;  %v7775_v25 = vor.u32 %v10057_v0, %v7772_v3  ;;  %v8079_v50 = vor.u32 %v10133_v6, %v8076_v4  ;;  %v8364_v58 = vld [vmem:[%s15650_s1 + $0xed8] sm:$0xf0]  ;;  %v10237_v42 = vld [vmem:[%s15650_s1 + $0xfcc] sm:$0xf]  ;;  %v8239_v63 = vor.u32 %v10173_v41, %v8236_v36 }
 0x2ab   :  { %5970 = vmatpush.bf16.msrb.mxu3 %v8127_v57  ;;  %v8383_v57 = vor.u32 %v10209_v27, %v8380_v40  ;;  %v8492_v59 = vld [vmem:[%s15650_s1 + $0xfd8] sm:$0xf0]  ;;  %v10125_v0 = vld [vmem:[%s15650_s1 + $0xc4c] sm:$0xf]  ;;  %v8367_v3 = vor.u32 %v10205_v55, %v8364_v58 }
 0x2ac   :  { %5936 = vmatpush.bf16.msrb.mxu0 %v7663_v44  ;;  %v5706_v44 = vpop.f32.mrf.mxu2  ;;  %v8495_v5 = vor.u32 %v10237_v42, %v8492_v59  ;;  %v10169_v60 = vld [vmem:[%s15650_s1 + $0xdac] sm:$0xf]  ;;  %v8476_v10 = vld [vmem:[%s15650_s1 + $0xfb8] sm:$0xf0] }
 0x2ad   :  { %5949 = vmatpush.bf16.msrb.mxu1 %v7791_v2  ;;  %v8063_v2 = vor.u32 %v10129_v52, %v8060_v54  ;;  %v5719_v38 = vpop.f32.mrf.mxu3  ;;  %v10201_v22 = vld [vmem:[%s15650_s1 + $0xeac] sm:$0xf]  ;;  %v8204_v14 = vld [vmem:[%s15650_s1 + $0xd98] sm:$0xf0] }
 0x2ae   :  { %5962 = vmatpush.bf16.msrb.mxu2 %v7919_v62  ;;  %v5707_v62 = vadd.f32 %v5706_v44, %v14841_v24  ;;  %v8220_v24 = vld [vmem:[%s15650_s1 + $0xdb8] sm:$0xf0]  ;;  %v10233_v8 = vld [vmem:[%s15650_s1 + $0xfac] sm:$0xf] }
 0x2af   :  { %5971 = vmatpush.bf16.msrb.mxu3 %v8111_v9  ;;  %v8044_v9 = vld [vmem:[%s15650_s1 + $0xc58] sm:$0xf0]  ;;  %v8479_v7 = vor.u32 %v10233_v8, %v8476_v10  ;;  %v10229_v4 = vld [vmem:[%s15650_s1 + $0xf8c] sm:$0xf] }
 0x2b0   :  { %5937 = vmatpush.bf16.msrb.mxu0 %v7647_v20  ;;  %v5720_v1 = vadd.f32 %v5719_v38, %v5707_v62  ;;  %v8348_v20 = vld [vmem:[%s15650_s1 + $0xeb8] sm:$0xf0]  ;;  %v10117_v43 = vld [vmem:[%s15650_s1 + $0xc0c] sm:$0xf] }
 0x2b1   :  { %5950 = vmatpush.bf16.msrb.mxu1 %v7775_v25  ;;  %v8223_v25 = vor.u32 %v10169_v60, %v8220_v24  ;;  %v8351_v13 = vor.u32 %v10201_v22, %v8348_v20  ;;  %v8332_v6 = vld [vmem:[%s15650_s1 + $0xe98] sm:$0xf0]  ;;  %v10161_v54 = vld [vmem:[%s15650_s1 + $0xd6c] sm:$0xf] }
 0x2b2   :  { %5963 = vmatpush.bf16.msrb.mxu2 %v7903_v12  ;;  %v8028_v12 = vld [vmem:[%s15650_s1 + $0xc38] sm:$0xf0]  ;;  %v10225_v36 = vld [vmem:[%s15650_s1 + $0xf6c] sm:$0xf] }
 0x2b3   :  { %5972 = vmatpush.bf16.msrb.mxu3 %v8095_v39  ;;  %v10197_v39 = vld [vmem:[%s15650_s1 + $0xe8c] sm:$0xf]  ;;  %v8460_v21 = vld [vmem:[%s15650_s1 + $0xf98] sm:$0xf0] }
 0x2b4   :  { %5938 = vmatpush.bf16.msrb.mxu0 %v7631_v32  ;;  %v5732_v34 = vpop.f32.mrf.mxu0  ;;  %v5708_v32 = vpop.f32.mrf.mxu2  ;;  %v8316_v41 = vld [vmem:[%s15650_s1 + $0xe78] sm:$0xf0]  ;;  %v10273_v58 = vld [vmem:[%s15650_s1 + $0x10ec] sm:$0xf] }
 0x2b5   :  { %5951 = vmatpush.bf16.msrb.mxu1 %v7759_v47  ;;  %v5733_v26 = vadd.f32 %v5732_v34, %v5720_v1  ;;  %v5745_v27 = vpop.f32.mrf.mxu1  ;;  %v8012_v47 = vld [vmem:[%s15650_s1 + $0xc18] sm:$0xf0]  ;;  %v10269_v22 = vld [vmem:[%s15650_s1 + $0x10cc] sm:$0xf] }
 0x2b6   :  { %5964 = vmatpush.bf16.msrb.mxu2 %v7887_v48  ;;  %v5721_v48 = vpop.f32.mrf.mxu3  ;;  %v8444_v55 = vld [vmem:[%s15650_s1 + $0xf78] sm:$0xf0]  ;;  %v8015_v59 = vor.u32 %v10117_v43, %v8012_v47  ;;  %v10261_v47 = vld [vmem:[%s15650_s1 + $0x108c] sm:$0xf] }
 0x2b7   :  { %5973 = vmatpush.bf16.msrb.mxu3 %v8079_v50  ;;  %5939 = vmatmul.bf16.vlgmr.msrb.gmra.mxu0 %v11246_v30  ;;  %v8047_v30 = vor.u32 %v10125_v0, %v8044_v9  ;;  %v8335_v50 = vor.u32 %v10197_v39, %v8332_v6  ;;  %v15040_v52 = vadd.f32 %v5745_v27, %v5733_v26  ;;  %v8636_v42 = vld [vmem:[%s15650_s1 + $0x10f8] sm:$0xf0]  ;;  %v10189_v0 = vld [vmem:[%s15650_s1 + $0xe4c] sm:$0xf] }
 0x2b8   :  { %5983 = vmatpush.bf16.msra.mxu0 %v8255_v51  ;;  %5952 = vmatmul.bf16.vlgmr.msrb.gmra.mxu1 %v11244_v29  ;;  %v10165_v29 = vld [vmem:[%s15650_s1 + $0xd8c] sm:$0xf]  ;;  %v8463_v51 = vor.u32 %v10229_v4, %v8460_v21  ;;  %v8447_v62 = vor.u32 %v10225_v36, %v8444_v55  ;;  %v8172_v38 = vld [vmem:[%s15650_s1 + $0xd58] sm:$0xf0]  ;;  %v8639_v9 = vor.u32 %v10273_v58, %v8636_v42 }
 0x2b9   :  { %5996 = vmatpush.bf16.msra.mxu1 %v8383_v57  ;;  %5965 = vmatmul.bf16.vlgmr.msrb.gmra.mxu2 %v11254_v33  ;;  %v10121_v33 = vld [vmem:[%s15650_s1 + $0xc2c] sm:$0xf]  ;;  %v8207_v18 = vor.u32 %v10165_v29, %v8204_v14  ;;  %v8188_v57 = vld [vmem:[%s15650_s1 + $0xd78] sm:$0xf0] }
 0x2ba   :  { %6009 = vmatpush.bf16.msra.mxu2 %v8511_v61  ;;  %v8031_v40 = vor.u32 %v10121_v33, %v8028_v12  ;;  %v10193_v61 = vld [vmem:[%s15650_s1 + $0xe6c] sm:$0xf]  ;;  %v8191_v44 = vor.u32 %v10161_v54, %v8188_v57  ;;  %v8428_v60 = vld [vmem:[%s15650_s1 + $0xf58] sm:$0xf0] }
 0x2bb   :  { %5974 = vmatpush.bf16.msrb.mxu3 %v8063_v2  ;;  %v8319_v2 = vor.u32 %v10193_v61, %v8316_v41  ;;  %v8620_v1 = vld [vmem:[%s15650_s1 + $0x10d8] sm:$0xf0]  ;;  %v10185_v12 = vld [vmem:[%s15650_s1 + $0xe2c] sm:$0xf] }
 0x2bc   :  { %5984 = vmatpush.bf16.msra.mxu0 %v8239_v63  ;;  %v10157_v63 = vld [vmem:[%s15650_s1 + $0xd4c] sm:$0xf]  ;;  %v5734_v24 = vpop.f32.mrf.mxu0  ;;  %v8156_v33 = vld [vmem:[%s15650_s1 + $0xd38] sm:$0xf0] }
 0x2bd   :  { %5997 = vmatpush.bf16.msra.mxu1 %v8367_v3  ;;  %v8300_v3 = vld [vmem:[%s15650_s1 + $0xe58] sm:$0xf0]  ;;  %v5747_v20 = vpop.f32.mrf.mxu1  ;;  %v8175_v8 = vor.u32 %v10157_v63, %v8172_v38  ;;  %v10217_v29 = vld [vmem:[%s15650_s1 + $0xf2c] sm:$0xf] }
 0x2be   :  { %6010 = vmatpush.bf16.msra.mxu2 %v8495_v5  ;;  %v10221_v5 = vld [vmem:[%s15650_s1 + $0xf4c] sm:$0xf]  ;;  %v8303_v10 = vor.u32 %v10189_v0, %v8300_v3  ;;  %v8412_v14 = vld [vmem:[%s15650_s1 + $0xf38] sm:$0xf0] }
 0x2bf   :  { %5975 = vmatpush.bf16.msrb.mxu3 %v8047_v30  ;;  %v8431_v30 = vor.u32 %v10221_v5, %v8428_v60  ;;  %v10265_v39 = vld [vmem:[%s15650_s1 + $0x10ac] sm:$0xf]  ;;  %v8604_v34 = vld [vmem:[%s15650_s1 + $0x10b8] sm:$0xf0]  ;;  %v8415_v26 = vor.u32 %v10217_v29, %v8412_v14 }
 0x2c0   :  { %5985 = vmatpush.bf16.msra.mxu0 %v8223_v25  ;;  %v10153_v25 = vld [vmem:[%s15650_s1 + $0xd2c] sm:$0xf]  ;;  %v8140_v21 = vld [vmem:[%s15650_s1 + $0xd18] sm:$0xf0] }
 0x2c1   :  { %5998 = vmatpush.bf16.msra.mxu1 %v8351_v13  ;;  %v8623_v13 = vor.u32 %v10269_v22, %v8620_v1  ;;  %v8159_v6 = vor.u32 %v10153_v25, %v8156_v33  ;;  %v10149_v4 = vld [vmem:[%s15650_s1 + $0xd0c] sm:$0xf]  ;;  %v8268_v32 = vld [vmem:[%s15650_s1 + $0xe18] sm:$0xf0] }
 0x2c2   :  { %6011 = vmatpush.bf16.msra.mxu2 %v8479_v7  ;;  %v8284_v7 = vld [vmem:[%s15650_s1 + $0xe38] sm:$0xf0]  ;;  %v10181_v27 = vld [vmem:[%s15650_s1 + $0xe0c] sm:$0xf]  ;;  %v8143_v57 = vor.u32 %v10149_v4, %v8140_v21 }
 0x2c3   :  { %5976 = vmatpush.bf16.msrb.mxu3 %v8031_v40  ;;  %v10213_v40 = vld [vmem:[%s15650_s1 + $0xf0c] sm:$0xf]  ;;  %v8396_v43 = vld [vmem:[%s15650_s1 + $0xf18] sm:$0xf0]  ;;  %v8271_v55 = vor.u32 %v10181_v27, %v8268_v32 }
 0x2c4   :  { %5986 = vmatpush.bf16.msra.mxu0 %v8207_v18  ;;  %v8607_v18 = vor.u32 %v10265_v39, %v8604_v34  ;;  %v8588_v48 = vld [vmem:[%s15650_s1 + $0x1098] sm:$0xf0]  ;;  %v10337_v54 = vld [vmem:[%s15650_s1 + $0x12ec] sm:$0xf]  ;;  %v8399_v58 = vor.u32 %v10213_v40, %v8396_v43 }
 0x2c5   :  { %5999 = vmatpush.bf16.msra.mxu1 %v8335_v50  ;;  %v10305_v50 = vld [vmem:[%s15650_s1 + $0x11ec] sm:$0xf]  ;;  %v8892_v61 = vld [vmem:[%s15650_s1 + $0x12f8] sm:$0xf0]  ;;  %v8591_v42 = vor.u32 %v10261_v47, %v8588_v48 }
 0x2c6   :  { %6012 = vmatpush.bf16.msra.mxu2 %v8463_v51  ;;  %v8764_v51 = vld [vmem:[%s15650_s1 + $0x11f8] sm:$0xf0]  ;;  %v10369_v41 = vld [vmem:[%s15650_s1 + $0x13ec] sm:$0xf] }
 0x2c7   :  { %5977 = vmatpush.bf16.msrb.mxu3 %v8015_v59  ;;  %v9020_v36 = vld [vmem:[%s15650_s1 + $0x13f8] sm:$0xf0]  ;;  %v8767_v59 = vor.u32 %v10305_v50, %v8764_v51  ;;  %v10301_v38 = vld [vmem:[%s15650_s1 + $0x11cc] sm:$0xf] }
 0x2c8   :  { %5987 = vmatpush.bf16.msra.mxu0 %v8191_v44  ;;  %v10257_v44 = vld [vmem:[%s15650_s1 + $0x106c] sm:$0xf]  ;;  %v9023_v63 = vor.u32 %v10369_v41, %v9020_v36  ;;  %v8748_v0 = vld [vmem:[%s15650_s1 + $0x11d8] sm:$0xf0] }
 0x2c9   :  { %6000 = vmatpush.bf16.msra.mxu1 %v8319_v2  ;;  %v8572_v2 = vld [vmem:[%s15650_s1 + $0x1078] sm:$0xf0]  ;;  %v10365_v5 = vld [vmem:[%s15650_s1 + $0x13cc] sm:$0xf]  ;;  %v8751_v20 = vor.u32 %v10301_v38, %v8748_v0 }
 0x2ca   :  { %6013 = vmatpush.bf16.msra.mxu2 %v8447_v62  ;;  %5978 = vmatmul.bf16.vlgmr.msrb.gmra.mxu3 %v11443_v23  ;;  %v8287_v23 = vor.u32 %v10185_v12, %v8284_v7  ;;  %v8895_v62 = vor.u32 %v10337_v54, %v8892_v61  ;;  %v8876_v3 = vld [vmem:[%s15650_s1 + $0x12d8] sm:$0xf0]  ;;  %v8575_v22 = vor.u32 %v10257_v44, %v8572_v2  ;;  %v10297_v12 = vld [vmem:[%s15650_s1 + $0x11ac] sm:$0xf] }
 0x2cb   :  { %6022 = vmatpush.bf16.msra.mxu3 %v8639_v9  ;;  %v10333_v9 = vld [vmem:[%s15650_s1 + $0x12cc] sm:$0xf]  ;;  %v9004_v60 = vld [vmem:[%s15650_s1 + $0x13d8] sm:$0xf0] }
 0x2cc   :  { %5988 = vmatpush.bf16.msra.mxu0 %v8175_v8  ;;  %v5758_v24 = vpop.f32.mrf.mxu2  ;;  %v8879_v25 = vor.u32 %v10333_v9, %v8876_v3  ;;  %v9007_v33 = vor.u32 %v10365_v5, %v9004_v60  ;;  %v8860_v29 = vld [vmem:[%s15650_s1 + $0x12b8] sm:$0xf0]  ;;  %v10361_v14 = vld [vmem:[%s15650_s1 + $0x13ac] sm:$0xf] }
 0x2cd   :  { %6001 = vmatpush.bf16.msra.mxu1 %v8303_v10  ;;  %v5759_v1 = vadd.f32 %v5758_v24, %v15040_v52  ;;  %v5771_v8 = vpop.f32.mrf.mxu3  ;;  %v10253_v10 = vld [vmem:[%s15650_s1 + $0x104c] sm:$0xf]  ;;  %v8732_v52 = vld [vmem:[%s15650_s1 + $0x11b8] sm:$0xf0] }
 0x2ce   :  { %6014 = vmatpush.bf16.msra.mxu2 %v8431_v30  ;;  %v8556_v30 = vld [vmem:[%s15650_s1 + $0x1058] sm:$0xf0]  ;;  %v8735_v34 = vor.u32 %v10297_v12, %v8732_v52  ;;  %v10357_v32 = vld [vmem:[%s15650_s1 + $0x138c] sm:$0xf] }
 0x2cf   :  { %6023 = vmatpush.bf16.msra.mxu3 %v8623_v13  ;;  %v10329_v13 = vld [vmem:[%s15650_s1 + $0x12ac] sm:$0xf]  ;;  %v5772_v7 = vadd.f32 %v5771_v8, %v5759_v1  ;;  %v8988_v39 = vld [vmem:[%s15650_s1 + $0x13b8] sm:$0xf0] }
 0x2d0   :  { %5989 = vmatpush.bf16.msra.mxu0 %v8159_v6  ;;  %v8540_v6 = vld [vmem:[%s15650_s1 + $0x1038] sm:$0xf0]  ;;  %v8863_v4 = vor.u32 %v10329_v13, %v8860_v29  ;;  %v8991_v21 = vor.u32 %v10361_v14, %v8988_v39  ;;  %v10245_v54 = vld [vmem:[%s15650_s1 + $0x100c] sm:$0xf] }
 0x2d1   :  { %6002 = vmatpush.bf16.msra.mxu1 %v8287_v23  ;;  %v8716_v23 = vld [vmem:[%s15650_s1 + $0x1198] sm:$0xf0]  ;;  %v10353_v2 = vld [vmem:[%s15650_s1 + $0x136c] sm:$0xf] }
 0x2d2   :  { %6015 = vmatpush.bf16.msra.mxu2 %v8415_v26  ;;  %v10325_v26 = vld [vmem:[%s15650_s1 + $0x128c] sm:$0xf]  ;;  %v8844_v27 = vld [vmem:[%s15650_s1 + $0x1298] sm:$0xf0] }
 0x2d3   :  { %6024 = vmatpush.bf16.msra.mxu3 %v8607_v18  ;;  %v8972_v40 = vld [vmem:[%s15650_s1 + $0x1398] sm:$0xf0]  ;;  %v8847_v41 = vor.u32 %v10325_v26, %v8844_v27  ;;  %v10285_v60 = vld [vmem:[%s15650_s1 + $0x114c] sm:$0xf] }
 0x2d4   :  { %5990 = vmatpush.bf16.msra.mxu0 %v8143_v57  ;;  %v5784_v18 = vpop.f32.mrf.mxu0  ;;  %v5760_v43 = vpop.f32.mrf.mxu2  ;;  %v8524_v57 = vld [vmem:[%s15650_s1 + $0x1018] sm:$0xf0]  ;;  %v8975_v36 = vor.u32 %v10357_v32, %v8972_v40  ;;  %v10349_v8 = vld [vmem:[%s15650_s1 + $0x134c] sm:$0xf] }
 0x2d5   :  { %6003 = vmatpush.bf16.msra.mxu1 %v8271_v55  ;;  %v5785_v47 = vadd.f32 %v5784_v18, %v5772_v7  ;;  %v5797_v51 = vpop.f32.mrf.mxu1  ;;  %v5773_v61 = vpop.f32.mrf.mxu3  ;;  %v10289_v55 = vld [vmem:[%s15650_s1 + $0x116c] sm:$0xf]  ;;  %v8828_v44 = vld [vmem:[%s15650_s1 + $0x1278] sm:$0xf0]  ;;  %v8527_v0 = vor.u32 %v10245_v54, %v8524_v57 }
 0x2d6   :  { %6016 = vmatpush.bf16.msra.mxu2 %v8399_v58  ;;  %v8700_v58 = vld [vmem:[%s15650_s1 + $0x1178] sm:$0xf0]  ;;  %v10281_v14 = vld [vmem:[%s15650_s1 + $0x112c] sm:$0xf] }
 0x2d7   :  { %6025 = vmatpush.bf16.msra.mxu3 %v8591_v42  ;;  %5991 = vmatmul.bf16.vlgmr.msra.gmra.mxu0 %v11456_v31  ;;  %v8559_v31 = vor.u32 %v10253_v10, %v8556_v30  ;;  %v10321_v42 = vld [vmem:[%s15650_s1 + $0x126c] sm:$0xf]  ;;  %v9148_v38 = vld [vmem:[%s15650_s1 + $0x14f8] sm:$0xf0]  ;;  %v8703_v9 = vor.u32 %v10289_v55, %v8700_v58 }
 0x2d8   :  { %6035 = vmatpush.bf16.msrb.mxu0 %v8767_v59  ;;  %6004 = vmatmul.bf16.vlgmr.msra.gmra.mxu1 %v11454_v28  ;;  %v10293_v28 = vld [vmem:[%s15650_s1 + $0x118c] sm:$0xf]  ;;  %v5798_v59 = vadd.f32 %v5797_v51, %v5785_v47  ;;  %v8831_v3 = vor.u32 %v10321_v42, %v8828_v44  ;;  %v8684_v24 = vld [vmem:[%s15650_s1 + $0x1158] sm:$0xf0] }
 0x2d9   :  { %6048 = vmatpush.bf16.msrb.mxu1 %v8895_v62  ;;  %6017 = vmatmul.bf16.vlgmr.msra.gmra.mxu2 %v11464_v35  ;;  %v10249_v35 = vld [vmem:[%s15650_s1 + $0x102c] sm:$0xf]  ;;  %v8719_v50 = vor.u32 %v10293_v28, %v8716_v23  ;;  %v8956_v62 = vld [vmem:[%s15650_s1 + $0x1378] sm:$0xf0]  ;;  %v8687_v12 = vor.u32 %v10285_v60, %v8684_v24 }
 0x2da   :  { %6061 = vmatpush.bf16.msrb.mxu2 %v9023_v63  ;;  %v8543_v48 = vor.u32 %v10249_v35, %v8540_v6  ;;  %v10401_v63 = vld [vmem:[%s15650_s1 + $0x14ec] sm:$0xf]  ;;  %v8959_v5 = vor.u32 %v10353_v2, %v8956_v62  ;;  %v8940_v10 = vld [vmem:[%s15650_s1 + $0x1358] sm:$0xf0] }
 0x2db   :  { %6026 = vmatpush.bf16.msra.mxu3 %v8575_v22  ;;  %v10317_v22 = vld [vmem:[%s15650_s1 + $0x124c] sm:$0xf]  ;;  %v9151_v1 = vor.u32 %v10401_v63, %v9148_v38  ;;  %v8943_v29 = vor.u32 %v10349_v8, %v8940_v10  ;;  %v8668_v39 = vld [vmem:[%s15650_s1 + $0x1138] sm:$0xf0] }
 0x2dc   :  { %6036 = vmatpush.bf16.msrb.mxu0 %v8751_v20  ;;  %v8812_v20 = vld [vmem:[%s15650_s1 + $0x1258] sm:$0xf0]  ;;  %v10397_v30 = vld [vmem:[%s15650_s1 + $0x14cc] sm:$0xf]  ;;  %v5810_v13 = vpop.f32.mrf.mxu2  ;;  %v8671_v26 = vor.u32 %v10281_v14, %v8668_v39 }
 0x2dd   :  { %6049 = vmatpush.bf16.msrb.mxu1 %v8879_v25  ;;  %v9132_v25 = vld [vmem:[%s15650_s1 + $0x14d8] sm:$0xf0]  ;;  %v5799_v52 = vpop.f32.mrf.mxu1  ;;  %v8815_v7 = vor.u32 %v10317_v22, %v8812_v20  ;;  %v10393_v28 = vld [vmem:[%s15650_s1 + $0x14ac] sm:$0xf] }
 0x2de   :  { %6062 = vmatpush.bf16.msrb.mxu2 %v9007_v33  ;;  %v5786_v33 = vpop.f32.mrf.mxu0  ;;  %v9135_v35 = vor.u32 %v10397_v30, %v9132_v25  ;;  %v8796_v6 = vld [vmem:[%s15650_s1 + $0x1238] sm:$0xf0]  ;;  %v10277_v27 = vld [vmem:[%s15650_s1 + $0x110c] sm:$0xf] }
 0x2df   :  { %6027 = vmatpush.bf16.msra.mxu3 %v8559_v31  ;;  %v10313_v31 = vld [vmem:[%s15650_s1 + $0x122c] sm:$0xf]  ;;  %v9116_v23 = vld [vmem:[%s15650_s1 + $0x14b8] sm:$0xf0]  ;;  %v10551_v33 = vld [vmem:[%s15652_s2] sm:$0xf] }
 0x2e0   :  { %6037 = vmatpush.bf16.msrb.mxu0 %v8735_v34  ;;  %v15296_v34 = vadd.f32 %v5810_v13, %v5798_v59  ;;  %v8652_v32 = vld [vmem:[%s15650_s1 + $0x1118] sm:$0xf0]  ;;  %v10309_v18 = vld [vmem:[%s15650_s1 + $0x120c] sm:$0xf] }
 0x2e1   :  { %6050 = vmatpush.bf16.msrb.mxu1 %v8863_v4  ;;  %v10345_v4 = vld [vmem:[%s15650_s1 + $0x132c] sm:$0xf]  ;;  %v8780_v43 = vld [vmem:[%s15650_s1 + $0x1218] sm:$0xf0] }
 0x2e2   :  { %6063 = vmatpush.bf16.msrb.mxu2 %v8991_v21  ;;  %v8924_v21 = vld [vmem:[%s15650_s1 + $0x1338] sm:$0xf0]  ;;  %v10341_v47 = vld [vmem:[%s15650_s1 + $0x130c] sm:$0xf]  ;;  %v8783_v59 = vor.u32 %v10309_v18, %v8780_v43 }
 0x2e3   :  { %6028 = vmatpush.bf16.msra.mxu3 %v8543_v48  ;;  %v8927_v40 = vor.u32 %v10345_v4, %v8924_v21  ;;  %v9119_v48 = vor.u32 %v10393_v28, %v9116_v23  ;;  %v10389_v51 = vld [vmem:[%s15650_s1 + $0x148c] sm:$0xf]  ;;  %v9100_v54 = vld [vmem:[%s15650_s1 + $0x1498] sm:$0xf0] }
 0x2e4   :  { %6038 = vmatpush.bf16.msrb.mxu0 %v8719_v50  ;;  %v8908_v50 = vld [vmem:[%s15650_s1 + $0x1318] sm:$0xf0]  ;;  %v10433_v57 = vld [vmem:[%s15650_s1 + $0x15ec] sm:$0xf]  ;;  %v5812_v2 = vpop.f32.mrf.mxu2  ;;  %v9103_v62 = vor.u32 %v10389_v51, %v9100_v54 }
 0x2e5   :  { %6051 = vmatpush.bf16.msrb.mxu1 %v8847_v41  ;;  %v9276_v61 = vld [vmem:[%s15650_s1 + $0x15f8] sm:$0xf0]  ;;  %v10465_v41 = vld [vmem:[%s15650_s1 + $0x16ec] sm:$0xf]  ;;  %v8911_v44 = vor.u32 %v10341_v47, %v8908_v50 }
 0x2e6   :  { %6064 = vmatpush.bf16.msrb.mxu2 %v8975_v36  ;;  %v8655_v36 = vor.u32 %v10277_v27, %v8652_v32  ;;  %v9404_v55 = vld [vmem:[%s15650_s1 + $0x16f8] sm:$0xf0]  ;;  %v10497_v58 = vld [vmem:[%s15650_s1 + $0x17ec] sm:$0xf]  ;;  %v9279_v63 = vor.u32 %v10433_v57, %v9276_v61 }
 0x2e7   :  { %6029 = vmatpush.bf16.msra.mxu3 %v8527_v0  ;;  %v9532_v42 = vld [vmem:[%s15650_s1 + $0x17f8] sm:$0xf0]  ;;  %v10385_v38 = vld [vmem:[%s15650_s1 + $0x146c] sm:$0xf] }
 0x2e8   :  { %6039 = vmatpush.bf16.msrb.mxu0 %v8703_v9  ;;  %v9084_v0 = vld [vmem:[%s15650_s1 + $0x1478] sm:$0xf0]  ;;  %v9407_v9 = vor.u32 %v10465_v41, %v9404_v55  ;;  %v10461_v24 = vld [vmem:[%s15650_s1 + $0x16cc] sm:$0xf] }
 0x2e9   :  { %6052 = vmatpush.bf16.msrb.mxu1 %v8831_v3  ;;  %v9535_v3 = vor.u32 %v10497_v58, %v9532_v42  ;;  %v9260_v60 = vld [vmem:[%s15650_s1 + $0x15d8] sm:$0xf0]  ;;  %v9087_v8 = vor.u32 %v10385_v38, %v9084_v0  ;;  %v10381_v30 = vld [vmem:[%s15650_s1 + $0x144c] sm:$0xf] }
 0x2ea   :  { %6065 = vmatpush.bf16.msrb.mxu2 %v8959_v5  ;;  %6030 = vmatmul.bf16.vlgmr.msra.gmra.mxu3 %v11653_v37  ;;  %v8799_v37 = vor.u32 %v10313_v31, %v8796_v6  ;;  %v10429_v5 = vld [vmem:[%s15650_s1 + $0x15cc] sm:$0xf]  ;;  %v9388_v22 = vld [vmem:[%s15650_s1 + $0x16d8] sm:$0xf0] }
 0x2eb   :  { %6074 = vmatpush.bf16.msrb.mxu3 %v9151_v1  ;;  %v10493_v1 = vld [vmem:[%s15650_s1 + $0x17cc] sm:$0xf]  ;;  %v9516_v20 = vld [vmem:[%s15650_s1 + $0x17d8] sm:$0xf0]  ;;  %v9263_v10 = vor.u32 %v10429_v5, %v9260_v60  ;;  %v9391_v13 = vor.u32 %v10461_v24, %v9388_v22 }
 0x2ec   :  { %6040 = vmatpush.bf16.msrb.mxu0 %v8687_v12  ;;  %v9068_v25 = vld [vmem:[%s15650_s1 + $0x1458] sm:$0xf0]  ;;  %v823_v12 = vperm.slane %v10551_v33, 3  ;;  %v10457_v39 = vld [vmem:[%s15650_s1 + $0x16ac] sm:$0xf] }
 0x2ed   :  { %6053 = vmatpush.bf16.msrb.mxu1 %v8815_v7  ;;  %v5823_v52 = vpop.f32.mrf.mxu3  ;;  %v9519_v7 = vor.u32 %v10493_v1, %v9516_v20  ;;  %v9244_v14 = vld [vmem:[%s15650_s1 + $0x15b8] sm:$0xf0]  ;;  %v9071_v4 = vor.u32 %v10381_v30, %v9068_v25  ;;  %v10453_v32 = vld [vmem:[%s15650_s1 + $0x168c] sm:$0xf] }
 0x2ee   :  { %6066 = vmatpush.bf16.msrb.mxu2 %v8943_v29  ;;  %v10425_v29 = vld [vmem:[%s15650_s1 + $0x15ac] sm:$0xf]  ;;  %v9372_v31 = vld [vmem:[%s15650_s1 + $0x16b8] sm:$0xf0]  ;;  %v5824_v28 = vadd.f32 %v5823_v52, %v823_v12 }
 0x2ef   :  { %6075 = vmatpush.bf16.msrb.mxu3 %v9135_v35  ;;  %v10489_v35 = vld [vmem:[%s15650_s1 + $0x17ac] sm:$0xf]  ;;  %v9500_v6 = vld [vmem:[%s15650_s1 + $0x17b8] sm:$0xf0]  ;;  %v9375_v23 = vor.u32 %v10457_v39, %v9372_v31 }
 0x2f0   :  { %6041 = vmatpush.bf16.msrb.mxu0 %v8671_v26  ;;  %v9052_v21 = vld [vmem:[%s15650_s1 + $0x1438] sm:$0xf0]  ;;  %v9503_v26 = vor.u32 %v10489_v35, %v9500_v6  ;;  %v10373_v50 = vld [vmem:[%s15650_s1 + $0x140c] sm:$0xf] }
 0x2f1   :  { %6054 = vmatpush.bf16.msrb.mxu1 %v8799_v37  ;;  %v9228_v27 = vld [vmem:[%s15650_s1 + $0x1598] sm:$0xf0]  ;;  %v10417_v55 = vld [vmem:[%s15650_s1 + $0x156c] sm:$0xf] }
 0x2f2   :  { %6067 = vmatpush.bf16.msrb.mxu2 %v8927_v40  ;;  %v9356_v37 = vld [vmem:[%s15650_s1 + $0x1698] sm:$0xf0]  ;;  %v10485_v40 = vld [vmem:[%s15650_s1 + $0x178c] sm:$0xf] }
 0x2f3   :  { %6076 = vmatpush.bf16.msrb.mxu3 %v9119_v48  ;;  %v9484_v18 = vld [vmem:[%s15650_s1 + $0x1798] sm:$0xf0]  ;;  %v9359_v41 = vor.u32 %v10453_v32, %v9356_v37  ;;  %v10449_v42 = vld [vmem:[%s15650_s1 + $0x166c] sm:$0xf] }
 0x2f4   :  { %6042 = vmatpush.bf16.msrb.mxu0 %v8655_v36  ;;  %v5836_v43 = vpop.f32.mrf.mxu0  ;;  %v9036_v51 = vld [vmem:[%s15650_s1 + $0x1418] sm:$0xf0]  ;;  %v9487_v36 = vor.u32 %v10485_v40, %v9484_v18  ;;  %v10413_v60 = vld [vmem:[%s15650_s1 + $0x154c] sm:$0xf] }
 0x2f5   :  { %6055 = vmatpush.bf16.msrb.mxu1 %v8783_v59  ;;  %v5837_v54 = vadd.f32 %v5836_v43, %v5824_v28  ;;  %v5849_v57 = vpop.f32.mrf.mxu1  ;;  %v5825_v61 = vpop.f32.mrf.mxu3  ;;  %v9212_v58 = vld [vmem:[%s15650_s1 + $0x1578] sm:$0xf0]  ;;  %v9039_v0 = vor.u32 %v10373_v50, %v9036_v51  ;;  %v10445_v22 = vld [vmem:[%s15650_s1 + $0x164c] sm:$0xf] }
 0x2f6   :  { %6068 = vmatpush.bf16.msrb.mxu2 %v8911_v44  ;;  %v9340_v59 = vld [vmem:[%s15650_s1 + $0x1678] sm:$0xf0]  ;;  %v10481_v44 = vld [vmem:[%s15650_s1 + $0x176c] sm:$0xf] }
 0x2f7   :  { %6077 = vmatpush.bf16.msrb.mxu3 %v9103_v62  ;;  %6043 = vmatmul.bf16.vlgmr.msrb.gmra.mxu0 %v11666_v46  ;;  %v9247_v46 = vor.u32 %v10425_v29, %v9244_v14  ;;  %v9468_v2 = vld [vmem:[%s15650_s1 + $0x1778] sm:$0xf0]  ;;  %v5850_v62 = vadd.f32 %v5849_v57, %v5837_v54  ;;  %v10509_v33 = vld [vmem:[%s15650_s1 + $0x184c] sm:$0xf] }
 0x2f8   :  { %6087 = vmatpush.bf16.msra.mxu0 %v9279_v63  ;;  %6056 = vmatmul.bf16.vlgmr.msrb.gmra.mxu1 %v11664_v45  ;;  %v10421_v45 = vld [vmem:[%s15650_s1 + $0x158c] sm:$0xf]  ;;  %v9596_v38 = vld [vmem:[%s15650_s1 + $0x1878] sm:$0xf0]  ;;  %v9471_v5 = vor.u32 %v10481_v44, %v9468_v2  ;;  %v10538_v44 = vld [vmem:[%s15653_s3 + $0xb0] sm:$0xff] }
 0x2f9   :  { %6100 = vmatpush.bf16.msra.mxu1 %v9407_v9  ;;  %6069 = vmatmul.bf16.vlgmr.msrb.gmra.mxu2 %v11674_v49  ;;  %v10377_v49 = vld [vmem:[%s15650_s1 + $0x142c] sm:$0xf]  ;;  %v9231_v48 = vor.u32 %v10421_v45, %v9228_v27  ;;  %v9215_v9 = vor.u32 %v10417_v55, %v9212_v58  ;;  %v9196_v24 = vld [vmem:[%s15650_s1 + $0x1558] sm:$0xf0]  ;;  %v10522_v58 = vld [vmem:[%s15653_s3 + $0x30] sm:$0xff] }
 0x2fa   :  { %6113 = vmatpush.bf16.msra.mxu2 %v9535_v3  ;;  %v9055_v47 = vor.u32 %v10377_v49, %v9052_v21  ;;  %v10513_v63 = vld [vmem:[%s15650_s1 + $0x186c] sm:$0xf]  ;;  %v9343_v3 = vor.u32 %v10449_v42, %v9340_v59  ;;  %v9452_v30 = vld [vmem:[%s15650_s1 + $0x1758] sm:$0xf0]  ;;  %v10530_v42 = vld [vmem:[%s15653_s3 + $0x70] sm:$0xff] }
 0x2fb   :  { %6078 = vmatpush.bf16.msrb.mxu3 %v9087_v8  ;;  %v9599_v20 = vor.u32 %v10513_v63, %v9596_v38  ;;  %v9324_v8 = vld [vmem:[%s15650_s1 + $0x1658] sm:$0xf0]  ;;  %v10409_v39 = vld [vmem:[%s15650_s1 + $0x152c] sm:$0xf]  ;;  %v10520_v38 = vld [vmem:[%s15653_s3 + $0x20] sm:$0xff] }
 0x2fc   :  { %6088 = vmatpush.bf16.msra.mxu0 %v9263_v10  ;;  %v5862_v1 = vpop.f32.mrf.mxu2  ;;  %v10477_v10 = vld [vmem:[%s15650_s1 + $0x174c] sm:$0xf]  ;;  %v9580_v12 = vld [vmem:[%s15650_s1 + $0x1858] sm:$0xf0]  ;;  %v5838_v52 = vpop.f32.mrf.mxu0  ;;  %v9327_v29 = vor.u32 %v10445_v22, %v9324_v8 }
 0x2fd   :  { %6101 = vmatpush.bf16.msra.mxu1 %v9391_v13  ;;  %v15482_v25 = vadd.f32 %v5862_v1, %v5850_v62  ;;  %v9199_v13 = vor.u32 %v10413_v60, %v9196_v24  ;;  %v9455_v14 = vor.u32 %v10477_v10, %v9452_v30  ;;  %v9180_v31 = vld [vmem:[%s15650_s1 + $0x1538] sm:$0xf0]  ;;  %v10441_v35 = vld [vmem:[%s15650_s1 + $0x162c] sm:$0xf]  ;;  %v9583_v6 = vor.u32 %v10509_v33, %v9580_v12  ;;  %v10518_v10 = vld [vmem:[%s15653_s3 + $0x10] sm:$0xff] }
 0x2fe   :  { %6114 = vmatpush.bf16.msra.mxu2 %v9519_v7  ;;  %v5851_v7 = vpop.f32.mrf.mxu1  ;;  %v9436_v49 = vld [vmem:[%s15650_s1 + $0x1738] sm:$0xf0]  ;;  %v10505_v21 = vld [vmem:[%s15650_s1 + $0x182c] sm:$0xf]  ;;  %v10526_v30 = vld [vmem:[%s15653_s3 + $0x50] sm:$0xff] }
 0x2ff   :  { %6079 = vmatpush.bf16.msrb.mxu3 %v9071_v4  ;;  %v9308_v4 = vld [vmem:[%s15650_s1 + $0x1638] sm:$0xf0]  ;;  %v10405_v27 = vld [vmem:[%s15650_s1 + $0x150c] sm:$0xf]  ;;  %v10534_v33 = vld [vmem:[%s15653_s3 + $0x90] sm:$0xff] }
 0x300   :  { %6089 = vmatpush.bf16.msra.mxu0 %v9247_v46  ;;  %v10473_v46 = vld [vmem:[%s15650_s1 + $0x172c] sm:$0xf]  ;;  %v9564_v28 = vld [vmem:[%s15650_s1 + $0x1838] sm:$0xf0] }
 0x301   :  { %6102 = vmatpush.bf16.msra.mxu1 %v9375_v23  ;;  %v9183_v23 = vor.u32 %v10409_v39, %v9180_v31  ;;  %v9439_v45 = vor.u32 %v10473_v46, %v9436_v49  ;;  %v10437_v32 = vld [vmem:[%s15650_s1 + $0x160c] sm:$0xf]  ;;  %v9567_v40 = vor.u32 %v10505_v21, %v9564_v28  ;;  %v9292_v18 = vld [vmem:[%s15650_s1 + $0x1618] sm:$0xf0]  ;;  %v6139_v39 = vmax.f32 %v12861_v53, 0.0 }
 0x302   :  { %6115 = vmatpush.bf16.msra.mxu2 %v9503_v26  ;;  %v9311_v26 = vor.u32 %v10441_v35, %v9308_v4  ;;  %v10469_v43 = vld [vmem:[%s15650_s1 + $0x170c] sm:$0xf]  ;;  %v9548_v51 = vld [vmem:[%s15650_s1 + $0x1818] sm:$0xf0]  ;;  %v9295_v54 = vor.u32 %v10437_v32, %v9292_v18  ;;  %v6140_v31 = vmax.f32 %v14065_v17, 0.0  ;;  %v10532_v35 = vld [vmem:[%s15653_s3 + $0x80] sm:$0xff] }
 0x303   :  { %6080 = vmatpush.bf16.msrb.mxu3 %v9055_v47  ;;  %v9420_v47 = vld [vmem:[%s15650_s1 + $0x1718] sm:$0xf0]  ;;  %v10501_v50 = vld [vmem:[%s15650_s1 + $0x180c] sm:$0xf]  ;;  %v6143_v4 = vpack.c.bf16 %v6139_v39, %v6139_v39 }
 0x304   :  { %6090 = vmatpush.bf16.msra.mxu0 %v9231_v48  ;;  %v5864_v37 = vpop.f32.mrf.mxu2  ;;  %v9423_v57 = vor.u32 %v10469_v43, %v9420_v47  ;;  %v10523_v61 = vld [vmem:[%s15653_s3 + $0x38] sm:$0xff]  ;;  %v9551_v55 = vor.u32 %v10501_v50, %v9548_v51  ;;  %v10521_v62 = vld [vmem:[%s15653_s3 + $0x28] sm:$0xff]  ;;  %v6144_v46 = vpack.c.bf16 %v6140_v31, %v6140_v31  ;;  %v10546_v51 = vld [vmem:[%s15653_s3 + $0xf0] sm:$0xff] }
 0x305   :  { %6103 = vmatpush.bf16.msra.mxu1 %v9359_v41  ;;  %v10531_v41 = vld [vmem:[%s15653_s3 + $0x78] sm:$0xff]  ;;  %v10529_v63 = vld [vmem:[%s15653_s3 + $0x68] sm:$0xff] }
 0x306   :  { %6116 = vmatpush.bf16.msra.mxu2 %v9487_v36  ;;  %v10539_v36 = vld [vmem:[%s15653_s3 + $0xb8] sm:$0xff]  ;;  %v10517_v12 = vld [vmem:[%s15653_s3 + $0x8] sm:$0xff] }
 0x307   :  { %6081 = vmatpush.bf16.msrb.mxu3 %v9039_v0  ;;  %v10528_v0 = vld [vmem:[%s15653_s3 + $0x60] sm:$0xff]  ;;  %v10519_v60 = vld [vmem:[%s15653_s3 + $0x18] sm:$0xff]  ;;  %v10525_v52 = vld [vmem:[%s15653_s3 + $0x48] sm:$0xff] }
 0x308   :  { %6091 = vmatpush.bf16.msra.mxu0 %v9215_v9  ;;  %v10527_v24 = vld [vmem:[%s15653_s3 + $0x58] sm:$0xff] }
 0x309   :  { %6104 = vmatpush.bf16.msra.mxu1 %v9343_v3  ;;  %v10535_v22 = vld [vmem:[%s15653_s3 + $0x98] sm:$0xff] }
 0x30a   :  { %6117 = vmatpush.bf16.msra.mxu2 %v9471_v5  ;;  %6082 = vmatmul.bf16.vlgmr.msrb.gmra.mxu3 %v11868_v11  ;;  %v9164_v11 = vld [vmem:[%s15650_s1 + $0x1518] sm:$0xf0] }
 0x30b   :  { %6130 = vmatpush.bf16.msra.mxu3 %v9599_v20  ;;  %v9167_v48 = vor.u32 %v10405_v27, %v9164_v11 }
 0x30c   :  { %6092 = vmatpush.bf16.msra.mxu0 %v9199_v13  ;;  %v10533_v13 = vld [vmem:[%s15653_s3 + $0x88] sm:$0xff] }
 0x30d   :  { %6105 = vmatpush.bf16.msra.mxu1 %v9327_v29  ;;  %v5875_v59 = vpop.f32.mrf.mxu3  ;;  %v10516_v29 = vld [vmem:[%s15653_s3] sm:$0xff] }
 0x30e   :  { %6118 = vmatpush.bf16.msra.mxu2 %v9455_v14  ;;  %v5876_v2 = vadd.f32 %v5875_v59, %v15482_v25  ;;  %v10524_v14 = vld [vmem:[%s15653_s3 + $0x40] sm:$0xff] }
 0x30f   :  { %6131 = vmatpush.bf16.msra.mxu3 %v9583_v6  ;;  %v6141_v6 = vmax.f32 %v15296_v34, 0.0 }
 0x310   :  { %6093 = vmatpush.bf16.msra.mxu0 %v9183_v23 }
 0x311   :  { %6106 = vmatpush.bf16.msra.mxu1 %v9311_v26  ;;  %v6145_v49 = vpack.c.bf16 %v6141_v6, %v6141_v6 }
 0x312   :  { %6119 = vmatpush.bf16.msra.mxu2 %v9439_v45 }
 0x313   :  { %6132 = vmatpush.bf16.msra.mxu3 %v9567_v40 }
 0x314   :  { %6094 = vmatpush.bf16.msra.mxu0 %v9167_v48  ;;  %v10547_v48 = vld [vmem:[%s15653_s3 + $0xf8] sm:$0xff] }
 0x315   :  { %6107 = vmatpush.bf16.msra.mxu1 %v9295_v54  ;;  %v5901_v9 = vpop.f32.mrf.mxu1  ;;  %v5877_v3 = vpop.f32.mrf.mxu3 }
 0x316   :  { %6120 = vmatpush.bf16.msra.mxu2 %v9423_v57 }
 0x317   :  { %6133 = vmatpush.bf16.msra.mxu3 %v9551_v55  ;;  %6095 = vmatmul.bf16.vlgmr.msra.gmra.mxu0 %v11881_v16  ;;  %v5888_v16 = vpop.f32.mrf.mxu0 }
 0x318   :  { %6407 = vmatpush.bf16.msrb.mxu0 %v10523_v61  ;;  %6108 = vmatmul.bf16.vlgmr.msra.gmra.mxu1 %v11879_v15  ;;  %v10537_v15 = vld [vmem:[%s15653_s3 + $0xa8] sm:$0xff] }
 0x319   :  { %6420 = vmatpush.bf16.msrb.mxu1 %v10531_v41  ;;  %6121 = vmatmul.bf16.vlgmr.msra.gmra.mxu2 %v11889_v19  ;;  %v5889_v19 = vadd.f32 %v5888_v16, %v5876_v2  ;;  %v10545_v41 = vld [vmem:[%s15653_s3 + $0xe8] sm:$0xff]  ;;  %v10542_v2 = vld [vmem:[%s15653_s3 + $0xd0] sm:$0xff] }
 0x31a   :  { %6433 = vmatpush.bf16.msrb.mxu2 %v10539_v36  ;;  %9603 = vmatmul.msk.bf16.vlgmr.msra.gmra.mxu3 %vm4835_vm0, %v11992_v56  ;;  %v10536_v56 = vld [vmem:[%s15653_s3 + $0xa0] sm:$0xff] }
 0x31b   :  { %v5902_v5 = vadd.f32 %v5901_v9, %v5889_v19  ;;  %6446 = vmatpush.bf16.msrb.mxu3 %v10547_v48  ;;  %v10544_v36 = vld [vmem:[%s15653_s3 + $0xe0] sm:$0xff] }
 0x31c   :  { %6408 = vmatpush.bf16.msrb.mxu0 %v10522_v58  ;;  %v5914_v1 = vpop.f32.mrf.mxu2  ;;  %v10543_v58 = vld [vmem:[%s15653_s3 + $0xd8] sm:$0xff] }
 0x31d   :  { %6421 = vmatpush.bf16.msrb.mxu1 %v10530_v42  ;;  %v5915_v20 = vadd.f32 %v5914_v1, %v5902_v5  ;;  %v5903_v25 = vpop.f32.mrf.mxu1 }
 0x31e   :  { %6434 = vmatpush.bf16.msrb.mxu2 %v10538_v44 }
 0x31f   :  { %v5890_v8 = vpop.f32.mrf.mxu0  ;;  %6447 = vmatpush.bf16.msrb.mxu3 %v10546_v51 }
 0x320   :  { %6409 = vmatpush.bf16.msrb.mxu0 %v10521_v62 }
 0x321   :  { %6422 = vmatpush.bf16.msrb.mxu1 %v10529_v63  ;;  %v10541_v63 = vld [vmem:[%s15653_s3 + $0xc8] sm:$0xff] }
 0x322   :  { %6435 = vmatpush.bf16.msrb.mxu2 %v10537_v15 }
 0x323   :  { %6448 = vmatpush.bf16.msrb.mxu3 %v10545_v41 }
 0x324   :  { %6410 = vmatpush.bf16.msrb.mxu0 %v10520_v38  ;;  %v5916_v7 = vpop.f32.mrf.mxu2  ;;  %v10540_v38 = vld [vmem:[%s15653_s3 + $0xc0] sm:$0xff] }
 0x325   :  { %6423 = vmatpush.bf16.msrb.mxu1 %v10528_v0 }
 0x326   :  { %6436 = vmatpush.bf16.msrb.mxu2 %v10536_v56 }
 0x327   :  { %6449 = vmatpush.bf16.msrb.mxu3 %v10544_v36 }
 0x328   :  { %6411 = vmatpush.bf16.msrb.mxu0 %v10519_v60 }
 0x329   :  { %6424 = vmatpush.bf16.msrb.mxu1 %v10527_v24 }
 0x32a   :  { %6437 = vmatpush.bf16.msrb.mxu2 %v10535_v22 }
 0x32b   :  { %6450 = vmatpush.bf16.msrb.mxu3 %v10543_v58 }
 0x32c   :  { %6412 = vmatpush.bf16.msrb.mxu0 %v10518_v10 }
 0x32d   :  { %6425 = vmatpush.bf16.msrb.mxu1 %v10526_v30  ;;  %v5927_v21 = vpop.f32.mrf.mxu3 }
 0x32e   :  { %6438 = vmatpush.bf16.msrb.mxu2 %v10534_v33  ;;  %v5928_v28 = vadd.f32 %v5927_v21, %v5915_v20 }
 0x32f   :  { %6451 = vmatpush.bf16.msrb.mxu3 %v10542_v2 }
 0x330   :  { %6413 = vmatpush.bf16.msrb.mxu0 %v10517_v12 }
 0x331   :  { %6426 = vmatpush.bf16.msrb.mxu1 %v10525_v52 }
 0x332   :  { %6439 = vmatpush.bf16.msrb.mxu2 %v10533_v13 }
 0x333   :  { %6452 = vmatpush.bf16.msrb.mxu3 %v10541_v63 }
 0x334   :  { %6414 = vmatpush.bf16.msrb.mxu0 %v10516_v29  ;;  %v5940_v53 = vpop.f32.mrf.mxu0 }
 0x335   :  { %6427 = vmatpush.bf16.msrb.mxu1 %v10524_v14  ;;  %v5941_v17 = vadd.f32 %v5940_v53, %v5928_v28  ;;  %v5953_v23 = vpop.f32.mrf.mxu1  ;;  %v5929_v26 = vpop.f32.mrf.mxu3 }
 0x336   :  { %6440 = vmatpush.bf16.msrb.mxu2 %v10532_v35 }
 0x337   :  { %6415 = vmatmul.bf16.vlgmr.msrb.gmra.mxu0 %v6143_v4  ;;  %v5954_v45 = vadd.f32 %v5953_v23, %v5941_v17  ;;  %6453 = vmatpush.bf16.msrb.mxu3 %v10540_v38  ;;  %v10548_v4 = vld [vmem:[%s15654_s4] ss:$0 sm:$0xff] }
 0x338   :  { %6428 = vmatmul.bf16.vlgmr.msrb.gmra.mxu1 %v6144_v46 }
 0x339   :  { %6441 = vmatmul.bf16.vlgmr.msrb.gmra.mxu2 %v6145_v49 }
 0x33c   :  { %v5966_v27 = vpop.f32.mrf.mxu2  ;;  %v5942_v32 = vpop.f32.mrf.mxu0 }
 0x33d   :  { %v5967_v11 = vadd.f32 %v5966_v27, %v5954_v45  ;;  %v5955_v34 = vpop.f32.mrf.mxu1 }
 0x344   :  { %v5968_v37 = vpop.f32.mrf.mxu2 }
 0x34d   :  { %v5979_v40 = vpop.f32.mrf.mxu3 }
 0x34e   :  { %v5980_v19 = vadd.f32 %v5979_v40, %v5967_v11 }
 0x354   :  { %v5992_v18 = vpop.f32.mrf.mxu0 }
 0x355   :  { %v6005_v43 = vpop.f32.mrf.mxu1  ;;  %v5981_v47 = vpop.f32.mrf.mxu3  ;;  %v5993_v0 = vadd.f32 %v5992_v18, %v5980_v19 }
 0x357   :  { %v6006_v3 = vadd.f32 %v6005_v43, %v5993_v0 }
 0x35c   :  { %v6018_v50 = vpop.f32.mrf.mxu2  ;;  %v5994_v54 = vpop.f32.mrf.mxu0 }
 0x35d   :  { %v6007_v57 = vpop.f32.mrf.mxu1  ;;  %v6019_v56 = vadd.f32 %v6018_v50, %v6006_v3 }
 0x364   :  { %v6020_v61 = vpop.f32.mrf.mxu2 }
 0x36d   :  { %v6031_v55 = vpop.f32.mrf.mxu3 }
 0x36e   :  { %v6032_v5 = vadd.f32 %v6031_v55, %v6019_v56 }
 0x374   :  { %v6044_v42 = vpop.f32.mrf.mxu0 }
 0x375   :  { %v6057_v59 = vpop.f32.mrf.mxu1  ;;  %v6033_v44 = vpop.f32.mrf.mxu3  ;;  %v6045_v60 = vadd.f32 %v6044_v42, %v6032_v5 }
 0x377   :  { %v6058_v22 = vadd.f32 %v6057_v59, %v6045_v60 }
 0x37c   :  { %v6070_v62 = vpop.f32.mrf.mxu2  ;;  %v6046_v15 = vpop.f32.mrf.mxu0 }
 0x37d   :  { %v6059_v16 = vpop.f32.mrf.mxu1  ;;  %v6071_v1 = vadd.f32 %v6070_v62, %v6058_v22 }
 0x384   :  { %v6072_v9 = vpop.f32.mrf.mxu2 }
 0x38d   :  { %v6083_v24 = vpop.f32.mrf.mxu3 }
 0x38e   :  { %v6084_v20 = vadd.f32 %v6083_v24, %v6071_v1 }
 0x394   :  { %v6096_v8 = vpop.f32.mrf.mxu0 }
 0x395   :  { %v6109_v10 = vpop.f32.mrf.mxu1  ;;  %v6085_v30 = vpop.f32.mrf.mxu3  ;;  %v6097_v25 = vadd.f32 %v6096_v8, %v6084_v20 }
 0x397   :  { %v6110_v33 = vadd.f32 %v6109_v10, %v6097_v25 }
 0x39c   :  { %v6122_v12 = vpop.f32.mrf.mxu2  ;;  %v6098_v13 = vpop.f32.mrf.mxu0 }
 0x39d   :  { %v6123_v52 = vadd.f32 %v6122_v12, %v6110_v33  ;;  %v6111_v7 = vpop.f32.mrf.mxu1  ;;  %v6135_v29 = vpop.f32.mrf.mxu3 }
 0x39f   :  { %v6136_v14 = vadd.f32 %v6135_v29, %v6123_v52 }
 0x3a1   :  { %v6142_v39 = vmax.f32 %v6136_v14, 0.0 }
 0x3a3   :  { %v6146_v31 = vpack.c.bf16 %v6142_v39, %v6142_v39 }
 0x3a4   :  { %v6124_v35 = vpop.f32.mrf.mxu2 }
 0x3a5   :  { %6454 = vmatmul.bf16.vlgmr.msrb.gmra.mxu3 %v6146_v31  ;;  %v6137_v6 = vpop.f32.mrf.mxu3 }
 0x3b4   :  { %v6416_v46 = vpop.f32.mrf.mxu0 }
 0x3b5   :  { %v6429_v49 = vpop.f32.mrf.mxu1  ;;  %v6417_v21 = vadd.f32 %v10548_v4, %v6416_v46 }
 0x3b7   :  { %v6430_v28 = vadd.f32 %v6429_v49, %v6417_v21 }
 0x3bc   :  { %v6442_v53 = vpop.f32.mrf.mxu2  ;;  %v6418_v23 = vpop.f32.mrf.mxu0 }
 0x3bd   :  { %v6443_v17 = vadd.f32 %v6442_v53, %v6430_v28  ;;  %v6431_v26 = vpop.f32.mrf.mxu1 }
 0x3c4   :  { %v6444_v45 = vpop.f32.mrf.mxu2 }
 0x428   :  { %v6455_v27 = vpop.f32.mrf.mxu3 }
 0x429   :  { %v6456_v11 = vadd.f32 %v6455_v27, %v6443_v17 }
 0x42b   :  { %6459 = vst [vmem:[%s15655_s5] sm:$0xff] %v6456_v11 }
 0x430   :  { %v6457_v32 = vpop.f32.mrf.mxu3 }

</bundles_post_ra>
